<compile_context>
chip_gen: v5e
topology: v5e:2x2
jax: 0.10.0
libtpu: 0.0.40
codegen_flags: <defaults>
</compile_context>

<pallas_src>
from functools import partial
from typing import Dict, List

import jax
import jax.numpy as jnp
from jax.experimental import pallas as pl
from jax.experimental.pallas import tpu as pltpu

EPS = 1e-5          # torch.nn.LayerNorm default eps
LANE = 128
SUBLANE = 8


def _round_up(x: int, m: int) -> int:
    return ((x + m - 1) // m) * m


# --------------------------------------------------------------------------
# Kernel
# --------------------------------------------------------------------------
def _encoder_kernel(num_layers, inv_in_dim, *refs):
    # refs: x, (w_i, b_i) * num_layers, out
    x_ref = refs[0]
    o_ref = refs[-1]
    wb_refs = refs[1:-1]

    x = x_ref[...].astype(jnp.float32)

    # first_normalization: LayerNorm over in_dim (biased variance, matching
    # torch.nn.LayerNorm).  Single-pass stats: var = E[x^2] - E[x]^2.
    s1 = jnp.sum(x, axis=-1, keepdims=True)
    s2 = jnp.sum(x * x, axis=-1, keepdims=True)
    mean = s1 * inv_in_dim
    var = jnp.maximum(s2 * inv_in_dim - mean * mean, 0.0)
    h = (x - mean) * jax.lax.rsqrt(var + EPS)
    # gamma/beta are folded into (w0, b0) by the wrapper.

    # MLP stack: relu between layers, plain linear on the last layer.
    for layer in range(num_layers):
        w = wb_refs[2 * layer][...]           # bf16 weights -> MXU
        b = wb_refs[2 * layer + 1][...]       # f32 [1, dim] bias
        h = jnp.dot(h.astype(w.dtype), w,
                    preferred_element_type=jnp.float32) + b.astype(jnp.float32)
        if layer < num_layers - 1:
            h = jnp.maximum(h, 0.0)           # activation = 'relu'

    o_ref[...] = h.astype(o_ref.dtype)


# --------------------------------------------------------------------------
# Parameter packing: fold LayerNorm affine into layer 0, zero-pad layer output
# dims to multiples of 128 (lane-dense), cast weights to bf16.
# --------------------------------------------------------------------------
def prepare_params(params: Dict[str, jax.Array], num_layers: int,
                   weight_dtype=jnp.bfloat16) -> Dict[str, jax.Array]:
    gamma = params["gamma"].astype(jnp.float32).reshape(1, -1)
    beta = params["beta"].astype(jnp.float32).reshape(1, -1)

    packed = {}
    for layer in range(num_layers):
        w = params[f"w{layer}"].astype(jnp.float32)
        b = params[f"b{layer}"].astype(jnp.float32).reshape(1, -1)
        if layer == 0:
            # LN(x) @ W + b = xhat @ (gamma[:, None] * W) + (beta @ W + b)
            b = beta @ w + b
            w = gamma.reshape(-1, 1) * w
        fan_in, fan_out = w.shape
        out_pad = _round_up(fan_out, LANE)
        # cannot pad in_dim of layer 0 (LayerNorm stats run over it);
        # padded rows of later layers meet zero-padded activation columns.
        in_pad = fan_in if layer == 0 else _round_up(fan_in, LANE)
        w = jnp.pad(w, ((0, in_pad - fan_in), (0, out_pad - fan_out)))
        b = jnp.pad(b, ((0, 0), (0, out_pad - fan_out)))
        packed[f"w{layer}"] = w.astype(weight_dtype)
        packed[f"b{layer}"] = b
    return packed


# --------------------------------------------------------------------------
# Wrapper
# --------------------------------------------------------------------------
def base_encoder_forward(
    x: jax.Array,
    params: Dict[str, jax.Array],
    *,
    num_layers: int,
    output_keys: List[str],
    max_tile_n: int = 1024,
    vmem_budget_bytes: int = 24 << 20,   # conservative: fits v7x 64 MiB VMEM
) -> Dict[str, jax.Array]:
    """Fused (LayerNorm -> MLP) encoder.  x: [N, in_dim] node features."""
    n, in_dim = x.shape
    out_dim = params[f"w{num_layers - 1}"].shape[1]

    packed = prepare_params(params, num_layers, jnp.bfloat16)
    out_pad = packed[f"w{num_layers - 1}"].shape[1]
    max_dim = max([in_dim] + [packed[f"w{l}"].shape[1] for l in range(num_layers)])

    weight_bytes = sum(
        packed[f"w{l}"].size * packed[f"w{l}"].dtype.itemsize
        + packed[f"b{l}"].size * 4
        for l in range(num_layers)
    )
    # per node-row VMEM: double-buffered x & out tiles + f32 intermediates.
    row_bytes = 4 * (2 * in_dim + 2 * out_pad + 4 * max_dim)

    # --- choose node tile: largest multiple of 8 under the VMEM budget, with
    #     >= 2 grid steps when possible (v7x megacore sharding). ---
    cap = max(SUBLANE,
              min(max_tile_n,
                  max(0, (vmem_budget_bytes - weight_bytes) // row_bytes)
                  // SUBLANE * SUBLANE))
    n8 = _round_up(n, SUBLANE)
    if n8 <= cap:
        tile_n = _round_up((n8 + 1) // 2, SUBLANE) if n8 >= 2 * SUBLANE else n8
    else:
        tile_n = cap
    grid_n = (n + tile_n - 1) // tile_n
    n_padded = tile_n * grid_n

    x_in = jnp.pad(x, ((0, n_padded - n), (0, 0))) if n_padded != n else x

    operands = [x_in]
    for layer in range(num_layers):
        operands.append(packed[f"w{layer}"])
        operands.append(packed[f"b{layer}"])

    vmem_limit = int(min(64 << 20,
                         max(32 << 20,
                             2 * (weight_bytes + tile_n * row_bytes))))

    def _call(single_buffer_weights: bool):
        def const_spec(shape):
            # grid-invariant operands: single-buffer to halve their VMEM cost.
            if single_buffer_weights:
                return pl.BlockSpec(shape, lambda i: (0, 0),
                                    pipeline_mode=pl.Buffered(1))
            return pl.BlockSpec(shape, lambda i: (0, 0))

        in_specs = [pl.BlockSpec((tile_n, in_dim), lambda i: (i, 0))]
        for op in operands[1:]:
            in_specs.append(const_spec(op.shape))

        return pl.pallas_call(
            partial(_encoder_kernel, num_layers, 1.0 / in_dim),
            out_shape=jax.ShapeDtypeStruct((n_padded, out_pad), x.dtype),
            grid_spec=pltpu.PrefetchScalarGridSpec(
                num_scalar_prefetch=0,
                grid=(grid_n,),
                in_specs=in_specs,
                out_specs=pl.BlockSpec((tile_n, out_pad), lambda i: (i, 0)),
            ),
            compiler_params=pltpu.CompilerParams(
                dimension_semantics=("parallel",),
                vmem_limit_bytes=vmem_limit,
            ),
        )(*operands)

    try:
        out_padded = _call(True)
    except Exception:
        # Compat fallback if this Pallas build rejects single-buffered
        # (pl.Buffered(1)) grid-invariant inputs.
        out_padded = _call(False)

    out = out_padded[:n, :out_dim]
    return {k: out for k in output_keys}


# --------------------------------------------------------------------------
# Pure-JAX references (for correctness checks)
# --------------------------------------------------------------------------
def jax_forward_packed(x, packed, num_layers, out_dim):
    """Reference using the SAME packed (folded / padded) parameters."""
    x = x.astype(jnp.float32)
    mean = jnp.mean(x, axis=-1, keepdims=True)
    var = jnp.maximum(jnp.mean(x * x, axis=-1, keepdims=True) - mean * mean, 0.0)
    h = (x - mean) * jax.lax.rsqrt(var + EPS)
    for layer in range(num_layers):
        w = packed[f"w{layer}"]
        b = packed[f"b{layer}"]
        h = jnp.dot(h.astype(w.dtype), w,
                    preferred_element_type=jnp.float32,
                    precision=jax.lax.Precision.HIGHEST) + b
        if layer < num_layers - 1:
            h = jnp.maximum(h, 0.0)
    return h[:, :out_dim]


def jax_forward_reference(x, params, num_layers):
    """Reference with the ORIGINAL (unfolded, f32) module semantics."""
    x = x.astype(jnp.float32)
    mean = jnp.mean(x, axis=-1, keepdims=True)
    var = jnp.mean((x - mean) ** 2, axis=-1, keepdims=True)
    h = (x - mean) * jax.lax.rsqrt(var + EPS)
    h = h * params["gamma"] + params["beta"]
    for layer in range(num_layers):
        h = jnp.dot(h, params[f"w{layer}"],
                    preferred_element_type=jnp.float32,
                    precision=jax.lax.Precision.HIGHEST) + params[f"b{layer}"]
        if layer < num_layers - 1:
            h = jnp.maximum(h, 0.0)
    return h


def init_params(key, in_dim, out_dim, num_layers):
    """Deterministic synthetic parameters (shapes implied by __init__)."""
    key, kg, kb0 = jax.random.split(key, 3)
    params = {
        # LayerNorm affine params, perturbed so the gamma/beta folding is
        # actually exercised (torch init would be ones / zeros).
        "gamma": 1.0 + 0.1 * jax.random.normal(kg, (1, in_dim), jnp.float32),
        "beta": 0.05 * jax.random.normal(kb0, (1, in_dim), jnp.float32),
    }
    dims = [in_dim] + [out_dim] * num_layers
    for layer in range(num_layers):
        key, kw, kb = jax.random.split(key, 3)
        fan_in, fan_out = dims[layer], dims[layer + 1]
        params[f"w{layer}"] = (
            jax.random.normal(kw, (fan_in, fan_out), jnp.float32)
            / jnp.sqrt(jnp.float32(fan_in))
        )
        params[f"b{layer}"] = 0.01 * jax.random.normal(
            kb, (1, fan_out), jnp.float32
        )
    return params


if __name__ == "__main__":
    # Small shapes consistent with the module: in_dim=32, out_dim=32,
    # num_layers=2; 1000 "nodes" (not a multiple of 8 -> exercises padding,
    # and yields a 2-step parallel grid).
    in_dim, out_dim, num_layers = 32, 32, 2
    n_nodes = 1000
    output_keys = ["feat"]

    key = jax.random.PRNGKey(0)
    key, kx = jax.random.split(key)
    x = jax.random.normal(kx, (n_nodes, in_dim), jnp.float32)
    params = init_params(key, in_dim, out_dim, num_layers)

    out = base_encoder_forward(
        x, params, num_layers=num_layers, output_keys=output_keys
    )
    result = jax.block_until_ready(out["feat"])
    assert result.shape == (n_nodes, out_dim)

    # 1) Kernel vs pure-JAX forward on the SAME packed (folded, padded, bf16)
    #    parameters.  Tolerance allows for rsqrt/rounding-boundary effects on
    #    the bf16 activation cast.
    packed_bf16 = prepare_params(params, num_layers, jnp.bfloat16)
    ref_packed = jax_forward_packed(x, packed_bf16, num_layers, out_dim)
    assert jnp.allclose(result, ref_packed, atol=5e-3, rtol=5e-3), (
        float(jnp.max(jnp.abs(result - ref_packed))))

    # 2) Validate the fold/pad transformation itself (f32, no quantization)
    #    against the original unfolded module semantics.
    packed_f32 = prepare_params(params, num_layers, jnp.float32)
    ref_fold_f32 = jax_forward_packed(x, packed_f32, num_layers, out_dim)
    ref_orig = jax_forward_reference(x, params, num_layers)
    assert jnp.allclose(ref_fold_f32, ref_orig, atol=1e-4, rtol=1e-4), (
        float(jnp.max(jnp.abs(ref_fold_f32 - ref_orig))))

    print("KERNEL_OK")
</pallas_src>

<mosaic_0001>
module attributes {stable_mosaic.version = 11 : i64} {
  func.func @_encoder_kernel(%arg0: i32, %arg1: memref<504x32xf32, #tpu.memory_space<vmem>>, %arg2: memref<32x128xbf16, #tpu.memory_space<vmem>>, %arg3: memref<1x128xf32, #tpu.memory_space<vmem>>, %arg4: memref<128x128xbf16, #tpu.memory_space<vmem>>, %arg5: memref<1x128xf32, #tpu.memory_space<vmem>>, %arg6: memref<504x128xf32, #tpu.memory_space<vmem>>) attributes {dimension_semantics = [#tpu.dimension_semantics<parallel>], iteration_bounds = array<i64: 2>, scalar_prefetch = 0 : i64, scratch_operands = 0 : i64, tpu.core_type = #tpu.core_type<tc>, window_params = [{transform_indices = @transform_0, window_bounds = array<i64: 504, 32>}, {pipeline_mode = #tpu.pipeline_mode<synchronous>, transform_indices = @transform_1, window_bounds = array<i64: 32, 128>}, {pipeline_mode = #tpu.pipeline_mode<synchronous>, transform_indices = @transform_2, window_bounds = array<i64: 1, 128>}, {pipeline_mode = #tpu.pipeline_mode<synchronous>, transform_indices = @transform_3, window_bounds = array<i64: 128, 128>}, {pipeline_mode = #tpu.pipeline_mode<synchronous>, transform_indices = @transform_4, window_bounds = array<i64: 1, 128>}, {transform_indices = @transform_5, window_bounds = array<i64: 504, 128>}]} {
    %c0 = arith.constant 0 : index
    %c0_0 = arith.constant 0 : index
    %0 = vector.load %arg1[%c0, %c0_0] : memref<504x32xf32, #tpu.memory_space<vmem>>, vector<504x32xf32>
    %cst = arith.constant dense<0.000000e+00> : vector<504xf32>
    %1 = vector.multi_reduction <add>, %0, %cst [1] : vector<504x32xf32> to vector<504xf32>
    %2 = vector.shape_cast %1 : vector<504xf32> to vector<504x1xf32>
    %3 = arith.mulf %0, %0 : vector<504x32xf32>
    %cst_1 = arith.constant dense<0.000000e+00> : vector<504xf32>
    %4 = vector.multi_reduction <add>, %3, %cst_1 [1] : vector<504x32xf32> to vector<504xf32>
    %5 = vector.shape_cast %4 : vector<504xf32> to vector<504x1xf32>
    %cst_2 = arith.constant 3.125000e-02 : f32
    %6 = vector.broadcast %cst_2 : f32 to vector<504x1xf32>
    %7 = arith.mulf %2, %6 : vector<504x1xf32>
    %cst_3 = arith.constant 3.125000e-02 : f32
    %8 = vector.broadcast %cst_3 : f32 to vector<504x1xf32>
    %9 = arith.mulf %5, %8 : vector<504x1xf32>
    %10 = arith.mulf %7, %7 : vector<504x1xf32>
    %11 = arith.subf %9, %10 : vector<504x1xf32>
    %cst_4 = arith.constant 0.000000e+00 : f32
    %12 = vector.broadcast %cst_4 : f32 to vector<504x1xf32>
    %13 = arith.maximumf %11, %12 : vector<504x1xf32>
    %14 = vector.broadcast %7 : vector<504x1xf32> to vector<504x32xf32>
    %15 = arith.subf %0, %14 : vector<504x32xf32>
    %cst_5 = arith.constant 9.99999974E-6 : f32
    %16 = vector.broadcast %cst_5 : f32 to vector<504x1xf32>
    %17 = arith.addf %13, %16 : vector<504x1xf32>
    %18 = math.rsqrt %17 : vector<504x1xf32>
    %19 = vector.broadcast %18 : vector<504x1xf32> to vector<504x32xf32>
    %20 = arith.mulf %15, %19 : vector<504x32xf32>
    %c0_6 = arith.constant 0 : index
    %c0_7 = arith.constant 0 : index
    %21 = vector.load %arg2[%c0_6, %c0_7] : memref<32x128xbf16, #tpu.memory_space<vmem>>, vector<32x128xbf16>
    %c0_8 = arith.constant 0 : index
    %c0_9 = arith.constant 0 : index
    %22 = vector.load %arg3[%c0_8, %c0_9] : memref<1x128xf32, #tpu.memory_space<vmem>>, vector<1x128xf32>
    %23 = arith.truncf %20 : vector<504x32xf32> to vector<504x32xbf16>
    %cst_10 = arith.constant dense<0.000000e+00> : vector<504x128xf32>
    %24 = tpu.matmul %23, %21, %cst_10 {dimension_numbers = #tpu.dot_dimension_numbers<[1], [0], [0], [1], [0, 0, 1, 1], [], []>} : vector<504x32xbf16>, vector<32x128xbf16>, vector<504x128xf32> -> vector<504x128xf32>
    %25 = vector.broadcast %22 : vector<1x128xf32> to vector<504x128xf32>
    %26 = arith.addf %24, %25 : vector<504x128xf32>
    %cst_11 = arith.constant 0.000000e+00 : f32
    %27 = vector.broadcast %cst_11 : f32 to vector<504x128xf32>
    %28 = arith.maximumf %26, %27 : vector<504x128xf32>
    %c0_12 = arith.constant 0 : index
    %c0_13 = arith.constant 0 : index
    %29 = vector.load %arg4[%c0_12, %c0_13] : memref<128x128xbf16, #tpu.memory_space<vmem>>, vector<128x128xbf16>
    %c0_14 = arith.constant 0 : index
    %c0_15 = arith.constant 0 : index
    %30 = vector.load %arg5[%c0_14, %c0_15] : memref<1x128xf32, #tpu.memory_space<vmem>>, vector<1x128xf32>
    %31 = arith.truncf %28 : vector<504x128xf32> to vector<504x128xbf16>
    %cst_16 = arith.constant dense<0.000000e+00> : vector<504x128xf32>
    %32 = tpu.matmul %31, %29, %cst_16 {dimension_numbers = #tpu.dot_dimension_numbers<[1], [0], [0], [1], [0, 0, 1, 1], [], []>} : vector<504x128xbf16>, vector<128x128xbf16>, vector<504x128xf32> -> vector<504x128xf32>
    %33 = vector.broadcast %30 : vector<1x128xf32> to vector<504x128xf32>
    %34 = arith.addf %32, %33 : vector<504x128xf32>
    %c0_17 = arith.constant 0 : index
    %c0_18 = arith.constant 0 : index
    %35 = vector.load %arg6[%c0_17, %c0_18] : memref<504x128xf32, #tpu.memory_space<vmem>>, vector<504x128xf32>
    tpu.vector_store %arg6[%c0_17, %c0_18], %34 {strides = array<i32>} : memref<504x128xf32, #tpu.memory_space<vmem>>, vector<504x128xf32>,
    return
  }
  func.func @transform_0(%arg0: i32) -> (i32, i32) {
    %c0_i32 = arith.constant 0 : i32
    %c0_i32_0 = arith.constant 0 : i32
    return %arg0, %c0_i32 : i32, i32
  }
  func.func @transform_1(%arg0: i32) -> (i32, i32) {
    %c0_i32 = arith.constant 0 : i32
    %c0_i32_0 = arith.constant 0 : i32
    %c0_i32_1 = arith.constant 0 : i32
    return %c0_i32, %c0_i32_0 : i32, i32
  }
  func.func @transform_2(%arg0: i32) -> (i32, i32) {
    %c0_i32 = arith.constant 0 : i32
    %c0_i32_0 = arith.constant 0 : i32
    %c0_i32_1 = arith.constant 0 : i32
    return %c0_i32, %c0_i32_0 : i32, i32
  }
  func.func @transform_3(%arg0: i32) -> (i32, i32) {
    %c0_i32 = arith.constant 0 : i32
    %c0_i32_0 = arith.constant 0 : i32
    %c0_i32_1 = arith.constant 0 : i32
    return %c0_i32, %c0_i32_0 : i32, i32
  }
  func.func @transform_4(%arg0: i32) -> (i32, i32) {
    %c0_i32 = arith.constant 0 : i32
    %c0_i32_0 = arith.constant 0 : i32
    %c0_i32_1 = arith.constant 0 : i32
    return %c0_i32, %c0_i32_0 : i32, i32
  }
  func.func @transform_5(%arg0: i32) -> (i32, i32) {
    %c0_i32 = arith.constant 0 : i32
    %c0_i32_0 = arith.constant 0 : i32
    return %arg0, %c0_i32 : i32, i32
  }
}

module attributes {stable_mosaic.version = 11 : i64} {
  func.func @_encoder_kernel(%arg0: i32, %arg1: memref<504x32xf32, #tpu.memory_space<vmem>>, %arg2: memref<32x128xbf16, #tpu.memory_space<vmem>>, %arg3: memref<1x128xf32, #tpu.memory_space<vmem>>, %arg4: memref<128x128xbf16, #tpu.memory_space<vmem>>, %arg5: memref<1x128xf32, #tpu.memory_space<vmem>>, %arg6: memref<504x128xf32, #tpu.memory_space<vmem>>) attributes {dimension_semantics = [#tpu.dimension_semantics<parallel>], iteration_bounds = array<i64: 2>, scalar_prefetch = 0 : i64, scratch_operands = 0 : i64, tpu.core_type = #tpu.core_type<tc>, window_params = [{transform_indices = @transform_0, window_bounds = array<i64: 504, 32>}, {pipeline_mode = #tpu.pipeline_mode<synchronous>, transform_indices = @transform_1, window_bounds = array<i64: 32, 128>}, {pipeline_mode = #tpu.pipeline_mode<synchronous>, transform_indices = @transform_2, window_bounds = array<i64: 1, 128>}, {pipeline_mode = #tpu.pipeline_mode<synchronous>, transform_indices = @transform_3, window_bounds = array<i64: 128, 128>}, {pipeline_mode = #tpu.pipeline_mode<synchronous>, transform_indices = @transform_4, window_bounds = array<i64: 1, 128>}, {transform_indices = @transform_5, window_bounds = array<i64: 504, 128>}]} {
    %c0 = arith.constant 0 : index
    %c0_0 = arith.constant 0 : index
    %0 = vector.load %arg1[%c0, %c0_0] : memref<504x32xf32, #tpu.memory_space<vmem>>, vector<504x32xf32>
    %cst = arith.constant dense<0.000000e+00> : vector<504xf32>
    %1 = vector.multi_reduction <add>, %0, %cst [1] : vector<504x32xf32> to vector<504xf32>
    %2 = vector.shape_cast %1 : vector<504xf32> to vector<504x1xf32>
    %3 = arith.mulf %0, %0 : vector<504x32xf32>
    %cst_1 = arith.constant dense<0.000000e+00> : vector<504xf32>
    %4 = vector.multi_reduction <add>, %3, %cst_1 [1] : vector<504x32xf32> to vector<504xf32>
    %5 = vector.shape_cast %4 : vector<504xf32> to vector<504x1xf32>
    %cst_2 = arith.constant 3.125000e-02 : f32
    %6 = vector.broadcast %cst_2 : f32 to vector<504x1xf32>
    %7 = arith.mulf %2, %6 : vector<504x1xf32>
    %cst_3 = arith.constant 3.125000e-02 : f32
    %8 = vector.broadcast %cst_3 : f32 to vector<504x1xf32>
    %9 = arith.mulf %5, %8 : vector<504x1xf32>
    %10 = arith.mulf %7, %7 : vector<504x1xf32>
    %11 = arith.subf %9, %10 : vector<504x1xf32>
    %cst_4 = arith.constant 0.000000e+00 : f32
    %12 = vector.broadcast %cst_4 : f32 to vector<504x1xf32>
    %13 = arith.maximumf %11, %12 : vector<504x1xf32>
    %14 = vector.broadcast %7 : vector<504x1xf32> to vector<504x32xf32>
    %15 = arith.subf %0, %14 : vector<504x32xf32>
    %cst_5 = arith.constant 9.99999974E-6 : f32
    %16 = vector.broadcast %cst_5 : f32 to vector<504x1xf32>
    %17 = arith.addf %13, %16 : vector<504x1xf32>
    %18 = math.rsqrt %17 : vector<504x1xf32>
    %19 = vector.broadcast %18 : vector<504x1xf32> to vector<504x32xf32>
    %20 = arith.mulf %15, %19 : vector<504x32xf32>
    %c0_6 = arith.constant 0 : index
    %c0_7 = arith.constant 0 : index
    %21 = vector.load %arg2[%c0_6, %c0_7] : memref<32x128xbf16, #tpu.memory_space<vmem>>, vector<32x128xbf16>
    %c0_8 = arith.constant 0 : index
    %c0_9 = arith.constant 0 : index
    %22 = vector.load %arg3[%c0_8, %c0_9] : memref<1x128xf32, #tpu.memory_space<vmem>>, vector<1x128xf32>
    %23 = arith.truncf %20 : vector<504x32xf32> to vector<504x32xbf16>
    %cst_10 = arith.constant dense<0.000000e+00> : vector<504x128xf32>
    %24 = tpu.matmul %23, %21, %cst_10 {dimension_numbers = #tpu.dot_dimension_numbers<[1], [0], [0], [1], [0, 0, 1, 1], [], []>} : vector<504x32xbf16>, vector<32x128xbf16>, vector<504x128xf32> -> vector<504x128xf32>
    %25 = vector.broadcast %22 : vector<1x128xf32> to vector<504x128xf32>
    %26 = arith.addf %24, %25 : vector<504x128xf32>
    %cst_11 = arith.constant 0.000000e+00 : f32
    %27 = vector.broadcast %cst_11 : f32 to vector<504x128xf32>
    %28 = arith.maximumf %26, %27 : vector<504x128xf32>
    %c0_12 = arith.constant 0 : index
    %c0_13 = arith.constant 0 : index
    %29 = vector.load %arg4[%c0_12, %c0_13] : memref<128x128xbf16, #tpu.memory_space<vmem>>, vector<128x128xbf16>
    %c0_14 = arith.constant 0 : index
    %c0_15 = arith.constant 0 : index
    %30 = vector.load %arg5[%c0_14, %c0_15] : memref<1x128xf32, #tpu.memory_space<vmem>>, vector<1x128xf32>
    %31 = arith.truncf %28 : vector<504x128xf32> to vector<504x128xbf16>
    %cst_16 = arith.constant dense<0.000000e+00> : vector<504x128xf32>
    %32 = tpu.matmul %31, %29, %cst_16 {dimension_numbers = #tpu.dot_dimension_numbers<[1], [0], [0], [1], [0, 0, 1, 1], [], []>} : vector<504x128xbf16>, vector<128x128xbf16>, vector<504x128xf32> -> vector<504x128xf32>
    %33 = vector.broadcast %30 : vector<1x128xf32> to vector<504x128xf32>
    %34 = arith.addf %32, %33 : vector<504x128xf32>
    %c0_17 = arith.constant 0 : index
    %c0_18 = arith.constant 0 : index
    %35 = vector.load %arg6[%c0_17, %c0_18] : memref<504x128xf32, #tpu.memory_space<vmem>>, vector<504x128xf32>
    tpu.vector_store %arg6[%c0_17, %c0_18], %34 {strides = array<i32>} : memref<504x128xf32, #tpu.memory_space<vmem>>, vector<504x128xf32>,
    return
  }
  func.func @transform_0(%arg0: i32) -> (i32, i32) {
    %c0_i32 = arith.constant 0 : i32
    %c0_i32_0 = arith.constant 0 : i32
    return %arg0, %c0_i32 : i32, i32
  }
  func.func @transform_1(%arg0: i32) -> (i32, i32) {
    %c0_i32 = arith.constant 0 : i32
    %c0_i32_0 = arith.constant 0 : i32
    %c0_i32_1 = arith.constant 0 : i32
    return %c0_i32, %c0_i32_0 : i32, i32
  }
  func.func @transform_2(%arg0: i32) -> (i32, i32) {
    %c0_i32 = arith.constant 0 : i32
    %c0_i32_0 = arith.constant 0 : i32
    %c0_i32_1 = arith.constant 0 : i32
    return %c0_i32, %c0_i32_0 : i32, i32
  }
  func.func @transform_3(%arg0: i32) -> (i32, i32) {
    %c0_i32 = arith.constant 0 : i32
    %c0_i32_0 = arith.constant 0 : i32
    %c0_i32_1 = arith.constant 0 : i32
    return %c0_i32, %c0_i32_0 : i32, i32
  }
  func.func @transform_4(%arg0: i32) -> (i32, i32) {
    %c0_i32 = arith.constant 0 : i32
    %c0_i32_0 = arith.constant 0 : i32
    %c0_i32_1 = arith.constant 0 : i32
    return %c0_i32, %c0_i32_0 : i32, i32
  }
  func.func @transform_5(%arg0: i32) -> (i32, i32) {
    %c0_i32 = arith.constant 0 : i32
    %c0_i32_0 = arith.constant 0 : i32
    return %arg0, %c0_i32 : i32, i32
  }
}

</mosaic_0001>

<bundles_post_ra>
// kernel: tpu_custom_call.1
= control target key start
LH: loop header
LB: loop body
LE: loop exit
PB: predicated region body
PF: predicated region fallthrough
CT: control target
= control target key end

     0   :  { %10 = vsyncpa [#allocation3], 0  ;;  %s5193_s0 = inlined_call_operand.vmem [shape: f32[1008,32], index: 0, kind: input, shape index: {}]   ;;  %s5194_s1 = inlined_call_operand.vmem [shape: bf16[32,128], index: 1, kind: input, shape index: {}]   ;;  %s5195_s2 = inlined_call_operand.vmem [shape: f32[1,128], index: 2, kind: input, shape index: {}]   ;;  %s5196_s3 = inlined_call_operand.vmem [shape: bf16[128,128], index: 3, kind: input, shape index: {}]   ;;  %s5197_s4 = inlined_call_operand.vmem [shape: f32[1,128], index: 4, kind: input, shape index: {}]   ;;  %s5198_s5 = inlined_call_operand.hbm [shape: f32[1008,128], index: 5, kind: output, shape index: {}]  }
   0x1   :  { %12 = vsyncpa [#allocation3 + $0x1], 0  ;;  %s3074_s18 = smov 0   ;;  %s3076_s19 = smov 0  }
   0x2   :  { %s3078_s20 = smov 0   ;;  %s3080_s21 = smov 0  }
   0x3 LB: > { %s3095_s22 = sadd.s32 4294967295, %s3040_s21   ;;  %s2654_s23 = sadd.s32 4294967294, %s3040_s21   ;;  %s3040_s21 = sphi %s3080_s21, %s5304_s21   ;;  %s3036_s20 = sphi %s3078_s20, %s5303_s20   ;;  %s3032_s19 = sphi %s3076_s19, %s5302_s19   ;;  %s3028_s18 = sphi %s3074_s18, %s5301_s18  }
   0x4   : > { %s3099_s24 = sadd.s32 1, %s3040_s21   ;;  %s135_s25 = sadd.s32 1, %s3036_s20 }
   0x5   : > { %s132_s26 = ssub.s32 %s3040_s21, %s3099_s24  ;;  %p145_p0 = scmp.ne.s32.totalorder %s3036_s20, %s3032_s19 }
   0x6   : > { %p133_p1 = scmp.eq.s32.totalorder %s132_s26, 0  ;;  %p146_p2 = scmp.eq.s32.totalorder %s3095_s22, 1 }
   0x7   : > { %p151_p3 = scmp.ne.s32.totalorder %s3032_s19, %s3028_s18  ;;  %p152_p4 = scmp.eq.s32.totalorder %s2654_s23, 1 }
   0x8   : > { %s3110_s27 = scalar_select %p133_p1, %s3036_s20, %s135_s25  }
   0x9   : > { %p3112_p5 = por %p146_p2, %p145_p0  ;;  %p3116_p6 = por %p152_p4, %p151_p3 }
   0xa   : > { %p2657_p7 = scmp.ge.s32.totalorder %s3040_s21, 1  ;;  %p191_p8 = scmp.lt.s32.totalorder %s3040_s21, 3 }
   0xc   : > { %p192_p9 = pnand %p2657_p7, %p191_p8 }
   0xd   : > { %s219_s30 = smul.u32 (!%p192_p9), 63, %s3095_s22  ;;  %s216_s25 = sand.u32 (!%p192_p9), 1, %s3032_s19  }
   0xe   : > { %195 = sbr.rel (%p192_p9) target bundleno = 956 (0x3bc), region = 40  ;;  %s2577_s23 = scalar_lea.sflag (!%p192_p9), [#allocation3], %s216_s25 }
   0xf   : > { %p220_p10 = scmp.lt.s32.totalorder (!%p192_p9), %s219_s30, 125  ;;  %s2755_s26 = smul.u32 (!%p192_p9), 504, %s216_s25 }
  0x10   : > { %s2744_s12 = smul.u32 (!%p192_p9), 504, %s3095_s22  ;;  %s2998_s8 = scalar_lea.hbm (!%p192_p9), %s5198_s5, 1008 }
  0x11   : > { %s4725_s7 = scalar_lea.vmem (!%p192_p9), [#allocation2], %s2755_s26 }
  0x12   : > { %s2588_s15 = scalar_lea.hbm (!%p192_p9), %s5198_s5, %s2744_s12  ;;  %s2589_s16 = sshll.u32 (!%p192_p9), %s4725_s7, 4  ;;  %s2590_s16 = int_to_ptr.vmem [resolvable:$true] %s2589_s16 }
  0x13   : > { %s5306_s30 = smov (!%p220_p10, %s219_s30), 125  ;;  %vm290_vm0 = vcmask 261120   ;;  %s2591_s17 = sshll.u32 %s2588_s15, 4  ;;  %s2592_s17 = int_to_ptr.hbm [resolvable:$true] %s2591_s17 }
  0x14   : > { %s2658_s6 = sshll.u32 %s5306_s30, 3  ;;  %s2992_s22 = sshra.s32 %s2592_s17, 4  ;;  %s2993_s22 = int_to_ptr.hbm [resolvable:$true] %s2992_s22 }
  0x15   : > { %s3126_s9 = scalar_lea.vmem %s5193_s0, %s2658_s6  ;;  %s2994_s26 = scalar_lea.hbm %s2993_s22, 504 }
  0x16   : > { %v3129_v0 = vld [vmem:[%s3126_s9] sm:$0xff]  ;;  %v3132_v1 = vld [vmem:[%s3126_s9 + $0x10] sm:$0xff]  ;;  %v3141_v5 = vld [vmem:[%s3126_s9 + $0x8] sm:$0xff]  ;;  %p2995_p11 = scmp.ne.s32.totalorder %s2993_s22, %s2994_s26  ;;  %p2999_p0 = scmp.lt.s32.totalorder %s2993_s22, %s5198_s5 }
  0x17   : > { %v291_v2 = vsel %vm290_vm0, %v3129_v0, 0.0  ;;  %v297_v3 = vsel %vm290_vm0, %v3132_v1, 0.0  ;;  %v480_v4 = vmul.f32 %v3129_v0, %v3129_v0  ;;  %v3145_v7 = vld [vmem:[%s3126_s9 + $0x18] sm:$0xff]  ;;  %v481_v8 = vmul.f32 %v3141_v5, %v3141_v5  ;;  %v3157_v13 = vld [vmem:[%s3126_s9 + $0x20] sm:$0xff]  ;;  %v3165_v17 = vld [vmem:[%s3126_s9 + $0x28] sm:$0xff]  ;;  %p3000_p1 = scmp.lt.s32.totalorder %s2998_s8, %s2994_s26 }
  0x18   : > { %292 = vadd.xlane.f32.xlu0 %v291_v2  ;;  %298 = vadd.xlane.f32.xlu2 %v297_v3  ;;  %v294_v9 = vsel %vm290_vm0, %v3141_v5, 0.0  ;;  %v300_v10 = vsel %vm290_vm0, %v3145_v7, 0.0  ;;  %v482_v12 = vmul.f32 %v3132_v1, %v3132_v1  ;;  %v483_v14 = vmul.f32 %v3145_v7, %v3145_v7  ;;  %v3176_v23 = vld [vmem:[%s3126_s9 + $0x30] sm:$0xff]  ;;  %v3182_v26 = vld [vmem:[%s3126_s9 + $0x38] sm:$0xff]  ;;  %v3192_v31 = vld [vmem:[%s3126_s9 + $0x48] sm:$0xff]  ;;  %p2996_p12 = pnand %p2995_p11, %p3112_p5 }
  0x19   : > { %v543_v6 = vsel %vm290_vm0, %v480_v4, 0.0  ;;  %v546_v11 = vsel %vm290_vm0, %v481_v8, 0.0  ;;  %v303_v16 = vsel %vm290_vm0, %v3157_v13, 0.0  ;;  %v485_v19 = vmul.f32 %v3165_v17, %v3165_v17  ;;  %v3195_v32 = vld [vmem:[%s3126_s9 + $0x40] sm:$0xff]  ;;  %v3205_v37 = vld [vmem:[%s3126_s9 + $0x50] sm:$0xff]  ;;  %v3213_v41 = vld [vmem:[%s3126_s9 + $0x58] sm:$0xff]  ;;  %p3001_p2 = por %p3000_p1, %p2999_p0 }
  0x1a   : > { %544 = vadd.xlane.f32.xlu1 %v543_v6  ;;  %v549_v15 = vsel %vm290_vm0, %v482_v12, 0.0  ;;  %v552_v18 = vsel %vm290_vm0, %v483_v14, 0.0  ;;  %v484_v20 = vmul.f32 %v3157_v13, %v3157_v13  ;;  %v306_v21 = vsel %vm290_vm0, %v3165_v17, 0.0  ;;  %v239_v48 = vld [vmem:[%s3126_s9 + $0x60] sm:$0xff]  ;;  %v240_v50 = vld [vmem:[%s3126_s9 + $0x68] sm:$0xff]  ;;  %v242_v55 = vld [vmem:[%s3126_s9 + $0x78] sm:$0xff]  ;;  %p2997_p13 = pneg %p2996_p12 }
  0x1b   : > { %v558_v22 = vsel %vm290_vm0, %v485_v19, 0.0  ;;  %v486_v25 = vmul.f32 %v3176_v23, %v3176_v23  ;;  %v309_v27 = vsel %vm290_vm0, %v3176_v23, 0.0  ;;  %v312_v29 = vsel %vm290_vm0, %v3182_v26, 0.0  ;;  %v241_v56 = vld [vmem:[%s3126_s9 + $0x70] sm:$0xff]  ;;  %v243_v61 = vld [vmem:[%s3126_s9 + $0x80] sm:$0xff]  ;;  %v244_v3 = vld [vmem:[%s3126_s9 + $0x88] sm:$0xff] }
  0x1c   : > { %v555_v24 = vsel %vm290_vm0, %v484_v20, 0.0  ;;  %v487_v30 = vmul.f32 %v3182_v26, %v3182_v26  ;;  %v318_v34 = vsel %vm290_vm0, %v3192_v31, 0.0  ;;  %v315_v35 = vsel %vm290_vm0, %v3195_v32, 0.0  ;;  %v245_v12 = vld [vmem:[%s3126_s9 + $0x90] sm:$0xff]  ;;  %p3002_p3 = pnand %p3001_p2, %p2997_p13 }
  0x1d   : > { %v561_v28 = vsel %vm290_vm0, %v486_v25, 0.0  ;;  %v488_v36 = vmul.f32 %v3195_v32, %v3195_v32  ;;  %v489_v38 = vmul.f32 %v3192_v31, %v3192_v31  ;;  %v321_v40 = vsel %vm290_vm0, %v3205_v37, 0.0  ;;  %v248_v25 = vld [vmem:[%s3126_s9 + $0xa8] sm:$0xff] }
  0x1e   : > { %v564_v33 = vsel %vm290_vm0, %v487_v30, 0.0  ;;  %v491_v43 = vmul.f32 %v3213_v41, %v3213_v41  ;;  %v490_v44 = vmul.f32 %v3205_v37, %v3205_v37  ;;  %v324_v45 = vsel %vm290_vm0, %v3213_v41, 0.0 }
  0x1f   : > { %v567_v39 = vsel %vm290_vm0, %v488_v36, 0.0  ;;  %v570_v42 = vsel %vm290_vm0, %v489_v38, 0.0  ;;  %v492_v49 = vmul.f32 %v239_v48, %v239_v48  ;;  %v327_v51 = vsel %vm290_vm0, %v239_v48, 0.0  ;;  %v249_v36 = vld [vmem:[%s3126_s9 + $0xb0] sm:$0xff] }
  0x20   : > { %295 = vadd.xlane.f32.xlu0 %v294_v9  ;;  %301 = vadd.xlane.f32.xlu2 %v300_v10  ;;  %v576_v46 = vsel %vm290_vm0, %v491_v43, 0.0  ;;  %v573_v47 = vsel %vm290_vm0, %v490_v44, 0.0  ;;  %v330_v53 = vsel %vm290_vm0, %v240_v50, 0.0  ;;  %v493_v54 = vmul.f32 %v240_v50, %v240_v50 }
  0x21   : > { %v579_v52 = vsel %vm290_vm0, %v492_v49, 0.0  ;;  %v336_v58 = vsel %vm290_vm0, %v242_v55, 0.0  ;;  %v333_v59 = vsel %vm290_vm0, %v241_v56, 0.0  ;;  %v494_v60 = vmul.f32 %v241_v56, %v241_v56 }
  0x22   : > { %547 = vadd.xlane.f32.xlu1 %v546_v11  ;;  %v582_v57 = vsel %vm290_vm0, %v493_v54, 0.0  ;;  %v495_v62 = vmul.f32 %v242_v55, %v242_v55  ;;  %v339_v2 = vsel %vm290_vm0, %v243_v61, 0.0  ;;  %v497_v6 = vmul.f32 %v244_v3, %v244_v3 }
  0x23   : > { %v585_v63 = vsel %vm290_vm0, %v494_v60, 0.0  ;;  %v496_v8 = vmul.f32 %v243_v61, %v243_v61  ;;  %v342_v9 = vsel %vm290_vm0, %v244_v3, 0.0  ;;  %v498_v14 = vmul.f32 %v245_v12, %v245_v12 }
  0x24   : > { %v588_v4 = vsel %vm290_vm0, %v495_v62, 0.0  ;;  %v594_v10 = vsel %vm290_vm0, %v497_v6, 0.0  ;;  %v502_v50 = vmul.f32 %v249_v36, %v249_v36 }
  0x25   : > { %v591_v11 = vsel %vm290_vm0, %v496_v8, 0.0 }
  0x26   : > { %v609_v56 = vsel %vm290_vm0, %v502_v50, 0.0 }
  0x28   : > { %550 = vadd.xlane.f32.xlu0 %v549_v15  ;;  %304 = vadd.xlane.f32.xlu2 %v303_v16  ;;  %v246_v15 = vld [vmem:[%s3126_s9 + $0x98] sm:$0xff]  ;;  %v345_v16 = vsel %vm290_vm0, %v245_v12, 0.0 }
  0x29   : > { %v348_v19 = vsel %vm290_vm0, %v246_v15, 0.0  ;;  %v499_v20 = vmul.f32 %v246_v15, %v246_v15 }
  0x2a   : > { %553 = vadd.xlane.f32.xlu1 %v552_v18  ;;  %v597_v18 = vsel %vm290_vm0, %v498_v14, 0.0  ;;  %v251_v14 = vld [vmem:[%s3126_s9 + $0xc0] sm:$0xff] }
  0x30   : > { %307 = vadd.xlane.f32.xlu0 %v306_v21  ;;  %559 = vadd.xlane.f32.xlu2 %v558_v22  ;;  %v247_v21 = vld [vmem:[%s3126_s9 + $0xa0] sm:$0xff]  ;;  %v600_v22 = vsel %vm290_vm0, %v499_v20, 0.0 }
  0x32   : > { %556 = vadd.xlane.f32.xlu1 %v555_v24  ;;  %v351_v24 = vsel %vm290_vm0, %v247_v21, 0.0 }
  0x38   : > { %310 = vadd.xlane.f32.xlu0 %v309_v27  ;;  %562 = vadd.xlane.f32.xlu2 %v561_v28  ;;  %v354_v27 = vsel %vm290_vm0, %v248_v25, 0.0  ;;  %v500_v28 = vmul.f32 %v247_v21, %v247_v21 }
  0x3a   : > { %313 = vadd.xlane.f32.xlu1 %v312_v29  ;;  %v501_v29 = vmul.f32 %v248_v25, %v248_v25  ;;  %v603_v30 = vsel %vm290_vm0, %v500_v28, 0.0 }
  0x40   : > { %565 = vadd.xlane.f32.xlu0 %v564_v33  ;;  %319 = vadd.xlane.f32.xlu2 %v318_v34  ;;  %v606_v33 = vsel %vm290_vm0, %v501_v29, 0.0 }
  0x42   : > { %316 = vadd.xlane.f32.xlu1 %v315_v35 }
  0x48   : > { %568 = vadd.xlane.f32.xlu0 %v567_v39  ;;  %322 = vadd.xlane.f32.xlu2 %v321_v40  ;;  %v357_v39 = vsel %vm290_vm0, %v249_v36, 0.0  ;;  %v2735_v40 = vld [vmem:[%s5194_s1 + $0x8] sm:$0xff] }
  0x49   : > { %2020 = vmatpush.bf16.msra.mxu0 %v2735_v40  ;;  %2745 = vmatpush.bf16.msra.mxu3 %v2735_v40 }
  0x4a   : > { %571 = vadd.xlane.f32.xlu1 %v570_v42 }
  0x50   : > { %325 = vadd.xlane.f32.xlu0 %v324_v45  ;;  %577 = vadd.xlane.f32.xlu2 %v576_v46  ;;  %v2734_v45 = vld [vmem:[%s5194_s1] sm:$0xff] }
  0x51   : > { %2021 = vmatpush.bf16.msra.mxu0 %v2734_v45  ;;  %2746 = vmatpush.bf16.msra.mxu3 %v2734_v45 }
  0x52   : > { %574 = vadd.xlane.f32.xlu1 %v573_v47  ;;  %v250_v47 = vld [vmem:[%s3126_s9 + $0xb8] sm:$0xff] }
  0x53   : > { %v360_v48 = vsel %vm290_vm0, %v250_v47, 0.0  ;;  %v503_v49 = vmul.f32 %v250_v47, %v250_v47 }
  0x55   : > { %v612_v55 = vsel %vm290_vm0, %v503_v49, 0.0 }
  0x58   : > { %328 = vadd.xlane.f32.xlu0 %v327_v51  ;;  %580 = vadd.xlane.f32.xlu2 %v579_v52 }
  0x5a   : > { %331 = vadd.xlane.f32.xlu1 %v330_v53 }
  0x60   : > { %583 = vadd.xlane.f32.xlu0 %v582_v57  ;;  %337 = vadd.xlane.f32.xlu2 %v336_v58 }
  0x62   : > { %334 = vadd.xlane.f32.xlu1 %v333_v59 }
  0x68   : > { %586 = vadd.xlane.f32.xlu0 %v585_v63  ;;  %340 = vadd.xlane.f32.xlu2 %v339_v2 }
  0x6a   : > { %589 = vadd.xlane.f32.xlu1 %v588_v4 }
  0x70   : > { %343 = vadd.xlane.f32.xlu0 %v342_v9  ;;  %595 = vadd.xlane.f32.xlu2 %v594_v10 }
  0x72   : > { %592 = vadd.xlane.f32.xlu1 %v591_v11 }
  0x78   : > { %346 = vadd.xlane.f32.xlu0 %v345_v16  ;;  %598 = vadd.xlane.f32.xlu2 %v597_v18 }
  0x7a   : > { %349 = vadd.xlane.f32.xlu1 %v348_v19 }
  0x80   : > { %601 = vadd.xlane.f32.xlu0 %v600_v22  ;;  %355 = vadd.xlane.f32.xlu2 %v354_v27  ;;  %v363_v22 = vsel %vm290_vm0, %v251_v14, 0.0 }
  0x82   : > { %352 = vadd.xlane.f32.xlu1 %v351_v24 }
  0x88   : > { %604 = vadd.xlane.f32.xlu0 %v603_v30  ;;  %358 = vadd.xlane.f32.xlu2 %v357_v39 }
  0x8a   : > { %607 = vadd.xlane.f32.xlu1 %v606_v33  ;;  %v252_v33 = vld [vmem:[%s3126_s9 + $0xc8] sm:$0xff] }
  0x8b   : > { %v293_v34 = vpop.xlane.xlu0 %292  ;;  %v299_v35 = vpop.xlane.xlu2 %298 }
  0x8c   : > { %v3255_v38 = vmul.f32 0.03125, %v293_v34  ;;  %v3274_v59 = vmul.f32 0.03125, %v299_v35 }
  0x8d   : > { %v545_v42 = vpop.xlane.xlu1 %544 }
  0x8e   : > { %v858_v43 = vmul.f32 %v3255_v38, %v3255_v38  ;;  %v795_v44 = vmul.f32 0.03125, %v545_v42  ;;  %v860_v2 = vmul.f32 %v3274_v59, %v3274_v59 }
  0x90   : > { %v921_v46 = vsub.f32 %v795_v44, %v858_v43  ;;  %361 = vadd.xlane.f32.xlu0 %v360_v48  ;;  %613 = vadd.xlane.f32.xlu2 %v612_v55  ;;  %v366_v43 = vsel %vm290_vm0, %v252_v33, 0.0  ;;  %v504_v44 = vmul.f32 %v251_v14, %v251_v14 }
  0x92   : > { %v984_v51 = vmax.f32 %v921_v46, 0.0  ;;  %610 = vadd.xlane.f32.xlu1 %v609_v56 }
  0x93   : > { %v296_v52 = vpop.xlane.xlu0 %295  ;;  %v302_v53 = vpop.xlane.xlu2 %301 }
  0x94   : > { %v3268_v54 = vmul.f32 0.03125, %v296_v52  ;;  %v3272_v57 = vadd.f32 1e-05, %v984_v51  ;;  %v3279_v62 = vmul.f32 0.03125, %v302_v53  ;;  %v615_v51 = vsel %vm290_vm0, %v504_v44, 0.0 }
  0x95   : > { %v548_v58 = vpop.xlane.xlu1 %547  ;;  %v505_v52 = vmul.f32 %v252_v33, %v252_v33 }
  0x96   : > { %v859_v60 = vmul.f32 %v3268_v54, %v3268_v54  ;;  %2799 = vrsqrt.f32 %v3272_v57  ;;  %v796_v61 = vmul.f32 0.03125, %v548_v58  ;;  %v861_v10 = vmul.f32 %v3279_v62, %v3279_v62 }
  0x97   : > { %vm1179_vm2 = vweird.f32 %v3272_v57 }
  0x98   : > { %v922_v63 = vsub.f32 %v796_v61, %v859_v60  ;;  %364 = vadd.xlane.f32.xlu0 %v363_v22  ;;  %616 = vadd.xlane.f32.xlu2 %v615_v51  ;;  %v618_v60 = vsel %vm290_vm0, %v505_v52, 0.0 }
  0x9a   : > { %v985_v3 = vmax.f32 %v922_v63, 0.0  ;;  %367 = vadd.xlane.f32.xlu1 %v366_v43 }
  0x9b   : > { %v551_v4 = vpop.xlane.xlu0 %550  ;;  %v305_v6 = vpop.xlane.xlu2 %304 }
  0x9c   : > { %v797_v8 = vmul.f32 0.03125, %v551_v4  ;;  %v3283_v9 = vpop.eup %2799  ;;  %v3287_v11 = vadd.f32 1e-05, %v985_v3  ;;  %v3294_v21 = vmul.f32 0.03125, %v305_v6 }
  0x9d   : > { %v554_v12 = vpop.xlane.xlu1 %553  ;;  %v1174_v15 = vmul.f32 %v3283_v9, %v3272_v57  ;;  %vm1180_vm1 = vweird.f32 %v3283_v9 }
  0x9e   : > { %v923_v16 = vsub.f32 %v797_v8, %v860_v2  ;;  %2801 = vrsqrt.f32 %v3287_v11  ;;  %v798_v18 = vmul.f32 0.03125, %v554_v12  ;;  %v862_v34 = vmul.f32 %v3294_v21, %v3294_v21  ;;  %vm3329_vm3 = vmor %vm1179_vm2, %vm1180_vm1 }
  0x9f   : > { %v1175_v19 = vmul.f32 %v3283_v9, %v1174_v15  ;;  %vm1189_vm4 = vweird.f32 %v3287_v11 }
  0xa0   : > { %v986_v20 = vmax.f32 %v923_v16, 0.0  ;;  %v924_v24 = vsub.f32 %v798_v18, %v861_v10  ;;  %619 = vadd.xlane.f32.xlu0 %v618_v60 }
  0xa1   : > { %v1176_v27 = vmul.f32 0.5, %v1175_v19 }
  0xa2   : > { %v3297_v25 = vadd.f32 1e-05, %v986_v20  ;;  %v987_v28 = vmax.f32 %v924_v24, 0.0  ;;  %v253_v24 = vld [vmem:[%s3126_s9 + $0xd0] sm:$0xff] }
  0xa3   : > { %v308_v29 = vpop.xlane.xlu0 %307  ;;  %v560_v30 = vpop.xlane.xlu2 %559  ;;  %v1177_v47 = vsub.f32 1.5, %v1176_v27  ;;  %v369_v33 = vsel %vm290_vm0, %v253_v24, 0.0 }
  0xa4   : > { %2803 = vrsqrt.f32 %v3297_v25  ;;  %v3303_v35 = vmul.f32 0.03125, %v308_v29  ;;  %v2802_v36 = vpop.eup %2801  ;;  %v3305_v39 = vadd.f32 1e-05, %v987_v28  ;;  %v800_v40 = vmul.f32 0.03125, %v560_v30  ;;  %370 = vadd.xlane.f32.xlu1 %v369_v33 }
  0xa5   : > { %v557_v42 = vpop.xlane.xlu1 %556  ;;  %v1184_v45 = vmul.f32 %v2802_v36, %v3287_v11  ;;  %v1178_v3 = vmul.f32 %v3283_v9, %v1177_v47  ;;  %vm1190_vm5 = vweird.f32 %v2802_v36  ;;  %v1047_v29 = vsub.f32 %v3129_v0, %v3255_v38 }
  0xa6   : > { %v863_v46 = vmul.f32 %v3303_v35, %v3303_v35  ;;  %2805 = vrsqrt.f32 %v3305_v39  ;;  %v799_v48 = vmul.f32 0.03125, %v557_v42  ;;  %v1048_v30 = vsub.f32 %v3141_v5, %v3268_v54  ;;  %vm1191_vm6 = vmor %vm1189_vm4, %vm1190_vm5 }
  0xa7   : > { %v1185_v49 = vmul.f32 %v2802_v36, %v1184_v45  ;;  %v1182_v22 = vsel %vm3329_vm3, %v3283_v9, %v1178_v3  ;;  %vm1209_vm7 = vweird.f32 %v3305_v39  ;;  %v506_v3 = vmul.f32 %v253_v24, %v253_v24 }
  0xa8   : > { %v926_v50 = vsub.f32 %v800_v40, %v863_v46  ;;  %v925_v53 = vsub.f32 %v799_v48, %v862_v34  ;;  %v1803_v44 = vmul.f32 %v1182_v22, %v1047_v29  ;;  %vm1199_vm11 = vweird.f32 %v3297_v25 }
  0xa9   : > { %v1186_v56 = vmul.f32 0.5, %v1185_v49  ;;  %v1049_v29 = vsub.f32 %v3132_v1, %v3274_v59 }
  0xaa   : > { %v3313_v55 = vpop.eup %2803  ;;  %v989_v58 = vmax.f32 %v926_v50, 0.0  ;;  %v988_v63 = vmax.f32 %v925_v53, 0.0 }
  0xab   : > { %v1194_v61 = vmul.f32 %v3313_v55, %v3297_v25  ;;  %v311_v2 = vpop.xlane.xlu0 %310  ;;  %v1187_v4 = vsub.f32 1.5, %v1186_v56  ;;  %v563_v8 = vpop.xlane.xlu2 %562  ;;  %vm1200_vm9 = vweird.f32 %v3313_v55 }
  0xac   : > { %v3320_v6 = vmul.f32 0.03125, %v311_v2  ;;  %v3322_v10 = vpop.eup %2805  ;;  %v3325_v12 = vadd.f32 1e-05, %v989_v58  ;;  %v3327_v14 = vadd.f32 1e-05, %v988_v63  ;;  %v801_v20 = vmul.f32 0.03125, %v563_v8  ;;  %vm3395_vm12 = vmor %vm1199_vm11, %vm1200_vm9 }
  0xad   : > { %v314_v15 = vpop.xlane.xlu1 %313  ;;  %v1204_v18 = vmul.f32 %v3322_v10, %v3305_v39  ;;  %v1195_v19 = vmul.f32 %v3313_v55, %v1194_v61  ;;  %v1188_v28 = vmul.f32 %v2802_v36, %v1187_v4  ;;  %vm1210_vm8 = vweird.f32 %v3322_v10 }
  0xae   : > { %v864_v57 = vmul.f32 %v3320_v6, %v3320_v6  ;;  %2807 = vrsqrt.f32 %v3327_v14  ;;  %v3345_v11 = vmul.f32 0.03125, %v314_v15  ;;  %vm3379_vm10 = vmor %vm1209_vm7, %vm1210_vm8  ;;  %v1050_v39 = vsub.f32 %v3145_v7, %v3279_v62 }
  0xaf   : > { %v1205_v27 = vmul.f32 %v3322_v10, %v1204_v18  ;;  %2809 = vrsqrt.f32 %v3325_v12  ;;  %v1192_v40 = vsel %vm1191_vm6, %v2802_v36, %v1188_v28  ;;  %v1196_v0 = vmul.f32 0.5, %v1195_v19  ;;  %v254_v36 = vld [vmem:[%s3126_s9 + $0xd8] sm:$0xff]  ;;  %v255_v28 = vld [vmem:[%s3126_s9 + $0xe0] sm:$0xff] }
  0xb0   : > { %v865_v34 = vmul.f32 %v3345_v11, %v3345_v11  ;;  %v927_v42 = vsub.f32 %v801_v20, %v864_v57  ;;  %v1804_v45 = vmul.f32 %v1192_v40, %v1048_v30  ;;  %v372_v61 = vsel %vm290_vm0, %v254_v36, 0.0 }
  0xb1   : > { %v1206_v9 = vmul.f32 0.5, %v1205_v27  ;;  %v1197_v51 = vsub.f32 1.5, %v1196_v0  ;;  %373 = vadd.xlane.f32.xlu2 %v372_v61  ;;  %v507_v2 = vmul.f32 %v254_v36, %v254_v36  ;;  %v621_v57 = vsel %vm290_vm0, %v506_v3, 0.0 }
  0xb2   : > { %v1871_v46 = vpack.c.bf16 %v1804_v45, %v1803_v44  ;;  %v990_v50 = vmax.f32 %v927_v42, 0.0  ;;  %622 = vadd.xlane.f32.xlu0 %v621_v57  ;;  %vm1229_vm13 = vweird.f32 %v3325_v12  ;;  %vm1219_vm15 = vweird.f32 %v3327_v14 }
  0xb3   : > { %v566_v43 = vpop.xlane.xlu0 %565  ;;  %v1207_v47 = vsub.f32 1.5, %v1206_v9  ;;  %v320_v56 = vpop.xlane.xlu2 %319  ;;  %v1198_v15 = vmul.f32 %v3313_v55, %v1197_v51  ;;  %v624_v19 = vsel %vm290_vm0, %v507_v2, 0.0  ;;  %v508_v36 = vmul.f32 %v255_v28, %v255_v28 }
  0xb4   : > { %v802_v38 = vmul.f32 0.03125, %v566_v43  ;;  %v3355_v54 = vpop.eup %2807  ;;  %2667 = vmatmul.msk.bf16.vlgmr.msra.gmra.mxu0 %vm290_vm0, %v1871_v46  ;;  %v3369_v63 = vadd.f32 1e-05, %v990_v50  ;;  %v3374_v8 = vmul.f32 0.03125, %v320_v56  ;;  %625 = vadd.xlane.f32.xlu1 %v624_v19  ;;  %v256_v46 = vld [vmem:[%s3126_s9 + $0xe8] sm:$0xff] }
  0xb5   : > { %v317_v5 = vpop.xlane.xlu1 %316  ;;  %v3357_v49 = vpop.eup %2809  ;;  %v1214_v53 = vmul.f32 %v3355_v54, %v3327_v14  ;;  %v1208_v60 = vmul.f32 %v3322_v10, %v1207_v47  ;;  %v1202_v62 = vsel %vm3395_vm12, %v3313_v55, %v1198_v15  ;;  %v378_v47 = vsel %vm290_vm0, %v256_v46, 0.0 }
  0xb6   : > { %v928_v48 = vsub.f32 %v802_v38, %v865_v34  ;;  %v1224_v58 = vmul.f32 %v3357_v49, %v3325_v12  ;;  %2811 = vrsqrt.f32 %v3369_v63  ;;  %v3400_v25 = vmul.f32 0.03125, %v317_v5 }
  0xb7   : > { %v1215_v18 = vmul.f32 %v3355_v54, %v1214_v53  ;;  %v1212_v24 = vsel %vm3379_vm10, %v3322_v10, %v1208_v60  ;;  %v867_v10 = vmul.f32 %v3374_v8, %v3374_v8  ;;  %v375_v34 = vsel %vm290_vm0, %v255_v28, 0.0 }
  0xb8   : > { %v991_v52 = vmax.f32 %v928_v48, 0.0  ;;  %v1225_v20 = vmul.f32 %v3357_v49, %v1224_v58  ;;  %v1806_v9 = vmul.f32 %v1212_v24, %v1050_v39  ;;  %v866_v1 = vmul.f32 %v3400_v25, %v3400_v25 }
  0xb9   : > { %v1216_v30 = vmul.f32 0.5, %v1215_v18  ;;  %v1805_v43 = vmul.f32 %v1202_v62, %v1049_v29  ;;  %376 = vadd.xlane.f32.xlu2 %v375_v34  ;;  %v509_v50 = vmul.f32 %v256_v46, %v256_v46  ;;  %vm1230_vm14 = vweird.f32 %v3357_v49 }
  0xba   : > { %v3372_v4 = vadd.f32 1e-05, %v991_v52  ;;  %v1226_v40 = vmul.f32 0.5, %v1225_v20  ;;  %379 = vadd.xlane.f32.xlu0 %v378_v47  ;;  %vm1220_vm1 = vweird.f32 %v3355_v54  ;;  %v627_v2 = vsel %vm290_vm0, %v508_v36, 0.0  ;;  %vm3435_vm2 = vmor %vm1229_vm13, %vm1230_vm14  ;;  %v259_v36 = vld [vmem:[%s3126_s9 + $0x100] sm:$0xff] }
  0xbb   : > { %v569_v7 = vpop.xlane.xlu0 %568  ;;  %v323_v42 = vpop.xlane.xlu2 %322  ;;  %v1217_v45 = vsub.f32 1.5, %v1216_v30  ;;  %v1872_v38 = vpack.c.bf16 %v1806_v9, %v1805_v43  ;;  %v630_v58 = vsel %vm290_vm0, %v509_v50, 0.0  ;;  %vm3445_vm3 = vmor %vm1219_vm15, %vm1220_vm1  ;;  %v1051_v39 = vsub.f32 %v3157_v13, %v3294_v21 }
  0xbc   : > { %2813 = vrsqrt.f32 %v3372_v4  ;;  %v803_v59 = vmul.f32 0.03125, %v569_v7  ;;  %v3414_v44 = vpop.eup %2811  ;;  %v1227_v5 = vsub.f32 1.5, %v1226_v40  ;;  %v3439_v16 = vmul.f32 0.03125, %v323_v42  ;;  %628 = vadd.xlane.f32.xlu1 %v627_v2 }
  0xbd   : > { %v572_v22 = vpop.xlane.xlu1 %571  ;;  %v1218_v56 = vmul.f32 %v3355_v54, %v1217_v45  ;;  %v1234_v60 = vmul.f32 %v3414_v44, %v3369_v63  ;;  %v1052_v28 = vsub.f32 %v3165_v17, %v3303_v35  ;;  %v258_v35 = vld [vmem:[%s3126_s9 + $0xf8] sm:$0xff]  ;;  %vm1249_vm4 = vweird.f32 %v3372_v4 }
  0xbe   : > { %v804_v33 = vmul.f32 0.03125, %v572_v22  ;;  %v929_v48 = vsub.f32 %v803_v59, %v866_v1  ;;  %v1228_v61 = vmul.f32 %v3357_v49, %v1227_v5  ;;  %v384_v34 = vsel %vm290_vm0, %v258_v35, 0.0 }
  0xbf   : > { %v1222_v24 = vsel %vm3445_vm3, %v3355_v54, %v1218_v56  ;;  %v1235_v14 = vmul.f32 %v3414_v44, %v1234_v60  ;;  %v257_v54 = vld [vmem:[%s3126_s9 + $0xf0] sm:$0xff]  ;;  %v511_v59 = vmul.f32 %v258_v35, %v258_v35  ;;  %vm1239_vm6 = vweird.f32 %v3369_v63 }
  0xc0   : > { %v930_v0 = vsub.f32 %v804_v33, %v867_v10  ;;  %v992_v15 = vmax.f32 %v929_v48, 0.0  ;;  %v1232_v27 = vsel %vm3435_vm2, %v3357_v49, %v1228_v61  ;;  %v868_v10 = vmul.f32 %v3439_v16, %v3439_v16  ;;  %v260_v48 = vld [vmem:[%s3126_s9 + $0x108] sm:$0xff] }
  0xc1   : > { %631 = vadd.xlane.f32.xlu2 %v630_v58  ;;  %v1807_v62 = vmul.f32 %v1222_v24, %v1051_v39  ;;  %v381_v30 = vsel %vm290_vm0, %v257_v54, 0.0  ;;  %v1808_v49 = vmul.f32 %v1232_v27, %v1052_v28  ;;  %v510_v17 = vmul.f32 %v257_v54, %v257_v54 }
  0xc2   : > { %v3417_v55 = vpop.eup %2813  ;;  %v993_v52 = vmax.f32 %v930_v0, 0.0  ;;  %v3465_v29 = vadd.f32 1e-05, %v992_v15  ;;  %382 = vadd.xlane.f32.xlu0 %v381_v30  ;;  %v1236_v9 = vmul.f32 0.5, %v1235_v14  ;;  %v636_v46 = vsel %vm290_vm0, %v511_v59, 0.0 }
  0xc3   : > { %v1244_v51 = vmul.f32 %v3417_v55, %v3372_v4  ;;  %v326_v53 = vpop.xlane.xlu0 %325  ;;  %v578_v22 = vpop.xlane.xlu2 %577  ;;  %v633_v1 = vsel %vm290_vm0, %v510_v17, 0.0  ;;  %v1873_v0 = vpack.c.bf16 %v1808_v49, %v1807_v62  ;;  %vm1250_vm5 = vweird.f32 %v3417_v55 }
  0xc4   : > { %2668 = vmatmul.msk.bf16.gmra.mxu0 %vm290_vm0, %v1872_v38  ;;  %v3449_v19 = vmul.f32 0.03125, %v326_v53  ;;  %v3452_v20 = vadd.f32 1e-05, %v993_v52  ;;  %v806_v21 = vmul.f32 0.03125, %v578_v22  ;;  %385 = vadd.xlane.f32.xlu1 %v384_v34  ;;  %v1237_v38 = vsub.f32 1.5, %v1236_v9  ;;  %vm3491_vm8 = vmor %vm1249_vm4, %vm1250_vm5  ;;  %v262_v9 = vld [vmem:[%s3126_s9 + $0x118] sm:$0xff] }
  0xc5   : > { %v575_v12 = vpop.xlane.xlu1 %574  ;;  %v1245_v57 = vmul.f32 %v3417_v55, %v1244_v51  ;;  %vm1240_vm7 = vweird.f32 %v3414_v44  ;;  %v390_v63 = vsel %vm290_vm0, %v260_v48, 0.0  ;;  %v387_v15 = vsel %vm290_vm0, %v259_v36, 0.0 }
  0xc6   : > { %v805_v7 = vmul.f32 0.03125, %v575_v12  ;;  %v869_v13 = vmul.f32 %v3449_v19, %v3449_v19  ;;  %2815 = vrsqrt.f32 %v3452_v20  ;;  %v1238_v58 = vmul.f32 %v3414_v44, %v1237_v38  ;;  %vm3499_vm9 = vmor %vm1239_vm6, %vm1240_vm7 }
  0xc7   : > { %v1246_v33 = vmul.f32 0.5, %v1245_v57  ;;  %2817 = vrsqrt.f32 %v3465_v29  ;;  %v1053_v22 = vsub.f32 %v3176_v23, %v3320_v6  ;;  %v1054_v39 = vsub.f32 %v3182_v26, %v3345_v11 }
  0xc8   : > { %v931_v40 = vsub.f32 %v805_v7, %v868_v10  ;;  %v932_v42 = vsub.f32 %v806_v21, %v869_v13  ;;  %v1242_v10 = vsel %vm3499_vm9, %v3414_v44, %v1238_v58  ;;  %v261_v7 = vld [vmem:[%s3126_s9 + $0x110] sm:$0xff]  ;;  %v512_v6 = vmul.f32 %v259_v36, %v259_v36 }
  0xc9   : > { %634 = vadd.xlane.f32.xlu2 %v633_v1  ;;  %v1247_v45 = vsub.f32 1.5, %v1246_v33  ;;  %v513_v54 = vmul.f32 %v260_v48, %v260_v48  ;;  %v393_v21 = vsel %vm290_vm0, %v261_v7, 0.0  ;;  %v1809_v49 = vmul.f32 %v1242_v10, %v1053_v22 }
  0xca   : > { %v994_v47 = vmax.f32 %v931_v40, 0.0  ;;  %v995_v50 = vmax.f32 %v932_v42, 0.0  ;;  %637 = vadd.xlane.f32.xlu0 %v636_v46  ;;  %v639_v44 = vsel %vm290_vm0, %v512_v6, 0.0  ;;  %vm1269_vm10 = vweird.f32 %v3452_v20 }
  0xcb   : > { %v329_v43 = vpop.xlane.xlu0 %328  ;;  %v1248_v53 = vmul.f32 %v3417_v55, %v1247_v45  ;;  %v581_v3 = vpop.xlane.xlu2 %580  ;;  %v642_v62 = vsel %vm290_vm0, %v513_v54, 0.0  ;;  %v396_v45 = vsel %vm290_vm0, %v262_v9, 0.0  ;;  %v514_v46 = vmul.f32 %v261_v7, %v261_v7 }
  0xcc   : > { %v3479_v5 = vpop.eup %2815  ;;  %v3503_v61 = vadd.f32 1e-05, %v994_v47  ;;  %v3505_v2 = vmul.f32 0.03125, %v329_v43  ;;  %v3510_v12 = vadd.f32 1e-05, %v995_v50  ;;  %388 = vadd.xlane.f32.xlu1 %v387_v15  ;;  %v807_v27 = vmul.f32 0.03125, %v581_v3 }
  0xcd   : > { %v3488_v51 = vpop.eup %2817  ;;  %v332_v52 = vpop.xlane.xlu1 %331  ;;  %v1264_v56 = vmul.f32 %v3479_v5, %v3452_v20  ;;  %v1252_v24 = vsel %vm3491_vm8, %v3417_v55, %v1248_v53  ;;  %vm1270_vm11 = vweird.f32 %v3479_v5  ;;  %vm1259_vm12 = vweird.f32 %v3465_v29  ;;  %v263_v3 = vld [vmem:[%s3126_s9 + $0x120] sm:$0xff] }
  0xce   : > { %v1254_v18 = vmul.f32 %v3488_v51, %v3465_v29  ;;  %v3512_v57 = vmul.f32 0.03125, %v332_v52  ;;  %2819 = vrsqrt.f32 %v3503_v61  ;;  %v870_v23 = vmul.f32 %v3505_v2, %v3505_v2  ;;  %vm3554_vm14 = vmor %vm1269_vm10, %vm1270_vm11 }
  0xcf   : > { %v1265_v14 = vmul.f32 %v3479_v5, %v1264_v56  ;;  %2821 = vrsqrt.f32 %v3510_v12  ;;  %v1810_v11 = vmul.f32 %v1252_v24, %v1054_v39  ;;  %vm1260_vm13 = vweird.f32 %v3488_v51 }
  0xd0   : > { %v1255_v55 = vmul.f32 %v3488_v51, %v1254_v18  ;;  %v871_v26 = vmul.f32 %v3512_v57, %v3512_v57  ;;  %v933_v33 = vsub.f32 %v807_v27, %v870_v23  ;;  %v645_v53 = vsel %vm290_vm0, %v514_v46, 0.0  ;;  %vm3572_vm15 = vmor %vm1259_vm12, %vm1260_vm13 }
  0xd1   : > { %391 = vadd.xlane.f32.xlu2 %v390_v63  ;;  %v1266_v30 = vmul.f32 0.5, %v1265_v14  ;;  %v1874_v1 = vpack.c.bf16 %v1810_v11, %v1809_v49  ;;  %v1056_v15 = vsub.f32 %v3192_v31, %v3374_v8  ;;  %v264_v8 = vld [vmem:[%s3126_s9 + $0x128] sm:$0xff]  ;;  %v1055_v29 = vsub.f32 %v3195_v32, %v3400_v25 }
  0xd2   : > { %640 = vadd.xlane.f32.xlu0 %v639_v44  ;;  %v1256_v17 = vmul.f32 0.5, %v1255_v55  ;;  %v996_v43 = vmax.f32 %v933_v33, 0.0  ;;  %v402_v25 = vsel %vm290_vm0, %v264_v8, 0.0  ;;  %vm1279_vm1 = vweird.f32 %v3503_v61 }
  0xd3   : > { %v584_v28 = vpop.xlane.xlu0 %583  ;;  %v1267_v42 = vsub.f32 1.5, %v1266_v30  ;;  %v338_v48 = vpop.xlane.xlu2 %337  ;;  %vm1289_vm3 = vweird.f32 %v3510_v12 }
  0xd4   : > { %2669 = vmatmul.msk.bf16.gmra.mxu0 %vm290_vm0, %v1873_v0  ;;  %v808_v13 = vmul.f32 0.03125, %v584_v28  ;;  %643 = vadd.xlane.f32.xlu1 %v642_v62  ;;  %v3537_v34 = vpop.eup %2819  ;;  %v515_v0 = vmul.f32 %v262_v9, %v262_v9  ;;  %v1257_v38 = vsub.f32 1.5, %v1256_v17  ;;  %v3558_v56 = vadd.f32 1e-05, %v996_v43  ;;  %v265_v9 = vld [vmem:[%s3126_s9 + $0x130] sm:$0xff] }
  0xd5   : > { %v335_v35 = vpop.xlane.xlu1 %334  ;;  %v3539_v59 = vpop.eup %2821  ;;  %v1274_v52 = vmul.f32 %v3537_v34, %v3503_v61  ;;  %v1268_v20 = vmul.f32 %v3479_v5, %v1267_v42  ;;  %v3562_v63 = vmul.f32 0.03125, %v338_v48  ;;  %v399_v28 = vsel %vm290_vm0, %v263_v3, 0.0 }
  0xd6   : > { %v934_v40 = vsub.f32 %v808_v13, %v871_v26  ;;  %v648_v50 = vsel %vm290_vm0, %v515_v0, 0.0  ;;  %v1284_v36 = vmul.f32 %v3539_v59, %v3510_v12  ;;  %v3560_v58 = vmul.f32 0.03125, %v335_v35 }
  0xd7   : > { %v1258_v60 = vmul.f32 %v3488_v51, %v1257_v38  ;;  %v1275_v14 = vmul.f32 %v3537_v34, %v1274_v52  ;;  %v1272_v31 = vsel %vm3554_vm14, %v3479_v5, %v1268_v20  ;;  %2823 = vrsqrt.f32 %v3558_v56 }
  0xd8   : > { %v997_v47 = vmax.f32 %v934_v40, 0.0  ;;  %v1285_v39 = vmul.f32 %v3539_v59, %v1284_v36  ;;  %v872_v10 = vmul.f32 %v3560_v58, %v3560_v58  ;;  %v873_v7 = vmul.f32 %v3562_v63, %v3562_v63  ;;  %v2743_v40 = vld [vmem:[%s5196_s3 + $0x38] sm:$0xff] }
  0xd9   : > { %394 = vadd.xlane.f32.xlu2 %v393_v21  ;;  %v1262_v6 = vsel %vm3572_vm15, %v3488_v51, %v1258_v60  ;;  %v1812_v32 = vmul.f32 %v1272_v31, %v1056_v15  ;;  %v1276_v26 = vmul.f32 0.5, %v1275_v14  ;;  %vm1280_vm2 = vweird.f32 %v3537_v34  ;;  %2345 = vmatpush.bf16.msra.mxu1 %v2743_v40 }
  0xda   : > { %397 = vadd.xlane.f32.xlu0 %v396_v45  ;;  %v3576_v22 = vadd.f32 1e-05, %v997_v47  ;;  %v1286_v55 = vmul.f32 0.5, %v1285_v39  ;;  %v1811_v11 = vmul.f32 %v1262_v6, %v1055_v29  ;;  %v516_v35 = vmul.f32 %v263_v3, %v263_v3  ;;  %2747 = vmatpush.bf16.msra.mxu2 %v2743_v40  ;;  %vm3619_vm5 = vmor %vm1279_vm1, %vm1280_vm2 }
  0xdb   : > { %v587_v24 = vpop.xlane.xlu0 %586  ;;  %v341_v54 = vpop.xlane.xlu2 %340  ;;  %v1277_v51 = vsub.f32 1.5, %v1276_v26  ;;  %vm1290_vm4 = vweird.f32 %v3539_v59  ;;  %v517_v42 = vmul.f32 %v264_v8, %v264_v8  ;;  %v405_v38 = vsel %vm290_vm0, %v265_v9, 0.0 }
  0xdc   : > { %646 = vadd.xlane.f32.xlu1 %v645_v53  ;;  %v809_v23 = vmul.f32 0.03125, %v587_v24  ;;  %2825 = vrsqrt.f32 %v3576_v22  ;;  %v1875_v62 = vpack.c.bf16 %v1812_v32, %v1811_v11  ;;  %v1287_v30 = vsub.f32 1.5, %v1286_v55  ;;  %vm3630_vm6 = vmor %vm1289_vm3, %vm1290_vm4  ;;  %v266_v24 = vld [vmem:[%s3126_s9 + $0x138] sm:$0xff]  ;;  %v2742_v11 = vld [vmem:[%s5196_s3 + $0x30] sm:$0xff] }
  0xdd   : > { %v590_v27 = vpop.xlane.xlu1 %589  ;;  %v3597_v44 = vpop.eup %2823  ;;  %v3612_v0 = vmul.f32 0.03125, %v341_v54  ;;  %v1278_v48 = vmul.f32 %v3537_v34, %v1277_v51  ;;  %v651_v36 = vsel %vm290_vm0, %v516_v35, 0.0  ;;  %v654_v20 = vsel %vm290_vm0, %v517_v42, 0.0  ;;  %v3678_v51 = vld [vmem:[%s3126_s9 + $0x140] sm:$0xff]  ;;  %2346 = vmatpush.bf16.msra.mxu1 %v2742_v11 }
  0xde   : > { %v810_v5 = vmul.f32 0.03125, %v590_v27  ;;  %v935_v13 = vsub.f32 %v809_v23, %v872_v10  ;;  %v1294_v43 = vmul.f32 %v3597_v44, %v3558_v56  ;;  %v1057_v53 = vsub.f32 %v3205_v37, %v3439_v16  ;;  %2748 = vmatpush.bf16.msra.mxu2 %v2742_v11 }
  0xdf   : > { %v1058_v12 = vsub.f32 %v3213_v41, %v3449_v19  ;;  %v874_v18 = vmul.f32 %v3612_v0, %v3612_v0  ;;  %v1282_v16 = vsel %vm3619_vm5, %v3537_v34, %v1278_v48  ;;  %v408_v8 = vsel %vm290_vm0, %v266_v24, 0.0 }
  0xe0   : > { %v936_v21 = vsub.f32 %v810_v5, %v873_v7  ;;  %v1295_v3 = vmul.f32 %v3597_v44, %v1294_v43  ;;  %vm1299_vm7 = vweird.f32 %v3558_v56  ;;  %vm1300_vm8 = vweird.f32 %v3597_v44 }
  0xe1   : > { %649 = vadd.xlane.f32.xlu2 %v648_v50  ;;  %v1288_v50 = vmul.f32 %v3539_v59, %v1287_v30  ;;  %vm1309_vm9 = vweird.f32 %v3576_v22  ;;  %vm3692_vm11 = vmor %vm1299_vm7, %vm1300_vm8  ;;  %v411_v46 = vsel %vm290_vm0, %v3678_v51, 0.0 }
  0xe2   : > { %400 = vadd.xlane.f32.xlu0 %v399_v28  ;;  %v3599_v33 = vpop.eup %2825  ;;  %v999_v45 = vmax.f32 %v936_v21, 0.0  ;;  %v1296_v29 = vmul.f32 0.5, %v1295_v3  ;;  %v1813_v28 = vmul.f32 %v1282_v16, %v1057_v53  ;;  %v518_v21 = vmul.f32 %v265_v9, %v265_v9  ;;  %v2926_v53 = vld [vmem:[%s3126_s9 + $0x68] sm:$0xff]  ;;  %v2740_v3 = vld [vmem:[%s5196_s3 + $0x20] sm:$0xff] }
  0xe3   : > { %v344_v49 = vpop.xlane.xlu0 %343  ;;  %v1304_v47 = vmul.f32 %v3599_v33, %v3576_v22  ;;  %v596_v61 = vpop.xlane.xlu2 %595  ;;  %v1292_v14 = vsel %vm3630_vm6, %v3539_v59, %v1288_v50  ;;  %vm1310_vm10 = vweird.f32 %v3599_v33  ;;  %v1060_v22 = vsub.f32 %v2926_v53, %v3512_v57 }
  0xe4   : > { %2670 = vmatmul.msk.bf16.gmra.mxu0 %vm290_vm0, %v1874_v1  ;;  %403 = vadd.xlane.f32.xlu1 %v402_v25  ;;  %v998_v1 = vmax.f32 %v935_v13, 0.0  ;;  %v3639_v60 = vmul.f32 0.03125, %v344_v49  ;;  %v3644_v15 = vadd.f32 1e-05, %v999_v45  ;;  %v812_v31 = vmul.f32 0.03125, %v596_v61  ;;  %vm3707_vm12 = vmor %vm1309_vm9, %vm1310_vm10  ;;  %v2925_v61 = vld [vmem:[%s3126_s9 + $0x60] sm:$0xff] }
  0xe5   : > { %v593_v17 = vpop.xlane.xlu1 %592  ;;  %v1305_v39 = vmul.f32 %v3599_v33, %v1304_v47  ;;  %v1814_v10 = vmul.f32 %v1292_v14, %v1058_v12  ;;  %v1297_v6 = vsub.f32 1.5, %v1296_v29  ;;  %v519_v13 = vmul.f32 %v266_v24, %v266_v24 }
  0xe6   : > { %v3637_v4 = vadd.f32 1e-05, %v998_v1  ;;  %v811_v37 = vmul.f32 0.03125, %v593_v17  ;;  %v875_v27 = vmul.f32 %v3639_v60, %v3639_v60  ;;  %v657_v9 = vsel %vm290_vm0, %v518_v21, 0.0  ;;  %v2741_v1 = vld [vmem:[%s5196_s3 + $0x28] sm:$0xff] }
  0xe7   : > { %v1306_v34 = vmul.f32 0.5, %v1305_v39  ;;  %v1876_v5 = vpack.c.bf16 %v1814_v10, %v1813_v28  ;;  %v1298_v35 = vmul.f32 %v3597_v44, %v1297_v6  ;;  %v660_v40 = vsel %vm290_vm0, %v519_v13, 0.0  ;;  %2347 = vmatpush.bf16.msra.mxu1 %v2741_v1  ;;  %2749 = vmatpush.bf16.msra.mxu2 %v2741_v1  ;;  %v2739_v28 = vld [vmem:[%s5196_s3 + $0x18] sm:$0xff] }
  0xe8   : > { %2827 = vrsqrt.f32 %v3637_v4  ;;  %v937_v7 = vsub.f32 %v811_v37, %v874_v18  ;;  %v938_v59 = vsub.f32 %v812_v31, %v875_v27  ;;  %vm1319_vm13 = vweird.f32 %v3637_v4 }
  0xe9   : > { %652 = vadd.xlane.f32.xlu2 %v651_v36  ;;  %2829 = vrsqrt.f32 %v3644_v15  ;;  %v1307_v32 = vsub.f32 1.5, %v1306_v34  ;;  %v1302_v24 = vsel %vm3692_vm11, %v3597_v44, %v1298_v35  ;;  %vm1329_vm14 = vweird.f32 %v3644_v15 }
  0xea   : > { %655 = vadd.xlane.f32.xlu0 %v654_v20  ;;  %v1000_v25 = vmax.f32 %v937_v7, 0.0  ;;  %v1059_v20 = vsub.f32 %v2925_v61, %v3505_v2 }
  0xeb   : > { %v347_v41 = vpop.xlane.xlu0 %346  ;;  %v599_v23 = vpop.xlane.xlu2 %598  ;;  %2348 = vmatpush.bf16.msra.mxu1 %v2740_v3  ;;  %2750 = vmatpush.bf16.msra.mxu2 %v2740_v3 }
  0xec   : > { %406 = vadd.xlane.f32.xlu1 %v405_v38  ;;  %v3675_v30 = vmul.f32 0.03125, %v347_v41  ;;  %v3698_v45 = vadd.f32 1e-05, %v1000_v25  ;;  %v1308_v38 = vmul.f32 %v3599_v33, %v1307_v32  ;;  %v813_v52 = vmul.f32 0.03125, %v599_v23  ;;  %v268_v32 = vld [vmem:[%s3126_s9 + $0x148] sm:$0xff]  ;;  %v2738_v25 = vld [vmem:[%s5196_s3 + $0x10] sm:$0xff] }
  0xed   : > { %v350_v19 = vpop.xlane.xlu1 %349  ;;  %v1815_v14 = vmul.f32 %v1302_v24, %v1059_v20  ;;  %v414_v21 = vsel %vm290_vm0, %v268_v32, 0.0  ;;  %v2928_v20 = vld [vmem:[%s3126_s9 + $0x78] sm:$0xff] }
  0xee   : > { %v3661_v54 = vpop.eup %2827  ;;  %v876_v50 = vmul.f32 %v3675_v30, %v3675_v30  ;;  %v3715_v36 = vmul.f32 0.03125, %v350_v19  ;;  %2831 = vrsqrt.f32 %v3698_v45  ;;  %v1312_v2 = vsel %vm3707_vm12, %v3599_v33, %v1308_v38 }
  0xef   : > { %v3663_v55 = vpop.eup %2829  ;;  %v1314_v49 = vmul.f32 %v3661_v54, %v3637_v4  ;;  %v1816_v41 = vmul.f32 %v1312_v2, %v1060_v22  ;;  %vm1320_vm15 = vweird.f32 %v3661_v54  ;;  %2349 = vmatpush.bf16.msra.mxu1 %v2739_v28  ;;  %2751 = vmatpush.bf16.msra.mxu2 %v2739_v28  ;;  %v1062_v53 = vsub.f32 %v2928_v20, %v3562_v63  ;;  %v269_v63 = vld [vmem:[%s3126_s9 + $0x150] sm:$0xff] }
  0xf0   : > { %v1324_v43 = vmul.f32 %v3663_v55, %v3644_v15  ;;  %v877_v57 = vmul.f32 %v3715_v36, %v3715_v36  ;;  %v939_v39 = vsub.f32 %v813_v52, %v876_v50  ;;  %vm1330_vm1 = vweird.f32 %v3663_v55  ;;  %vm3772_vm2 = vmor %vm1319_vm13, %vm1320_vm15  ;;  %v2737_v15 = vld [vmem:[%s5196_s3 + $0x8] sm:$0xff]  ;;  %v2927_v52 = vld [vmem:[%s3126_s9 + $0x70] sm:$0xff] }
  0xf1   : > { %409 = vadd.xlane.f32.xlu2 %v408_v8  ;;  %v1315_v12 = vmul.f32 %v3661_v54, %v1314_v49  ;;  %v1877_v34 = vpack.c.bf16 %v1816_v41, %v1815_v14  ;;  %vm3784_vm3 = vmor %vm1329_vm14, %vm1330_vm1  ;;  %v1061_v61 = vsub.f32 %v2927_v52, %v3560_v58  ;;  %v2736_v58 = vld [vmem:[%s5196_s3] sm:$0xff]  ;;  %vm1339_vm5 = vweird.f32 %v3698_v45 }
  0xf2   : > { %658 = vadd.xlane.f32.xlu0 %v657_v9  ;;  %v1325_v18 = vmul.f32 %v3663_v55, %v1324_v43  ;;  %v1002_v29 = vmax.f32 %v939_v39, 0.0 }
  0xf3   : > { %v602_v17 = vpop.xlane.xlu0 %601  ;;  %v356_v47 = vpop.xlane.xlu2 %355  ;;  %v1316_v16 = vmul.f32 0.5, %v1315_v12  ;;  %2350 = vmatpush.bf16.msra.mxu1 %v2738_v25  ;;  %2752 = vmatpush.bf16.msra.mxu2 %v2738_v25 }
  0xf4   : > { %2671 = vmatmul.msk.bf16.gmra.mxu0 %vm290_vm0, %v1875_v62  ;;  %v1001_v62 = vmax.f32 %v938_v59, 0.0  ;;  %661 = vadd.xlane.f32.xlu1 %v660_v40  ;;  %v814_v37 = vmul.f32 0.03125, %v602_v17  ;;  %v1326_v31 = vmul.f32 0.5, %v1325_v18  ;;  %v3736_v8 = vpop.eup %2831  ;;  %v3761_v11 = vadd.f32 1e-05, %v1002_v29 }
  0xf5   : > { %v3668_v26 = vpop.xlane.xlu1 %352  ;;  %v1317_v10 = vsub.f32 1.5, %v1316_v16  ;;  %v1334_v6 = vmul.f32 %v3736_v8, %v3698_v45  ;;  %vm1340_vm6 = vweird.f32 %v3736_v8 }
  0xf6   : > { %v3711_v48 = vadd.f32 1e-05, %v1001_v62  ;;  %v940_v33 = vsub.f32 %v814_v37, %v877_v57  ;;  %v1327_v23 = vsub.f32 1.5, %v1326_v31  ;;  %v3747_v59 = vmul.f32 0.03125, %v3668_v26  ;;  %vm3853_vm8 = vmor %vm1339_vm5, %vm1340_vm6 }
  0xf7   : > { %v520_v26 = vmul.f32 %v3678_v51, %v3678_v51  ;;  %v521_v62 = vmul.f32 %v268_v32, %v268_v32  ;;  %v1318_v17 = vmul.f32 %v3661_v54, %v1317_v10  ;;  %2351 = vmatpush.bf16.msra.mxu1 %v2737_v15  ;;  %2753 = vmatpush.bf16.msra.mxu2 %v2737_v15  ;;  %v417_v37 = vsel %vm290_vm0, %v269_v63, 0.0 }
  0xf8   : > { %2833 = vrsqrt.f32 %v3711_v48  ;;  %v1003_v13 = vmax.f32 %v940_v33, 0.0  ;;  %v878_v1 = vmul.f32 %v3747_v59, %v3747_v59  ;;  %v1328_v43 = vmul.f32 %v3663_v55, %v1327_v23 }
  0xf9   : > { %412 = vadd.xlane.f32.xlu2 %v411_v46  ;;  %v663_v9 = vsel %vm290_vm0, %v520_v26, 0.0  ;;  %v666_v38 = vsel %vm290_vm0, %v521_v62, 0.0  ;;  %v1335_v46 = vmul.f32 %v3736_v8, %v1334_v6  ;;  %2835 = vrsqrt.f32 %v3761_v11 }
  0xfa   : > { %415 = vadd.xlane.f32.xlu0 %v414_v21  ;;  %v3792_v50 = vadd.f32 1e-05, %v1003_v13  ;;  %v1322_v18 = vsel %vm3772_vm2, %v3661_v54, %v1318_v17  ;;  %v1332_v24 = vsel %vm3784_vm3, %v3663_v55, %v1328_v43  ;;  %vm1349_vm4 = vweird.f32 %v3711_v48 }
  0xfb   : > { %v605_v27 = vpop.xlane.xlu0 %604  ;;  %v359_v44 = vpop.xlane.xlu2 %358  ;;  %v1336_v2 = vmul.f32 0.5, %v1335_v46  ;;  %v1817_v16 = vmul.f32 %v1322_v18, %v1061_v61  ;;  %v1818_v14 = vmul.f32 %v1332_v24, %v1062_v53  ;;  %2352 = vmatpush.bf16.msra.mxu1 %v2736_v58  ;;  %2754 = vmatpush.bf16.msra.mxu2 %v2736_v58  ;;  %v2929_v53 = vld [vmem:[%s3126_s9 + $0x80] sm:$0xff]  ;;  %v2930_v18 = vld [vmem:[%s3126_s9 + $0x88] sm:$0xff]  ;;  %vm1359_vm10 = vweird.f32 %v3761_v11 }
  0xfc   : > { %v815_v42 = vmul.f32 0.03125, %v605_v27  ;;  %664 = vadd.xlane.f32.xlu1 %v663_v9  ;;  %v3808_v39 = vmul.f32 0.03125, %v359_v44  ;;  %2837 = vrsqrt.f32 %v3792_v50  ;;  %v1064_v24 = vsub.f32 %v2930_v18, %v3639_v60 }
  0xfd   : > { %v608_v19 = vpop.xlane.xlu1 %607  ;;  %v1337_v44 = vsub.f32 1.5, %v1336_v2  ;;  %v1878_v6 = vpack.c.bf16 %v1818_v14, %v1817_v16  ;;  %v271_v16 = vld [vmem:[%s3126_s9 + $0x160] sm:$0xff]  ;;  %vm1369_vm12 = vweird.f32 %v3792_v50 }
  0xfe   : > { %v3742_v7 = vpop.eup %2833  ;;  %v941_v3 = vsub.f32 %v815_v42, %v878_v1  ;;  %v880_v33 = vmul.f32 %v3808_v39, %v3808_v39 }
  0xff   : > { %v1344_v49 = vmul.f32 %v3742_v7, %v3711_v48  ;;  %vm1350_vm7 = vweird.f32 %v3742_v7  ;;  %v1338_v17 = vmul.f32 %v3736_v8, %v1337_v44 }
 0x100   : > { %v1004_v27 = vmax.f32 %v941_v3, 0.0  ;;  %vm3865_vm9 = vmor %vm1349_vm4, %vm1350_vm7 }
 0x101   : > { %667 = vadd.xlane.f32.xlu2 %v666_v38  ;;  %v1345_v22 = vmul.f32 %v3742_v7, %v1344_v49 }
 0x102   : > { %418 = vadd.xlane.f32.xlu0 %v417_v37  ;;  %v3832_v26 = vadd.f32 1e-05, %v1004_v27 }
 0x103   : > { %v362_v35 = vpop.xlane.xlu0 %361  ;;  %v614_v12 = vpop.xlane.xlu2 %613  ;;  %v1346_v54 = vmul.f32 0.5, %v1345_v22  ;;  %v1063_v22 = vsub.f32 %v2929_v53, %v3612_v0 }
 0x104   : > { %2672 = vmatmul.msk.bf16.gmra.mxu0 %vm290_vm0, %v1876_v5  ;;  %v3753_v5 = vmul.f32 0.03125, %v356_v47  ;;  %v816_v47 = vmul.f32 0.03125, %v608_v19  ;;  %v3816_v19 = vpop.eup %2835  ;;  %v3818_v31 = vmul.f32 0.03125, %v362_v35  ;;  %v818_v21 = vmul.f32 0.03125, %v614_v12  ;;  %v270_v35 = vld [vmem:[%s3126_s9 + $0x158] sm:$0xff] }
 0x105   : > { %v611_v40 = vpop.xlane.xlu1 %610  ;;  %v1354_v23 = vmul.f32 %v3816_v19, %v3761_v11  ;;  %v3829_v25 = vpop.eup %2837  ;;  %v420_v1 = vsel %vm290_vm0, %v270_v35, 0.0  ;;  %v523_v42 = vmul.f32 %v270_v35, %v270_v35  ;;  %2839 = vrsqrt.f32 %v3832_v26 }
 0x106   : > { %v879_v56 = vmul.f32 %v3753_v5, %v3753_v5  ;;  %v817_v28 = vmul.f32 0.03125, %v611_v40  ;;  %v881_v13 = vmul.f32 %v3818_v31, %v3818_v31  ;;  %v522_v40 = vmul.f32 %v269_v63, %v269_v63  ;;  %421 = vadd.xlane.f32.xlu1 %v420_v1 }
 0x107   : > { %v1355_v43 = vmul.f32 %v3816_v19, %v1354_v23  ;;  %v1364_v38 = vmul.f32 %v3829_v25, %v3792_v50  ;;  %v672_v61 = vsel %vm290_vm0, %v523_v42, 0.0  ;;  %vm1360_vm11 = vweird.f32 %v3816_v19  ;;  %v2932_v50 = vld [vmem:[%s3126_s9 + $0x98] sm:$0xff] }
 0x108   : > { %v942_v57 = vsub.f32 %v816_v47, %v879_v56  ;;  %v943_v49 = vsub.f32 %v817_v28, %v880_v33  ;;  %v669_v56 = vsel %vm290_vm0, %v522_v40, 0.0  ;;  %v944_v15 = vsub.f32 %v818_v21, %v881_v13  ;;  %vm3926_vm14 = vmor %vm1359_vm10, %vm1360_vm11 }
 0x109   : > { %670 = vadd.xlane.f32.xlu2 %v669_v56  ;;  %v1356_v2 = vmul.f32 0.5, %v1355_v43  ;;  %v1365_v48 = vmul.f32 %v3829_v25, %v1364_v38  ;;  %vm1370_vm13 = vweird.f32 %v3829_v25  ;;  %v3916_v43 = vld [vmem:[%s5195_s2] ss:$0 sm:$0xff]  ;;  %v524_v56 = vmul.f32 %v271_v16, %v271_v16 }
 0x10a   : > { %v1005_v29 = vmax.f32 %v942_v57, 0.0  ;;  %673 = vadd.xlane.f32.xlu0 %v672_v61  ;;  %v1006_v12 = vmax.f32 %v943_v49, 0.0  ;;  %v1342_v57 = vsel %vm3853_vm8, %v3736_v8, %v1338_v17  ;;  %v1007_v58 = vmax.f32 %v944_v15, 0.0  ;;  %vm3945_vm15 = vmor %vm1369_vm12, %vm1370_vm13 }
 0x10b   : > { %v365_v41 = vpop.xlane.xlu0 %364  ;;  %v617_v32 = vpop.xlane.xlu2 %616  ;;  %v1366_v8 = vmul.f32 0.5, %v1365_v48  ;;  %v1819_v44 = vmul.f32 %v1342_v57, %v1063_v22  ;;  %v675_v11 = vsel %vm290_vm0, %v524_v56, 0.0  ;;  %vm1379_vm1 = vweird.f32 %v3832_v26 }
 0x10c   : > { %v3824_v10 = vmul.f32 0.03125, %v365_v41  ;;  %v3836_v62 = vadd.f32 1e-05, %v1005_v29  ;;  %v819_v51 = vmul.f32 0.03125, %v617_v32  ;;  %v3884_v14 = vpop.eup %2839  ;;  %v3886_v60 = vadd.f32 1e-05, %v1006_v12 }
 0x10d   : > { %v368_v55 = vpop.xlane.xlu1 %367  ;;  %v3891_v33 = vadd.f32 1e-05, %v1007_v58  ;;  %v1367_v17 = vsub.f32 1.5, %v1366_v8  ;;  %vm1380_vm2 = vweird.f32 %v3884_v14 }
 0x10e   : > { %v882_v9 = vmul.f32 %v3824_v10, %v3824_v10  ;;  %v3858_v52 = vmul.f32 0.03125, %v368_v55  ;;  %2841 = vrsqrt.f32 %v3836_v62  ;;  %v423_v55 = vsel %vm290_vm0, %v271_v16, 0.0  ;;  %vm3991_vm5 = vmor %vm1379_vm1, %vm1380_vm2 }
 0x10f   : > { %424 = vadd.xlane.f32.xlu1 %v423_v55  ;;  %2843 = vrsqrt.f32 %v3886_v60  ;;  %v1368_v53 = vmul.f32 %v3829_v25, %v1367_v17  ;;  %vm1389_vm3 = vweird.f32 %v3836_v62  ;;  %vm1399_vm7 = vweird.f32 %v3886_v60 }
 0x110   : > { %v945_v3 = vsub.f32 %v819_v51, %v882_v9  ;;  %v883_v0 = vmul.f32 %v3858_v52, %v3858_v52  ;;  %2845 = vrsqrt.f32 %v3891_v33  ;;  %vm1409_vm8 = vweird.f32 %v3891_v33 }
 0x112   : > { %v1008_v41 = vmax.f32 %v945_v3, 0.0  ;;  %v2931_v3 = vld [vmem:[%s3126_s9 + $0x90] sm:$0xff]  ;;  %676 = vadd.xlane.f32.xlu0 %v675_v11 }
 0x113   : > { %v620_v45 = vpop.xlane.xlu0 %619  ;;  %v1065_v18 = vsub.f32 %v2931_v3, %v3675_v30 }
 0x114   : > { %2673 = vmatmul.msk.bf16.gmra.mxu0 %vm290_vm0, %v1877_v34  ;;  %v1347_v34 = vsub.f32 1.5, %v1346_v54  ;;  %v820_v37 = vmul.f32 0.03125, %v620_v45  ;;  %v3889_v27 = vpop.eup %2841  ;;  %v3902_v21 = vadd.f32 1e-05, %v1008_v41 }
 0x115   : > { %v1384_v32 = vmul.f32 %v3889_v27, %v3836_v62  ;;  %v3937_v12 = vpop.eup %2843  ;;  %vm1390_vm4 = vweird.f32 %v3889_v27 }
 0x116   : > { %v1348_v4 = vmul.f32 %v3742_v7, %v1347_v34  ;;  %v946_v28 = vsub.f32 %v820_v37, %v883_v0  ;;  %v1374_v34 = vmul.f32 %v3884_v14, %v3832_v26  ;;  %2847 = vrsqrt.f32 %v3902_v21  ;;  %vm3999_vm6 = vmor %vm1389_vm3, %vm1390_vm4 }
 0x117   : > { %v371_v46 = vpop.xlane.xlu1 %370  ;;  %v1385_v15 = vmul.f32 %v3889_v27, %v1384_v32  ;;  %v1066_v0 = vsub.f32 %v2932_v50, %v3715_v36  ;;  %v1394_v55 = vmul.f32 %v3937_v12, %v3886_v60  ;;  %vm1419_vm11 = vweird.f32 %v3902_v21 }
 0x118   : > { %v1352_v63 = vsel %vm3865_vm9, %v3742_v7, %v1348_v4  ;;  %v1357_v7 = vsub.f32 1.5, %v1356_v2  ;;  %v3905_v40 = vmul.f32 0.03125, %v371_v46  ;;  %v1009_v9 = vmax.f32 %v946_v28, 0.0  ;;  %v272_v46 = vld [vmem:[%s3126_s9 + $0x168] sm:$0xff] }
 0x119   : > { %v1820_v29 = vmul.f32 %v1352_v63, %v1064_v24  ;;  %v1375_v42 = vmul.f32 %v3884_v14, %v1374_v34  ;;  %v426_v61 = vsel %vm290_vm0, %v272_v46, 0.0  ;;  %v525_v20 = vmul.f32 %v272_v46, %v272_v46  ;;  %v3956_v63 = vpop.eup %2845  ;;  %v2933_v24 = vld [vmem:[%s3126_s9 + $0xa0] sm:$0xff] }
 0x11a   : > { %v1358_v51 = vmul.f32 %v3816_v19, %v1357_v7  ;;  %v884_v45 = vmul.f32 %v3905_v40, %v3905_v40  ;;  %427 = vadd.xlane.f32.xlu2 %v426_v61  ;;  %v3949_v2 = vadd.f32 1e-05, %v1009_v9  ;;  %v1386_v37 = vmul.f32 0.5, %v1385_v15 }
 0x11b   : > { %v1879_v35 = vpack.c.bf16 %v1820_v29, %v1819_v44  ;;  %v678_v48 = vsel %vm290_vm0, %v525_v20, 0.0  ;;  %v1404_v28 = vmul.f32 %v3956_v63, %v3891_v33  ;;  %vm1400_vm9 = vweird.f32 %v3937_v12 }
 0x11c   : > { %v1362_v58 = vsel %vm3926_vm14, %v3816_v19, %v1358_v51  ;;  %679 = vadd.xlane.f32.xlu1 %v678_v48  ;;  %v1372_v19 = vsel %vm3945_vm15, %v3829_v25, %v1368_v53  ;;  %v3966_v29 = vpop.eup %2847  ;;  %2849 = vrsqrt.f32 %v3949_v2  ;;  %v273_v25 = vld [vmem:[%s3126_s9 + $0x170] sm:$0xff]  ;;  %v1395_v51 = vmul.f32 %v3937_v12, %v1394_v55  ;;  %vm4063_vm12 = vmor %vm1399_vm7, %vm1400_vm9 }
 0x11d   : > { %v1821_v36 = vmul.f32 %v1362_v58, %v1065_v18  ;;  %v429_v9 = vsel %vm290_vm0, %v273_v25, 0.0  ;;  %v1405_v46 = vmul.f32 %v3956_v63, %v1404_v28  ;;  %v1067_v48 = vsub.f32 %v2933_v24, %v3747_v59 }
 0x11e   : > { %v1396_v11 = vmul.f32 0.5, %v1395_v51  ;;  %vm1410_vm10 = vweird.f32 %v3956_v63  ;;  %vm1420_vm13 = vweird.f32 %v3966_v29  ;;  %vm1429_vm1 = vweird.f32 %v3949_v2 }
 0x11f   : > { %vm4080_vm14 = vmor %vm1409_vm8, %vm1410_vm10 }
 0x120   : > { %vm4096_vm15 = vmor %vm1419_vm11, %vm1420_vm13 }
 0x122   : > { %430 = vadd.xlane.f32.xlu2 %v429_v9  ;;  %v3985_v47 = vpop.eup %2849 }
 0x123   : > { %vm1430_vm2 = vweird.f32 %v3985_v47 }
 0x124   : > { %2674 = vmatmul.msk.bf16.gmra.mxu0 %vm290_vm0, %v1878_v6  ;;  %v374_v54 = vpop.xlane.xlu2 %373  ;;  %vm4145_vm3 = vmor %vm1429_vm1, %vm1430_vm2 }
 0x125   : > { %v3896_v23 = vmul.f32 0.03125, %v374_v54  ;;  %v623_v49 = vpop.xlane.xlu0 %622  ;;  %v1376_v54 = vmul.f32 0.5, %v1375_v42  ;;  %v1414_v42 = vmul.f32 %v3966_v29, %v3902_v21 }
 0x126   : > { %v821_v22 = vmul.f32 0.03125, %v623_v49  ;;  %v1387_v49 = vsub.f32 1.5, %v1386_v37  ;;  %v1406_v37 = vmul.f32 0.5, %v1405_v46 }
 0x127   : > { %v626_v6 = vpop.xlane.xlu1 %625  ;;  %v885_v38 = vmul.f32 %v3896_v23, %v3896_v23  ;;  %v1377_v17 = vsub.f32 1.5, %v1376_v54  ;;  %v1415_v26 = vmul.f32 %v3966_v29, %v1414_v42  ;;  %v1424_v54 = vmul.f32 %v3985_v47, %v3949_v2 }
 0x128   : > { %v822_v4 = vmul.f32 0.03125, %v626_v6  ;;  %v947_v44 = vsub.f32 %v821_v22, %v884_v45  ;;  %v1388_v45 = vmul.f32 %v3889_v27, %v1387_v49 }
 0x129   : > { %v1378_v20 = vmul.f32 %v3884_v14, %v1377_v17 }
 0x12a   : > { %v948_v30 = vsub.f32 %v822_v4, %v885_v38  ;;  %v1010_v4 = vmax.f32 %v947_v44, 0.0  ;;  %v1392_v55 = vsel %vm3999_vm6, %v3889_v27, %v1388_v45 }
 0x12c   : > { %v3910_v1 = vpop.xlane.xlu2 %376  ;;  %v1011_v32 = vmax.f32 %v948_v30, 0.0  ;;  %v4004_v3 = vadd.f32 1e-05, %v1010_v4  ;;  %v4013_v30 = vld [vmem:[%s3126_s9 + $0xb0] sm:$0xff] }
 0x12d   : > { %v380_v41 = vpop.xlane.xlu0 %379  ;;  %v1069_v50 = vsub.f32 %v4013_v30, %v3808_v39 }
 0x12e   : > { %v3983_v56 = vadd.f32 1e-05, %v1011_v32  ;;  %v4006_v18 = vmul.f32 0.03125, %v380_v41  ;;  %v1382_v41 = vsel %vm3991_vm5, %v3884_v14, %v1378_v20  ;;  %v1425_v14 = vmul.f32 %v3985_v47, %v1424_v54 }
 0x12f   : > { %v3971_v7 = vpop.xlane.xlu1 %628  ;;  %vm1439_vm6 = vweird.f32 %v4004_v3 }
 0x130   : > { %2851 = vrsqrt.f32 %v3983_v56  ;;  %v887_v44 = vmul.f32 %v4006_v18, %v4006_v18  ;;  %v823_v17 = vmul.f32 0.03125, %v3971_v7  ;;  %vm1449_vm4 = vweird.f32 %v3983_v56 }
 0x131   : > { %v2023_v13 = vpop.f32.mrf.mxu0  ;;  %2853 = vrsqrt.f32 %v4004_v3 }
 0x132   : > { %v2024_v57 = vadd.f32 %v3916_v43, %v2023_v13 }
 0x134   : > { %2675 = vmatmul.msk.bf16.gmra.mxu0 %vm290_vm0, %v1879_v35  ;;  %v2182_v34 = vmax.f32 %v2024_v57, 0.0  ;;  %v632_v13 = vpop.xlane.xlu2 %631  ;;  %v1822_v35 = vmul.f32 %v1372_v19, %v1066_v0  ;;  %v2934_v57 = vld [vmem:[%s3126_s9 + $0xa8] sm:$0xff]  ;;  %v1416_v19 = vmul.f32 0.5, %v1415_v26 }
 0x135   : > { %v3997_v53 = vpop.xlane.xlu0 %382  ;;  %v1068_v58 = vsub.f32 %v2934_v57, %v3753_v5  ;;  %v274_v5 = vld [vmem:[%s3126_s9 + $0x178] sm:$0xff]  ;;  %v275_v57 = vld [vmem:[%s3126_s9 + $0x180] sm:$0xff] }
 0x136   : > { %v1880_v61 = vpack.c.bf16 %v1822_v35, %v1821_v36  ;;  %v824_v36 = vmul.f32 0.03125, %v632_v13  ;;  %v432_v28 = vsel %vm290_vm0, %v274_v5, 0.0  ;;  %v1417_v51 = vsub.f32 1.5, %v1416_v19  ;;  %v4088_v19 = vld [vmem:[%s3126_s9 + $0xc8] sm:$0xff] }
 0x137   : > { %v4017_v0 = vpop.xlane.xlu1 %385  ;;  %433 = vadd.xlane.f32.xlu0 %v432_v28  ;;  %v1824_v7 = vmul.f32 %v1392_v55, %v1068_v58  ;;  %v2936_v58 = vld [vmem:[%s3126_s9 + $0xb8] sm:$0xff] }
 0x138   : > { %v950_v4 = vsub.f32 %v824_v36, %v887_v44  ;;  %v1418_v55 = vmul.f32 %v3966_v29, %v1417_v51  ;;  %v1072_v44 = vsub.f32 %v4088_v19, %v3858_v52  ;;  %v4128_v51 = vmul.f32 0.03125, %v3997_v53 }
 0x139   : > { %v2025_v16 = vpop.f32.mrf.mxu0 }
 0x13a   : > { %v2026_v8 = vadd.f32 %v3916_v43, %v2025_v16  ;;  %v4029_v16 = vmul.f32 0.03125, %v3910_v1  ;;  %v527_v1 = vmul.f32 %v274_v5, %v274_v5  ;;  %v2937_v5 = vld [vmem:[%s3126_s9 + $0xc0] sm:$0xff] }
 0x13c   : > { %v2183_v6 = vmax.f32 %v2026_v8, 0.0  ;;  %v4024_v59 = vpop.xlane.xlu2 %634  ;;  %v1397_v8 = vsub.f32 1.5, %v1396_v11  ;;  %v886_v49 = vmul.f32 %v4029_v16, %v4029_v16  ;;  %v684_v13 = vsel %vm290_vm0, %v527_v1, 0.0 }
 0x13d   : > { %v4049_v9 = vpop.xlane.xlu0 %637  ;;  %685 = vadd.xlane.f32.xlu2 %v684_v13  ;;  %v1422_v13 = vsel %vm4096_vm15, %v3966_v29, %v1418_v55  ;;  %v276_v29 = vld [vmem:[%s3126_s9 + $0x188] sm:$0xff] }
 0x13e   : > { %v2262_v38 = vpack.c.bf16 %v2183_v6, %v2182_v34  ;;  %v526_v34 = vmul.f32 %v273_v25, %v273_v25  ;;  %v1407_v6 = vsub.f32 1.5, %v1406_v37  ;;  %v4051_v25 = vpop.eup %2851  ;;  %v1398_v46 = vmul.f32 %v3937_v12, %v1397_v8 }
 0x13f   : > { %v4057_v15 = vpop.eup %2853  ;;  %v389_v11 = vpop.xlane.xlu1 %388  ;;  %v1444_v26 = vmul.f32 %v4051_v25, %v3983_v56  ;;  %v949_v24 = vsub.f32 %v823_v17, %v886_v49  ;;  %v1070_v37 = vsub.f32 %v2936_v58, %v3818_v31  ;;  %v825_v58 = vmul.f32 0.03125, %v4024_v59 }
 0x140   : > { %2353 = vmatmul.bf16.vlgmr.msra.gmra.mxu1 %v2262_v38  ;;  %v681_v35 = vsel %vm290_vm0, %v526_v34, 0.0  ;;  %v1823_v38 = vmul.f32 %v1382_v41, %v1067_v48  ;;  %v1408_v48 = vmul.f32 %v3956_v63, %v1407_v6  ;;  %v4071_v60 = vmul.f32 0.03125, %v389_v11 }
 0x141   : > { %v2028_v62 = vpop.f32.mrf.mxu0  ;;  %682 = vadd.xlane.f32.xlu1 %v681_v35  ;;  %v1071_v41 = vsub.f32 %v2937_v5, %v3824_v10  ;;  %v1434_v33 = vmul.f32 %v4057_v15, %v4004_v3  ;;  %v1013_v10 = vmax.f32 %v950_v4, 0.0  ;;  %v1402_v36 = vsel %vm4063_vm12, %v3937_v12, %v1398_v46 }
 0x142   : > { %v2029_v32 = vadd.f32 %v3916_v43, %v2028_v62  ;;  %v1881_v1 = vpack.c.bf16 %v1824_v7, %v1823_v38  ;;  %v435_v6 = vsel %vm290_vm0, %v275_v57, 0.0  ;;  %v1445_v21 = vmul.f32 %v4051_v25, %v1444_v26 }
 0x143   : > { %v890_v49 = vmul.f32 %v4071_v60, %v4071_v60  ;;  %436 = vadd.xlane.f32.xlu0 %v435_v6  ;;  %v4119_v12 = vmul.f32 %v1402_v36, %v1069_v50  ;;  %v4125_v35 = vadd.f32 1e-05, %v1013_v10  ;;  %v528_v4 = vmul.f32 %v275_v57, %v275_v57 }
 0x144   : > { %2676 = vmatmul.msk.bf16.gmra.mxu0 %vm290_vm0, %v1880_v61  ;;  %v1426_v61 = vmul.f32 0.5, %v1425_v14  ;;  %v2184_v20 = vmax.f32 %v2029_v32, 0.0  ;;  %v392_v22 = vpop.xlane.xlu2 %391  ;;  %v1012_v32 = vmax.f32 %v949_v24, 0.0  ;;  %v1446_v46 = vmul.f32 0.5, %v1445_v21 }
 0x145   : > { %v4105_v34 = vmul.f32 0.03125, %v392_v22  ;;  %v641_v17 = vpop.xlane.xlu0 %640  ;;  %v4139_v53 = vmul.f32 %v1422_v13, %v1071_v41  ;;  %v438_v22 = vsel %vm290_vm0, %v276_v29, 0.0  ;;  %v687_v11 = vsel %vm290_vm0, %v528_v4, 0.0 }
 0x146   : > { %v1427_v28 = vsub.f32 1.5, %v1426_v61  ;;  %v4137_v62 = vadd.f32 1e-05, %v1012_v32  ;;  %v529_v26 = vmul.f32 %v276_v29, %v276_v29  ;;  %2855 = vrsqrt.f32 %v4125_v35  ;;  %688 = vadd.xlane.f32.xlu2 %v687_v11 }
 0x147   : > { %v891_v30 = vmul.f32 %v4105_v34, %v4105_v34  ;;  %v644_v7 = vpop.xlane.xlu1 %643  ;;  %v1447_v31 = vsub.f32 1.5, %v1446_v46  ;;  %vm1450_vm5 = vweird.f32 %v4051_v25  ;;  %vm1440_vm7 = vweird.f32 %v4057_v15 }
 0x148   : > { %v1428_v38 = vmul.f32 %v3985_v47, %v1427_v28  ;;  %v690_v54 = vsel %vm290_vm0, %v529_v26, 0.0  ;;  %2857 = vrsqrt.f32 %v4137_v62  ;;  %v4168_v28 = vmul.f32 0.03125, %v4017_v0  ;;  %vm4197_vm8 = vmor %vm1449_vm4, %vm1450_vm5 }
 0x149   : > { %v2030_v27 = vpop.f32.mrf.mxu0  ;;  %439 = vadd.xlane.f32.xlu1 %v438_v22  ;;  %v1448_v4 = vmul.f32 %v4051_v25, %v1447_v31  ;;  %vm4210_vm9 = vmor %vm1439_vm6, %vm1440_vm7  ;;  %v826_v22 = vmul.f32 0.03125, %v4049_v9  ;;  %vm1469_vm7 = vweird.f32 %v4125_v35 }
 0x14a   : > { %v2031_v42 = vadd.f32 %v3916_v43, %v2030_v27  ;;  %v1412_v27 = vsel %vm4080_vm14, %v3956_v63, %v1408_v48  ;;  %v1435_v63 = vmul.f32 %v4057_v15, %v1434_v33  ;;  %v888_v48 = vmul.f32 %v4128_v51, %v4128_v51 }
 0x14b   : > { %v4132_v39 = vmul.f32 %v1412_v27, %v1070_v37  ;;  %691 = vadd.xlane.f32.xlu0 %v690_v54  ;;  %v889_v19 = vmul.f32 %v4168_v28, %v4168_v28 }
 0x14c   : > { %v2185_v45 = vmax.f32 %v2031_v42, 0.0  ;;  %v827_v42 = vmul.f32 0.03125, %v641_v17  ;;  %v395_v50 = vpop.xlane.xlu2 %394  ;;  %v1436_v24 = vmul.f32 0.5, %v1435_v63  ;;  %v4176_v17 = vpop.eup %2855 }
 0x14d   : > { %v4160_v55 = vmul.f32 0.03125, %v395_v50  ;;  %v398_v10 = vpop.xlane.xlu0 %397  ;;  %v1882_v3 = vpack.c.bf16 %v4132_v39, %v4119_v12  ;;  %v278_v12 = vld [vmem:[%s3126_s9 + $0x198] sm:$0xff] }
 0x14e   : > { %v2263_v8 = vpack.c.bf16 %v2185_v45, %v2184_v20  ;;  %v953_v61 = vsub.f32 %v827_v42, %v890_v49  ;;  %v828_v45 = vmul.f32 0.03125, %v644_v7  ;;  %v1437_v36 = vsub.f32 1.5, %v1436_v24  ;;  %v277_v49 = vld [vmem:[%s3126_s9 + $0x190] sm:$0xff] }
 0x14f   : > { %v647_v27 = vpop.xlane.xlu1 %646  ;;  %v892_v0 = vmul.f32 %v4160_v55, %v4160_v55  ;;  %v441_v29 = vsel %vm290_vm0, %v277_v49, 0.0  ;;  %v1464_v20 = vmul.f32 %v4176_v17, %v4125_v35  ;;  %v2939_v24 = vld [vmem:[%s3126_s9 + $0xd0] sm:$0xff] }
 0x150   : > { %2358 = vmatmul.bf16.gmra.mxu1 %v2263_v8  ;;  %v1016_v57 = vmax.f32 %v953_v61, 0.0  ;;  %v954_v37 = vsub.f32 %v828_v45, %v891_v30  ;;  %v1432_v8 = vsel %vm4145_vm3, %v3985_v47, %v1428_v38  ;;  %v951_v47 = vsub.f32 %v825_v58, %v888_v48  ;;  %v4186_v38 = vpop.eup %2857  ;;  %v2940_v58 = vld [vmem:[%s3126_s9 + $0xd8] sm:$0xff] }
 0x151   : > { %v2033_v14 = vpop.f32.mrf.mxu0  ;;  %v4191_v30 = vmul.f32 %v1432_v8, %v1072_v44  ;;  %v829_v7 = vmul.f32 0.03125, %v647_v27  ;;  %v1438_v61 = vmul.f32 %v4057_v15, %v1437_v36  ;;  %442 = vadd.xlane.f32.xlu1 %v441_v29  ;;  %v1073_v48 = vsub.f32 %v2939_v24, %v3905_v40 }
 0x152   : > { %v2034_v2 = vadd.f32 %v3916_v43, %v2033_v14  ;;  %v4158_v41 = vadd.f32 1e-05, %v1016_v57  ;;  %v1017_v33 = vmax.f32 %v954_v37, 0.0  ;;  %v1014_v52 = vmax.f32 %v951_v47, 0.0 }
 0x153   : > { %v955_v26 = vsub.f32 %v829_v7, %v892_v0  ;;  %v1454_v57 = vmul.f32 %v4186_v38, %v4137_v62  ;;  %v1074_v37 = vsub.f32 %v2940_v58, %v3896_v23  ;;  %v1883_v9 = vpack.c.bf16 %v4191_v30, %v4139_v53 }
 0x154   : > { %2677 = vmatmul.msk.bf16.gmra.mxu0 %vm290_vm0, %v1881_v1  ;;  %2859 = vrsqrt.f32 %v4158_v41  ;;  %v4171_v1 = vmul.f32 0.03125, %v398_v10  ;;  %v2186_v6 = vmax.f32 %v2034_v2, 0.0  ;;  %v4173_v14 = vadd.f32 1e-05, %v1017_v33  ;;  %v650_v32 = vpop.xlane.xlu2 %649 }
 0x155   : > { %v830_v63 = vmul.f32 0.03125, %v650_v32  ;;  %v401_v8 = vpop.xlane.xlu0 %400  ;;  %v4233_v31 = vadd.f32 1e-05, %v1014_v52  ;;  %v1442_v39 = vsel %vm4210_vm9, %v4057_v15, %v1438_v61  ;;  %v1452_v23 = vsel %vm4197_vm8, %v4051_v25, %v1448_v4 }
 0x156   : > { %v893_v13 = vmul.f32 %v4171_v1, %v4171_v1  ;;  %2861 = vrsqrt.f32 %v4173_v14  ;;  %v1465_v33 = vmul.f32 %v4176_v17, %v1464_v20  ;;  %v952_v10 = vsub.f32 %v826_v22, %v889_v19 }
 0x157   : > { %v4251_v15 = vmul.f32 0.03125, %v401_v8  ;;  %v444_v27 = vsel %vm290_vm0, %v278_v12, 0.0  ;;  %v4265_v29 = vmul.f32 %v1442_v39, %v1073_v48  ;;  %vm1499_vm10 = vweird.f32 %v4158_v41 }
 0x158   : > { %v956_v50 = vsub.f32 %v830_v63, %v893_v13  ;;  %445 = vadd.xlane.f32.xlu2 %v444_v27  ;;  %v4258_v63 = vmul.f32 %v1452_v23, %v1074_v37  ;;  %v1015_v46 = vmax.f32 %v952_v10, 0.0  ;;  %v279_v37 = vld [vmem:[%s3126_s9 + $0x1a0] sm:$0xff]  ;;  %vm1509_vm11 = vweird.f32 %v4173_v14 }
 0x159   : > { %v2035_v5 = vpop.f32.mrf.mxu0  ;;  %v894_v19 = vmul.f32 %v4251_v15, %v4251_v15  ;;  %v447_v39 = vsel %vm290_vm0, %v279_v37, 0.0  ;;  %vm1459_vm8 = vweird.f32 %v4137_v62  ;;  %vm1470_vm9 = vweird.f32 %v4176_v17 }
 0x15a   : > { %v2036_v59 = vadd.f32 %v3916_v43, %v2035_v5  ;;  %v4204_v44 = vpop.eup %2859  ;;  %v1019_v11 = vmax.f32 %v956_v50, 0.0  ;;  %v1018_v5 = vmax.f32 %v955_v26, 0.0  ;;  %v4262_v50 = vmul.f32 0.5, %v1465_v33 }
 0x15b   : > { %v1494_v2 = vmul.f32 %v4204_v44, %v4158_v41  ;;  %vm1500_vm12 = vweird.f32 %v4204_v44  ;;  %v1884_v30 = vpack.c.bf16 %v4258_v63, %v4265_v29 }
 0x15c   : > { %v2187_v21 = vmax.f32 %v2036_v59, 0.0  ;;  %v4229_v54 = vadd.f32 1e-05, %v1019_v11  ;;  %v4231_v40 = vpop.eup %2861  ;;  %v530_v59 = vmul.f32 %v277_v49, %v277_v49  ;;  %v4249_v32 = vadd.f32 1e-05, %v1018_v5  ;;  %v653_v24 = vpop.xlane.xlu2 %652  ;;  %v4286_v5 = vld [vmem:[%s3126_s9 + $0x100] sm:$0xff]  ;;  %vm4313_vm2 = vmor %vm1499_vm10, %vm1500_vm12 }
 0x15d   : > { %v1504_v36 = vmul.f32 %v4231_v40, %v4173_v14  ;;  %v1495_v47 = vmul.f32 %v4204_v44, %v1494_v2  ;;  %v531_v49 = vmul.f32 %v278_v12, %v278_v12  ;;  %v831_v2 = vmul.f32 0.03125, %v653_v24  ;;  %v656_v58 = vpop.xlane.xlu0 %655 }
 0x15e   : > { %v2264_v42 = vpack.c.bf16 %v2187_v21, %v2186_v6  ;;  %2863 = vrsqrt.f32 %v4229_v54  ;;  %v404_v6 = vpop.xlane.xlu1 %403  ;;  %v1455_v21 = vmul.f32 %v4186_v38, %v1454_v57  ;;  %v693_v0 = vsel %vm290_vm0, %v530_v59, 0.0 }
 0x15f   : > { %v1505_v25 = vmul.f32 %v4231_v40, %v1504_v36  ;;  %2865 = vrsqrt.f32 %v4249_v32  ;;  %694 = vadd.xlane.f32.xlu0 %v693_v0  ;;  %v696_v4 = vsel %vm290_vm0, %v531_v49, 0.0  ;;  %v1496_v52 = vmul.f32 0.5, %v1495_v47 }
 0x160   : > { %2363 = vmatmul.bf16.gmra.mxu1 %v2264_v42  ;;  %v4260_v42 = vmul.f32 0.03125, %v404_v6  ;;  %2867 = vrsqrt.f32 %v4233_v31  ;;  %697 = vadd.xlane.f32.xlu1 %v696_v4  ;;  %v4273_v20 = vmul.f32 0.5, %v1455_v21  ;;  %v1079_v8 = vsub.f32 %v4286_v5, %v4071_v60 }
 0x161   : > { %v2038_v45 = vpop.f32.mrf.mxu0  ;;  %v1506_v11 = vmul.f32 0.5, %v1505_v25  ;;  %v832_v12 = vmul.f32 0.03125, %v656_v58  ;;  %v1497_v59 = vsub.f32 1.5, %v1496_v52  ;;  %v957_v36 = vsub.f32 %v831_v2, %v894_v19  ;;  %448 = vadd.xlane.f32.xlu2 %v447_v39  ;;  %v2944_v39 = vld [vmem:[%s3126_s9 + $0x118] sm:$0xff] }
 0x162   : > { %v2039_v13 = vadd.f32 %v3916_v43, %v2038_v45  ;;  %v4276_v45 = vld [vmem:[%s3126_s9 + $0x108] sm:$0xff]  ;;  %v895_v26 = vmul.f32 %v4260_v42, %v4260_v42  ;;  %vm1510_vm13 = vweird.f32 %v4231_v40  ;;  %vm1529_vm14 = vweird.f32 %v4229_v54 }
 0x163   : > { %v1080_v22 = vsub.f32 %v4276_v45, %v4105_v34  ;;  %v1507_v21 = vsub.f32 1.5, %v1506_v11  ;;  %v1020_v49 = vmax.f32 %v957_v36, 0.0  ;;  %vm1519_vm15 = vweird.f32 %v4249_v32  ;;  %vm4329_vm4 = vmor %vm1509_vm11, %vm1510_vm13 }
 0x164   : > { %2678 = vmatmul.msk.bf16.gmra.mxu0 %vm290_vm0, %v1882_v3  ;;  %v4271_v56 = vpop.eup %2863  ;;  %v2188_v48 = vmax.f32 %v2039_v13, 0.0  ;;  %v958_v25 = vsub.f32 %v832_v12, %v895_v26  ;;  %v532_v58 = vmul.f32 %v279_v37, %v279_v37  ;;  %v410_v12 = vpop.xlane.xlu2 %409  ;;  %vm1460_vm10 = vweird.f32 %v4186_v38  ;;  %vm4430_vm13 = vmor %vm1469_vm7, %vm1470_vm9 }
 0x165   : > { %v1524_v3 = vmul.f32 %v4271_v56, %v4229_v54  ;;  %v4292_v23 = vpop.eup %2865  ;;  %vm1530_vm1 = vweird.f32 %v4271_v56  ;;  %v4307_v19 = vadd.f32 1e-05, %v1020_v49  ;;  %v1508_v26 = vmul.f32 %v4231_v40, %v1507_v21 }
 0x166   : > { %v4295_v6 = vpop.eup %2867  ;;  %v1514_v47 = vmul.f32 %v4292_v23, %v4249_v32  ;;  %v407_v0 = vpop.xlane.xlu1 %406  ;;  %v1021_v4 = vmax.f32 %v958_v25, 0.0  ;;  %vm1520_vm3 = vweird.f32 %v4292_v23  ;;  %vm4345_vm5 = vmor %vm1529_vm14, %vm1530_vm1  ;;  %v4360_v54 = vmul.f32 0.03125, %v410_v12 }
 0x167   : > { %v1525_v10 = vmul.f32 %v4271_v56, %v1524_v3  ;;  %v2943_v3 = vld [vmem:[%s3126_s9 + $0x110] sm:$0xff]  ;;  %2869 = vrsqrt.f32 %v4307_v19  ;;  %vm4355_vm6 = vmor %vm1519_vm15, %vm1520_vm3  ;;  %v1512_v36 = vsel %vm4329_vm4, %v4231_v40, %v1508_v26  ;;  %vm1539_vm11 = vweird.f32 %v4307_v19 }
 0x168   : > { %v1081_v2 = vsub.f32 %v2943_v3, %v4160_v55  ;;  %v1082_v55 = vsub.f32 %v2944_v39, %v4171_v1  ;;  %v897_v25 = vmul.f32 %v4360_v54, %v4360_v54  ;;  %v1457_v39 = vsub.f32 1.5, %v4273_v20 }
 0x169   : > { %v2040_v7 = vpop.f32.mrf.mxu0  ;;  %v1526_v27 = vmul.f32 0.5, %v1525_v10  ;;  %v1474_v29 = vmul.f32 %v4295_v6, %v4233_v31  ;;  %vm1479_vm4 = vweird.f32 %v4233_v31 }
 0x16a   : > { %v2041_v61 = vadd.f32 %v3916_v43, %v2040_v7  ;;  %v1515_v7 = vmul.f32 %v4292_v23, %v1514_v47 }
 0x16b   : > { %v1527_v52 = vsub.f32 1.5, %v1526_v27 }
 0x16c   : > { %v2189_v57 = vmax.f32 %v2041_v61, 0.0  ;;  %v1498_v61 = vmul.f32 %v4204_v44, %v1497_v59  ;;  %v1516_v24 = vmul.f32 0.5, %v1515_v7  ;;  %v1467_v7 = vsub.f32 1.5, %v4262_v50 }
 0x16d   : > { %v1528_v37 = vmul.f32 %v4271_v56, %v1527_v52 }
 0x16e   : > { %v2265_v33 = vpack.c.bf16 %v2189_v57, %v2188_v48  ;;  %v4319_v48 = vadd.f32 1e-05, %v1021_v4  ;;  %v4321_v57 = vadd.f32 1e-05, %v1015_v46  ;;  %v280_v46 = vld [vmem:[%s3126_s9 + $0x1a8] sm:$0xff]  ;;  %v1517_v59 = vsub.f32 1.5, %v1516_v24 }
 0x16f   : > { %v450_v53 = vsel %vm290_vm0, %v280_v46, 0.0  ;;  %v533_v1 = vmul.f32 %v280_v46, %v280_v46  ;;  %v1502_v32 = vsel %vm4313_vm2, %v4204_v44, %v1498_v61  ;;  %v1532_v27 = vsel %vm4345_vm5, %v4271_v56, %v1528_v37  ;;  %v4394_v56 = vpop.eup %2869  ;;  %v662_v61 = vpop.xlane.xlu1 %661  ;;  %v281_v24 = vld [vmem:[%s3126_s9 + $0x1b0] sm:$0xff]  ;;  %vm4456_vm2 = vmor %vm1459_vm8, %vm1460_vm10 }
 0x170   : > { %2368 = vmatmul.bf16.gmra.mxu1 %v2265_v33  ;;  %2871 = vrsqrt.f32 %v4319_v48  ;;  %451 = vadd.xlane.f32.xlu0 %v450_v53  ;;  %v4364_v33 = vmul.f32 0.03125, %v407_v0  ;;  %v1518_v10 = vmul.f32 %v4292_v23, %v1517_v59  ;;  %v1838_v40 = vmul.f32 %v1532_v27, %v1082_v55 }
 0x171   : > { %v2043_v13 = vpop.f32.mrf.mxu0  ;;  %v702_v47 = vsel %vm290_vm0, %v533_v1, 0.0  ;;  %v4387_v0 = vmul.f32 %v1502_v32, %v1079_v8  ;;  %2873 = vrsqrt.f32 %v4321_v57  ;;  %v1534_v60 = vmul.f32 %v4394_v56, %v4307_v19  ;;  %v2946_v19 = vld [vmem:[%s3126_s9 + $0x128] sm:$0xff] }
 0x172   : > { %v2044_v21 = vadd.f32 %v3916_v43, %v2043_v13  ;;  %703 = vadd.xlane.f32.xlu2 %v702_v47  ;;  %v1522_v44 = vsel %vm4355_vm6, %v4292_v23, %v1518_v10  ;;  %v4392_v13 = vmul.f32 %v1512_v36, %v1080_v22  ;;  %v896_v34 = vmul.f32 %v4364_v33, %v4364_v33  ;;  %v659_v22 = vpop.xlane.xlu0 %658  ;;  %v413_v36 = vpop.xlane.xlu2 %412 }
 0x173   : > { %v1837_v4 = vmul.f32 %v1522_v44, %v1081_v2  ;;  %v834_v45 = vmul.f32 0.03125, %v662_v61  ;;  %v1535_v3 = vmul.f32 %v4394_v56, %v1534_v60  ;;  %v833_v41 = vmul.f32 0.03125, %v659_v22 }
 0x174   : > { %2679 = vmatmul.msk.bf16.gmra.mxu0 %vm290_vm0, %v1883_v9  ;;  %v699_v9 = vsel %vm290_vm0, %v532_v58, 0.0  ;;  %v1887_v5 = vpack.c.bf16 %v4392_v13, %v4387_v0  ;;  %v2190_v50 = vmax.f32 %v2044_v21, 0.0  ;;  %v453_v46 = vsel %vm290_vm0, %v281_v24, 0.0 }
 0x175   : > { %700 = vadd.xlane.f32.xlu1 %v699_v9  ;;  %v1888_v26 = vpack.c.bf16 %v1838_v40, %v1837_v4  ;;  %v960_v2 = vsub.f32 %v834_v45, %v897_v25  ;;  %v1536_v55 = vmul.f32 0.5, %v1535_v3  ;;  %v959_v59 = vsub.f32 %v833_v41, %v896_v34  ;;  %v2945_v25 = vld [vmem:[%s3126_s9 + $0x120] sm:$0xff] }
 0x176   : > { %v4399_v52 = vpop.eup %2871  ;;  %vm1540_vm12 = vweird.f32 %v4394_v56  ;;  %v1468_v9 = vmul.f32 %v4176_v17, %v1467_v7  ;;  %vm1549_vm14 = vweird.f32 %v4319_v48  ;;  %v1458_v47 = vmul.f32 %v4186_v38, %v1457_v39  ;;  %v282_v7 = vld [vmem:[%s3126_s9 + $0x1b8] sm:$0xff] }
 0x177   : > { %v1544_v11 = vmul.f32 %v4399_v52, %v4319_v48  ;;  %2684 = vmatmul.msk.bf16.vlgmr.msra.gmra.mxu3 %vm290_vm0, %v1888_v26  ;;  %v1023_v14 = vmax.f32 %v960_v2, 0.0  ;;  %v4417_v53 = vpop.eup %2873  ;;  %v1537_v10 = vsub.f32 1.5, %v1536_v55  ;;  %v1022_v32 = vmax.f32 %v959_v59, 0.0  ;;  %vm4445_vm1 = vmor %vm1539_vm11, %vm1540_vm12  ;;  %v665_v59 = vpop.xlane.xlu1 %664 }
 0x178   : > { %454 = vadd.xlane.f32.xlu0 %v453_v46  ;;  %vm1550_vm15 = vweird.f32 %v4399_v52  ;;  %v1083_v27 = vsub.f32 %v2945_v25, %v4251_v15  ;;  %v1484_v15 = vmul.f32 %v4417_v53, %v4321_v57  ;;  %v1084_v40 = vsub.f32 %v2946_v19, %v4260_v42 }
 0x179   : > { %v2045_v49 = vpop.f32.mrf.mxu0  ;;  %v1545_v12 = vmul.f32 %v4399_v52, %v1544_v11  ;;  %v4424_v20 = vadd.f32 1e-05, %v1023_v14  ;;  %v1538_v4 = vmul.f32 %v4394_v56, %v1537_v10  ;;  %vm4471_vm3 = vmor %vm1549_vm14, %vm1550_vm15  ;;  %v4476_v61 = vmul.f32 0.03125, %v413_v36  ;;  %v2948_v11 = vld [vmem:[%s3126_s9 + $0xe8] sm:$0xff] }
 0x17a   : > { %v2046_v23 = vadd.f32 %v3916_v43, %v2045_v49  ;;  %v4450_v49 = vadd.f32 1e-05, %v1022_v32  ;;  %v456_v60 = vsel %vm290_vm0, %v282_v7, 0.0  ;;  %v535_v42 = vmul.f32 %v282_v7, %v282_v7  ;;  %v416_v39 = vpop.xlane.xlu0 %415  ;;  %v668_v10 = vpop.xlane.xlu2 %667 }
 0x17b   : > { %v1546_v1 = vmul.f32 0.5, %v1545_v12  ;;  %2875 = vrsqrt.f32 %v4424_v20  ;;  %v1475_v34 = vmul.f32 %v4295_v6, %v1474_v29  ;;  %v1542_v48 = vsel %vm4445_vm1, %v4394_v56, %v1538_v4 }
 0x17c   : > { %v2191_v8 = vmax.f32 %v2046_v23, 0.0  ;;  %v534_v23 = vmul.f32 %v281_v24, %v281_v24  ;;  %2877 = vrsqrt.f32 %v4450_v49  ;;  %v1076_v26 = vsub.f32 %v2948_v11, %v4006_v18 }
 0x17d   : > { %v1547_v21 = vsub.f32 1.5, %v1546_v1  ;;  %457 = vadd.xlane.f32.xlu1 %v456_v60  ;;  %v708_v24 = vsel %vm290_vm0, %v535_v42, 0.0  ;;  %v1839_v3 = vmul.f32 %v1542_v48, %v1083_v27  ;;  %v1462_v41 = vsel %vm4456_vm2, %v4186_v38, %v1458_v47 }
 0x17e   : > { %v2266_v58 = vpack.c.bf16 %v2191_v8, %v2190_v50  ;;  %v705_v45 = vsel %vm290_vm0, %v534_v23, 0.0  ;;  %v2947_v50 = vld [vmem:[%s3126_s9 + $0xe0] sm:$0xff]  ;;  %v1472_v56 = vsel %vm4430_vm13, %v4176_v17, %v1468_v9  ;;  %v1485_v46 = vmul.f32 %v4417_v53, %v1484_v15 }
 0x17f   : > { %v1548_v22 = vmul.f32 %v4399_v52, %v1547_v21  ;;  %v1075_v8 = vsub.f32 %v2947_v50, %v4029_v16  ;;  %706 = vadd.xlane.f32.xlu2 %v705_v45  ;;  %v898_v12 = vmul.f32 %v4476_v61, %v4476_v61  ;;  %v1476_v38 = vmul.f32 0.5, %v1475_v34  ;;  %v283_v21 = vld [vmem:[%s3126_s9 + $0x1c0] sm:$0xff] }
 0x180   : > { %2373 = vmatmul.bf16.gmra.mxu1 %v2266_v58  ;;  %709 = vadd.xlane.f32.xlu0 %v708_v24  ;;  %v1832_v9 = vmul.f32 %v1472_v56, %v1076_v26  ;;  %v835_v32 = vmul.f32 0.03125, %v665_v59  ;;  %vm1489_vm5 = vweird.f32 %v4321_v57  ;;  %v1486_v47 = vmul.f32 0.5, %v1485_v46 }
 0x181   : > { %v2048_v37 = vpop.f32.mrf.mxu0  ;;  %v1552_v16 = vsel %vm4471_vm3, %v4399_v52, %v1548_v22  ;;  %v4500_v18 = vpop.eup %2875  ;;  %v4509_v52 = vmul.f32 0.03125, %v416_v39  ;;  %v1831_v1 = vmul.f32 %v1462_v41, %v1075_v8  ;;  %v836_v27 = vmul.f32 0.03125, %v668_v10  ;;  %v2949_v8 = vld [vmem:[%s3126_s9 + $0x130] sm:$0xff]  ;;  %v2950_v41 = vld [vmem:[%s3126_s9 + $0x138] sm:$0xff] }
 0x182   : > { %v2049_v2 = vadd.f32 %v3916_v43, %v2048_v37  ;;  %v1840_v55 = vmul.f32 %v1552_v16, %v1084_v40  ;;  %v1564_v14 = vmul.f32 %v4500_v18, %v4424_v20  ;;  %v961_v35 = vsub.f32 %v835_v32, %v898_v12  ;;  %v419_v24 = vpop.xlane.xlu0 %418  ;;  %v284_v16 = vld [vmem:[%s3126_s9 + $0x1c8] sm:$0xff] }
 0x183   : > { %v899_v25 = vmul.f32 %v4509_v52, %v4509_v52  ;;  %v459_v40 = vsel %vm290_vm0, %v283_v21, 0.0  ;;  %v1477_v7 = vsub.f32 1.5, %v1476_v38  ;;  %vm1480_vm6 = vweird.f32 %v4295_v6 }
 0x184   : > { %2680 = vmatmul.msk.bf16.gmra.mxu0 %vm290_vm0, %v1884_v30  ;;  %v4511_v30 = vpop.eup %2877  ;;  %v1889_v37 = vpack.c.bf16 %v1840_v55, %v1839_v3  ;;  %v2192_v36 = vmax.f32 %v2049_v2, 0.0  ;;  %v1565_v29 = vmul.f32 %v4500_v18, %v1564_v14  ;;  %v1024_v4 = vmax.f32 %v961_v35, 0.0  ;;  %vm4559_vm14 = vmor %vm1479_vm4, %vm1480_vm6 }
 0x185   : > { %v962_v23 = vsub.f32 %v836_v27, %v899_v25  ;;  %460 = vadd.xlane.f32.xlu1 %v459_v40  ;;  %vm1559_vm7 = vweird.f32 %v4450_v49  ;;  %vm1560_vm8 = vweird.f32 %v4511_v30  ;;  %vm1569_vm9 = vweird.f32 %v4424_v20  ;;  %v671_v27 = vpop.xlane.xlu2 %670 }
 0x186   : > { %v1566_v15 = vmul.f32 0.5, %v1565_v29  ;;  %vm1570_vm10 = vweird.f32 %v4500_v18  ;;  %v4528_v45 = vadd.f32 1e-05, %v1024_v4  ;;  %v1487_v48 = vsub.f32 1.5, %v1486_v47  ;;  %vm4533_vm12 = vmor %vm1559_vm7, %vm1560_vm8 }
 0x187   : > { %2685 = vmatmul.msk.bf16.gmra.mxu3 %vm290_vm0, %v1889_v37  ;;  %v1025_v34 = vmax.f32 %v962_v23, 0.0  ;;  %vm1490_vm11 = vweird.f32 %v4417_v53  ;;  %v1885_v22 = vpack.c.bf16 %v1832_v9, %v1831_v1  ;;  %v1478_v2 = vmul.f32 %v4295_v6, %v1477_v7  ;;  %vm4549_vm13 = vmor %vm1569_vm9, %vm1570_vm10 }
 0x188   : > { %v1567_v62 = vsub.f32 1.5, %v1566_v15  ;;  %2879 = vrsqrt.f32 %v4528_v45  ;;  %v1086_v56 = vsub.f32 %v2950_v41, %v4360_v54  ;;  %v536_v46 = vmul.f32 %v283_v21, %v283_v21  ;;  %vm4578_vm15 = vmor %vm1489_vm5, %vm1490_vm11 }
 0x189   : > { %v2050_v58 = vpop.f32.mrf.mxu0  ;;  %v4537_v26 = vadd.f32 1e-05, %v1025_v34  ;;  %v4564_v54 = vmul.f32 0.03125, %v419_v24  ;;  %v462_v20 = vsel %vm290_vm0, %v284_v16, 0.0  ;;  %v537_v39 = vmul.f32 %v284_v16, %v284_v16  ;;  %v2954_v16 = vld [vmem:[%s3126_s9 + $0x140] sm:$0xff] }
 0x18a   : > { %v2051_v17 = vadd.f32 %v3916_v43, %v2050_v58  ;;  %v1554_v43 = vmul.f32 %v4511_v30, %v4450_v49  ;;  %v1085_v49 = vsub.f32 %v2949_v8, %v4364_v33  ;;  %v1568_v3 = vmul.f32 %v4500_v18, %v1567_v62  ;;  %463 = vadd.xlane.f32.xlu2 %v462_v20 }
 0x18b   : > { %2881 = vrsqrt.f32 %v4537_v26  ;;  %v1488_v55 = vmul.f32 %v4417_v53, %v1487_v48  ;;  %v711_v38 = vsel %vm290_vm0, %v536_v46, 0.0  ;;  %v714_v1 = vsel %vm290_vm0, %v537_v39, 0.0  ;;  %v2955_v39 = vld [vmem:[%s3126_s9 + $0x148] sm:$0xff] }
 0x18c   : > { %v2193_v63 = vmax.f32 %v2051_v17, 0.0  ;;  %v1555_v19 = vmul.f32 %v4511_v30, %v1554_v43  ;;  %v2951_v17 = vld [vmem:[%s3126_s9 + $0xf0] sm:$0xff]  ;;  %712 = vadd.xlane.f32.xlu0 %v711_v38  ;;  %v1572_v9 = vsel %vm4549_vm13, %v4500_v18, %v1568_v3  ;;  %v1482_v57 = vsel %vm4559_vm14, %v4295_v6, %v1478_v2  ;;  %v422_v43 = vpop.xlane.xlu1 %421 }
 0x18d   : > { %v1077_v14 = vsub.f32 %v2951_v17, %v4128_v51  ;;  %v4589_v51 = vld [vmem:[%s5195_s2] ss:$0 sm:$0xff]  ;;  %715 = vadd.xlane.f32.xlu1 %v714_v1  ;;  %v1842_v10 = vmul.f32 %v1572_v9, %v1086_v56  ;;  %v900_v29 = vmul.f32 %v4564_v54, %v4564_v54  ;;  %v1492_v47 = vsel %vm4578_vm15, %v4417_v53, %v1488_v55 }
 0x18e   : > { %v2267_v44 = vpack.c.bf16 %v2193_v63, %v2192_v36  ;;  %v1556_v60 = vmul.f32 0.5, %v1555_v19  ;;  %v4595_v32 = vpop.eup %2879  ;;  %v2953_v36 = vld [vmem:[%s3126_s9 + $0xf8] sm:$0xff]  ;;  %v4607_v25 = vmul.f32 0.03125, %v422_v43  ;;  %v837_v15 = vmul.f32 0.03125, %v671_v27  ;;  %v674_v19 = vpop.xlane.xlu0 %673 }
 0x18f   : > { %v1078_v63 = vsub.f32 %v2953_v36, %v4168_v28  ;;  %v1574_v6 = vmul.f32 %v4595_v32, %v4528_v45  ;;  %vm1579_vm1 = vweird.f32 %v4528_v45  ;;  %vm1580_vm2 = vweird.f32 %v4595_v32  ;;  %v286_v45 = vld [vmem:[%s3126_s9 + $0x1d8] sm:$0xff] }
 0x190   : > { %2378 = vmatmul.bf16.gmra.mxu1 %v2267_v44  ;;  %v1557_v50 = vsub.f32 1.5, %v1556_v60  ;;  %v1833_v44 = vmul.f32 %v1482_v57, %v1077_v14  ;;  %v901_v53 = vmul.f32 %v4607_v25, %v4607_v25  ;;  %v963_v60 = vsub.f32 %v837_v15, %v900_v29  ;;  %vm4627_vm5 = vmor %vm1579_vm1, %vm1580_vm2  ;;  %v428_v29 = vpop.xlane.xlu2 %427 }
 0x191   : > { %v2053_v42 = vpop.f32.mrf.mxu0  ;;  %v2882_v35 = vpop.eup %2881  ;;  %v1575_v4 = vmul.f32 %v4595_v32, %v1574_v6  ;;  %v1834_v62 = vmul.f32 %v1492_v47, %v1078_v63  ;;  %vm1589_vm3 = vweird.f32 %v4537_v26  ;;  %v1087_v46 = vsub.f32 %v2954_v16, %v4476_v61 }
 0x192   : > { %v1558_v58 = vmul.f32 %v4511_v30, %v1557_v50  ;;  %v1584_v23 = vmul.f32 %v2882_v35, %v4537_v26  ;;  %v285_v50 = vld [vmem:[%s3126_s9 + $0x1d0] sm:$0xff]  ;;  %v1026_v8 = vmax.f32 %v963_v60, 0.0  ;;  %vm1590_vm4 = vweird.f32 %v2882_v35 }
 0x193   : > { %v465_v11 = vsel %vm290_vm0, %v285_v50, 0.0  ;;  %v1088_v55 = vsub.f32 %v2955_v39, %v4509_v52  ;;  %vm4635_vm6 = vmor %vm1589_vm3, %vm1590_vm4  ;;  %v468_v52 = vsel %vm290_vm0, %v286_v45, 0.0  ;;  %v539_v14 = vmul.f32 %v286_v45, %v286_v45  ;;  %v288_v39 = vld [vmem:[%s3126_s9 + $0x1e8] sm:$0xff] }
 0x194   : > { %2681 = vmatmul.msk.bf16.gmra.mxu0 %vm290_vm0, %v1885_v22  ;;  %v1562_v31 = vsel %vm4533_vm12, %v4511_v30, %v1558_v58  ;;  %v2054_v30 = vadd.f32 %v4589_v51, %v2053_v42  ;;  %v838_v42 = vmul.f32 0.03125, %v674_v19  ;;  %v1585_v48 = vmul.f32 %v2882_v35, %v1584_v23  ;;  %466 = vadd.xlane.f32.xlu2 %v465_v11  ;;  %v425_v33 = vpop.xlane.xlu1 %424 }
 0x195   : > { %v1841_v37 = vmul.f32 %v1562_v31, %v1085_v49  ;;  %v1576_v22 = vmul.f32 0.5, %v1575_v4  ;;  %v4619_v41 = vadd.f32 1e-05, %v1026_v8  ;;  %v1886_v58 = vpack.c.bf16 %v1834_v62, %v1833_v44  ;;  %469 = vadd.xlane.f32.xlu0 %v468_v52 }
 0x196   : > { %v2194_v40 = vmax.f32 %v2054_v30, 0.0  ;;  %v964_v49 = vsub.f32 %v838_v42, %v901_v53  ;;  %v1586_v24 = vmul.f32 0.5, %v1585_v48  ;;  %v538_v26 = vmul.f32 %v285_v50, %v285_v50  ;;  %v677_v44 = vpop.xlane.xlu0 %676  ;;  %v287_v42 = vld [vmem:[%s3126_s9 + $0x1e0] sm:$0xff] }
 0x197   : > { %v1890_v28 = vpack.c.bf16 %v1842_v10, %v1841_v37  ;;  %v1577_v3 = vsub.f32 1.5, %v1576_v22  ;;  %2883 = vrsqrt.f32 %v4619_v41  ;;  %v4652_v9 = vmul.f32 0.03125, %v425_v33 }
 0x198   : > { %v1027_v56 = vmax.f32 %v964_v49, 0.0  ;;  %v1587_v12 = vsub.f32 1.5, %v1586_v24  ;;  %v720_v37 = vsel %vm290_vm0, %v539_v14, 0.0  ;;  %v717_v36 = vsel %vm290_vm0, %v538_v26, 0.0 }
 0x199   : > { %v2055_v18 = vpop.f32.mrf.mxu0  ;;  %2686 = vmatmul.msk.bf16.gmra.mxu3 %vm290_vm0, %v1890_v28  ;;  %v1578_v31 = vmul.f32 %v4595_v32, %v1577_v3  ;;  %718 = vadd.xlane.f32.xlu1 %v717_v36  ;;  %v902_v27 = vmul.f32 %v4652_v9, %v4652_v9  ;;  %v839_v4 = vmul.f32 0.03125, %v677_v44  ;;  %v471_v22 = vsel %vm290_vm0, %v287_v42, 0.0 }
 0x19a   : > { %v2056_v21 = vadd.f32 %v4589_v51, %v2055_v18  ;;  %v4640_v61 = vadd.f32 1e-05, %v1027_v56  ;;  %v1588_v17 = vmul.f32 %v2882_v35, %v1587_v12  ;;  %vm1599_vm7 = vweird.f32 %v4619_v41  ;;  %v2957_v12 = vld [vmem:[%s3126_s9 + $0x158] sm:$0xff] }
 0x19b   : > { %v1582_v59 = vsel %vm4627_vm5, %v4595_v32, %v1578_v31  ;;  %v965_v48 = vsub.f32 %v839_v4, %v902_v27  ;;  %v1090_v20 = vsub.f32 %v2957_v12, %v4607_v25  ;;  %v474_v38 = vsel %vm290_vm0, %v288_v39, 0.0 }
 0x19c   : > { %v2195_v7 = vmax.f32 %v2056_v21, 0.0  ;;  %2885 = vrsqrt.f32 %v4640_v61  ;;  %v1592_v1 = vsel %vm4635_vm6, %v2882_v35, %v1588_v17  ;;  %v1843_v30 = vmul.f32 %v1582_v59, %v1087_v46  ;;  %721 = vadd.xlane.f32.xlu2 %v720_v37  ;;  %v680_v35 = vpop.xlane.xlu1 %679  ;;  %v431_v46 = vpop.xlane.xlu2 %430 }
 0x19d   : > { %v1844_v57 = vmul.f32 %v1592_v1, %v1088_v55  ;;  %v2884_v63 = vpop.eup %2883  ;;  %v4659_v21 = vmul.f32 0.03125, %v428_v29  ;;  %v840_v23 = vmul.f32 0.03125, %v680_v35  ;;  %472 = vadd.xlane.f32.xlu0 %v471_v22  ;;  %vm1609_vm9 = vweird.f32 %v4640_v61  ;;  %v4713_v1 = vld [vmem:[%s5197_s4] ss:$0 sm:$0xff] }
 0x19e   : > { %v2268_v34 = vpack.c.bf16 %v2195_v7, %v2194_v40  ;;  %v1594_v43 = vmul.f32 %v2884_v63, %v4619_v41  ;;  %vm1600_vm8 = vweird.f32 %v2884_v63  ;;  %v1028_v24 = vmax.f32 %v965_v48, 0.0 }
 0x19f   : > { %v1891_v47 = vpack.c.bf16 %v1844_v57, %v1843_v30  ;;  %v903_v7 = vmul.f32 %v4659_v21, %v4659_v21  ;;  %vm4673_vm11 = vmor %vm1599_vm7, %vm1600_vm8  ;;  %v540_v0 = vmul.f32 %v287_v42, %v287_v42  ;;  %v541_v13 = vmul.f32 %v288_v39, %v288_v39 }
 0x1a0   : > { %2383 = vmatmul.bf16.gmra.mxu1 %v2268_v34  ;;  %v1595_v19 = vmul.f32 %v2884_v63, %v1594_v43  ;;  %v4679_v16 = vadd.f32 1e-05, %v1028_v24  ;;  %v4707_v26 = vmul.f32 0.03125, %v431_v46 }
 0x1a1   : > { %v2058_v2 = vpop.f32.mrf.mxu0  ;;  %v966_v34 = vsub.f32 %v840_v23, %v903_v7  ;;  %475 = vadd.xlane.f32.xlu1 %v474_v38  ;;  %v723_v45 = vsel %vm290_vm0, %v540_v0, 0.0  ;;  %v726_v17 = vsel %vm290_vm0, %v541_v13, 0.0 }
 0x1a2   : > { %v2059_v10 = vadd.f32 %v4589_v51, %v2058_v2  ;;  %v2886_v6 = vpop.eup %2885  ;;  %v1596_v53 = vmul.f32 0.5, %v1595_v19  ;;  %v2956_v2 = vld [vmem:[%s3126_s9 + $0x150] sm:$0xff]  ;;  %vm1619_vm15 = vweird.f32 %v4679_v16 }
 0x1a3   : > { %v1604_v40 = vmul.f32 %v2886_v6, %v4640_v61  ;;  %vm1610_vm10 = vweird.f32 %v2886_v6  ;;  %v1029_v11 = vmax.f32 %v966_v34, 0.0  ;;  %v1089_v56 = vsub.f32 %v2956_v2, %v4564_v54 }
 0x1a4   : > { %2682 = vmatmul.msk.bf16.gmra.mxu0 %vm290_vm0, %v1886_v58  ;;  %v2196_v28 = vmax.f32 %v2059_v10, 0.0  ;;  %v1597_v50 = vsub.f32 1.5, %v1596_v53  ;;  %vm4689_vm12 = vmor %vm1609_vm9, %vm1610_vm10  ;;  %724 = vadd.xlane.f32.xlu2 %v723_v45 }
 0x1a5   : > { %v1605_v60 = vmul.f32 %v2886_v6, %v1604_v40  ;;  %v4677_v41 = vadd.f32 1e-05, %v1029_v11  ;;  %727 = vadd.xlane.f32.xlu0 %v726_v17  ;;  %v2959_v11 = vld [vmem:[%s3126_s9 + $0x168] sm:$0xff] }
 0x1a6   : > { %v1598_v58 = vmul.f32 %v2884_v63, %v1597_v50  ;;  %v1092_v24 = vsub.f32 %v2959_v11, %v4659_v21 }
 0x1a7   : > { %v1606_v8 = vmul.f32 0.5, %v1605_v60  ;;  %2887 = vrsqrt.f32 %v4677_v41  ;;  %vm1629_vm13 = vweird.f32 %v4677_v41 }
 0x1a8   : > { %2889 = vrsqrt.f32 %v4679_v16 }
 0x1a9   : > { %v2060_v18 = vpop.f32.mrf.mxu0  ;;  %2687 = vmatmul.msk.bf16.gmra.mxu3 %vm290_vm0, %v1891_v47  ;;  %v1607_v3 = vsub.f32 1.5, %v1606_v8  ;;  %v904_v47 = vmul.f32 %v4707_v26, %v4707_v26  ;;  %v2958_v8 = vld [vmem:[%s3126_s9 + $0x160] sm:$0xff] }
 0x1aa   : > { %v2061_v32 = vadd.f32 %v4589_v51, %v2060_v18  ;;  %v434_v57 = vpop.xlane.xlu0 %433 }
 0x1ab   : > { %v1608_v55 = vmul.f32 %v2886_v6, %v1607_v3  ;;  %v4716_v29 = vmul.f32 0.03125, %v434_v57 }
 0x1ac   : > { %v2197_v15 = vmax.f32 %v2061_v32, 0.0 }
 0x1ad   : > { %v1612_v25 = vsel %vm4689_vm12, %v2886_v6, %v1608_v55  ;;  %v2888_v30 = vpop.eup %2887 }
 0x1ae   : > { %v2269_v62 = vpack.c.bf16 %v2197_v15, %v2196_v28  ;;  %v1846_v52 = vmul.f32 %v1612_v25, %v1090_v20  ;;  %v2890_v10 = vpop.eup %2889  ;;  %v1624_v18 = vmul.f32 %v2888_v30, %v4677_v41  ;;  %v905_v28 = vmul.f32 %v4716_v29, %v4716_v29 }
 0x1af   : > { %v1614_v43 = vmul.f32 %v2890_v10, %v4679_v16  ;;  %vm1630_vm14 = vweird.f32 %v2888_v30  ;;  %vm1620_vm1 = vweird.f32 %v2890_v10 }
 0x1b0   : > { %2388 = vmatmul.bf16.gmra.mxu1 %v2269_v62  ;;  %v686_v6 = vpop.xlane.xlu2 %685  ;;  %v1625_v44 = vmul.f32 %v2888_v30, %v1624_v18  ;;  %vm4730_vm2 = vmor %vm1629_vm13, %vm1630_vm14 }
 0x1b1   : > { %v2063_v49 = vpop.f32.mrf.mxu0  ;;  %v1615_v19 = vmul.f32 %v2890_v10, %v1614_v43  ;;  %v842_v40 = vmul.f32 0.03125, %v686_v6  ;;  %vm1621_vm3 = vmor %vm1619_vm15, %vm1620_vm1 }
 0x1b2   : > { %v2064_v31 = vadd.f32 %v4589_v51, %v2063_v49  ;;  %v1626_v23 = vmul.f32 0.5, %v1625_v44  ;;  %v1091_v49 = vsub.f32 %v2958_v8, %v4652_v9 }
 0x1b3   : > { %v1616_v62 = vmul.f32 0.5, %v1615_v19  ;;  %v968_v53 = vsub.f32 %v842_v40, %v905_v28 }
 0x1b4   : > { %2683 = vmatmul.msk.bf16.gmra.mxu0 %vm290_vm0, %v1887_v5  ;;  %v1602_v5 = vsel %vm4673_vm11, %v2884_v63, %v1598_v58  ;;  %v2198_v36 = vmax.f32 %v2064_v31, 0.0  ;;  %v683_v15 = vpop.xlane.xlu1 %682  ;;  %v1627_v42 = vsub.f32 1.5, %v1626_v23 }
 0x1b5   : > { %v1845_v61 = vmul.f32 %v1602_v5, %v1089_v56  ;;  %v841_v7 = vmul.f32 0.03125, %v683_v15  ;;  %v1617_v48 = vsub.f32 1.5, %v1616_v62  ;;  %v1031_v22 = vmax.f32 %v968_v53, 0.0  ;;  %v4763_v15 = vld [vmem:[%s3126_s9 + $0x1f0] sm:$0xff]  ;;  %v2960_v53 = vld [vmem:[%s3126_s9 + $0x178] sm:$0xff] }
 0x1b6   : > { %v437_v3 = vpop.xlane.xlu0 %436  ;;  %v1628_v2 = vmul.f32 %v2888_v30, %v1627_v42 }
 0x1b7   : > { %v1892_v37 = vpack.c.bf16 %v1846_v52, %v1845_v61  ;;  %v967_v60 = vsub.f32 %v841_v7, %v904_v47  ;;  %v1157_v33 = vadd.f32 1e-05, %v1031_v22  ;;  %v4740_v16 = vmul.f32 0.03125, %v437_v3  ;;  %v2961_v22 = vld [vmem:[%s3126_s9 + $0x170] sm:$0xff] }
 0x1b8   : > { %v1618_v46 = vmul.f32 %v2890_v10, %v1617_v48  ;;  %v1632_v12 = vsel %vm4730_vm2, %v2888_v30, %v1628_v2  ;;  %v542_v48 = vmul.f32 %v4763_v15, %v4763_v15 }
 0x1b9   : > { %v2065_v14 = vpop.f32.mrf.mxu0  ;;  %2688 = vmatmul.msk.bf16.gmra.mxu3 %vm290_vm0, %v1892_v37  ;;  %v1030_v50 = vmax.f32 %v967_v60, 0.0  ;;  %2891 = vrsqrt.f32 %v1157_v33  ;;  %v1848_v20 = vmul.f32 %v1632_v12, %v1092_v24  ;;  %v906_v39 = vmul.f32 %v4740_v16, %v4740_v16  ;;  %v689_v13 = vpop.xlane.xlu2 %688 }
 0x1ba   : > { %v2066_v59 = vadd.f32 %v4589_v51, %v2065_v14  ;;  %v1622_v21 = vsel %vm1621_vm3, %v2890_v10, %v1618_v46  ;;  %v843_v61 = vmul.f32 0.03125, %v689_v13  ;;  %vm1649_vm4 = vweird.f32 %v1157_v33 }
 0x1bb   : > { %v4738_v41 = vadd.f32 1e-05, %v1030_v50  ;;  %v1847_v55 = vmul.f32 %v1622_v21, %v1091_v49  ;;  %v1094_v60 = vsub.f32 %v2960_v53, %v4716_v29  ;;  %v1093_v50 = vsub.f32 %v2961_v22, %v4707_v26 }
 0x1bc   : > { %v2199_v63 = vmax.f32 %v2066_v59, 0.0  ;;  %v440_v0 = vpop.xlane.xlu1 %439  ;;  %v969_v37 = vsub.f32 %v843_v61, %v906_v39  ;;  %v729_v11 = vsel %vm290_vm0, %v542_v48, 0.0 }
 0x1bd   : > { %v2354_v32 = vpop.f32.mrf.mxu1  ;;  %2893 = vrsqrt.f32 %v4738_v41  ;;  %v4751_v5 = vmul.f32 0.03125, %v440_v0  ;;  %v1893_v25 = vpack.c.bf16 %v1848_v20, %v1847_v55  ;;  %vm1639_vm6 = vweird.f32 %v4738_v41  ;;  %730 = vadd.xlane.f32.xlu2 %v729_v11 }
 0x1be   : > { %v2355_v27 = vadd.f32 %v4713_v1, %v2354_v32  ;;  %v2270_v35 = vpack.c.bf16 %v2199_v63, %v2198_v36  ;;  %v692_v17 = vpop.xlane.xlu0 %691  ;;  %v1032_v32 = vmax.f32 %v969_v37, 0.0 }
 0x1bf   : > { %v2892_v52 = vpop.eup %2891  ;;  %v907_v59 = vmul.f32 %v4751_v5, %v4751_v5  ;;  %v844_v30 = vmul.f32 0.03125, %v692_v17 }
 0x1c0   : > { %2513 = vst [vmem:[%s4725_s7] sm:$0xff] %v2355_v27  ;;  %2393 = vmatmul.bf16.gmra.mxu1 %v2270_v35  ;;  %v1644_v63 = vmul.f32 %v2892_v52, %v1157_v33  ;;  %v4759_v35 = vadd.f32 1e-05, %v1032_v32  ;;  %vm1650_vm5 = vweird.f32 %v2892_v52 }
 0x1c1   : > { %v2068_v4 = vpop.f32.mrf.mxu0  ;;  %v970_v43 = vsub.f32 %v844_v30, %v907_v59  ;;  %vm4772_vm8 = vmor %vm1649_vm4, %vm1650_vm5 }
 0x1c2   : > { %v2069_v9 = vadd.f32 %v4589_v51, %v2068_v4  ;;  %v1645_v47 = vmul.f32 %v2892_v52, %v1644_v63  ;;  %2895 = vrsqrt.f32 %v4759_v35  ;;  %v477_v4 = vsel %vm290_vm0, %v4763_v15, 0.0 }
 0x1c3   : > { %v2894_v57 = vpop.eup %2893  ;;  %v1033_v44 = vmax.f32 %v970_v43, 0.0  ;;  %478 = vadd.xlane.f32.xlu1 %v477_v4  ;;  %vm1659_vm10 = vweird.f32 %v4759_v35  ;;  %v2962_v43 = vld [vmem:[%s3126_s9 + $0x180] sm:$0xff] }
 0x1c4   : > { %v2200_v31 = vmax.f32 %v2069_v9, 0.0  ;;  %v1634_v18 = vmul.f32 %v2894_v57, %v4738_v41  ;;  %v1646_v28 = vmul.f32 0.5, %v1645_v47  ;;  %vm1640_vm7 = vweird.f32 %v2894_v57  ;;  %v443_v7 = vpop.xlane.xlu1 %442 }
 0x1c5   : > { %v2356_v56 = vpop.f32.mrf.mxu1  ;;  %v4766_v40 = vadd.f32 1e-05, %v1033_v44  ;;  %vm1641_vm9 = vmor %vm1639_vm6, %vm1640_vm7  ;;  %v4785_v49 = vmul.f32 0.03125, %v443_v7  ;;  %v1095_v47 = vsub.f32 %v2962_v43, %v4740_v16  ;;  %v2963_v44 = vld [vmem:[%s3126_s9 + $0x188] sm:$0xff] }
 0x1c6   : > { %v2357_v58 = vadd.f32 %v4713_v1, %v2356_v56  ;;  %v1635_v27 = vmul.f32 %v2894_v57, %v1634_v18  ;;  %v1647_v23 = vsub.f32 1.5, %v1646_v28  ;;  %v1096_v28 = vsub.f32 %v2963_v44, %v4751_v5 }
 0x1c7   : > { %2897 = vrsqrt.f32 %v4766_v40  ;;  %v908_v21 = vmul.f32 %v4785_v49, %v4785_v49  ;;  %vm1669_vm12 = vweird.f32 %v4766_v40 }
 0x1c8   : > { %2514 = vst [vmem:[%s4725_s7 + $0x8] sm:$0xff] %v2357_v58  ;;  %v1636_v19 = vmul.f32 0.5, %v1635_v27  ;;  %v1648_v29 = vmul.f32 %v2892_v52, %v1647_v23  ;;  %v2896_v26 = vpop.eup %2895 }
 0x1c9   : > { %v2070_v54 = vpop.f32.mrf.mxu0  ;;  %2689 = vmatmul.msk.bf16.gmra.mxu3 %vm290_vm0, %v1893_v25  ;;  %v1654_v58 = vmul.f32 %v2896_v26, %v4759_v35  ;;  %vm1660_vm11 = vweird.f32 %v2896_v26 }
 0x1ca   : > { %v2071_v38 = vadd.f32 %v4589_v51, %v2070_v54  ;;  %v1637_v34 = vsub.f32 1.5, %v1636_v19  ;;  %v1652_v2 = vsel %vm4772_vm8, %v2892_v52, %v1648_v29  ;;  %vm4811_vm14 = vmor %vm1659_vm10, %vm1660_vm11 }
 0x1cb   : > { %v1850_v46 = vmul.f32 %v1652_v2, %v1094_v60  ;;  %v446_v20 = vpop.xlane.xlu2 %445 }
 0x1cc   : > { %v2201_v45 = vmax.f32 %v2071_v38, 0.0  ;;  %v1638_v24 = vmul.f32 %v2894_v57, %v1637_v34  ;;  %v1655_v38 = vmul.f32 %v2896_v26, %v1654_v58  ;;  %v4798_v25 = vmul.f32 0.03125, %v446_v20 }
 0x1cd   : > { %v2359_v14 = vpop.f32.mrf.mxu1  ;;  %v2898_v9 = vpop.eup %2897 }
 0x1ce   : > { %v2360_v10 = vadd.f32 %v4713_v1, %v2359_v14  ;;  %v2271_v36 = vpack.c.bf16 %v2201_v45, %v2200_v31  ;;  %v1642_v33 = vsel %vm1641_vm9, %v2894_v57, %v1638_v24  ;;  %v1664_v0 = vmul.f32 %v2898_v9, %v4766_v40 }
 0x1cf   : > { %v1849_v12 = vmul.f32 %v1642_v33, %v1093_v50  ;;  %v1656_v14 = vmul.f32 0.5, %v1655_v38  ;;  %v909_v37 = vmul.f32 %v4798_v25, %v4798_v25  ;;  %vm1670_vm13 = vweird.f32 %v2898_v9 }
 0x1d0   : > { %2515 = vst [vmem:[%s4725_s7 + $0x10] sm:$0xff] %v2360_v10  ;;  %2398 = vmatmul.bf16.gmra.mxu1 %v2271_v36  ;;  %v1665_v59 = vmul.f32 %v2898_v9, %v1664_v0  ;;  %vm1671_vm15 = vmor %vm1669_vm12, %vm1670_vm13 }
 0x1d1   : > { %v2073_v6 = vpop.f32.mrf.mxu0  ;;  %v1894_v61 = vpack.c.bf16 %v1850_v46, %v1849_v12  ;;  %v1657_v10 = vsub.f32 1.5, %v1656_v14 }
 0x1d2   : > { %v2074_v3 = vadd.f32 %v4589_v51, %v2073_v6  ;;  %v695_v54 = vpop.xlane.xlu0 %694  ;;  %v1666_v36 = vmul.f32 0.5, %v1665_v59 }
 0x1d3   : > { %v698_v31 = vpop.xlane.xlu1 %697  ;;  %v845_v45 = vmul.f32 0.03125, %v695_v54  ;;  %v1658_v23 = vmul.f32 %v2896_v26, %v1657_v10 }
 0x1d4   : > { %v2202_v39 = vmax.f32 %v2074_v3, 0.0  ;;  %v846_v30 = vmul.f32 0.03125, %v698_v31  ;;  %v1667_v27 = vsub.f32 1.5, %v1666_v36  ;;  %v449_v7 = vpop.xlane.xlu2 %448 }
 0x1d5   : > { %v2361_v62 = vpop.f32.mrf.mxu1  ;;  %v971_v57 = vsub.f32 %v845_v45, %v908_v21  ;;  %v4817_v53 = vmul.f32 0.03125, %v449_v7  ;;  %v1662_v35 = vsel %vm4811_vm14, %v2896_v26, %v1658_v23 }
 0x1d6   : > { %v2362_v8 = vadd.f32 %v4713_v1, %v2361_v62  ;;  %v972_v18 = vsub.f32 %v846_v30, %v909_v37  ;;  %v1668_v4 = vmul.f32 %v2898_v9, %v1667_v27  ;;  %v1851_v5 = vmul.f32 %v1662_v35, %v1095_v47 }
 0x1d7   : > { %v1034_v32 = vmax.f32 %v971_v57, 0.0  ;;  %v910_v50 = vmul.f32 %v4817_v53, %v4817_v53  ;;  %v2964_v57 = vld [vmem:[%s3126_s9 + $0x190] sm:$0xff] }
 0x1d8   : > { %2516 = vst [vmem:[%s4725_s7 + $0x18] sm:$0xff] %v2362_v8  ;;  %v1035_v19 = vmax.f32 %v972_v18, 0.0  ;;  %v1672_v42 = vsel %vm1671_vm15, %v2898_v9, %v1668_v4  ;;  %v1097_v10 = vsub.f32 %v2964_v57, %v4785_v49  ;;  %v2965_v18 = vld [vmem:[%s3126_s9 + $0x198] sm:$0xff] }
 0x1d9   : > { %v2075_v56 = vpop.f32.mrf.mxu0  ;;  %2690 = vmatmul.msk.bf16.gmra.mxu3 %vm290_vm0, %v1894_v61  ;;  %v1160_v40 = vadd.f32 1e-05, %v1034_v32  ;;  %v1852_v34 = vmul.f32 %v1672_v42, %v1096_v28  ;;  %v1098_v32 = vsub.f32 %v2965_v18, %v4798_v25 }
 0x1da   : > { %v2076_v41 = vadd.f32 %v4589_v51, %v2075_v56  ;;  %v1161_v16 = vadd.f32 1e-05, %v1035_v19 }
 0x1db   : > { %2899 = vrsqrt.f32 %v1160_v40  ;;  %v1895_v2 = vpack.c.bf16 %v1852_v34, %v1851_v5  ;;  %vm1679_vm1 = vweird.f32 %v1160_v40 }
 0x1dc   : > { %v2203_v55 = vmax.f32 %v2076_v41, 0.0  ;;  %2901 = vrsqrt.f32 %v1161_v16  ;;  %vm1689_vm3 = vweird.f32 %v1161_v16 }
 0x1dd   : > { %v2364_v13 = vpop.f32.mrf.mxu1 }
 0x1de   : > { %v2365_v17 = vadd.f32 %v4713_v1, %v2364_v13  ;;  %v2272_v52 = vpack.c.bf16 %v2203_v55, %v2202_v39 }
 0x1e0   : > { %2517 = vst [vmem:[%s4725_s7 + $0x20] sm:$0xff] %v2365_v17  ;;  %2403 = vmatmul.bf16.gmra.mxu1 %v2272_v52 }
 0x1e1   : > { %v2078_v63 = vpop.f32.mrf.mxu0  ;;  %v2900_v3 = vpop.eup %2899 }
 0x1e2   : > { %v2079_v48 = vadd.f32 %v4589_v51, %v2078_v63  ;;  %v1674_v46 = vmul.f32 %v2900_v3, %v1160_v40  ;;  %v2902_v12 = vpop.eup %2901  ;;  %vm1680_vm2 = vweird.f32 %v2900_v3 }
 0x1e3   : > { %v452_v8 = vpop.xlane.xlu0 %451  ;;  %v1684_v55 = vmul.f32 %v2902_v12, %v1161_v16  ;;  %vm1690_vm4 = vweird.f32 %v2902_v12  ;;  %vm1681_vm5 = vmor %vm1679_vm1, %vm1680_vm2 }
 0x1e4   : > { %v4827_v11 = vmul.f32 0.03125, %v452_v8  ;;  %v2204_v56 = vmax.f32 %v2079_v48, 0.0  ;;  %v1675_v38 = vmul.f32 %v2900_v3, %v1674_v46  ;;  %vm1691_vm6 = vmor %vm1689_vm3, %vm1690_vm4 }
 0x1e5   : > { %v2366_v62 = vpop.f32.mrf.mxu1  ;;  %v704_v58 = vpop.xlane.xlu2 %703  ;;  %v1685_v61 = vmul.f32 %v2902_v12, %v1684_v55 }
 0x1e6   : > { %v2367_v60 = vadd.f32 %v4713_v1, %v2366_v62  ;;  %v911_v41 = vmul.f32 %v4827_v11, %v4827_v11  ;;  %v848_v21 = vmul.f32 0.03125, %v704_v58  ;;  %v1676_v45 = vmul.f32 0.5, %v1675_v38 }
 0x1e7   : > { %v1686_v14 = vmul.f32 0.5, %v1685_v61  ;;  %v2966_v61 = vld [vmem:[%s3126_s9 + $0x1a0] sm:$0xff] }
 0x1e8   : > { %2518 = vst [vmem:[%s4725_s7 + $0x28] sm:$0xff] %v2367_v60  ;;  %v701_v24 = vpop.xlane.xlu1 %700  ;;  %v974_v0 = vsub.f32 %v848_v21, %v911_v41  ;;  %v1677_v59 = vsub.f32 1.5, %v1676_v45  ;;  %v2967_v45 = vld [vmem:[%s3126_s9 + $0x1a8] sm:$0xff] }
 0x1e9   : > { %v2080_v22 = vpop.f32.mrf.mxu0  ;;  %v847_v26 = vmul.f32 0.03125, %v701_v24  ;;  %2691 = vmatmul.msk.bf16.gmra.mxu3 %vm290_vm0, %v1895_v2  ;;  %v1687_v36 = vsub.f32 1.5, %v1686_v14 }
 0x1ea   : > { %v2081_v29 = vadd.f32 %v4589_v51, %v2080_v22  ;;  %v1037_v17 = vmax.f32 %v974_v0, 0.0  ;;  %v1678_v47 = vmul.f32 %v2900_v3, %v1677_v59 }
 0x1eb   : > { %v973_v20 = vsub.f32 %v847_v26, %v910_v50  ;;  %v455_v30 = vpop.xlane.xlu0 %454  ;;  %v1688_v27 = vmul.f32 %v2902_v12, %v1687_v36 }
 0x1ec   : > { %v2205_v33 = vmax.f32 %v2081_v29, 0.0  ;;  %v4836_v37 = vadd.f32 1e-05, %v1037_v17  ;;  %v4845_v43 = vmul.f32 0.03125, %v455_v30  ;;  %v1682_v44 = vsel %vm1681_vm5, %v2900_v3, %v1678_v47 }
 0x1ed   : > { %v2369_v9 = vpop.f32.mrf.mxu1  ;;  %v1036_v13 = vmax.f32 %v973_v20, 0.0  ;;  %v1692_v49 = vsel %vm1691_vm6, %v2902_v12, %v1688_v27  ;;  %v1853_v19 = vmul.f32 %v1682_v44, %v1097_v10  ;;  %v1100_v17 = vsub.f32 %v2967_v45, %v4827_v11 }
 0x1ee   : > { %v2370_v54 = vadd.f32 %v4713_v1, %v2369_v9  ;;  %v2273_v39 = vpack.c.bf16 %v2205_v33, %v2204_v56  ;;  %v912_v25 = vmul.f32 %v4845_v43, %v4845_v43  ;;  %v1854_v4 = vmul.f32 %v1692_v49, %v1098_v32 }
 0x1ef   : > { %v4834_v52 = vadd.f32 1e-05, %v1036_v13  ;;  %vm1709_vm9 = vweird.f32 %v4836_v37 }
 0x1f0   : > { %2519 = vst [vmem:[%s4725_s7 + $0x30] sm:$0xff] %v2370_v54  ;;  %2408 = vmatmul.bf16.gmra.mxu1 %v2273_v39  ;;  %v458_v23 = vpop.xlane.xlu1 %457  ;;  %v1896_v5 = vpack.c.bf16 %v1854_v4, %v1853_v19 }
 0x1f1   : > { %v2083_v31 = vpop.f32.mrf.mxu0  ;;  %2903 = vrsqrt.f32 %v4834_v52  ;;  %v4854_v35 = vmul.f32 0.03125, %v458_v23  ;;  %vm1699_vm7 = vweird.f32 %v4834_v52 }
 0x1f2   : > { %2905 = vrsqrt.f32 %v4836_v37  ;;  %v2084_v28 = vadd.f32 %v4589_v51, %v2083_v31  ;;  %v707_v60 = vpop.xlane.xlu2 %706  ;;  %v1099_v31 = vsub.f32 %v2966_v61, %v4817_v53 }
 0x1f3   : > { %v849_v34 = vmul.f32 0.03125, %v707_v60  ;;  %v710_v48 = vpop.xlane.xlu0 %709  ;;  %v913_v3 = vmul.f32 %v4854_v35, %v4854_v35 }
 0x1f4   : > { %v2206_v22 = vmax.f32 %v2084_v28, 0.0  ;;  %v850_v26 = vmul.f32 0.03125, %v710_v48 }
 0x1f5   : > { %v2371_v63 = vpop.f32.mrf.mxu1  ;;  %v975_v2 = vsub.f32 %v849_v34, %v912_v25 }
 0x1f6   : > { %v2372_v6 = vadd.f32 %v4713_v1, %v2371_v63  ;;  %v976_v12 = vsub.f32 %v850_v26, %v913_v3 }
 0x1f7   : > { %v2904_v40 = vpop.eup %2903  ;;  %v1038_v58 = vmax.f32 %v975_v2, 0.0 }
 0x1f8   : > { %2520 = vst [vmem:[%s4725_s7 + $0x38] sm:$0xff] %v2372_v6  ;;  %v1694_v16 = vmul.f32 %v2904_v40, %v4834_v52  ;;  %v2906_v42 = vpop.eup %2905  ;;  %vm1700_vm8 = vweird.f32 %v2904_v40  ;;  %v1039_v39 = vmax.f32 %v976_v12, 0.0  ;;  %v461_v13 = vpop.xlane.xlu1 %460 }
 0x1f9   : > { %v2085_v7 = vpop.f32.mrf.mxu0  ;;  %v1704_v8 = vmul.f32 %v2906_v42, %v4836_v37  ;;  %2692 = vmatmul.msk.bf16.gmra.mxu3 %vm290_vm0, %v1896_v5  ;;  %vm1710_vm10 = vweird.f32 %v2906_v42  ;;  %v4864_v54 = vadd.f32 1e-05, %v1038_v58  ;;  %vm4871_vm11 = vmor %vm1699_vm7, %vm1700_vm8  ;;  %v4885_v32 = vmul.f32 0.03125, %v461_v13  ;;  %v2970_v58 = vld [vmem:[%s3126_s9 + $0x1c0] sm:$0xff] }
 0x1fa   : > { %v2086_v62 = vadd.f32 %v4589_v51, %v2085_v7  ;;  %v1695_v29 = vmul.f32 %v2904_v40, %v1694_v16  ;;  %v4866_v55 = vpop.f32.mrf.mxu3  ;;  %vm1711_vm12 = vmor %vm1709_vm9, %vm1710_vm10  ;;  %v1165_v14 = vadd.f32 1e-05, %v1039_v39 }
 0x1fb   : > { %v1705_v46 = vmul.f32 %v2906_v42, %v1704_v8  ;;  %2907 = vrsqrt.f32 %v4864_v54  ;;  %v914_v60 = vmul.f32 %v4885_v32, %v4885_v32  ;;  %vm1719_vm13 = vweird.f32 %v4864_v54 }
 0x1fc   : > { %v2207_v50 = vmax.f32 %v2086_v62, 0.0  ;;  %v1696_v41 = vmul.f32 0.5, %v1695_v29  ;;  %2909 = vrsqrt.f32 %v1165_v14  ;;  %vm1729_vm15 = vweird.f32 %v1165_v14 }
 0x1fd   : > { %v2374_v24 = vpop.f32.mrf.mxu1  ;;  %v1706_v9 = vmul.f32 0.5, %v1705_v46  ;;  %v464_v44 = vpop.xlane.xlu2 %463  ;;  %v2968_v46 = vld [vmem:[%s3126_s9 + $0x1b0] sm:$0xff] }
 0x1fe   : > { %v2274_v56 = vpack.c.bf16 %v2207_v50, %v2206_v22  ;;  %v2375_v33 = vadd.f32 %v4713_v1, %v2374_v24  ;;  %v1697_v21 = vsub.f32 1.5, %v1696_v41  ;;  %v4891_v49 = vmul.f32 0.03125, %v464_v44 }
 0x1ff   : > { %v1707_v38 = vsub.f32 1.5, %v1706_v9  ;;  %v713_v62 = vpop.xlane.xlu0 %712  ;;  %v1101_v41 = vsub.f32 %v2968_v46, %v4845_v43  ;;  %v2969_v9 = vld [vmem:[%s3126_s9 + $0x1b8] sm:$0xff] }
 0x200   : > { %2521 = vst [vmem:[%s4725_s7 + $0x40] sm:$0xff] %v2375_v33  ;;  %2413 = vmatmul.bf16.gmra.mxu1 %v2274_v56  ;;  %v1698_v59 = vmul.f32 %v2904_v40, %v1697_v21  ;;  %v851_v29 = vmul.f32 0.03125, %v713_v62  ;;  %v1102_v21 = vsub.f32 %v2969_v9, %v4854_v35 }
 0x201   : > { %v2088_v20 = vpop.f32.mrf.mxu0  ;;  %v1708_v37 = vmul.f32 %v2906_v42, %v1707_v38  ;;  %v2908_v11 = vpop.eup %2907 }
 0x202   : > { %v1702_v57 = vsel %vm4871_vm11, %v2904_v40, %v1698_v59  ;;  %v2089_v63 = vadd.f32 %v4589_v51, %v2088_v20  ;;  %v4887_v47 = vpop.f32.mrf.mxu3  ;;  %v1714_v27 = vmul.f32 %v2908_v11, %v4864_v54  ;;  %v2910_v28 = vpop.eup %2909  ;;  %vm1720_vm14 = vweird.f32 %v2908_v11 }
 0x203   : > { %v1712_v10 = vsel %vm1711_vm12, %v2906_v42, %v1708_v37  ;;  %v1855_v36 = vmul.f32 %v1702_v57, %v1099_v31  ;;  %v716_v40 = vpop.xlane.xlu1 %715  ;;  %v1724_v4 = vmul.f32 %v2910_v28, %v1165_v14  ;;  %v915_v42 = vmul.f32 %v4891_v49, %v4891_v49  ;;  %vm4908_vm2 = vmor %vm1719_vm13, %vm1720_vm14 }
 0x204   : > { %v1856_v53 = vmul.f32 %v1712_v10, %v1100_v17  ;;  %v2208_v7 = vmax.f32 %v2089_v63, 0.0  ;;  %v1715_v23 = vmul.f32 %v2908_v11, %v1714_v27  ;;  %v852_v5 = vmul.f32 0.03125, %v716_v40 }
 0x205   : > { %v2376_v30 = vpop.f32.mrf.mxu1  ;;  %v1725_v50 = vmul.f32 %v2910_v28, %v1724_v4  ;;  %vm1730_vm1 = vweird.f32 %v2910_v28  ;;  %v977_v56 = vsub.f32 %v851_v29, %v914_v60 }
 0x206   : > { %v2377_v52 = vadd.f32 %v4713_v1, %v2376_v30  ;;  %v1897_v19 = vpack.c.bf16 %v1856_v53, %v1855_v36  ;;  %v1716_v22 = vmul.f32 0.5, %v1715_v23  ;;  %v978_v8 = vsub.f32 %v852_v5, %v915_v42  ;;  %vm1731_vm3 = vmor %vm1729_vm15, %vm1730_vm1 }
 0x207   : > { %v1726_v3 = vmul.f32 0.5, %v1725_v50  ;;  %v1040_v39 = vmax.f32 %v977_v56, 0.0  ;;  %v467_v38 = vpop.xlane.xlu2 %466 }
 0x208   : > { %2522 = vst [vmem:[%s4725_s7 + $0x48] sm:$0xff] %v2377_v52  ;;  %v1717_v24 = vsub.f32 1.5, %v1716_v22  ;;  %v1041_v26 = vmax.f32 %v978_v8, 0.0  ;;  %v4917_v17 = vmul.f32 0.03125, %v467_v38  ;;  %v470_v57 = vpop.xlane.xlu0 %469 }
 0x209   : > { %v2090_v18 = vpop.f32.mrf.mxu0  ;;  %2693 = vmatmul.msk.bf16.gmra.mxu3 %vm290_vm0, %v1897_v19  ;;  %v1727_v12 = vsub.f32 1.5, %v1726_v3  ;;  %v1166_v43 = vadd.f32 1e-05, %v1040_v39  ;;  %v4928_v53 = vmul.f32 0.03125, %v470_v57 }
 0x20a   : > { %v2091_v6 = vadd.f32 %v4589_v51, %v2090_v18  ;;  %v4901_v33 = vpop.f32.mrf.mxu3  ;;  %v1167_v20 = vadd.f32 1e-05, %v1041_v26  ;;  %v1718_v0 = vmul.f32 %v2908_v11, %v1717_v24  ;;  %v916_v36 = vmul.f32 %v4917_v17, %v4917_v17 }
 0x20b   : > { %v1728_v13 = vmul.f32 %v2910_v28, %v1727_v12  ;;  %vm1739_vm6 = vweird.f32 %v1166_v43  ;;  %v1103_v12 = vsub.f32 %v2970_v58, %v4885_v32 }
 0x20c   : > { %v2209_v25 = vmax.f32 %v2091_v6, 0.0  ;;  %2911 = vrsqrt.f32 %v1167_v20  ;;  %v1722_v54 = vsel %vm4908_vm2, %v2908_v11, %v1718_v0  ;;  %v719_v44 = vpop.xlane.xlu1 %718  ;;  %vm1749_vm4 = vweird.f32 %v1167_v20  ;;  %v4960_v0 = vld [vmem:[%s5195_s2] ss:$0 sm:$0xff] }
 0x20d   : > { %v2379_v16 = vpop.f32.mrf.mxu1  ;;  %v1732_v45 = vsel %vm1731_vm3, %v2910_v28, %v1728_v13  ;;  %2913 = vrsqrt.f32 %v1166_v43  ;;  %v1857_v35 = vmul.f32 %v1722_v54, %v1101_v41 }
 0x20e   : > { %v2275_v34 = vpack.c.bf16 %v2209_v25, %v2208_v7  ;;  %v2380_v48 = vadd.f32 %v4713_v1, %v2379_v16  ;;  %v1858_v14 = vmul.f32 %v1732_v45, %v1102_v21  ;;  %v853_v7 = vmul.f32 0.03125, %v719_v44  ;;  %v2971_v21 = vld [vmem:[%s3126_s9 + $0x1c8] sm:$0xff] }
 0x20f   : > { %v722_v11 = vpop.xlane.xlu2 %721 }
 0x210   : > { %2523 = vst [vmem:[%s4725_s7 + $0x50] sm:$0xff] %v2380_v48  ;;  %2418 = vmatmul.bf16.gmra.mxu1 %v2275_v34  ;;  %v1898_v63 = vpack.c.bf16 %v1858_v14, %v1857_v35  ;;  %v854_v40 = vmul.f32 0.03125, %v722_v11  ;;  %v979_v60 = vsub.f32 %v853_v7, %v916_v36 }
 0x211   : > { %v2093_v2 = vpop.f32.mrf.mxu0 }
 0x212   : > { %v2094_v59 = vadd.f32 %v4589_v51, %v2093_v2  ;;  %v4921_v30 = vpop.f32.mrf.mxu3  ;;  %v4924_v10 = vpop.eup %2911  ;;  %v1042_v22 = vmax.f32 %v979_v60, 0.0 }
 0x213   : > { %v1744_v27 = vmul.f32 %v4924_v10, %v1167_v20  ;;  %v2914_v28 = vpop.eup %2913  ;;  %vm1750_vm5 = vweird.f32 %v4924_v10  ;;  %v473_v2 = vpop.xlane.xlu0 %472  ;;  %v1104_v20 = vsub.f32 %v2971_v21, %v4891_v49 }
 0x214   : > { %v2210_v18 = vmax.f32 %v2094_v59, 0.0  ;;  %v1734_v62 = vmul.f32 %v2914_v28, %v1166_v43  ;;  %vm1740_vm7 = vweird.f32 %v2914_v28  ;;  %v4940_v3 = vadd.f32 1e-05, %v1042_v22  ;;  %vm4942_vm8 = vmor %vm1749_vm4, %vm1750_vm5 }
 0x215   : > { %v2381_v61 = vpop.f32.mrf.mxu1  ;;  %v1745_v4 = vmul.f32 %v4924_v10, %v1744_v27  ;;  %vm1741_vm9 = vmor %vm1739_vm6, %vm1740_vm7 }
 0x216   : > { %v2382_v31 = vadd.f32 %v4713_v1, %v2381_v61  ;;  %v1735_v5 = vmul.f32 %v2914_v28, %v1734_v62  ;;  %v4964_v61 = vmul.f32 0.03125, %v473_v2  ;;  %vm1759_vm12 = vweird.f32 %v4940_v3  ;;  %v2974_v2 = vld [vmem:[%s3126_s9 + $0x1d8] sm:$0xff] }
 0x217   : > { %v1746_v42 = vmul.f32 0.5, %v1745_v4  ;;  %v725_v36 = vpop.xlane.xlu2 %724  ;;  %v1106_v26 = vsub.f32 %v2974_v2, %v4928_v53  ;;  %v5020_v2 = vld [vmem:[%s5197_s4] ss:$0 sm:$0xff] }
 0x218   : > { %2524 = vst [vmem:[%s4725_s7 + $0x58] sm:$0xff] %v2382_v31  ;;  %v1736_v29 = vmul.f32 0.5, %v1735_v5  ;;  %v476_v31 = vpop.xlane.xlu1 %475  ;;  %v855_v7 = vmul.f32 0.03125, %v725_v36 }
 0x219   : > { %v2095_v37 = vpop.f32.mrf.mxu0  ;;  %2694 = vmatmul.msk.bf16.gmra.mxu3 %vm290_vm0, %v1898_v63  ;;  %v1747_v8 = vsub.f32 1.5, %v1746_v42  ;;  %v4969_v59 = vmul.f32 0.03125, %v476_v31 }
 0x21a   : > { %v2096_v52 = vadd.f32 %v4589_v51, %v2095_v37  ;;  %v917_v51 = vmul.f32 %v4928_v53, %v4928_v53  ;;  %v1737_v56 = vsub.f32 1.5, %v1736_v29  ;;  %v2973_v29 = vld [vmem:[%s3126_s9 + $0x1d0] sm:$0xff] }
 0x21b   : > { %v1748_v41 = vmul.f32 %v4924_v10, %v1747_v8  ;;  %v728_v63 = vpop.xlane.xlu0 %727  ;;  %v919_v27 = vmul.f32 %v4969_v59, %v4969_v59 }
 0x21c   : > { %v2211_v6 = vmax.f32 %v2096_v52, 0.0  ;;  %v980_v16 = vsub.f32 %v854_v40, %v917_v51  ;;  %v4938_v50 = vpop.f32.mrf.mxu3  ;;  %v1738_v39 = vmul.f32 %v2914_v28, %v1737_v56 }
 0x21d   : > { %v2384_v19 = vpop.f32.mrf.mxu1  ;;  %v1752_v38 = vsel %vm4942_vm8, %v4924_v10, %v1748_v41 }
 0x21e   : > { %v2276_v25 = vpack.c.bf16 %v2211_v6, %v2210_v18  ;;  %v2385_v23 = vadd.f32 %v4713_v1, %v2384_v19  ;;  %v1043_v48 = vmax.f32 %v980_v16, 0.0  ;;  %v1742_v43 = vsel %vm1741_vm9, %v2914_v28, %v1738_v39 }
 0x21f   : > { %v1859_v45 = vmul.f32 %v1742_v43, %v1103_v12  ;;  %v1860_v35 = vmul.f32 %v1752_v38, %v1104_v20  ;;  %v918_v6 = vmul.f32 %v4964_v61, %v4964_v61 }
 0x220   : > { %2525 = vst [vmem:[%s4725_s7 + $0x60] sm:$0xff] %v2385_v23  ;;  %2423 = vmatmul.bf16.gmra.mxu1 %v2276_v25  ;;  %v1169_v24 = vadd.f32 1e-05, %v1043_v48  ;;  %v856_v25 = vmul.f32 0.03125, %v728_v63 }
 0x221   : > { %v2098_v34 = vpop.f32.mrf.mxu0  ;;  %v1899_v51 = vpack.c.bf16 %v1860_v35, %v1859_v45  ;;  %v981_v16 = vsub.f32 %v855_v7, %v918_v6 }
 0x222   : > { %2915 = vrsqrt.f32 %v1169_v24  ;;  %v2099_v32 = vadd.f32 %v4960_v0, %v2098_v34  ;;  %vm1769_vm10 = vweird.f32 %v1169_v24  ;;  %v982_v60 = vsub.f32 %v856_v25, %v919_v27  ;;  %v2976_v25 = vld [vmem:[%s3126_s9 + $0x1e8] sm:$0xff] }
 0x223   : > { %2917 = vrsqrt.f32 %v4940_v3  ;;  %v1044_v22 = vmax.f32 %v981_v16, 0.0  ;;  %v2109_v27 = vadd.f32 %v4960_v0, %v4866_v55 }
 0x224   : > { %v4966_v49 = vpop.f32.mrf.mxu3  ;;  %v2212_v52 = vmax.f32 %v2099_v32, 0.0  ;;  %v1045_v8 = vmax.f32 %v982_v60, 0.0 }
 0x225   : > { %v2386_v46 = vpop.f32.mrf.mxu1  ;;  %v1170_v58 = vadd.f32 1e-05, %v1044_v22 }
 0x226   : > { %v2387_v9 = vadd.f32 %v4713_v1, %v2386_v46  ;;  %v1171_v12 = vadd.f32 1e-05, %v1045_v8 }
 0x227   : > { %2919 = vrsqrt.f32 %v1170_v58  ;;  %vm1779_vm1 = vweird.f32 %v1170_v58 }
 0x228   : > { %2526 = vst [vmem:[%s4725_s7 + $0x68] sm:$0xff] %v2387_v9  ;;  %v2916_v14 = vpop.eup %2915  ;;  %2921 = vrsqrt.f32 %v1171_v12  ;;  %vm1789_vm3 = vweird.f32 %v1171_v12 }
 0x229   : > { %v2100_v13 = vpop.f32.mrf.mxu0  ;;  %v2918_v37 = vpop.eup %2917  ;;  %v1764_v10 = vmul.f32 %v2916_v14, %v1169_v24  ;;  %vm1770_vm11 = vweird.f32 %v2916_v14  ;;  %2695 = vmatmul.msk.bf16.gmra.mxu3 %vm290_vm0, %v1899_v51  ;;  %v1105_v24 = vsub.f32 %v2973_v29, %v4917_v17 }
 0x22a   : > { %v2101_v54 = vadd.f32 %v4960_v0, %v2100_v13  ;;  %v1754_v18 = vmul.f32 %v2918_v37, %v4940_v3  ;;  %vm1760_vm13 = vweird.f32 %v2918_v37  ;;  %vm4982_vm14 = vmor %vm1769_vm10, %vm1770_vm11 }
 0x22b   : > { %v1765_v19 = vmul.f32 %v2916_v14, %v1764_v10  ;;  %vm1761_vm15 = vmor %vm1759_vm12, %vm1760_vm13 }
 0x22c   : > { %v2213_v57 = vmax.f32 %v2101_v54, 0.0  ;;  %v1755_v40 = vmul.f32 %v2918_v37, %v1754_v18  ;;  %v4980_v42 = vpop.f32.mrf.mxu3 }
 0x22d   : > { %v2389_v11 = vpop.f32.mrf.mxu1  ;;  %v1766_v23 = vmul.f32 0.5, %v1765_v19  ;;  %v2920_v31 = vpop.eup %2919 }
 0x22e   : > { %v2277_v44 = vpack.c.bf16 %v2213_v57, %v2212_v52  ;;  %v2390_v28 = vadd.f32 %v4713_v1, %v2389_v11  ;;  %v1756_v62 = vmul.f32 0.5, %v1755_v40  ;;  %v2922_v35 = vpop.eup %2921  ;;  %v1774_v52 = vmul.f32 %v2920_v31, %v1170_v58 }
 0x22f   : > { %v1767_v5 = vsub.f32 1.5, %v1766_v23  ;;  %v1784_v57 = vmul.f32 %v2922_v35, %v1171_v12  ;;  %vm1780_vm2 = vweird.f32 %v2920_v31  ;;  %vm1790_vm4 = vweird.f32 %v2922_v35 }
 0x230   : > { %2527 = vst [vmem:[%s4725_s7 + $0x70] sm:$0xff] %v2390_v28  ;;  %2428 = vmatmul.bf16.gmra.mxu1 %v2277_v44  ;;  %v1757_v48 = vsub.f32 1.5, %v1756_v62  ;;  %v1775_v10 = vmul.f32 %v2920_v31, %v1774_v52  ;;  %v2975_v44 = vld [vmem:[%s3126_s9 + $0x1e0] sm:$0xff]  ;;  %vm1781_vm5 = vmor %vm1779_vm1, %vm1780_vm2  ;;  %v2111_v40 = vadd.f32 %v4960_v0, %v4887_v47  ;;  %v1108_v23 = vsub.f32 %v2976_v25, %v4969_v59 }
 0x231   : > { %v2103_v4 = vpop.f32.mrf.mxu0  ;;  %v1768_v56 = vmul.f32 %v2916_v14, %v1767_v5  ;;  %v1785_v36 = vmul.f32 %v2922_v35, %v1784_v57  ;;  %v1107_v28 = vsub.f32 %v2975_v44, %v4964_v61  ;;  %vm1791_vm6 = vmor %vm1789_vm3, %vm1790_vm4 }
 0x232   : > { %v1758_v41 = vmul.f32 %v2918_v37, %v1757_v48  ;;  %v2104_v17 = vadd.f32 %v4960_v0, %v2103_v4  ;;  %v1776_v11 = vmul.f32 0.5, %v1775_v10  ;;  %v2216_v48 = vmax.f32 %v2109_v27, 0.0 }
 0x233   : > { %v1772_v21 = vsel %vm4982_vm14, %v2916_v14, %v1768_v56  ;;  %v1786_v18 = vmul.f32 0.5, %v1785_v36  ;;  %v2217_v22 = vmax.f32 %v2111_v40, 0.0  ;;  %v2119_v10 = vadd.f32 %v4960_v0, %v4938_v50 }
 0x234   : > { %v1762_v20 = vsel %vm1761_vm15, %v2918_v37, %v1758_v41  ;;  %v1862_v39 = vmul.f32 %v1772_v21, %v1106_v26  ;;  %v4997_v38 = vpop.f32.mrf.mxu3  ;;  %v2214_v13 = vmax.f32 %v2104_v17, 0.0  ;;  %v1777_v6 = vsub.f32 1.5, %v1776_v11 }
 0x235   : > { %v2391_v46 = vpop.f32.mrf.mxu1  ;;  %v1861_v53 = vmul.f32 %v1762_v20, %v1105_v24  ;;  %v1787_v51 = vsub.f32 1.5, %v1786_v18  ;;  %v2279_v56 = vpack.c.bf16 %v2217_v22, %v2216_v48  ;;  %v2114_v21 = vadd.f32 %v4960_v0, %v4901_v33 }
 0x236   : > { %v2392_v9 = vadd.f32 %v4713_v1, %v2391_v46  ;;  %v1778_v4 = vmul.f32 %v2920_v31, %v1777_v6  ;;  %v479_v16 = vpop.xlane.xlu1 %478  ;;  %v2116_v20 = vadd.f32 %v4960_v0, %v4921_v30  ;;  %v2121_v36 = vadd.f32 %v4960_v0, %v4966_v49 }
 0x237   : > { %v1900_v54 = vpack.c.bf16 %v1862_v39, %v1861_v53  ;;  %v1788_v62 = vmul.f32 %v2922_v35, %v1787_v51  ;;  %v794_v61 = vmul.f32 0.03125, %v479_v16  ;;  %v2124_v40 = vadd.f32 %v4960_v0, %v4980_v42 }
 0x238   : > { %2528 = vst [vmem:[%s4725_s7 + $0x78] sm:$0xff] %v2392_v9  ;;  %v1782_v55 = vsel %vm1781_vm5, %v2920_v31, %v1778_v4  ;;  %v2221_v27 = vmax.f32 %v2121_v36, 0.0 }
 0x239   : > { %v2105_v3 = vpop.f32.mrf.mxu0  ;;  %2696 = vmatmul.msk.bf16.gmra.mxu3 %vm290_vm0, %v1900_v54  ;;  %v1792_v5 = vsel %vm1791_vm6, %v2922_v35, %v1788_v62  ;;  %v1863_v34 = vmul.f32 %v1782_v55, %v1107_v28  ;;  %v920_v8 = vmul.f32 %v794_v61, %v794_v61  ;;  %v1109_v30 = vsub.f32 %v4763_v15, %v794_v61 }
 0x23a   : > { %v2106_v32 = vadd.f32 %v4960_v0, %v2105_v3  ;;  %v1864_v47 = vmul.f32 %v1792_v5, %v1108_v23  ;;  %v2218_v3 = vmax.f32 %v2114_v21, 0.0  ;;  %v2220_v15 = vmax.f32 %v2119_v10, 0.0 }
 0x23b   : > { %v2222_v23 = vmax.f32 %v2124_v40, 0.0 }
 0x23c   : > { %v2215_v43 = vmax.f32 %v2106_v32, 0.0  ;;  %v5003_v63 = vpop.f32.mrf.mxu3  ;;  %v1901_v24 = vpack.c.bf16 %v1864_v47, %v1863_v34  ;;  %v2219_v32 = vmax.f32 %v2116_v20, 0.0  ;;  %v2281_v51 = vpack.c.bf16 %v2221_v27, %v2220_v15 }
 0x23d   : > { %v2394_v45 = vpop.f32.mrf.mxu1  ;;  %v2129_v42 = vadd.f32 %v4960_v0, %v5003_v63 }
 0x23e   : > { %v2395_v14 = vadd.f32 %v4713_v1, %v2394_v45  ;;  %v2278_v37 = vpack.c.bf16 %v2215_v43, %v2214_v13  ;;  %v2280_v45 = vpack.c.bf16 %v2219_v32, %v2218_v3 }
 0x23f   : > { %v2224_v22 = vmax.f32 %v2129_v42, 0.0 }
 0x240   : > { %2529 = vst [vmem:[%s4725_s7 + $0x80] sm:$0xff] %v2395_v14  ;;  %2433 = vmatmul.bf16.vlgmr.msra.gmra.mxu2 %v2278_v37 }
 0x244   : > { %v5015_v60 = vpop.f32.mrf.mxu3 }
 0x245   : > { %v2396_v19 = vpop.f32.mrf.mxu1 }
 0x246   : > { %v2397_v7 = vadd.f32 %v4713_v1, %v2396_v19  ;;  %v731_v1 = vpop.xlane.xlu2 %730 }
 0x247   : > { %v857_v29 = vmul.f32 0.03125, %v731_v1 }
 0x248   : > { %2530 = vst [vmem:[%s4725_s7 + $0x88] sm:$0xff] %v2397_v7  ;;  %v2126_v7 = vadd.f32 %v4960_v0, %v4997_v38  ;;  %v2131_v38 = vadd.f32 %v4960_v0, %v5015_v60 }
 0x249   : > { %v983_v46 = vsub.f32 %v857_v29, %v920_v8  ;;  %2697 = vmatmul.msk.bf16.gmra.mxu3 %vm290_vm0, %v1901_v24 }
 0x24a   : > { %v2223_v4 = vmax.f32 %v2126_v7, 0.0  ;;  %v2225_v47 = vmax.f32 %v2131_v38, 0.0 }
 0x24b   : > { %v1046_v41 = vmax.f32 %v983_v46, 0.0 }
 0x24c   : > { %v5025_v58 = vpop.f32.mrf.mxu3  ;;  %v2282_v61 = vpack.c.bf16 %v2223_v4, %v2222_v23  ;;  %v2283_v24 = vpack.c.bf16 %v2225_v47, %v2224_v22 }
 0x24d   : > { %v2399_v59 = vpop.f32.mrf.mxu1  ;;  %v1172_v12 = vadd.f32 1e-05, %v1046_v41  ;;  %v2134_v63 = vadd.f32 %v4960_v0, %v5025_v58 }
 0x24e   : > { %v2400_v26 = vadd.f32 %v5020_v2, %v2399_v59 }
 0x24f   : > { %2923 = vrsqrt.f32 %v1172_v12  ;;  %vm1799_vm7 = vweird.f32 %v1172_v12  ;;  %v2226_v46 = vmax.f32 %v2134_v63, 0.0 }
 0x250   : > { %2531 = vst [vmem:[%s4725_s7 + $0x90] sm:$0xff] %v2400_v26  ;;  %2438 = vmatmul.bf16.gmra.mxu2 %v2279_v56 }
 0x254   : > { %v5033_v53 = vpop.f32.mrf.mxu3 }
 0x255   : > { %v2401_v9 = vpop.f32.mrf.mxu1  ;;  %v2924_v39 = vpop.eup %2923  ;;  %v2136_v60 = vadd.f32 %v4960_v0, %v5033_v53 }
 0x256   : > { %v2402_v17 = vadd.f32 %v5020_v2, %v2401_v9  ;;  %v1794_v13 = vmul.f32 %v2924_v39, %v1172_v12  ;;  %vm1800_vm8 = vweird.f32 %v2924_v39 }
 0x257   : > { %vm1801_vm9 = vmor %vm1799_vm7, %vm1800_vm8  ;;  %v2227_v41 = vmax.f32 %v2136_v60, 0.0 }
 0x258   : > { %2532 = vst [vmem:[%s4725_s7 + $0x98] sm:$0xff] %v2402_v17  ;;  %v1795_v54 = vmul.f32 %v2924_v39, %v1794_v13 }
 0x259   : > { %v2284_v20 = vpack.c.bf16 %v2227_v41, %v2226_v46 }
 0x25a   : > { %v1796_v35 = vmul.f32 0.5, %v1795_v54 }
 0x25c   : > { %v1797_v33 = vsub.f32 1.5, %v1796_v35  ;;  %v5038_v14 = vpop.f32.mrf.mxu3 }
 0x25d   : > { %v2404_v43 = vpop.f32.mrf.mxu1  ;;  %v2139_v58 = vadd.f32 %v4960_v0, %v5038_v14 }
 0x25e   : > { %v2405_v31 = vadd.f32 %v5020_v2, %v2404_v43  ;;  %v1798_v37 = vmul.f32 %v2924_v39, %v1797_v33 }
 0x25f   : > { %v2228_v32 = vmax.f32 %v2139_v58, 0.0 }
 0x260   : > { %2533 = vst [vmem:[%s4725_s7 + $0xa0] sm:$0xff] %v2405_v31  ;;  %2443 = vmatmul.bf16.gmra.mxu2 %v2280_v45  ;;  %v1802_v57 = vsel %vm1801_vm9, %v2924_v39, %v1798_v37 }
 0x261   : > { %v1865_v18 = vmul.f32 %v1802_v57, %v1109_v30 }
 0x263   : > { %v1902_v6 = vpack.c.bf16 %v1865_v18, %v1865_v18 }
 0x264   : > { %v2140_v44 = vpop.f32.mrf.mxu3 }
 0x265   : > { %v2406_v52 = vpop.f32.mrf.mxu1  ;;  %2698 = vmatmul.msk.bf16.gmra.mxu3 %vm290_vm0, %v1902_v6  ;;  %v2141_v53 = vadd.f32 %v4960_v0, %v2140_v44 }
 0x266   : > { %v2407_v11 = vadd.f32 %v5020_v2, %v2406_v52 }
 0x267   : > { %v2229_v13 = vmax.f32 %v2141_v53, 0.0 }
 0x268   : > { %2534 = vst [vmem:[%s4725_s7 + $0xa8] sm:$0xff] %v2407_v11 }
 0x269   : > { %v2285_v45 = vpack.c.bf16 %v2229_v13, %v2228_v32 }
 0x26c   : > { %v2143_v50 = vpop.f32.mrf.mxu3 }
 0x26d   : > { %v2409_v28 = vpop.f32.mrf.mxu1  ;;  %v2144_v30 = vadd.f32 %v4960_v0, %v2143_v50 }
 0x26e   : > { %v2410_v19 = vadd.f32 %v5020_v2, %v2409_v28 }
 0x26f   : > { %v2230_v52 = vmax.f32 %v2144_v30, 0.0 }
 0x270   : > { %2535 = vst [vmem:[%s4725_s7 + $0xb0] sm:$0xff] %v2410_v19  ;;  %2448 = vmatmul.bf16.gmra.mxu2 %v2281_v51 }
 0x274   : > { %v2145_v62 = vpop.f32.mrf.mxu3 }
 0x275   : > { %v2411_v49 = vpop.f32.mrf.mxu1  ;;  %v2146_v14 = vadd.f32 %v4960_v0, %v2145_v62 }
 0x276   : > { %v2412_v25 = vadd.f32 %v5020_v2, %v2411_v49 }
 0x277   : > { %v2231_v57 = vmax.f32 %v2146_v14, 0.0 }
 0x278   : > { %2536 = vst [vmem:[%s4725_s7 + $0xb8] sm:$0xff] %v2412_v25 }
 0x279   : > { %v2286_v36 = vpack.c.bf16 %v2231_v57, %v2230_v52 }
 0x27c   : > { %v2148_v5 = vpop.f32.mrf.mxu3 }
 0x27d   : > { %v2414_v16 = vpop.f32.mrf.mxu1  ;;  %v2149_v6 = vadd.f32 %v4960_v0, %v2148_v5 }
 0x27e   : > { %v2415_v55 = vadd.f32 %v5020_v2, %v2414_v16 }
 0x27f   : > { %v2232_v44 = vmax.f32 %v2149_v6, 0.0 }
 0x280   : > { %2537 = vst [vmem:[%s4725_s7 + $0xc0] sm:$0xff] %v2415_v55  ;;  %2453 = vmatmul.bf16.gmra.mxu2 %v2282_v61 }
 0x284   : > { %v2150_v8 = vpop.f32.mrf.mxu3 }
 0x285   : > { %v2416_v34 = vpop.f32.mrf.mxu1  ;;  %v2151_v15 = vadd.f32 %v4960_v0, %v2150_v8 }
 0x286   : > { %v2417_v48 = vadd.f32 %v5020_v2, %v2416_v34 }
 0x287   : > { %v2233_v28 = vmax.f32 %v2151_v15, 0.0 }
 0x288   : > { %2538 = vst [vmem:[%s4725_s7 + $0xc8] sm:$0xff] %v2417_v48 }
 0x289   : > { %v2287_v50 = vpack.c.bf16 %v2233_v28, %v2232_v44 }
 0x28c   : > { %v2153_v59 = vpop.f32.mrf.mxu3 }
 0x28d   : > { %v2419_v1 = vpop.f32.mrf.mxu1  ;;  %v2154_v25 = vadd.f32 %v4960_v0, %v2153_v59 }
 0x28e   : > { %v2420_v29 = vadd.f32 %v5020_v2, %v2419_v1 }
 0x28f   : > { %v2234_v4 = vmax.f32 %v2154_v25, 0.0 }
 0x290   : > { %2539 = vst [vmem:[%s4725_s7 + $0xd0] sm:$0xff] %v2420_v29  ;;  %2458 = vmatmul.bf16.gmra.mxu2 %v2283_v24 }
 0x294   : > { %v2155_v12 = vpop.f32.mrf.mxu3 }
 0x295   : > { %v2421_v26 = vpop.f32.mrf.mxu1  ;;  %v2156_v23 = vadd.f32 %v4960_v0, %v2155_v12 }
 0x296   : > { %v2422_v56 = vadd.f32 %v5020_v2, %v2421_v26 }
 0x297   : > { %v2235_v62 = vmax.f32 %v2156_v23, 0.0 }
 0x298   : > { %2540 = vst [vmem:[%s4725_s7 + $0xd8] sm:$0xff] %v2422_v56 }
 0x299   : > { %v2288_v5 = vpack.c.bf16 %v2235_v62, %v2234_v4 }
 0x29c   : > { %v2158_v17 = vpop.f32.mrf.mxu3 }
 0x29d   : > { %v2424_v9 = vpop.f32.mrf.mxu1  ;;  %v2159_v48 = vadd.f32 %v4960_v0, %v2158_v17 }
 0x29e   : > { %v2425_v21 = vadd.f32 %v5020_v2, %v2424_v9 }
 0x29f   : > { %v2236_v47 = vmax.f32 %v2159_v48, 0.0 }
 0x2a0   : > { %2541 = vst [vmem:[%s4725_s7 + $0xe0] sm:$0xff] %v2425_v21  ;;  %2463 = vmatmul.bf16.gmra.mxu2 %v2284_v20 }
 0x2a4   : > { %v2160_v43 = vpop.f32.mrf.mxu3 }
 0x2a5   : > { %v2426_v39 = vpop.f32.mrf.mxu1  ;;  %v2161_v22 = vadd.f32 %v4960_v0, %v2160_v43 }
 0x2a6   : > { %v2427_v3 = vadd.f32 %v5020_v2, %v2426_v39 }
 0x2a7   : > { %v2237_v8 = vmax.f32 %v2161_v22, 0.0 }
 0x2a8   : > { %2542 = vst [vmem:[%s4725_s7 + $0xe8] sm:$0xff] %v2427_v3 }
 0x2a9   : > { %v2289_v59 = vpack.c.bf16 %v2237_v8, %v2236_v47 }
 0x2ac   : > { %v2163_v35 = vpop.f32.mrf.mxu3 }
 0x2ad   : > { %v2429_v54 = vpop.f32.mrf.mxu1  ;;  %v2164_v56 = vadd.f32 %v4960_v0, %v2163_v35 }
 0x2ae   : > { %v2430_v31 = vadd.f32 %v5020_v2, %v2429_v54 }
 0x2af   : > { %v2238_v41 = vmax.f32 %v2164_v56, 0.0 }
 0x2b0   : > { %2543 = vst [vmem:[%s4725_s7 + $0xf0] sm:$0xff] %v2430_v31  ;;  %2468 = vmatmul.bf16.gmra.mxu2 %v2285_v45 }
 0x2b4   : > { %v2165_v10 = vpop.f32.mrf.mxu3 }
 0x2b5   : > { %v2431_v33 = vpop.f32.mrf.mxu1  ;;  %v2166_v46 = vadd.f32 %v4960_v0, %v2165_v10 }
 0x2b6   : > { %v2432_v37 = vadd.f32 %v5020_v2, %v2431_v33 }
 0x2b7   : > { %v2239_v12 = vmax.f32 %v2166_v46, 0.0 }
 0x2b8   : > { %2544 = vst [vmem:[%s4725_s7 + $0xf8] sm:$0xff] %v2432_v37 }
 0x2b9   : > { %v2290_v20 = vpack.c.bf16 %v2239_v12, %v2238_v41 }
 0x2bc   : > { %v2168_v27 = vpop.f32.mrf.mxu3 }
 0x2bd   : > { %v2169_v58 = vadd.f32 %v4960_v0, %v2168_v27 }
 0x2bf   : > { %v2240_v3 = vmax.f32 %v2169_v58, 0.0 }
 0x2c0   : > { %2473 = vmatmul.bf16.gmra.mxu2 %v2286_v36 }
 0x2c3   : > { %v2434_v11 = vpop.f32.mrf.mxu2 }
 0x2c4   : > { %v2435_v18 = vadd.f32 %v5020_v2, %v2434_v11  ;;  %v2170_v49 = vpop.f32.mrf.mxu3 }
 0x2c5   : > { %v2171_v53 = vadd.f32 %v4960_v0, %v2170_v49 }
 0x2c6   : > { %2545 = vst [vmem:[%s4725_s7 + $0x100] sm:$0xff] %v2435_v18 }
 0x2c7   : > { %v2241_v32 = vmax.f32 %v2171_v53, 0.0 }
 0x2c9   : > { %v2291_v54 = vpack.c.bf16 %v2241_v32, %v2240_v3 }
 0x2cb   : > { %v2436_v19 = vpop.f32.mrf.mxu2 }
 0x2cc   : > { %v2437_v51 = vadd.f32 %v5020_v2, %v2436_v19  ;;  %v2173_v55 = vpop.f32.mrf.mxu3 }
 0x2cd   : > { %v2174_v35 = vadd.f32 %v4960_v0, %v2173_v55 }
 0x2ce   : > { %2546 = vst [vmem:[%s4725_s7 + $0x108] sm:$0xff] %v2437_v51 }
 0x2cf   : > { %v2242_v30 = vmax.f32 %v2174_v35, 0.0 }
 0x2d0   : > { %2478 = vmatmul.bf16.gmra.mxu2 %v2287_v50 }
 0x2d3   : > { %v2439_v40 = vpop.f32.mrf.mxu2 }
 0x2d4   : > { %v2440_v7 = vadd.f32 %v5020_v2, %v2439_v40  ;;  %v2175_v38 = vpop.f32.mrf.mxu3 }
 0x2d5   : > { %v2176_v33 = vadd.f32 %v4960_v0, %v2175_v38 }
 0x2d6   : > { %2547 = vst [vmem:[%s4725_s7 + $0x110] sm:$0xff] %v2440_v7 }
 0x2d7   : > { %v2243_v14 = vmax.f32 %v2176_v33, 0.0 }
 0x2d9   : > { %v2292_v57 = vpack.c.bf16 %v2243_v14, %v2242_v30 }
 0x2db   : > { %v2441_v16 = vpop.f32.mrf.mxu2 }
 0x2dc   : > { %v2442_v61 = vadd.f32 %v5020_v2, %v2441_v16 }
 0x2de   : > { %2548 = vst [vmem:[%s4725_s7 + $0x118] sm:$0xff] %v2442_v61 }
 0x2e0   : > { %2483 = vmatmul.bf16.gmra.mxu2 %v2288_v5 }
 0x2e3   : > { %v2444_v34 = vpop.f32.mrf.mxu2 }
 0x2e4   : > { %v2445_v42 = vadd.f32 %v5020_v2, %v2444_v34 }
 0x2e6   : > { %2549 = vst [vmem:[%s4725_s7 + $0x120] sm:$0xff] %v2445_v42 }
 0x2e8   : > { %v2178_v24 = vpop.f32.mrf.mxu3 }
 0x2e9   : > { %v2179_v11 = vadd.f32 %v4960_v0, %v2178_v24 }
 0x2eb   : > { %v2446_v1 = vpop.f32.mrf.mxu2  ;;  %v2244_v18 = vmax.f32 %v2179_v11, 0.0 }
 0x2ec   : > { %v2447_v29 = vadd.f32 %v5020_v2, %v2446_v1 }
 0x2ed   : > { %v2293_v27 = vpack.c.bf16 %v2244_v18, %v2244_v18 }
 0x2ee   : > { %2550 = vst [vmem:[%s4725_s7 + $0x128] sm:$0xff] %v2447_v29 }
 0x2f0   : > { %2488 = vmatmul.bf16.gmra.mxu2 %v2289_v59  ;;  %v2180_v60 = vpop.f32.mrf.mxu3 }
 0x2f3   : > { %v2449_v26 = vpop.f32.mrf.mxu2 }
 0x2f4   : > { %v2450_v63 = vadd.f32 %v5020_v2, %v2449_v26 }
 0x2f6   : > { %2551 = vst [vmem:[%s4725_s7 + $0x130] sm:$0xff] %v2450_v63 }
 0x2fb   : > { %v2451_v9 = vpop.f32.mrf.mxu2 }
 0x2fc   : > { %v2452_v21 = vadd.f32 %v5020_v2, %v2451_v9 }
 0x2fe   : > { %2552 = vst [vmem:[%s4725_s7 + $0x138] sm:$0xff] %v2452_v21 }
 0x300   : > { %2493 = vmatmul.bf16.gmra.mxu2 %v2290_v20 }
 0x303   : > { %v2454_v17 = vpop.f32.mrf.mxu2 }
 0x304   : > { %v2455_v39 = vadd.f32 %v5020_v2, %v2454_v17 }
 0x306   : > { %2553 = vst [vmem:[%s4725_s7 + $0x140] sm:$0xff] %v2455_v39 }
 0x30b   : > { %v2456_v13 = vpop.f32.mrf.mxu2 }
 0x30c   : > { %v2457_v43 = vadd.f32 %v5020_v2, %v2456_v13 }
 0x30e   : > { %2554 = vst [vmem:[%s4725_s7 + $0x148] sm:$0xff] %v2457_v43 }
 0x310   : > { %2498 = vmatmul.bf16.gmra.mxu2 %v2291_v54 }
 0x313   : > { %v2459_v31 = vpop.f32.mrf.mxu2 }
 0x314   : > { %v2460_v45 = vadd.f32 %v5020_v2, %v2459_v31 }
 0x316   : > { %2555 = vst [vmem:[%s4725_s7 + $0x150] sm:$0xff] %v2460_v45 }
 0x31b   : > { %v2461_v37 = vpop.f32.mrf.mxu2 }
 0x31c   : > { %v2462_v52 = vadd.f32 %v5020_v2, %v2461_v37 }
 0x31e   : > { %2556 = vst [vmem:[%s4725_s7 + $0x158] sm:$0xff] %v2462_v52 }
 0x320   : > { %2503 = vmatmul.bf16.gmra.mxu2 %v2292_v57 }
 0x323   : > { %v2464_v10 = vpop.f32.mrf.mxu2 }
 0x324   : > { %v2465_v36 = vadd.f32 %v5020_v2, %v2464_v10 }
 0x326   : > { %2557 = vst [vmem:[%s4725_s7 + $0x160] sm:$0xff] %v2465_v36 }
 0x32b   : > { %v2466_v6 = vpop.f32.mrf.mxu2 }
 0x32c   : > { %v2467_v15 = vadd.f32 %v5020_v2, %v2466_v6 }
 0x32e   : > { %2558 = vst [vmem:[%s4725_s7 + $0x168] sm:$0xff] %v2467_v15 }
 0x330   : > { %2508 = vmatmul.bf16.gmra.mxu2 %v2293_v27 }
 0x333   : > { %v2469_v44 = vpop.f32.mrf.mxu2 }
 0x334   : > { %v2470_v28 = vadd.f32 %v5020_v2, %v2469_v44 }
 0x336   : > { %2559 = vst [vmem:[%s4725_s7 + $0x170] sm:$0xff] %v2470_v28 }
 0x33b   : > { %v2471_v19 = vpop.f32.mrf.mxu2 }
 0x33c   : > { %v2472_v51 = vadd.f32 %v5020_v2, %v2471_v19 }
 0x33e   : > { %2560 = vst [vmem:[%s4725_s7 + $0x178] sm:$0xff] %v2472_v51 }
 0x343   : > { %v2474_v0 = vpop.f32.mrf.mxu2 }
 0x344   : > { %v2475_v50 = vadd.f32 %v5020_v2, %v2474_v0 }
 0x346   : > { %2561 = vst [vmem:[%s4725_s7 + $0x180] sm:$0xff] %v2475_v50 }
 0x34b   : > { %v2476_v49 = vpop.f32.mrf.mxu2 }
 0x34c   : > { %v2477_v40 = vadd.f32 %v5020_v2, %v2476_v49 }
 0x34e   : > { %2562 = vst [vmem:[%s4725_s7 + $0x188] sm:$0xff] %v2477_v40 }
 0x353   : > { %v2479_v7 = vpop.f32.mrf.mxu2 }
 0x354   : > { %v2480_v25 = vadd.f32 %v5020_v2, %v2479_v7 }
 0x356   : > { %2563 = vst [vmem:[%s4725_s7 + $0x190] sm:$0xff] %v2480_v25 }
 0x35b   : > { %v2481_v23 = vpop.f32.mrf.mxu2 }
 0x35c   : > { %v2482_v4 = vadd.f32 %v5020_v2, %v2481_v23 }
 0x35e   : > { %2564 = vst [vmem:[%s4725_s7 + $0x198] sm:$0xff] %v2482_v4 }
 0x363   : > { %v2484_v62 = vpop.f32.mrf.mxu2 }
 0x364   : > { %v2485_v16 = vadd.f32 %v5020_v2, %v2484_v62 }
 0x366   : > { %2565 = vst [vmem:[%s4725_s7 + $0x1a0] sm:$0xff] %v2485_v16 }
 0x36b   : > { %v2486_v55 = vpop.f32.mrf.mxu2 }
 0x36c   : > { %v2487_v61 = vadd.f32 %v5020_v2, %v2486_v55 }
 0x36e   : > { %2566 = vst [vmem:[%s4725_s7 + $0x1a8] sm:$0xff] %v2487_v61 }
 0x373   : > { %v2489_v5 = vpop.f32.mrf.mxu2 }
 0x374   : > { %v2490_v34 = vadd.f32 %v5020_v2, %v2489_v5 }
 0x376   : > { %2567 = vst [vmem:[%s4725_s7 + $0x1b0] sm:$0xff] %v2490_v34 }
 0x37b   : > { %v2491_v42 = vpop.f32.mrf.mxu2 }
 0x37c   : > { %v2492_v38 = vadd.f32 %v5020_v2, %v2491_v42 }
 0x37e   : > { %2568 = vst [vmem:[%s4725_s7 + $0x1b8] sm:$0xff] %v2492_v38 }
 0x383   : > { %v2494_v48 = vpop.f32.mrf.mxu2 }
 0x384   : > { %v2495_v22 = vadd.f32 %v5020_v2, %v2494_v48 }
 0x386   : > { %2569 = vst [vmem:[%s4725_s7 + $0x1c0] sm:$0xff] %v2495_v22 }
 0x38b   : > { %v2496_v47 = vpop.f32.mrf.mxu2 }
 0x38c   : > { %v2497_v8 = vadd.f32 %v5020_v2, %v2496_v47 }
 0x38e   : > { %2570 = vst [vmem:[%s4725_s7 + $0x1c8] sm:$0xff] %v2497_v8 }
 0x393   : > { %v2499_v1 = vpop.f32.mrf.mxu2 }
 0x394   : > { %v2500_v29 = vadd.f32 %v5020_v2, %v2499_v1 }
 0x396   : > { %2571 = vst [vmem:[%s4725_s7 + $0x1d0] sm:$0xff] %v2500_v29 }
 0x39b   : > { %v2501_v24 = vpop.f32.mrf.mxu2 }
 0x39c   : > { %v2502_v59 = vadd.f32 %v5020_v2, %v2501_v24 }
 0x39e   : > { %2572 = vst [vmem:[%s4725_s7 + $0x1d8] sm:$0xff] %v2502_v59 }
 0x3a3   : > { %v2504_v26 = vpop.f32.mrf.mxu2 }
 0x3a4   : > { %v2505_v63 = vadd.f32 %v5020_v2, %v2504_v26 }
 0x3a6   : > { %2573 = vst [vmem:[%s4725_s7 + $0x1e0] sm:$0xff] %v2505_v63 }
 0x3ab   : > { %v2506_v60 = vpop.f32.mrf.mxu2 }
 0x3ac   : > { %v2507_v56 = vadd.f32 %v5020_v2, %v2506_v60 }
 0x3ae   : > { %2574 = vst [vmem:[%s4725_s7 + $0x1e8] sm:$0xff] %v2507_v56 }
 0x3b3   : > { %v2509_v46 = vpop.f32.mrf.mxu2 }
 0x3b4   : > { %v2510_v41 = vadd.f32 %v5020_v2, %v2509_v46 }
 0x3b6   : > { %2575 = vst [vmem:[%s4725_s7 + $0x1f0] sm:$0xff] %v2510_v41 }
 0x3b7   : > { %3005 = shalt.err (!%p3002_p3)
}
 0x3b8   : > { %s3042_s25 = smov 128   ;;  %s3043_s7 = smov 8  }
 0x3b9   : > { %2756 = dma.vmem_to_hbm [thread:$0]  (%p3112_p5), %s2590_s16, 8064, %s2592_s17, %s2577_s23, %s3042_s25, %s3042_s25, %s3043_s7  }
 0x3bb   : > { %v2511_v2 = vpop.f32.mrf.mxu2 }
 0x3bc PF: > { %p2762_p4 = scmp.ge.s32.totalorder %s3040_s21, 2  ;;  %s2606_s11 = sand.u32 1, %s3028_s18  }
 0x3bd   : > { %s2607_s12 = scalar_lea.sflag [#allocation3], %s2606_s11 }
 0x3be   : > { %p2759_p7 = pnand %p2762_p4, %p3116_p6 }
 0x3c0   : > { %p2760_p8 = pneg %p2759_p7 }
 0x3c2   : > { %3023 = dma.done.wait (%p2760_p8), %s2607_s12, 8064  }
 0x3c3   : > { %3025 = vsyncadd (%p2760_p8), %s2607_s12, 4294959232  ;;  %p15_p9 = scmp.ge.s32.totalorder %s3099_s24, 4   ;;  %s5301_s18 = smov %s3032_s19 }
 0x3c4   : > { %s5302_s19 = smov %s3036_s20  ;;  %s5303_s20 = smov %s3110_s27 }
 0x3c5   : > { %s5304_s21 = smov %s3099_s24  ;;  %17 = sbr.rel (!%p15_p9) target bundleno = 3 (0x3), region = 75 }
 0x3ca   :  { %2613 = vsyncpa [#allocation3], 1 }
 0x3cb   :  { %2615 = vsyncpa [#allocation3 + $0x1], 1 }

// kernel: tpu_custom_call.1
= control target key start
LH: loop header
LB: loop body
LE: loop exit
PB: predicated region body
PF: predicated region fallthrough
CT: control target
= control target key end

     0   :  { %10 = vsyncpa [#allocation3], 0  ;;  %s5193_s0 = inlined_call_operand.vmem [shape: f32[1008,32], index: 0, kind: input, shape index: {}]   ;;  %s5194_s1 = inlined_call_operand.vmem [shape: bf16[32,128], index: 1, kind: input, shape index: {}]   ;;  %s5195_s2 = inlined_call_operand.vmem [shape: f32[1,128], index: 2, kind: input, shape index: {}]   ;;  %s5196_s3 = inlined_call_operand.vmem [shape: bf16[128,128], index: 3, kind: input, shape index: {}]   ;;  %s5197_s4 = inlined_call_operand.vmem [shape: f32[1,128], index: 4, kind: input, shape index: {}]   ;;  %s5198_s5 = inlined_call_operand.hbm [shape: f32[1008,128], index: 5, kind: output, shape index: {}]  }
   0x1   :  { %12 = vsyncpa [#allocation3 + $0x1], 0  ;;  %s3074_s18 = smov 0   ;;  %s3076_s19 = smov 0  }
   0x2   :  { %s3078_s20 = smov 0   ;;  %s3080_s21 = smov 0  }
   0x3 LB: > { %s3095_s22 = sadd.s32 4294967295, %s3040_s21   ;;  %s2654_s23 = sadd.s32 4294967294, %s3040_s21   ;;  %s3040_s21 = sphi %s3080_s21, %s5304_s21   ;;  %s3036_s20 = sphi %s3078_s20, %s5303_s20   ;;  %s3032_s19 = sphi %s3076_s19, %s5302_s19   ;;  %s3028_s18 = sphi %s3074_s18, %s5301_s18  }
   0x4   : > { %s3099_s24 = sadd.s32 1, %s3040_s21   ;;  %s135_s25 = sadd.s32 1, %s3036_s20 }
   0x5   : > { %s132_s26 = ssub.s32 %s3040_s21, %s3099_s24  ;;  %p145_p0 = scmp.ne.s32.totalorder %s3036_s20, %s3032_s19 }
   0x6   : > { %p133_p1 = scmp.eq.s32.totalorder %s132_s26, 0  ;;  %p146_p2 = scmp.eq.s32.totalorder %s3095_s22, 1 }
   0x7   : > { %p151_p3 = scmp.ne.s32.totalorder %s3032_s19, %s3028_s18  ;;  %p152_p4 = scmp.eq.s32.totalorder %s2654_s23, 1 }
   0x8   : > { %s3110_s27 = scalar_select %p133_p1, %s3036_s20, %s135_s25  }
   0x9   : > { %p3112_p5 = por %p146_p2, %p145_p0  ;;  %p3116_p6 = por %p152_p4, %p151_p3 }
   0xa   : > { %p2657_p7 = scmp.ge.s32.totalorder %s3040_s21, 1  ;;  %p191_p8 = scmp.lt.s32.totalorder %s3040_s21, 3 }
   0xc   : > { %p192_p9 = pnand %p2657_p7, %p191_p8 }
   0xd   : > { %s219_s30 = smul.u32 (!%p192_p9), 63, %s3095_s22  ;;  %s216_s25 = sand.u32 (!%p192_p9), 1, %s3032_s19  }
   0xe   : > { %195 = sbr.rel (%p192_p9) target bundleno = 956 (0x3bc), region = 40  ;;  %s2577_s23 = scalar_lea.sflag (!%p192_p9), [#allocation3], %s216_s25 }
   0xf   : > { %p220_p10 = scmp.lt.s32.totalorder (!%p192_p9), %s219_s30, 125  ;;  %s2755_s26 = smul.u32 (!%p192_p9), 504, %s216_s25 }
  0x10   : > { %s2744_s12 = smul.u32 (!%p192_p9), 504, %s3095_s22  ;;  %s2998_s8 = scalar_lea.hbm (!%p192_p9), %s5198_s5, 1008 }
  0x11   : > { %s4725_s7 = scalar_lea.vmem (!%p192_p9), [#allocation2], %s2755_s26 }
  0x12   : > { %s2588_s15 = scalar_lea.hbm (!%p192_p9), %s5198_s5, %s2744_s12  ;;  %s2589_s16 = sshll.u32 (!%p192_p9), %s4725_s7, 4  ;;  %s2590_s16 = int_to_ptr.vmem [resolvable:$true] %s2589_s16 }
  0x13   : > { %s5306_s30 = smov (!%p220_p10, %s219_s30), 125  ;;  %vm290_vm0 = vcmask 261120   ;;  %s2591_s17 = sshll.u32 %s2588_s15, 4  ;;  %s2592_s17 = int_to_ptr.hbm [resolvable:$true] %s2591_s17 }
  0x14   : > { %s2658_s6 = sshll.u32 %s5306_s30, 3  ;;  %s2992_s22 = sshra.s32 %s2592_s17, 4  ;;  %s2993_s22 = int_to_ptr.hbm [resolvable:$true] %s2992_s22 }
  0x15   : > { %s3126_s9 = scalar_lea.vmem %s5193_s0, %s2658_s6  ;;  %s2994_s26 = scalar_lea.hbm %s2993_s22, 504 }
  0x16   : > { %v3129_v0 = vld [vmem:[%s3126_s9] sm:$0xff]  ;;  %v3132_v1 = vld [vmem:[%s3126_s9 + $0x10] sm:$0xff]  ;;  %v3141_v5 = vld [vmem:[%s3126_s9 + $0x8] sm:$0xff]  ;;  %p2995_p11 = scmp.ne.s32.totalorder %s2993_s22, %s2994_s26  ;;  %p2999_p0 = scmp.lt.s32.totalorder %s2993_s22, %s5198_s5 }
  0x17   : > { %v291_v2 = vsel %vm290_vm0, %v3129_v0, 0.0  ;;  %v297_v3 = vsel %vm290_vm0, %v3132_v1, 0.0  ;;  %v480_v4 = vmul.f32 %v3129_v0, %v3129_v0  ;;  %v3145_v7 = vld [vmem:[%s3126_s9 + $0x18] sm:$0xff]  ;;  %v481_v8 = vmul.f32 %v3141_v5, %v3141_v5  ;;  %v3157_v13 = vld [vmem:[%s3126_s9 + $0x20] sm:$0xff]  ;;  %v3165_v17 = vld [vmem:[%s3126_s9 + $0x28] sm:$0xff]  ;;  %p3000_p1 = scmp.lt.s32.totalorder %s2998_s8, %s2994_s26 }
  0x18   : > { %292 = vadd.xlane.f32.xlu0 %v291_v2  ;;  %298 = vadd.xlane.f32.xlu2 %v297_v3  ;;  %v294_v9 = vsel %vm290_vm0, %v3141_v5, 0.0  ;;  %v300_v10 = vsel %vm290_vm0, %v3145_v7, 0.0  ;;  %v482_v12 = vmul.f32 %v3132_v1, %v3132_v1  ;;  %v483_v14 = vmul.f32 %v3145_v7, %v3145_v7  ;;  %v3176_v23 = vld [vmem:[%s3126_s9 + $0x30] sm:$0xff]  ;;  %v3182_v26 = vld [vmem:[%s3126_s9 + $0x38] sm:$0xff]  ;;  %v3192_v31 = vld [vmem:[%s3126_s9 + $0x48] sm:$0xff]  ;;  %p2996_p12 = pnand %p2995_p11, %p3112_p5 }
  0x19   : > { %v543_v6 = vsel %vm290_vm0, %v480_v4, 0.0  ;;  %v546_v11 = vsel %vm290_vm0, %v481_v8, 0.0  ;;  %v303_v16 = vsel %vm290_vm0, %v3157_v13, 0.0  ;;  %v485_v19 = vmul.f32 %v3165_v17, %v3165_v17  ;;  %v3195_v32 = vld [vmem:[%s3126_s9 + $0x40] sm:$0xff]  ;;  %v3205_v37 = vld [vmem:[%s3126_s9 + $0x50] sm:$0xff]  ;;  %v3213_v41 = vld [vmem:[%s3126_s9 + $0x58] sm:$0xff]  ;;  %p3001_p2 = por %p3000_p1, %p2999_p0 }
  0x1a   : > { %544 = vadd.xlane.f32.xlu1 %v543_v6  ;;  %v549_v15 = vsel %vm290_vm0, %v482_v12, 0.0  ;;  %v552_v18 = vsel %vm290_vm0, %v483_v14, 0.0  ;;  %v484_v20 = vmul.f32 %v3157_v13, %v3157_v13  ;;  %v306_v21 = vsel %vm290_vm0, %v3165_v17, 0.0  ;;  %v239_v48 = vld [vmem:[%s3126_s9 + $0x60] sm:$0xff]  ;;  %v240_v50 = vld [vmem:[%s3126_s9 + $0x68] sm:$0xff]  ;;  %v242_v55 = vld [vmem:[%s3126_s9 + $0x78] sm:$0xff]  ;;  %p2997_p13 = pneg %p2996_p12 }
  0x1b   : > { %v558_v22 = vsel %vm290_vm0, %v485_v19, 0.0  ;;  %v486_v25 = vmul.f32 %v3176_v23, %v3176_v23  ;;  %v309_v27 = vsel %vm290_vm0, %v3176_v23, 0.0  ;;  %v312_v29 = vsel %vm290_vm0, %v3182_v26, 0.0  ;;  %v241_v56 = vld [vmem:[%s3126_s9 + $0x70] sm:$0xff]  ;;  %v243_v61 = vld [vmem:[%s3126_s9 + $0x80] sm:$0xff]  ;;  %v244_v3 = vld [vmem:[%s3126_s9 + $0x88] sm:$0xff] }
  0x1c   : > { %v555_v24 = vsel %vm290_vm0, %v484_v20, 0.0  ;;  %v487_v30 = vmul.f32 %v3182_v26, %v3182_v26  ;;  %v318_v34 = vsel %vm290_vm0, %v3192_v31, 0.0  ;;  %v315_v35 = vsel %vm290_vm0, %v3195_v32, 0.0  ;;  %v245_v12 = vld [vmem:[%s3126_s9 + $0x90] sm:$0xff]  ;;  %p3002_p3 = pnand %p3001_p2, %p2997_p13 }
  0x1d   : > { %v561_v28 = vsel %vm290_vm0, %v486_v25, 0.0  ;;  %v488_v36 = vmul.f32 %v3195_v32, %v3195_v32  ;;  %v489_v38 = vmul.f32 %v3192_v31, %v3192_v31  ;;  %v321_v40 = vsel %vm290_vm0, %v3205_v37, 0.0  ;;  %v248_v25 = vld [vmem:[%s3126_s9 + $0xa8] sm:$0xff] }
  0x1e   : > { %v564_v33 = vsel %vm290_vm0, %v487_v30, 0.0  ;;  %v491_v43 = vmul.f32 %v3213_v41, %v3213_v41  ;;  %v490_v44 = vmul.f32 %v3205_v37, %v3205_v37  ;;  %v324_v45 = vsel %vm290_vm0, %v3213_v41, 0.0 }
  0x1f   : > { %v567_v39 = vsel %vm290_vm0, %v488_v36, 0.0  ;;  %v570_v42 = vsel %vm290_vm0, %v489_v38, 0.0  ;;  %v492_v49 = vmul.f32 %v239_v48, %v239_v48  ;;  %v327_v51 = vsel %vm290_vm0, %v239_v48, 0.0  ;;  %v249_v36 = vld [vmem:[%s3126_s9 + $0xb0] sm:$0xff] }
  0x20   : > { %295 = vadd.xlane.f32.xlu0 %v294_v9  ;;  %301 = vadd.xlane.f32.xlu2 %v300_v10  ;;  %v576_v46 = vsel %vm290_vm0, %v491_v43, 0.0  ;;  %v573_v47 = vsel %vm290_vm0, %v490_v44, 0.0  ;;  %v330_v53 = vsel %vm290_vm0, %v240_v50, 0.0  ;;  %v493_v54 = vmul.f32 %v240_v50, %v240_v50 }
  0x21   : > { %v579_v52 = vsel %vm290_vm0, %v492_v49, 0.0  ;;  %v336_v58 = vsel %vm290_vm0, %v242_v55, 0.0  ;;  %v333_v59 = vsel %vm290_vm0, %v241_v56, 0.0  ;;  %v494_v60 = vmul.f32 %v241_v56, %v241_v56 }
  0x22   : > { %547 = vadd.xlane.f32.xlu1 %v546_v11  ;;  %v582_v57 = vsel %vm290_vm0, %v493_v54, 0.0  ;;  %v495_v62 = vmul.f32 %v242_v55, %v242_v55  ;;  %v339_v2 = vsel %vm290_vm0, %v243_v61, 0.0  ;;  %v497_v6 = vmul.f32 %v244_v3, %v244_v3 }
  0x23   : > { %v585_v63 = vsel %vm290_vm0, %v494_v60, 0.0  ;;  %v496_v8 = vmul.f32 %v243_v61, %v243_v61  ;;  %v342_v9 = vsel %vm290_vm0, %v244_v3, 0.0  ;;  %v498_v14 = vmul.f32 %v245_v12, %v245_v12 }
  0x24   : > { %v588_v4 = vsel %vm290_vm0, %v495_v62, 0.0  ;;  %v594_v10 = vsel %vm290_vm0, %v497_v6, 0.0  ;;  %v502_v50 = vmul.f32 %v249_v36, %v249_v36 }
  0x25   : > { %v591_v11 = vsel %vm290_vm0, %v496_v8, 0.0 }
  0x26   : > { %v609_v56 = vsel %vm290_vm0, %v502_v50, 0.0 }
  0x28   : > { %550 = vadd.xlane.f32.xlu0 %v549_v15  ;;  %304 = vadd.xlane.f32.xlu2 %v303_v16  ;;  %v246_v15 = vld [vmem:[%s3126_s9 + $0x98] sm:$0xff]  ;;  %v345_v16 = vsel %vm290_vm0, %v245_v12, 0.0 }
  0x29   : > { %v348_v19 = vsel %vm290_vm0, %v246_v15, 0.0  ;;  %v499_v20 = vmul.f32 %v246_v15, %v246_v15 }
  0x2a   : > { %553 = vadd.xlane.f32.xlu1 %v552_v18  ;;  %v597_v18 = vsel %vm290_vm0, %v498_v14, 0.0  ;;  %v251_v14 = vld [vmem:[%s3126_s9 + $0xc0] sm:$0xff] }
  0x30   : > { %307 = vadd.xlane.f32.xlu0 %v306_v21  ;;  %559 = vadd.xlane.f32.xlu2 %v558_v22  ;;  %v247_v21 = vld [vmem:[%s3126_s9 + $0xa0] sm:$0xff]  ;;  %v600_v22 = vsel %vm290_vm0, %v499_v20, 0.0 }
  0x32   : > { %556 = vadd.xlane.f32.xlu1 %v555_v24  ;;  %v351_v24 = vsel %vm290_vm0, %v247_v21, 0.0 }
  0x38   : > { %310 = vadd.xlane.f32.xlu0 %v309_v27  ;;  %562 = vadd.xlane.f32.xlu2 %v561_v28  ;;  %v354_v27 = vsel %vm290_vm0, %v248_v25, 0.0  ;;  %v500_v28 = vmul.f32 %v247_v21, %v247_v21 }
  0x3a   : > { %313 = vadd.xlane.f32.xlu1 %v312_v29  ;;  %v501_v29 = vmul.f32 %v248_v25, %v248_v25  ;;  %v603_v30 = vsel %vm290_vm0, %v500_v28, 0.0 }
  0x40   : > { %565 = vadd.xlane.f32.xlu0 %v564_v33  ;;  %319 = vadd.xlane.f32.xlu2 %v318_v34  ;;  %v606_v33 = vsel %vm290_vm0, %v501_v29, 0.0 }
  0x42   : > { %316 = vadd.xlane.f32.xlu1 %v315_v35 }
  0x48   : > { %568 = vadd.xlane.f32.xlu0 %v567_v39  ;;  %322 = vadd.xlane.f32.xlu2 %v321_v40  ;;  %v357_v39 = vsel %vm290_vm0, %v249_v36, 0.0  ;;  %v2735_v40 = vld [vmem:[%s5194_s1 + $0x8] sm:$0xff] }
  0x49   : > { %2020 = vmatpush.bf16.msra.mxu0 %v2735_v40  ;;  %2745 = vmatpush.bf16.msra.mxu3 %v2735_v40 }
  0x4a   : > { %571 = vadd.xlane.f32.xlu1 %v570_v42 }
  0x50   : > { %325 = vadd.xlane.f32.xlu0 %v324_v45  ;;  %577 = vadd.xlane.f32.xlu2 %v576_v46  ;;  %v2734_v45 = vld [vmem:[%s5194_s1] sm:$0xff] }
  0x51   : > { %2021 = vmatpush.bf16.msra.mxu0 %v2734_v45  ;;  %2746 = vmatpush.bf16.msra.mxu3 %v2734_v45 }
  0x52   : > { %574 = vadd.xlane.f32.xlu1 %v573_v47  ;;  %v250_v47 = vld [vmem:[%s3126_s9 + $0xb8] sm:$0xff] }
  0x53   : > { %v360_v48 = vsel %vm290_vm0, %v250_v47, 0.0  ;;  %v503_v49 = vmul.f32 %v250_v47, %v250_v47 }
  0x55   : > { %v612_v55 = vsel %vm290_vm0, %v503_v49, 0.0 }
  0x58   : > { %328 = vadd.xlane.f32.xlu0 %v327_v51  ;;  %580 = vadd.xlane.f32.xlu2 %v579_v52 }
  0x5a   : > { %331 = vadd.xlane.f32.xlu1 %v330_v53 }
  0x60   : > { %583 = vadd.xlane.f32.xlu0 %v582_v57  ;;  %337 = vadd.xlane.f32.xlu2 %v336_v58 }
  0x62   : > { %334 = vadd.xlane.f32.xlu1 %v333_v59 }
  0x68   : > { %586 = vadd.xlane.f32.xlu0 %v585_v63  ;;  %340 = vadd.xlane.f32.xlu2 %v339_v2 }
  0x6a   : > { %589 = vadd.xlane.f32.xlu1 %v588_v4 }
  0x70   : > { %343 = vadd.xlane.f32.xlu0 %v342_v9  ;;  %595 = vadd.xlane.f32.xlu2 %v594_v10 }
  0x72   : > { %592 = vadd.xlane.f32.xlu1 %v591_v11 }
  0x78   : > { %346 = vadd.xlane.f32.xlu0 %v345_v16  ;;  %598 = vadd.xlane.f32.xlu2 %v597_v18 }
  0x7a   : > { %349 = vadd.xlane.f32.xlu1 %v348_v19 }
  0x80   : > { %601 = vadd.xlane.f32.xlu0 %v600_v22  ;;  %355 = vadd.xlane.f32.xlu2 %v354_v27  ;;  %v363_v22 = vsel %vm290_vm0, %v251_v14, 0.0 }
  0x82   : > { %352 = vadd.xlane.f32.xlu1 %v351_v24 }
  0x88   : > { %604 = vadd.xlane.f32.xlu0 %v603_v30  ;;  %358 = vadd.xlane.f32.xlu2 %v357_v39 }
  0x8a   : > { %607 = vadd.xlane.f32.xlu1 %v606_v33  ;;  %v252_v33 = vld [vmem:[%s3126_s9 + $0xc8] sm:$0xff] }
  0x8b   : > { %v293_v34 = vpop.xlane.xlu0 %292  ;;  %v299_v35 = vpop.xlane.xlu2 %298 }
  0x8c   : > { %v3255_v38 = vmul.f32 0.03125, %v293_v34  ;;  %v3274_v59 = vmul.f32 0.03125, %v299_v35 }
  0x8d   : > { %v545_v42 = vpop.xlane.xlu1 %544 }
  0x8e   : > { %v858_v43 = vmul.f32 %v3255_v38, %v3255_v38  ;;  %v795_v44 = vmul.f32 0.03125, %v545_v42  ;;  %v860_v2 = vmul.f32 %v3274_v59, %v3274_v59 }
  0x90   : > { %v921_v46 = vsub.f32 %v795_v44, %v858_v43  ;;  %361 = vadd.xlane.f32.xlu0 %v360_v48  ;;  %613 = vadd.xlane.f32.xlu2 %v612_v55  ;;  %v366_v43 = vsel %vm290_vm0, %v252_v33, 0.0  ;;  %v504_v44 = vmul.f32 %v251_v14, %v251_v14 }
  0x92   : > { %v984_v51 = vmax.f32 %v921_v46, 0.0  ;;  %610 = vadd.xlane.f32.xlu1 %v609_v56 }
  0x93   : > { %v296_v52 = vpop.xlane.xlu0 %295  ;;  %v302_v53 = vpop.xlane.xlu2 %301 }
  0x94   : > { %v3268_v54 = vmul.f32 0.03125, %v296_v52  ;;  %v3272_v57 = vadd.f32 1e-05, %v984_v51  ;;  %v3279_v62 = vmul.f32 0.03125, %v302_v53  ;;  %v615_v51 = vsel %vm290_vm0, %v504_v44, 0.0 }
  0x95   : > { %v548_v58 = vpop.xlane.xlu1 %547  ;;  %v505_v52 = vmul.f32 %v252_v33, %v252_v33 }
  0x96   : > { %v859_v60 = vmul.f32 %v3268_v54, %v3268_v54  ;;  %2799 = vrsqrt.f32 %v3272_v57  ;;  %v796_v61 = vmul.f32 0.03125, %v548_v58  ;;  %v861_v10 = vmul.f32 %v3279_v62, %v3279_v62 }
  0x97   : > { %vm1179_vm2 = vweird.f32 %v3272_v57 }
  0x98   : > { %v922_v63 = vsub.f32 %v796_v61, %v859_v60  ;;  %364 = vadd.xlane.f32.xlu0 %v363_v22  ;;  %616 = vadd.xlane.f32.xlu2 %v615_v51  ;;  %v618_v60 = vsel %vm290_vm0, %v505_v52, 0.0 }
  0x9a   : > { %v985_v3 = vmax.f32 %v922_v63, 0.0  ;;  %367 = vadd.xlane.f32.xlu1 %v366_v43 }
  0x9b   : > { %v551_v4 = vpop.xlane.xlu0 %550  ;;  %v305_v6 = vpop.xlane.xlu2 %304 }
  0x9c   : > { %v797_v8 = vmul.f32 0.03125, %v551_v4  ;;  %v3283_v9 = vpop.eup %2799  ;;  %v3287_v11 = vadd.f32 1e-05, %v985_v3  ;;  %v3294_v21 = vmul.f32 0.03125, %v305_v6 }
  0x9d   : > { %v554_v12 = vpop.xlane.xlu1 %553  ;;  %v1174_v15 = vmul.f32 %v3283_v9, %v3272_v57  ;;  %vm1180_vm1 = vweird.f32 %v3283_v9 }
  0x9e   : > { %v923_v16 = vsub.f32 %v797_v8, %v860_v2  ;;  %2801 = vrsqrt.f32 %v3287_v11  ;;  %v798_v18 = vmul.f32 0.03125, %v554_v12  ;;  %v862_v34 = vmul.f32 %v3294_v21, %v3294_v21  ;;  %vm3329_vm3 = vmor %vm1179_vm2, %vm1180_vm1 }
  0x9f   : > { %v1175_v19 = vmul.f32 %v3283_v9, %v1174_v15  ;;  %vm1189_vm4 = vweird.f32 %v3287_v11 }
  0xa0   : > { %v986_v20 = vmax.f32 %v923_v16, 0.0  ;;  %v924_v24 = vsub.f32 %v798_v18, %v861_v10  ;;  %619 = vadd.xlane.f32.xlu0 %v618_v60 }
  0xa1   : > { %v1176_v27 = vmul.f32 0.5, %v1175_v19 }
  0xa2   : > { %v3297_v25 = vadd.f32 1e-05, %v986_v20  ;;  %v987_v28 = vmax.f32 %v924_v24, 0.0  ;;  %v253_v24 = vld [vmem:[%s3126_s9 + $0xd0] sm:$0xff] }
  0xa3   : > { %v308_v29 = vpop.xlane.xlu0 %307  ;;  %v560_v30 = vpop.xlane.xlu2 %559  ;;  %v1177_v47 = vsub.f32 1.5, %v1176_v27  ;;  %v369_v33 = vsel %vm290_vm0, %v253_v24, 0.0 }
  0xa4   : > { %2803 = vrsqrt.f32 %v3297_v25  ;;  %v3303_v35 = vmul.f32 0.03125, %v308_v29  ;;  %v2802_v36 = vpop.eup %2801  ;;  %v3305_v39 = vadd.f32 1e-05, %v987_v28  ;;  %v800_v40 = vmul.f32 0.03125, %v560_v30  ;;  %370 = vadd.xlane.f32.xlu1 %v369_v33 }
  0xa5   : > { %v557_v42 = vpop.xlane.xlu1 %556  ;;  %v1184_v45 = vmul.f32 %v2802_v36, %v3287_v11  ;;  %v1178_v3 = vmul.f32 %v3283_v9, %v1177_v47  ;;  %vm1190_vm5 = vweird.f32 %v2802_v36  ;;  %v1047_v29 = vsub.f32 %v3129_v0, %v3255_v38 }
  0xa6   : > { %v863_v46 = vmul.f32 %v3303_v35, %v3303_v35  ;;  %2805 = vrsqrt.f32 %v3305_v39  ;;  %v799_v48 = vmul.f32 0.03125, %v557_v42  ;;  %v1048_v30 = vsub.f32 %v3141_v5, %v3268_v54  ;;  %vm1191_vm6 = vmor %vm1189_vm4, %vm1190_vm5 }
  0xa7   : > { %v1185_v49 = vmul.f32 %v2802_v36, %v1184_v45  ;;  %v1182_v22 = vsel %vm3329_vm3, %v3283_v9, %v1178_v3  ;;  %vm1209_vm7 = vweird.f32 %v3305_v39  ;;  %v506_v3 = vmul.f32 %v253_v24, %v253_v24 }
  0xa8   : > { %v926_v50 = vsub.f32 %v800_v40, %v863_v46  ;;  %v925_v53 = vsub.f32 %v799_v48, %v862_v34  ;;  %v1803_v44 = vmul.f32 %v1182_v22, %v1047_v29  ;;  %vm1199_vm11 = vweird.f32 %v3297_v25 }
  0xa9   : > { %v1186_v56 = vmul.f32 0.5, %v1185_v49  ;;  %v1049_v29 = vsub.f32 %v3132_v1, %v3274_v59 }
  0xaa   : > { %v3313_v55 = vpop.eup %2803  ;;  %v989_v58 = vmax.f32 %v926_v50, 0.0  ;;  %v988_v63 = vmax.f32 %v925_v53, 0.0 }
  0xab   : > { %v1194_v61 = vmul.f32 %v3313_v55, %v3297_v25  ;;  %v311_v2 = vpop.xlane.xlu0 %310  ;;  %v1187_v4 = vsub.f32 1.5, %v1186_v56  ;;  %v563_v8 = vpop.xlane.xlu2 %562  ;;  %vm1200_vm9 = vweird.f32 %v3313_v55 }
  0xac   : > { %v3320_v6 = vmul.f32 0.03125, %v311_v2  ;;  %v3322_v10 = vpop.eup %2805  ;;  %v3325_v12 = vadd.f32 1e-05, %v989_v58  ;;  %v3327_v14 = vadd.f32 1e-05, %v988_v63  ;;  %v801_v20 = vmul.f32 0.03125, %v563_v8  ;;  %vm3395_vm12 = vmor %vm1199_vm11, %vm1200_vm9 }
  0xad   : > { %v314_v15 = vpop.xlane.xlu1 %313  ;;  %v1204_v18 = vmul.f32 %v3322_v10, %v3305_v39  ;;  %v1195_v19 = vmul.f32 %v3313_v55, %v1194_v61  ;;  %v1188_v28 = vmul.f32 %v2802_v36, %v1187_v4  ;;  %vm1210_vm8 = vweird.f32 %v3322_v10 }
  0xae   : > { %v864_v57 = vmul.f32 %v3320_v6, %v3320_v6  ;;  %2807 = vrsqrt.f32 %v3327_v14  ;;  %v3345_v11 = vmul.f32 0.03125, %v314_v15  ;;  %vm3379_vm10 = vmor %vm1209_vm7, %vm1210_vm8  ;;  %v1050_v39 = vsub.f32 %v3145_v7, %v3279_v62 }
  0xaf   : > { %v1205_v27 = vmul.f32 %v3322_v10, %v1204_v18  ;;  %2809 = vrsqrt.f32 %v3325_v12  ;;  %v1192_v40 = vsel %vm1191_vm6, %v2802_v36, %v1188_v28  ;;  %v1196_v0 = vmul.f32 0.5, %v1195_v19  ;;  %v254_v36 = vld [vmem:[%s3126_s9 + $0xd8] sm:$0xff]  ;;  %v255_v28 = vld [vmem:[%s3126_s9 + $0xe0] sm:$0xff] }
  0xb0   : > { %v865_v34 = vmul.f32 %v3345_v11, %v3345_v11  ;;  %v927_v42 = vsub.f32 %v801_v20, %v864_v57  ;;  %v1804_v45 = vmul.f32 %v1192_v40, %v1048_v30  ;;  %v372_v61 = vsel %vm290_vm0, %v254_v36, 0.0 }
  0xb1   : > { %v1206_v9 = vmul.f32 0.5, %v1205_v27  ;;  %v1197_v51 = vsub.f32 1.5, %v1196_v0  ;;  %373 = vadd.xlane.f32.xlu2 %v372_v61  ;;  %v507_v2 = vmul.f32 %v254_v36, %v254_v36  ;;  %v621_v57 = vsel %vm290_vm0, %v506_v3, 0.0 }
  0xb2   : > { %v1871_v46 = vpack.c.bf16 %v1804_v45, %v1803_v44  ;;  %v990_v50 = vmax.f32 %v927_v42, 0.0  ;;  %622 = vadd.xlane.f32.xlu0 %v621_v57  ;;  %vm1229_vm13 = vweird.f32 %v3325_v12  ;;  %vm1219_vm15 = vweird.f32 %v3327_v14 }
  0xb3   : > { %v566_v43 = vpop.xlane.xlu0 %565  ;;  %v1207_v47 = vsub.f32 1.5, %v1206_v9  ;;  %v320_v56 = vpop.xlane.xlu2 %319  ;;  %v1198_v15 = vmul.f32 %v3313_v55, %v1197_v51  ;;  %v624_v19 = vsel %vm290_vm0, %v507_v2, 0.0  ;;  %v508_v36 = vmul.f32 %v255_v28, %v255_v28 }
  0xb4   : > { %v802_v38 = vmul.f32 0.03125, %v566_v43  ;;  %v3355_v54 = vpop.eup %2807  ;;  %2667 = vmatmul.msk.bf16.vlgmr.msra.gmra.mxu0 %vm290_vm0, %v1871_v46  ;;  %v3369_v63 = vadd.f32 1e-05, %v990_v50  ;;  %v3374_v8 = vmul.f32 0.03125, %v320_v56  ;;  %625 = vadd.xlane.f32.xlu1 %v624_v19  ;;  %v256_v46 = vld [vmem:[%s3126_s9 + $0xe8] sm:$0xff] }
  0xb5   : > { %v317_v5 = vpop.xlane.xlu1 %316  ;;  %v3357_v49 = vpop.eup %2809  ;;  %v1214_v53 = vmul.f32 %v3355_v54, %v3327_v14  ;;  %v1208_v60 = vmul.f32 %v3322_v10, %v1207_v47  ;;  %v1202_v62 = vsel %vm3395_vm12, %v3313_v55, %v1198_v15  ;;  %v378_v47 = vsel %vm290_vm0, %v256_v46, 0.0 }
  0xb6   : > { %v928_v48 = vsub.f32 %v802_v38, %v865_v34  ;;  %v1224_v58 = vmul.f32 %v3357_v49, %v3325_v12  ;;  %2811 = vrsqrt.f32 %v3369_v63  ;;  %v3400_v25 = vmul.f32 0.03125, %v317_v5 }
  0xb7   : > { %v1215_v18 = vmul.f32 %v3355_v54, %v1214_v53  ;;  %v1212_v24 = vsel %vm3379_vm10, %v3322_v10, %v1208_v60  ;;  %v867_v10 = vmul.f32 %v3374_v8, %v3374_v8  ;;  %v375_v34 = vsel %vm290_vm0, %v255_v28, 0.0 }
  0xb8   : > { %v991_v52 = vmax.f32 %v928_v48, 0.0  ;;  %v1225_v20 = vmul.f32 %v3357_v49, %v1224_v58  ;;  %v1806_v9 = vmul.f32 %v1212_v24, %v1050_v39  ;;  %v866_v1 = vmul.f32 %v3400_v25, %v3400_v25 }
  0xb9   : > { %v1216_v30 = vmul.f32 0.5, %v1215_v18  ;;  %v1805_v43 = vmul.f32 %v1202_v62, %v1049_v29  ;;  %376 = vadd.xlane.f32.xlu2 %v375_v34  ;;  %v509_v50 = vmul.f32 %v256_v46, %v256_v46  ;;  %vm1230_vm14 = vweird.f32 %v3357_v49 }
  0xba   : > { %v3372_v4 = vadd.f32 1e-05, %v991_v52  ;;  %v1226_v40 = vmul.f32 0.5, %v1225_v20  ;;  %379 = vadd.xlane.f32.xlu0 %v378_v47  ;;  %vm1220_vm1 = vweird.f32 %v3355_v54  ;;  %v627_v2 = vsel %vm290_vm0, %v508_v36, 0.0  ;;  %vm3435_vm2 = vmor %vm1229_vm13, %vm1230_vm14  ;;  %v259_v36 = vld [vmem:[%s3126_s9 + $0x100] sm:$0xff] }
  0xbb   : > { %v569_v7 = vpop.xlane.xlu0 %568  ;;  %v323_v42 = vpop.xlane.xlu2 %322  ;;  %v1217_v45 = vsub.f32 1.5, %v1216_v30  ;;  %v1872_v38 = vpack.c.bf16 %v1806_v9, %v1805_v43  ;;  %v630_v58 = vsel %vm290_vm0, %v509_v50, 0.0  ;;  %vm3445_vm3 = vmor %vm1219_vm15, %vm1220_vm1  ;;  %v1051_v39 = vsub.f32 %v3157_v13, %v3294_v21 }
  0xbc   : > { %2813 = vrsqrt.f32 %v3372_v4  ;;  %v803_v59 = vmul.f32 0.03125, %v569_v7  ;;  %v3414_v44 = vpop.eup %2811  ;;  %v1227_v5 = vsub.f32 1.5, %v1226_v40  ;;  %v3439_v16 = vmul.f32 0.03125, %v323_v42  ;;  %628 = vadd.xlane.f32.xlu1 %v627_v2 }
  0xbd   : > { %v572_v22 = vpop.xlane.xlu1 %571  ;;  %v1218_v56 = vmul.f32 %v3355_v54, %v1217_v45  ;;  %v1234_v60 = vmul.f32 %v3414_v44, %v3369_v63  ;;  %v1052_v28 = vsub.f32 %v3165_v17, %v3303_v35  ;;  %v258_v35 = vld [vmem:[%s3126_s9 + $0xf8] sm:$0xff]  ;;  %vm1249_vm4 = vweird.f32 %v3372_v4 }
  0xbe   : > { %v804_v33 = vmul.f32 0.03125, %v572_v22  ;;  %v929_v48 = vsub.f32 %v803_v59, %v866_v1  ;;  %v1228_v61 = vmul.f32 %v3357_v49, %v1227_v5  ;;  %v384_v34 = vsel %vm290_vm0, %v258_v35, 0.0 }
  0xbf   : > { %v1222_v24 = vsel %vm3445_vm3, %v3355_v54, %v1218_v56  ;;  %v1235_v14 = vmul.f32 %v3414_v44, %v1234_v60  ;;  %v257_v54 = vld [vmem:[%s3126_s9 + $0xf0] sm:$0xff]  ;;  %v511_v59 = vmul.f32 %v258_v35, %v258_v35  ;;  %vm1239_vm6 = vweird.f32 %v3369_v63 }
  0xc0   : > { %v930_v0 = vsub.f32 %v804_v33, %v867_v10  ;;  %v992_v15 = vmax.f32 %v929_v48, 0.0  ;;  %v1232_v27 = vsel %vm3435_vm2, %v3357_v49, %v1228_v61  ;;  %v868_v10 = vmul.f32 %v3439_v16, %v3439_v16  ;;  %v260_v48 = vld [vmem:[%s3126_s9 + $0x108] sm:$0xff] }
  0xc1   : > { %631 = vadd.xlane.f32.xlu2 %v630_v58  ;;  %v1807_v62 = vmul.f32 %v1222_v24, %v1051_v39  ;;  %v381_v30 = vsel %vm290_vm0, %v257_v54, 0.0  ;;  %v1808_v49 = vmul.f32 %v1232_v27, %v1052_v28  ;;  %v510_v17 = vmul.f32 %v257_v54, %v257_v54 }
  0xc2   : > { %v3417_v55 = vpop.eup %2813  ;;  %v993_v52 = vmax.f32 %v930_v0, 0.0  ;;  %v3465_v29 = vadd.f32 1e-05, %v992_v15  ;;  %382 = vadd.xlane.f32.xlu0 %v381_v30  ;;  %v1236_v9 = vmul.f32 0.5, %v1235_v14  ;;  %v636_v46 = vsel %vm290_vm0, %v511_v59, 0.0 }
  0xc3   : > { %v1244_v51 = vmul.f32 %v3417_v55, %v3372_v4  ;;  %v326_v53 = vpop.xlane.xlu0 %325  ;;  %v578_v22 = vpop.xlane.xlu2 %577  ;;  %v633_v1 = vsel %vm290_vm0, %v510_v17, 0.0  ;;  %v1873_v0 = vpack.c.bf16 %v1808_v49, %v1807_v62  ;;  %vm1250_vm5 = vweird.f32 %v3417_v55 }
  0xc4   : > { %2668 = vmatmul.msk.bf16.gmra.mxu0 %vm290_vm0, %v1872_v38  ;;  %v3449_v19 = vmul.f32 0.03125, %v326_v53  ;;  %v3452_v20 = vadd.f32 1e-05, %v993_v52  ;;  %v806_v21 = vmul.f32 0.03125, %v578_v22  ;;  %385 = vadd.xlane.f32.xlu1 %v384_v34  ;;  %v1237_v38 = vsub.f32 1.5, %v1236_v9  ;;  %vm3491_vm8 = vmor %vm1249_vm4, %vm1250_vm5  ;;  %v262_v9 = vld [vmem:[%s3126_s9 + $0x118] sm:$0xff] }
  0xc5   : > { %v575_v12 = vpop.xlane.xlu1 %574  ;;  %v1245_v57 = vmul.f32 %v3417_v55, %v1244_v51  ;;  %vm1240_vm7 = vweird.f32 %v3414_v44  ;;  %v390_v63 = vsel %vm290_vm0, %v260_v48, 0.0  ;;  %v387_v15 = vsel %vm290_vm0, %v259_v36, 0.0 }
  0xc6   : > { %v805_v7 = vmul.f32 0.03125, %v575_v12  ;;  %v869_v13 = vmul.f32 %v3449_v19, %v3449_v19  ;;  %2815 = vrsqrt.f32 %v3452_v20  ;;  %v1238_v58 = vmul.f32 %v3414_v44, %v1237_v38  ;;  %vm3499_vm9 = vmor %vm1239_vm6, %vm1240_vm7 }
  0xc7   : > { %v1246_v33 = vmul.f32 0.5, %v1245_v57  ;;  %2817 = vrsqrt.f32 %v3465_v29  ;;  %v1053_v22 = vsub.f32 %v3176_v23, %v3320_v6  ;;  %v1054_v39 = vsub.f32 %v3182_v26, %v3345_v11 }
  0xc8   : > { %v931_v40 = vsub.f32 %v805_v7, %v868_v10  ;;  %v932_v42 = vsub.f32 %v806_v21, %v869_v13  ;;  %v1242_v10 = vsel %vm3499_vm9, %v3414_v44, %v1238_v58  ;;  %v261_v7 = vld [vmem:[%s3126_s9 + $0x110] sm:$0xff]  ;;  %v512_v6 = vmul.f32 %v259_v36, %v259_v36 }
  0xc9   : > { %634 = vadd.xlane.f32.xlu2 %v633_v1  ;;  %v1247_v45 = vsub.f32 1.5, %v1246_v33  ;;  %v513_v54 = vmul.f32 %v260_v48, %v260_v48  ;;  %v393_v21 = vsel %vm290_vm0, %v261_v7, 0.0  ;;  %v1809_v49 = vmul.f32 %v1242_v10, %v1053_v22 }
  0xca   : > { %v994_v47 = vmax.f32 %v931_v40, 0.0  ;;  %v995_v50 = vmax.f32 %v932_v42, 0.0  ;;  %637 = vadd.xlane.f32.xlu0 %v636_v46  ;;  %v639_v44 = vsel %vm290_vm0, %v512_v6, 0.0  ;;  %vm1269_vm10 = vweird.f32 %v3452_v20 }
  0xcb   : > { %v329_v43 = vpop.xlane.xlu0 %328  ;;  %v1248_v53 = vmul.f32 %v3417_v55, %v1247_v45  ;;  %v581_v3 = vpop.xlane.xlu2 %580  ;;  %v642_v62 = vsel %vm290_vm0, %v513_v54, 0.0  ;;  %v396_v45 = vsel %vm290_vm0, %v262_v9, 0.0  ;;  %v514_v46 = vmul.f32 %v261_v7, %v261_v7 }
  0xcc   : > { %v3479_v5 = vpop.eup %2815  ;;  %v3503_v61 = vadd.f32 1e-05, %v994_v47  ;;  %v3505_v2 = vmul.f32 0.03125, %v329_v43  ;;  %v3510_v12 = vadd.f32 1e-05, %v995_v50  ;;  %388 = vadd.xlane.f32.xlu1 %v387_v15  ;;  %v807_v27 = vmul.f32 0.03125, %v581_v3 }
  0xcd   : > { %v3488_v51 = vpop.eup %2817  ;;  %v332_v52 = vpop.xlane.xlu1 %331  ;;  %v1264_v56 = vmul.f32 %v3479_v5, %v3452_v20  ;;  %v1252_v24 = vsel %vm3491_vm8, %v3417_v55, %v1248_v53  ;;  %vm1270_vm11 = vweird.f32 %v3479_v5  ;;  %vm1259_vm12 = vweird.f32 %v3465_v29  ;;  %v263_v3 = vld [vmem:[%s3126_s9 + $0x120] sm:$0xff] }
  0xce   : > { %v1254_v18 = vmul.f32 %v3488_v51, %v3465_v29  ;;  %v3512_v57 = vmul.f32 0.03125, %v332_v52  ;;  %2819 = vrsqrt.f32 %v3503_v61  ;;  %v870_v23 = vmul.f32 %v3505_v2, %v3505_v2  ;;  %vm3554_vm14 = vmor %vm1269_vm10, %vm1270_vm11 }
  0xcf   : > { %v1265_v14 = vmul.f32 %v3479_v5, %v1264_v56  ;;  %2821 = vrsqrt.f32 %v3510_v12  ;;  %v1810_v11 = vmul.f32 %v1252_v24, %v1054_v39  ;;  %vm1260_vm13 = vweird.f32 %v3488_v51 }
  0xd0   : > { %v1255_v55 = vmul.f32 %v3488_v51, %v1254_v18  ;;  %v871_v26 = vmul.f32 %v3512_v57, %v3512_v57  ;;  %v933_v33 = vsub.f32 %v807_v27, %v870_v23  ;;  %v645_v53 = vsel %vm290_vm0, %v514_v46, 0.0  ;;  %vm3572_vm15 = vmor %vm1259_vm12, %vm1260_vm13 }
  0xd1   : > { %391 = vadd.xlane.f32.xlu2 %v390_v63  ;;  %v1266_v30 = vmul.f32 0.5, %v1265_v14  ;;  %v1874_v1 = vpack.c.bf16 %v1810_v11, %v1809_v49  ;;  %v1056_v15 = vsub.f32 %v3192_v31, %v3374_v8  ;;  %v264_v8 = vld [vmem:[%s3126_s9 + $0x128] sm:$0xff]  ;;  %v1055_v29 = vsub.f32 %v3195_v32, %v3400_v25 }
  0xd2   : > { %640 = vadd.xlane.f32.xlu0 %v639_v44  ;;  %v1256_v17 = vmul.f32 0.5, %v1255_v55  ;;  %v996_v43 = vmax.f32 %v933_v33, 0.0  ;;  %v402_v25 = vsel %vm290_vm0, %v264_v8, 0.0  ;;  %vm1279_vm1 = vweird.f32 %v3503_v61 }
  0xd3   : > { %v584_v28 = vpop.xlane.xlu0 %583  ;;  %v1267_v42 = vsub.f32 1.5, %v1266_v30  ;;  %v338_v48 = vpop.xlane.xlu2 %337  ;;  %vm1289_vm3 = vweird.f32 %v3510_v12 }
  0xd4   : > { %2669 = vmatmul.msk.bf16.gmra.mxu0 %vm290_vm0, %v1873_v0  ;;  %v808_v13 = vmul.f32 0.03125, %v584_v28  ;;  %643 = vadd.xlane.f32.xlu1 %v642_v62  ;;  %v3537_v34 = vpop.eup %2819  ;;  %v515_v0 = vmul.f32 %v262_v9, %v262_v9  ;;  %v1257_v38 = vsub.f32 1.5, %v1256_v17  ;;  %v3558_v56 = vadd.f32 1e-05, %v996_v43  ;;  %v265_v9 = vld [vmem:[%s3126_s9 + $0x130] sm:$0xff] }
  0xd5   : > { %v335_v35 = vpop.xlane.xlu1 %334  ;;  %v3539_v59 = vpop.eup %2821  ;;  %v1274_v52 = vmul.f32 %v3537_v34, %v3503_v61  ;;  %v1268_v20 = vmul.f32 %v3479_v5, %v1267_v42  ;;  %v3562_v63 = vmul.f32 0.03125, %v338_v48  ;;  %v399_v28 = vsel %vm290_vm0, %v263_v3, 0.0 }
  0xd6   : > { %v934_v40 = vsub.f32 %v808_v13, %v871_v26  ;;  %v648_v50 = vsel %vm290_vm0, %v515_v0, 0.0  ;;  %v1284_v36 = vmul.f32 %v3539_v59, %v3510_v12  ;;  %v3560_v58 = vmul.f32 0.03125, %v335_v35 }
  0xd7   : > { %v1258_v60 = vmul.f32 %v3488_v51, %v1257_v38  ;;  %v1275_v14 = vmul.f32 %v3537_v34, %v1274_v52  ;;  %v1272_v31 = vsel %vm3554_vm14, %v3479_v5, %v1268_v20  ;;  %2823 = vrsqrt.f32 %v3558_v56 }
  0xd8   : > { %v997_v47 = vmax.f32 %v934_v40, 0.0  ;;  %v1285_v39 = vmul.f32 %v3539_v59, %v1284_v36  ;;  %v872_v10 = vmul.f32 %v3560_v58, %v3560_v58  ;;  %v873_v7 = vmul.f32 %v3562_v63, %v3562_v63  ;;  %v2743_v40 = vld [vmem:[%s5196_s3 + $0x38] sm:$0xff] }
  0xd9   : > { %394 = vadd.xlane.f32.xlu2 %v393_v21  ;;  %v1262_v6 = vsel %vm3572_vm15, %v3488_v51, %v1258_v60  ;;  %v1812_v32 = vmul.f32 %v1272_v31, %v1056_v15  ;;  %v1276_v26 = vmul.f32 0.5, %v1275_v14  ;;  %vm1280_vm2 = vweird.f32 %v3537_v34  ;;  %2345 = vmatpush.bf16.msra.mxu1 %v2743_v40 }
  0xda   : > { %397 = vadd.xlane.f32.xlu0 %v396_v45  ;;  %v3576_v22 = vadd.f32 1e-05, %v997_v47  ;;  %v1286_v55 = vmul.f32 0.5, %v1285_v39  ;;  %v1811_v11 = vmul.f32 %v1262_v6, %v1055_v29  ;;  %v516_v35 = vmul.f32 %v263_v3, %v263_v3  ;;  %2747 = vmatpush.bf16.msra.mxu2 %v2743_v40  ;;  %vm3619_vm5 = vmor %vm1279_vm1, %vm1280_vm2 }
  0xdb   : > { %v587_v24 = vpop.xlane.xlu0 %586  ;;  %v341_v54 = vpop.xlane.xlu2 %340  ;;  %v1277_v51 = vsub.f32 1.5, %v1276_v26  ;;  %vm1290_vm4 = vweird.f32 %v3539_v59  ;;  %v517_v42 = vmul.f32 %v264_v8, %v264_v8  ;;  %v405_v38 = vsel %vm290_vm0, %v265_v9, 0.0 }
  0xdc   : > { %646 = vadd.xlane.f32.xlu1 %v645_v53  ;;  %v809_v23 = vmul.f32 0.03125, %v587_v24  ;;  %2825 = vrsqrt.f32 %v3576_v22  ;;  %v1875_v62 = vpack.c.bf16 %v1812_v32, %v1811_v11  ;;  %v1287_v30 = vsub.f32 1.5, %v1286_v55  ;;  %vm3630_vm6 = vmor %vm1289_vm3, %vm1290_vm4  ;;  %v266_v24 = vld [vmem:[%s3126_s9 + $0x138] sm:$0xff]  ;;  %v2742_v11 = vld [vmem:[%s5196_s3 + $0x30] sm:$0xff] }
  0xdd   : > { %v590_v27 = vpop.xlane.xlu1 %589  ;;  %v3597_v44 = vpop.eup %2823  ;;  %v3612_v0 = vmul.f32 0.03125, %v341_v54  ;;  %v1278_v48 = vmul.f32 %v3537_v34, %v1277_v51  ;;  %v651_v36 = vsel %vm290_vm0, %v516_v35, 0.0  ;;  %v654_v20 = vsel %vm290_vm0, %v517_v42, 0.0  ;;  %v3678_v51 = vld [vmem:[%s3126_s9 + $0x140] sm:$0xff]  ;;  %2346 = vmatpush.bf16.msra.mxu1 %v2742_v11 }
  0xde   : > { %v810_v5 = vmul.f32 0.03125, %v590_v27  ;;  %v935_v13 = vsub.f32 %v809_v23, %v872_v10  ;;  %v1294_v43 = vmul.f32 %v3597_v44, %v3558_v56  ;;  %v1057_v53 = vsub.f32 %v3205_v37, %v3439_v16  ;;  %2748 = vmatpush.bf16.msra.mxu2 %v2742_v11 }
  0xdf   : > { %v1058_v12 = vsub.f32 %v3213_v41, %v3449_v19  ;;  %v874_v18 = vmul.f32 %v3612_v0, %v3612_v0  ;;  %v1282_v16 = vsel %vm3619_vm5, %v3537_v34, %v1278_v48  ;;  %v408_v8 = vsel %vm290_vm0, %v266_v24, 0.0 }
  0xe0   : > { %v936_v21 = vsub.f32 %v810_v5, %v873_v7  ;;  %v1295_v3 = vmul.f32 %v3597_v44, %v1294_v43  ;;  %vm1299_vm7 = vweird.f32 %v3558_v56  ;;  %vm1300_vm8 = vweird.f32 %v3597_v44 }
  0xe1   : > { %649 = vadd.xlane.f32.xlu2 %v648_v50  ;;  %v1288_v50 = vmul.f32 %v3539_v59, %v1287_v30  ;;  %vm1309_vm9 = vweird.f32 %v3576_v22  ;;  %vm3692_vm11 = vmor %vm1299_vm7, %vm1300_vm8  ;;  %v411_v46 = vsel %vm290_vm0, %v3678_v51, 0.0 }
  0xe2   : > { %400 = vadd.xlane.f32.xlu0 %v399_v28  ;;  %v3599_v33 = vpop.eup %2825  ;;  %v999_v45 = vmax.f32 %v936_v21, 0.0  ;;  %v1296_v29 = vmul.f32 0.5, %v1295_v3  ;;  %v1813_v28 = vmul.f32 %v1282_v16, %v1057_v53  ;;  %v518_v21 = vmul.f32 %v265_v9, %v265_v9  ;;  %v2926_v53 = vld [vmem:[%s3126_s9 + $0x68] sm:$0xff]  ;;  %v2740_v3 = vld [vmem:[%s5196_s3 + $0x20] sm:$0xff] }
  0xe3   : > { %v344_v49 = vpop.xlane.xlu0 %343  ;;  %v1304_v47 = vmul.f32 %v3599_v33, %v3576_v22  ;;  %v596_v61 = vpop.xlane.xlu2 %595  ;;  %v1292_v14 = vsel %vm3630_vm6, %v3539_v59, %v1288_v50  ;;  %vm1310_vm10 = vweird.f32 %v3599_v33  ;;  %v1060_v22 = vsub.f32 %v2926_v53, %v3512_v57 }
  0xe4   : > { %2670 = vmatmul.msk.bf16.gmra.mxu0 %vm290_vm0, %v1874_v1  ;;  %403 = vadd.xlane.f32.xlu1 %v402_v25  ;;  %v998_v1 = vmax.f32 %v935_v13, 0.0  ;;  %v3639_v60 = vmul.f32 0.03125, %v344_v49  ;;  %v3644_v15 = vadd.f32 1e-05, %v999_v45  ;;  %v812_v31 = vmul.f32 0.03125, %v596_v61  ;;  %vm3707_vm12 = vmor %vm1309_vm9, %vm1310_vm10  ;;  %v2925_v61 = vld [vmem:[%s3126_s9 + $0x60] sm:$0xff] }
  0xe5   : > { %v593_v17 = vpop.xlane.xlu1 %592  ;;  %v1305_v39 = vmul.f32 %v3599_v33, %v1304_v47  ;;  %v1814_v10 = vmul.f32 %v1292_v14, %v1058_v12  ;;  %v1297_v6 = vsub.f32 1.5, %v1296_v29  ;;  %v519_v13 = vmul.f32 %v266_v24, %v266_v24 }
  0xe6   : > { %v3637_v4 = vadd.f32 1e-05, %v998_v1  ;;  %v811_v37 = vmul.f32 0.03125, %v593_v17  ;;  %v875_v27 = vmul.f32 %v3639_v60, %v3639_v60  ;;  %v657_v9 = vsel %vm290_vm0, %v518_v21, 0.0  ;;  %v2741_v1 = vld [vmem:[%s5196_s3 + $0x28] sm:$0xff] }
  0xe7   : > { %v1306_v34 = vmul.f32 0.5, %v1305_v39  ;;  %v1876_v5 = vpack.c.bf16 %v1814_v10, %v1813_v28  ;;  %v1298_v35 = vmul.f32 %v3597_v44, %v1297_v6  ;;  %v660_v40 = vsel %vm290_vm0, %v519_v13, 0.0  ;;  %2347 = vmatpush.bf16.msra.mxu1 %v2741_v1  ;;  %2749 = vmatpush.bf16.msra.mxu2 %v2741_v1  ;;  %v2739_v28 = vld [vmem:[%s5196_s3 + $0x18] sm:$0xff] }
  0xe8   : > { %2827 = vrsqrt.f32 %v3637_v4  ;;  %v937_v7 = vsub.f32 %v811_v37, %v874_v18  ;;  %v938_v59 = vsub.f32 %v812_v31, %v875_v27  ;;  %vm1319_vm13 = vweird.f32 %v3637_v4 }
  0xe9   : > { %652 = vadd.xlane.f32.xlu2 %v651_v36  ;;  %2829 = vrsqrt.f32 %v3644_v15  ;;  %v1307_v32 = vsub.f32 1.5, %v1306_v34  ;;  %v1302_v24 = vsel %vm3692_vm11, %v3597_v44, %v1298_v35  ;;  %vm1329_vm14 = vweird.f32 %v3644_v15 }
  0xea   : > { %655 = vadd.xlane.f32.xlu0 %v654_v20  ;;  %v1000_v25 = vmax.f32 %v937_v7, 0.0  ;;  %v1059_v20 = vsub.f32 %v2925_v61, %v3505_v2 }
  0xeb   : > { %v347_v41 = vpop.xlane.xlu0 %346  ;;  %v599_v23 = vpop.xlane.xlu2 %598  ;;  %2348 = vmatpush.bf16.msra.mxu1 %v2740_v3  ;;  %2750 = vmatpush.bf16.msra.mxu2 %v2740_v3 }
  0xec   : > { %406 = vadd.xlane.f32.xlu1 %v405_v38  ;;  %v3675_v30 = vmul.f32 0.03125, %v347_v41  ;;  %v3698_v45 = vadd.f32 1e-05, %v1000_v25  ;;  %v1308_v38 = vmul.f32 %v3599_v33, %v1307_v32  ;;  %v813_v52 = vmul.f32 0.03125, %v599_v23  ;;  %v268_v32 = vld [vmem:[%s3126_s9 + $0x148] sm:$0xff]  ;;  %v2738_v25 = vld [vmem:[%s5196_s3 + $0x10] sm:$0xff] }
  0xed   : > { %v350_v19 = vpop.xlane.xlu1 %349  ;;  %v1815_v14 = vmul.f32 %v1302_v24, %v1059_v20  ;;  %v414_v21 = vsel %vm290_vm0, %v268_v32, 0.0  ;;  %v2928_v20 = vld [vmem:[%s3126_s9 + $0x78] sm:$0xff] }
  0xee   : > { %v3661_v54 = vpop.eup %2827  ;;  %v876_v50 = vmul.f32 %v3675_v30, %v3675_v30  ;;  %v3715_v36 = vmul.f32 0.03125, %v350_v19  ;;  %2831 = vrsqrt.f32 %v3698_v45  ;;  %v1312_v2 = vsel %vm3707_vm12, %v3599_v33, %v1308_v38 }
  0xef   : > { %v3663_v55 = vpop.eup %2829  ;;  %v1314_v49 = vmul.f32 %v3661_v54, %v3637_v4  ;;  %v1816_v41 = vmul.f32 %v1312_v2, %v1060_v22  ;;  %vm1320_vm15 = vweird.f32 %v3661_v54  ;;  %2349 = vmatpush.bf16.msra.mxu1 %v2739_v28  ;;  %2751 = vmatpush.bf16.msra.mxu2 %v2739_v28  ;;  %v1062_v53 = vsub.f32 %v2928_v20, %v3562_v63  ;;  %v269_v63 = vld [vmem:[%s3126_s9 + $0x150] sm:$0xff] }
  0xf0   : > { %v1324_v43 = vmul.f32 %v3663_v55, %v3644_v15  ;;  %v877_v57 = vmul.f32 %v3715_v36, %v3715_v36  ;;  %v939_v39 = vsub.f32 %v813_v52, %v876_v50  ;;  %vm1330_vm1 = vweird.f32 %v3663_v55  ;;  %vm3772_vm2 = vmor %vm1319_vm13, %vm1320_vm15  ;;  %v2737_v15 = vld [vmem:[%s5196_s3 + $0x8] sm:$0xff]  ;;  %v2927_v52 = vld [vmem:[%s3126_s9 + $0x70] sm:$0xff] }
  0xf1   : > { %409 = vadd.xlane.f32.xlu2 %v408_v8  ;;  %v1315_v12 = vmul.f32 %v3661_v54, %v1314_v49  ;;  %v1877_v34 = vpack.c.bf16 %v1816_v41, %v1815_v14  ;;  %vm3784_vm3 = vmor %vm1329_vm14, %vm1330_vm1  ;;  %v1061_v61 = vsub.f32 %v2927_v52, %v3560_v58  ;;  %v2736_v58 = vld [vmem:[%s5196_s3] sm:$0xff]  ;;  %vm1339_vm5 = vweird.f32 %v3698_v45 }
  0xf2   : > { %658 = vadd.xlane.f32.xlu0 %v657_v9  ;;  %v1325_v18 = vmul.f32 %v3663_v55, %v1324_v43  ;;  %v1002_v29 = vmax.f32 %v939_v39, 0.0 }
  0xf3   : > { %v602_v17 = vpop.xlane.xlu0 %601  ;;  %v356_v47 = vpop.xlane.xlu2 %355  ;;  %v1316_v16 = vmul.f32 0.5, %v1315_v12  ;;  %2350 = vmatpush.bf16.msra.mxu1 %v2738_v25  ;;  %2752 = vmatpush.bf16.msra.mxu2 %v2738_v25 }
  0xf4   : > { %2671 = vmatmul.msk.bf16.gmra.mxu0 %vm290_vm0, %v1875_v62  ;;  %v1001_v62 = vmax.f32 %v938_v59, 0.0  ;;  %661 = vadd.xlane.f32.xlu1 %v660_v40  ;;  %v814_v37 = vmul.f32 0.03125, %v602_v17  ;;  %v1326_v31 = vmul.f32 0.5, %v1325_v18  ;;  %v3736_v8 = vpop.eup %2831  ;;  %v3761_v11 = vadd.f32 1e-05, %v1002_v29 }
  0xf5   : > { %v3668_v26 = vpop.xlane.xlu1 %352  ;;  %v1317_v10 = vsub.f32 1.5, %v1316_v16  ;;  %v1334_v6 = vmul.f32 %v3736_v8, %v3698_v45  ;;  %vm1340_vm6 = vweird.f32 %v3736_v8 }
  0xf6   : > { %v3711_v48 = vadd.f32 1e-05, %v1001_v62  ;;  %v940_v33 = vsub.f32 %v814_v37, %v877_v57  ;;  %v1327_v23 = vsub.f32 1.5, %v1326_v31  ;;  %v3747_v59 = vmul.f32 0.03125, %v3668_v26  ;;  %vm3853_vm8 = vmor %vm1339_vm5, %vm1340_vm6 }
  0xf7   : > { %v520_v26 = vmul.f32 %v3678_v51, %v3678_v51  ;;  %v521_v62 = vmul.f32 %v268_v32, %v268_v32  ;;  %v1318_v17 = vmul.f32 %v3661_v54, %v1317_v10  ;;  %2351 = vmatpush.bf16.msra.mxu1 %v2737_v15  ;;  %2753 = vmatpush.bf16.msra.mxu2 %v2737_v15  ;;  %v417_v37 = vsel %vm290_vm0, %v269_v63, 0.0 }
  0xf8   : > { %2833 = vrsqrt.f32 %v3711_v48  ;;  %v1003_v13 = vmax.f32 %v940_v33, 0.0  ;;  %v878_v1 = vmul.f32 %v3747_v59, %v3747_v59  ;;  %v1328_v43 = vmul.f32 %v3663_v55, %v1327_v23 }
  0xf9   : > { %412 = vadd.xlane.f32.xlu2 %v411_v46  ;;  %v663_v9 = vsel %vm290_vm0, %v520_v26, 0.0  ;;  %v666_v38 = vsel %vm290_vm0, %v521_v62, 0.0  ;;  %v1335_v46 = vmul.f32 %v3736_v8, %v1334_v6  ;;  %2835 = vrsqrt.f32 %v3761_v11 }
  0xfa   : > { %415 = vadd.xlane.f32.xlu0 %v414_v21  ;;  %v3792_v50 = vadd.f32 1e-05, %v1003_v13  ;;  %v1322_v18 = vsel %vm3772_vm2, %v3661_v54, %v1318_v17  ;;  %v1332_v24 = vsel %vm3784_vm3, %v3663_v55, %v1328_v43  ;;  %vm1349_vm4 = vweird.f32 %v3711_v48 }
  0xfb   : > { %v605_v27 = vpop.xlane.xlu0 %604  ;;  %v359_v44 = vpop.xlane.xlu2 %358  ;;  %v1336_v2 = vmul.f32 0.5, %v1335_v46  ;;  %v1817_v16 = vmul.f32 %v1322_v18, %v1061_v61  ;;  %v1818_v14 = vmul.f32 %v1332_v24, %v1062_v53  ;;  %2352 = vmatpush.bf16.msra.mxu1 %v2736_v58  ;;  %2754 = vmatpush.bf16.msra.mxu2 %v2736_v58  ;;  %v2929_v53 = vld [vmem:[%s3126_s9 + $0x80] sm:$0xff]  ;;  %v2930_v18 = vld [vmem:[%s3126_s9 + $0x88] sm:$0xff]  ;;  %vm1359_vm10 = vweird.f32 %v3761_v11 }
  0xfc   : > { %v815_v42 = vmul.f32 0.03125, %v605_v27  ;;  %664 = vadd.xlane.f32.xlu1 %v663_v9  ;;  %v3808_v39 = vmul.f32 0.03125, %v359_v44  ;;  %2837 = vrsqrt.f32 %v3792_v50  ;;  %v1064_v24 = vsub.f32 %v2930_v18, %v3639_v60 }
  0xfd   : > { %v608_v19 = vpop.xlane.xlu1 %607  ;;  %v1337_v44 = vsub.f32 1.5, %v1336_v2  ;;  %v1878_v6 = vpack.c.bf16 %v1818_v14, %v1817_v16  ;;  %v271_v16 = vld [vmem:[%s3126_s9 + $0x160] sm:$0xff]  ;;  %vm1369_vm12 = vweird.f32 %v3792_v50 }
  0xfe   : > { %v3742_v7 = vpop.eup %2833  ;;  %v941_v3 = vsub.f32 %v815_v42, %v878_v1  ;;  %v880_v33 = vmul.f32 %v3808_v39, %v3808_v39 }
  0xff   : > { %v1344_v49 = vmul.f32 %v3742_v7, %v3711_v48  ;;  %vm1350_vm7 = vweird.f32 %v3742_v7  ;;  %v1338_v17 = vmul.f32 %v3736_v8, %v1337_v44 }
 0x100   : > { %v1004_v27 = vmax.f32 %v941_v3, 0.0  ;;  %vm3865_vm9 = vmor %vm1349_vm4, %vm1350_vm7 }
 0x101   : > { %667 = vadd.xlane.f32.xlu2 %v666_v38  ;;  %v1345_v22 = vmul.f32 %v3742_v7, %v1344_v49 }
 0x102   : > { %418 = vadd.xlane.f32.xlu0 %v417_v37  ;;  %v3832_v26 = vadd.f32 1e-05, %v1004_v27 }
 0x103   : > { %v362_v35 = vpop.xlane.xlu0 %361  ;;  %v614_v12 = vpop.xlane.xlu2 %613  ;;  %v1346_v54 = vmul.f32 0.5, %v1345_v22  ;;  %v1063_v22 = vsub.f32 %v2929_v53, %v3612_v0 }
 0x104   : > { %2672 = vmatmul.msk.bf16.gmra.mxu0 %vm290_vm0, %v1876_v5  ;;  %v3753_v5 = vmul.f32 0.03125, %v356_v47  ;;  %v816_v47 = vmul.f32 0.03125, %v608_v19  ;;  %v3816_v19 = vpop.eup %2835  ;;  %v3818_v31 = vmul.f32 0.03125, %v362_v35  ;;  %v818_v21 = vmul.f32 0.03125, %v614_v12  ;;  %v270_v35 = vld [vmem:[%s3126_s9 + $0x158] sm:$0xff] }
 0x105   : > { %v611_v40 = vpop.xlane.xlu1 %610  ;;  %v1354_v23 = vmul.f32 %v3816_v19, %v3761_v11  ;;  %v3829_v25 = vpop.eup %2837  ;;  %v420_v1 = vsel %vm290_vm0, %v270_v35, 0.0  ;;  %v523_v42 = vmul.f32 %v270_v35, %v270_v35  ;;  %2839 = vrsqrt.f32 %v3832_v26 }
 0x106   : > { %v879_v56 = vmul.f32 %v3753_v5, %v3753_v5  ;;  %v817_v28 = vmul.f32 0.03125, %v611_v40  ;;  %v881_v13 = vmul.f32 %v3818_v31, %v3818_v31  ;;  %v522_v40 = vmul.f32 %v269_v63, %v269_v63  ;;  %421 = vadd.xlane.f32.xlu1 %v420_v1 }
 0x107   : > { %v1355_v43 = vmul.f32 %v3816_v19, %v1354_v23  ;;  %v1364_v38 = vmul.f32 %v3829_v25, %v3792_v50  ;;  %v672_v61 = vsel %vm290_vm0, %v523_v42, 0.0  ;;  %vm1360_vm11 = vweird.f32 %v3816_v19  ;;  %v2932_v50 = vld [vmem:[%s3126_s9 + $0x98] sm:$0xff] }
 0x108   : > { %v942_v57 = vsub.f32 %v816_v47, %v879_v56  ;;  %v943_v49 = vsub.f32 %v817_v28, %v880_v33  ;;  %v669_v56 = vsel %vm290_vm0, %v522_v40, 0.0  ;;  %v944_v15 = vsub.f32 %v818_v21, %v881_v13  ;;  %vm3926_vm14 = vmor %vm1359_vm10, %vm1360_vm11 }
 0x109   : > { %670 = vadd.xlane.f32.xlu2 %v669_v56  ;;  %v1356_v2 = vmul.f32 0.5, %v1355_v43  ;;  %v1365_v48 = vmul.f32 %v3829_v25, %v1364_v38  ;;  %vm1370_vm13 = vweird.f32 %v3829_v25  ;;  %v3916_v43 = vld [vmem:[%s5195_s2] ss:$0 sm:$0xff]  ;;  %v524_v56 = vmul.f32 %v271_v16, %v271_v16 }
 0x10a   : > { %v1005_v29 = vmax.f32 %v942_v57, 0.0  ;;  %673 = vadd.xlane.f32.xlu0 %v672_v61  ;;  %v1006_v12 = vmax.f32 %v943_v49, 0.0  ;;  %v1342_v57 = vsel %vm3853_vm8, %v3736_v8, %v1338_v17  ;;  %v1007_v58 = vmax.f32 %v944_v15, 0.0  ;;  %vm3945_vm15 = vmor %vm1369_vm12, %vm1370_vm13 }
 0x10b   : > { %v365_v41 = vpop.xlane.xlu0 %364  ;;  %v617_v32 = vpop.xlane.xlu2 %616  ;;  %v1366_v8 = vmul.f32 0.5, %v1365_v48  ;;  %v1819_v44 = vmul.f32 %v1342_v57, %v1063_v22  ;;  %v675_v11 = vsel %vm290_vm0, %v524_v56, 0.0  ;;  %vm1379_vm1 = vweird.f32 %v3832_v26 }
 0x10c   : > { %v3824_v10 = vmul.f32 0.03125, %v365_v41  ;;  %v3836_v62 = vadd.f32 1e-05, %v1005_v29  ;;  %v819_v51 = vmul.f32 0.03125, %v617_v32  ;;  %v3884_v14 = vpop.eup %2839  ;;  %v3886_v60 = vadd.f32 1e-05, %v1006_v12 }
 0x10d   : > { %v368_v55 = vpop.xlane.xlu1 %367  ;;  %v3891_v33 = vadd.f32 1e-05, %v1007_v58  ;;  %v1367_v17 = vsub.f32 1.5, %v1366_v8  ;;  %vm1380_vm2 = vweird.f32 %v3884_v14 }
 0x10e   : > { %v882_v9 = vmul.f32 %v3824_v10, %v3824_v10  ;;  %v3858_v52 = vmul.f32 0.03125, %v368_v55  ;;  %2841 = vrsqrt.f32 %v3836_v62  ;;  %v423_v55 = vsel %vm290_vm0, %v271_v16, 0.0  ;;  %vm3991_vm5 = vmor %vm1379_vm1, %vm1380_vm2 }
 0x10f   : > { %424 = vadd.xlane.f32.xlu1 %v423_v55  ;;  %2843 = vrsqrt.f32 %v3886_v60  ;;  %v1368_v53 = vmul.f32 %v3829_v25, %v1367_v17  ;;  %vm1389_vm3 = vweird.f32 %v3836_v62  ;;  %vm1399_vm7 = vweird.f32 %v3886_v60 }
 0x110   : > { %v945_v3 = vsub.f32 %v819_v51, %v882_v9  ;;  %v883_v0 = vmul.f32 %v3858_v52, %v3858_v52  ;;  %2845 = vrsqrt.f32 %v3891_v33  ;;  %vm1409_vm8 = vweird.f32 %v3891_v33 }
 0x112   : > { %v1008_v41 = vmax.f32 %v945_v3, 0.0  ;;  %v2931_v3 = vld [vmem:[%s3126_s9 + $0x90] sm:$0xff]  ;;  %676 = vadd.xlane.f32.xlu0 %v675_v11 }
 0x113   : > { %v620_v45 = vpop.xlane.xlu0 %619  ;;  %v1065_v18 = vsub.f32 %v2931_v3, %v3675_v30 }
 0x114   : > { %2673 = vmatmul.msk.bf16.gmra.mxu0 %vm290_vm0, %v1877_v34  ;;  %v1347_v34 = vsub.f32 1.5, %v1346_v54  ;;  %v820_v37 = vmul.f32 0.03125, %v620_v45  ;;  %v3889_v27 = vpop.eup %2841  ;;  %v3902_v21 = vadd.f32 1e-05, %v1008_v41 }
 0x115   : > { %v1384_v32 = vmul.f32 %v3889_v27, %v3836_v62  ;;  %v3937_v12 = vpop.eup %2843  ;;  %vm1390_vm4 = vweird.f32 %v3889_v27 }
 0x116   : > { %v1348_v4 = vmul.f32 %v3742_v7, %v1347_v34  ;;  %v946_v28 = vsub.f32 %v820_v37, %v883_v0  ;;  %v1374_v34 = vmul.f32 %v3884_v14, %v3832_v26  ;;  %2847 = vrsqrt.f32 %v3902_v21  ;;  %vm3999_vm6 = vmor %vm1389_vm3, %vm1390_vm4 }
 0x117   : > { %v371_v46 = vpop.xlane.xlu1 %370  ;;  %v1385_v15 = vmul.f32 %v3889_v27, %v1384_v32  ;;  %v1066_v0 = vsub.f32 %v2932_v50, %v3715_v36  ;;  %v1394_v55 = vmul.f32 %v3937_v12, %v3886_v60  ;;  %vm1419_vm11 = vweird.f32 %v3902_v21 }
 0x118   : > { %v1352_v63 = vsel %vm3865_vm9, %v3742_v7, %v1348_v4  ;;  %v1357_v7 = vsub.f32 1.5, %v1356_v2  ;;  %v3905_v40 = vmul.f32 0.03125, %v371_v46  ;;  %v1009_v9 = vmax.f32 %v946_v28, 0.0  ;;  %v272_v46 = vld [vmem:[%s3126_s9 + $0x168] sm:$0xff] }
 0x119   : > { %v1820_v29 = vmul.f32 %v1352_v63, %v1064_v24  ;;  %v1375_v42 = vmul.f32 %v3884_v14, %v1374_v34  ;;  %v426_v61 = vsel %vm290_vm0, %v272_v46, 0.0  ;;  %v525_v20 = vmul.f32 %v272_v46, %v272_v46  ;;  %v3956_v63 = vpop.eup %2845  ;;  %v2933_v24 = vld [vmem:[%s3126_s9 + $0xa0] sm:$0xff] }
 0x11a   : > { %v1358_v51 = vmul.f32 %v3816_v19, %v1357_v7  ;;  %v884_v45 = vmul.f32 %v3905_v40, %v3905_v40  ;;  %427 = vadd.xlane.f32.xlu2 %v426_v61  ;;  %v3949_v2 = vadd.f32 1e-05, %v1009_v9  ;;  %v1386_v37 = vmul.f32 0.5, %v1385_v15 }
 0x11b   : > { %v1879_v35 = vpack.c.bf16 %v1820_v29, %v1819_v44  ;;  %v678_v48 = vsel %vm290_vm0, %v525_v20, 0.0  ;;  %v1404_v28 = vmul.f32 %v3956_v63, %v3891_v33  ;;  %vm1400_vm9 = vweird.f32 %v3937_v12 }
 0x11c   : > { %v1362_v58 = vsel %vm3926_vm14, %v3816_v19, %v1358_v51  ;;  %679 = vadd.xlane.f32.xlu1 %v678_v48  ;;  %v1372_v19 = vsel %vm3945_vm15, %v3829_v25, %v1368_v53  ;;  %v3966_v29 = vpop.eup %2847  ;;  %2849 = vrsqrt.f32 %v3949_v2  ;;  %v273_v25 = vld [vmem:[%s3126_s9 + $0x170] sm:$0xff]  ;;  %v1395_v51 = vmul.f32 %v3937_v12, %v1394_v55  ;;  %vm4063_vm12 = vmor %vm1399_vm7, %vm1400_vm9 }
 0x11d   : > { %v1821_v36 = vmul.f32 %v1362_v58, %v1065_v18  ;;  %v429_v9 = vsel %vm290_vm0, %v273_v25, 0.0  ;;  %v1405_v46 = vmul.f32 %v3956_v63, %v1404_v28  ;;  %v1067_v48 = vsub.f32 %v2933_v24, %v3747_v59 }
 0x11e   : > { %v1396_v11 = vmul.f32 0.5, %v1395_v51  ;;  %vm1410_vm10 = vweird.f32 %v3956_v63  ;;  %vm1420_vm13 = vweird.f32 %v3966_v29  ;;  %vm1429_vm1 = vweird.f32 %v3949_v2 }
 0x11f   : > { %vm4080_vm14 = vmor %vm1409_vm8, %vm1410_vm10 }
 0x120   : > { %vm4096_vm15 = vmor %vm1419_vm11, %vm1420_vm13 }
 0x122   : > { %430 = vadd.xlane.f32.xlu2 %v429_v9  ;;  %v3985_v47 = vpop.eup %2849 }
 0x123   : > { %vm1430_vm2 = vweird.f32 %v3985_v47 }
 0x124   : > { %2674 = vmatmul.msk.bf16.gmra.mxu0 %vm290_vm0, %v1878_v6  ;;  %v374_v54 = vpop.xlane.xlu2 %373  ;;  %vm4145_vm3 = vmor %vm1429_vm1, %vm1430_vm2 }
 0x125   : > { %v3896_v23 = vmul.f32 0.03125, %v374_v54  ;;  %v623_v49 = vpop.xlane.xlu0 %622  ;;  %v1376_v54 = vmul.f32 0.5, %v1375_v42  ;;  %v1414_v42 = vmul.f32 %v3966_v29, %v3902_v21 }
 0x126   : > { %v821_v22 = vmul.f32 0.03125, %v623_v49  ;;  %v1387_v49 = vsub.f32 1.5, %v1386_v37  ;;  %v1406_v37 = vmul.f32 0.5, %v1405_v46 }
 0x127   : > { %v626_v6 = vpop.xlane.xlu1 %625  ;;  %v885_v38 = vmul.f32 %v3896_v23, %v3896_v23  ;;  %v1377_v17 = vsub.f32 1.5, %v1376_v54  ;;  %v1415_v26 = vmul.f32 %v3966_v29, %v1414_v42  ;;  %v1424_v54 = vmul.f32 %v3985_v47, %v3949_v2 }
 0x128   : > { %v822_v4 = vmul.f32 0.03125, %v626_v6  ;;  %v947_v44 = vsub.f32 %v821_v22, %v884_v45  ;;  %v1388_v45 = vmul.f32 %v3889_v27, %v1387_v49 }
 0x129   : > { %v1378_v20 = vmul.f32 %v3884_v14, %v1377_v17 }
 0x12a   : > { %v948_v30 = vsub.f32 %v822_v4, %v885_v38  ;;  %v1010_v4 = vmax.f32 %v947_v44, 0.0  ;;  %v1392_v55 = vsel %vm3999_vm6, %v3889_v27, %v1388_v45 }
 0x12c   : > { %v3910_v1 = vpop.xlane.xlu2 %376  ;;  %v1011_v32 = vmax.f32 %v948_v30, 0.0  ;;  %v4004_v3 = vadd.f32 1e-05, %v1010_v4  ;;  %v4013_v30 = vld [vmem:[%s3126_s9 + $0xb0] sm:$0xff] }
 0x12d   : > { %v380_v41 = vpop.xlane.xlu0 %379  ;;  %v1069_v50 = vsub.f32 %v4013_v30, %v3808_v39 }
 0x12e   : > { %v3983_v56 = vadd.f32 1e-05, %v1011_v32  ;;  %v4006_v18 = vmul.f32 0.03125, %v380_v41  ;;  %v1382_v41 = vsel %vm3991_vm5, %v3884_v14, %v1378_v20  ;;  %v1425_v14 = vmul.f32 %v3985_v47, %v1424_v54 }
 0x12f   : > { %v3971_v7 = vpop.xlane.xlu1 %628  ;;  %vm1439_vm6 = vweird.f32 %v4004_v3 }
 0x130   : > { %2851 = vrsqrt.f32 %v3983_v56  ;;  %v887_v44 = vmul.f32 %v4006_v18, %v4006_v18  ;;  %v823_v17 = vmul.f32 0.03125, %v3971_v7  ;;  %vm1449_vm4 = vweird.f32 %v3983_v56 }
 0x131   : > { %v2023_v13 = vpop.f32.mrf.mxu0  ;;  %2853 = vrsqrt.f32 %v4004_v3 }
 0x132   : > { %v2024_v57 = vadd.f32 %v3916_v43, %v2023_v13 }
 0x134   : > { %2675 = vmatmul.msk.bf16.gmra.mxu0 %vm290_vm0, %v1879_v35  ;;  %v2182_v34 = vmax.f32 %v2024_v57, 0.0  ;;  %v632_v13 = vpop.xlane.xlu2 %631  ;;  %v1822_v35 = vmul.f32 %v1372_v19, %v1066_v0  ;;  %v2934_v57 = vld [vmem:[%s3126_s9 + $0xa8] sm:$0xff]  ;;  %v1416_v19 = vmul.f32 0.5, %v1415_v26 }
 0x135   : > { %v3997_v53 = vpop.xlane.xlu0 %382  ;;  %v1068_v58 = vsub.f32 %v2934_v57, %v3753_v5  ;;  %v274_v5 = vld [vmem:[%s3126_s9 + $0x178] sm:$0xff]  ;;  %v275_v57 = vld [vmem:[%s3126_s9 + $0x180] sm:$0xff] }
 0x136   : > { %v1880_v61 = vpack.c.bf16 %v1822_v35, %v1821_v36  ;;  %v824_v36 = vmul.f32 0.03125, %v632_v13  ;;  %v432_v28 = vsel %vm290_vm0, %v274_v5, 0.0  ;;  %v1417_v51 = vsub.f32 1.5, %v1416_v19  ;;  %v4088_v19 = vld [vmem:[%s3126_s9 + $0xc8] sm:$0xff] }
 0x137   : > { %v4017_v0 = vpop.xlane.xlu1 %385  ;;  %433 = vadd.xlane.f32.xlu0 %v432_v28  ;;  %v1824_v7 = vmul.f32 %v1392_v55, %v1068_v58  ;;  %v2936_v58 = vld [vmem:[%s3126_s9 + $0xb8] sm:$0xff] }
 0x138   : > { %v950_v4 = vsub.f32 %v824_v36, %v887_v44  ;;  %v1418_v55 = vmul.f32 %v3966_v29, %v1417_v51  ;;  %v1072_v44 = vsub.f32 %v4088_v19, %v3858_v52  ;;  %v4128_v51 = vmul.f32 0.03125, %v3997_v53 }
 0x139   : > { %v2025_v16 = vpop.f32.mrf.mxu0 }
 0x13a   : > { %v2026_v8 = vadd.f32 %v3916_v43, %v2025_v16  ;;  %v4029_v16 = vmul.f32 0.03125, %v3910_v1  ;;  %v527_v1 = vmul.f32 %v274_v5, %v274_v5  ;;  %v2937_v5 = vld [vmem:[%s3126_s9 + $0xc0] sm:$0xff] }
 0x13c   : > { %v2183_v6 = vmax.f32 %v2026_v8, 0.0  ;;  %v4024_v59 = vpop.xlane.xlu2 %634  ;;  %v1397_v8 = vsub.f32 1.5, %v1396_v11  ;;  %v886_v49 = vmul.f32 %v4029_v16, %v4029_v16  ;;  %v684_v13 = vsel %vm290_vm0, %v527_v1, 0.0 }
 0x13d   : > { %v4049_v9 = vpop.xlane.xlu0 %637  ;;  %685 = vadd.xlane.f32.xlu2 %v684_v13  ;;  %v1422_v13 = vsel %vm4096_vm15, %v3966_v29, %v1418_v55  ;;  %v276_v29 = vld [vmem:[%s3126_s9 + $0x188] sm:$0xff] }
 0x13e   : > { %v2262_v38 = vpack.c.bf16 %v2183_v6, %v2182_v34  ;;  %v526_v34 = vmul.f32 %v273_v25, %v273_v25  ;;  %v1407_v6 = vsub.f32 1.5, %v1406_v37  ;;  %v4051_v25 = vpop.eup %2851  ;;  %v1398_v46 = vmul.f32 %v3937_v12, %v1397_v8 }
 0x13f   : > { %v4057_v15 = vpop.eup %2853  ;;  %v389_v11 = vpop.xlane.xlu1 %388  ;;  %v1444_v26 = vmul.f32 %v4051_v25, %v3983_v56  ;;  %v949_v24 = vsub.f32 %v823_v17, %v886_v49  ;;  %v1070_v37 = vsub.f32 %v2936_v58, %v3818_v31  ;;  %v825_v58 = vmul.f32 0.03125, %v4024_v59 }
 0x140   : > { %2353 = vmatmul.bf16.vlgmr.msra.gmra.mxu1 %v2262_v38  ;;  %v681_v35 = vsel %vm290_vm0, %v526_v34, 0.0  ;;  %v1823_v38 = vmul.f32 %v1382_v41, %v1067_v48  ;;  %v1408_v48 = vmul.f32 %v3956_v63, %v1407_v6  ;;  %v4071_v60 = vmul.f32 0.03125, %v389_v11 }
 0x141   : > { %v2028_v62 = vpop.f32.mrf.mxu0  ;;  %682 = vadd.xlane.f32.xlu1 %v681_v35  ;;  %v1071_v41 = vsub.f32 %v2937_v5, %v3824_v10  ;;  %v1434_v33 = vmul.f32 %v4057_v15, %v4004_v3  ;;  %v1013_v10 = vmax.f32 %v950_v4, 0.0  ;;  %v1402_v36 = vsel %vm4063_vm12, %v3937_v12, %v1398_v46 }
 0x142   : > { %v2029_v32 = vadd.f32 %v3916_v43, %v2028_v62  ;;  %v1881_v1 = vpack.c.bf16 %v1824_v7, %v1823_v38  ;;  %v435_v6 = vsel %vm290_vm0, %v275_v57, 0.0  ;;  %v1445_v21 = vmul.f32 %v4051_v25, %v1444_v26 }
 0x143   : > { %v890_v49 = vmul.f32 %v4071_v60, %v4071_v60  ;;  %436 = vadd.xlane.f32.xlu0 %v435_v6  ;;  %v4119_v12 = vmul.f32 %v1402_v36, %v1069_v50  ;;  %v4125_v35 = vadd.f32 1e-05, %v1013_v10  ;;  %v528_v4 = vmul.f32 %v275_v57, %v275_v57 }
 0x144   : > { %2676 = vmatmul.msk.bf16.gmra.mxu0 %vm290_vm0, %v1880_v61  ;;  %v1426_v61 = vmul.f32 0.5, %v1425_v14  ;;  %v2184_v20 = vmax.f32 %v2029_v32, 0.0  ;;  %v392_v22 = vpop.xlane.xlu2 %391  ;;  %v1012_v32 = vmax.f32 %v949_v24, 0.0  ;;  %v1446_v46 = vmul.f32 0.5, %v1445_v21 }
 0x145   : > { %v4105_v34 = vmul.f32 0.03125, %v392_v22  ;;  %v641_v17 = vpop.xlane.xlu0 %640  ;;  %v4139_v53 = vmul.f32 %v1422_v13, %v1071_v41  ;;  %v438_v22 = vsel %vm290_vm0, %v276_v29, 0.0  ;;  %v687_v11 = vsel %vm290_vm0, %v528_v4, 0.0 }
 0x146   : > { %v1427_v28 = vsub.f32 1.5, %v1426_v61  ;;  %v4137_v62 = vadd.f32 1e-05, %v1012_v32  ;;  %v529_v26 = vmul.f32 %v276_v29, %v276_v29  ;;  %2855 = vrsqrt.f32 %v4125_v35  ;;  %688 = vadd.xlane.f32.xlu2 %v687_v11 }
 0x147   : > { %v891_v30 = vmul.f32 %v4105_v34, %v4105_v34  ;;  %v644_v7 = vpop.xlane.xlu1 %643  ;;  %v1447_v31 = vsub.f32 1.5, %v1446_v46  ;;  %vm1450_vm5 = vweird.f32 %v4051_v25  ;;  %vm1440_vm7 = vweird.f32 %v4057_v15 }
 0x148   : > { %v1428_v38 = vmul.f32 %v3985_v47, %v1427_v28  ;;  %v690_v54 = vsel %vm290_vm0, %v529_v26, 0.0  ;;  %2857 = vrsqrt.f32 %v4137_v62  ;;  %v4168_v28 = vmul.f32 0.03125, %v4017_v0  ;;  %vm4197_vm8 = vmor %vm1449_vm4, %vm1450_vm5 }
 0x149   : > { %v2030_v27 = vpop.f32.mrf.mxu0  ;;  %439 = vadd.xlane.f32.xlu1 %v438_v22  ;;  %v1448_v4 = vmul.f32 %v4051_v25, %v1447_v31  ;;  %vm4210_vm9 = vmor %vm1439_vm6, %vm1440_vm7  ;;  %v826_v22 = vmul.f32 0.03125, %v4049_v9  ;;  %vm1469_vm7 = vweird.f32 %v4125_v35 }
 0x14a   : > { %v2031_v42 = vadd.f32 %v3916_v43, %v2030_v27  ;;  %v1412_v27 = vsel %vm4080_vm14, %v3956_v63, %v1408_v48  ;;  %v1435_v63 = vmul.f32 %v4057_v15, %v1434_v33  ;;  %v888_v48 = vmul.f32 %v4128_v51, %v4128_v51 }
 0x14b   : > { %v4132_v39 = vmul.f32 %v1412_v27, %v1070_v37  ;;  %691 = vadd.xlane.f32.xlu0 %v690_v54  ;;  %v889_v19 = vmul.f32 %v4168_v28, %v4168_v28 }
 0x14c   : > { %v2185_v45 = vmax.f32 %v2031_v42, 0.0  ;;  %v827_v42 = vmul.f32 0.03125, %v641_v17  ;;  %v395_v50 = vpop.xlane.xlu2 %394  ;;  %v1436_v24 = vmul.f32 0.5, %v1435_v63  ;;  %v4176_v17 = vpop.eup %2855 }
 0x14d   : > { %v4160_v55 = vmul.f32 0.03125, %v395_v50  ;;  %v398_v10 = vpop.xlane.xlu0 %397  ;;  %v1882_v3 = vpack.c.bf16 %v4132_v39, %v4119_v12  ;;  %v278_v12 = vld [vmem:[%s3126_s9 + $0x198] sm:$0xff] }
 0x14e   : > { %v2263_v8 = vpack.c.bf16 %v2185_v45, %v2184_v20  ;;  %v953_v61 = vsub.f32 %v827_v42, %v890_v49  ;;  %v828_v45 = vmul.f32 0.03125, %v644_v7  ;;  %v1437_v36 = vsub.f32 1.5, %v1436_v24  ;;  %v277_v49 = vld [vmem:[%s3126_s9 + $0x190] sm:$0xff] }
 0x14f   : > { %v647_v27 = vpop.xlane.xlu1 %646  ;;  %v892_v0 = vmul.f32 %v4160_v55, %v4160_v55  ;;  %v441_v29 = vsel %vm290_vm0, %v277_v49, 0.0  ;;  %v1464_v20 = vmul.f32 %v4176_v17, %v4125_v35  ;;  %v2939_v24 = vld [vmem:[%s3126_s9 + $0xd0] sm:$0xff] }
 0x150   : > { %2358 = vmatmul.bf16.gmra.mxu1 %v2263_v8  ;;  %v1016_v57 = vmax.f32 %v953_v61, 0.0  ;;  %v954_v37 = vsub.f32 %v828_v45, %v891_v30  ;;  %v1432_v8 = vsel %vm4145_vm3, %v3985_v47, %v1428_v38  ;;  %v951_v47 = vsub.f32 %v825_v58, %v888_v48  ;;  %v4186_v38 = vpop.eup %2857  ;;  %v2940_v58 = vld [vmem:[%s3126_s9 + $0xd8] sm:$0xff] }
 0x151   : > { %v2033_v14 = vpop.f32.mrf.mxu0  ;;  %v4191_v30 = vmul.f32 %v1432_v8, %v1072_v44  ;;  %v829_v7 = vmul.f32 0.03125, %v647_v27  ;;  %v1438_v61 = vmul.f32 %v4057_v15, %v1437_v36  ;;  %442 = vadd.xlane.f32.xlu1 %v441_v29  ;;  %v1073_v48 = vsub.f32 %v2939_v24, %v3905_v40 }
 0x152   : > { %v2034_v2 = vadd.f32 %v3916_v43, %v2033_v14  ;;  %v4158_v41 = vadd.f32 1e-05, %v1016_v57  ;;  %v1017_v33 = vmax.f32 %v954_v37, 0.0  ;;  %v1014_v52 = vmax.f32 %v951_v47, 0.0 }
 0x153   : > { %v955_v26 = vsub.f32 %v829_v7, %v892_v0  ;;  %v1454_v57 = vmul.f32 %v4186_v38, %v4137_v62  ;;  %v1074_v37 = vsub.f32 %v2940_v58, %v3896_v23  ;;  %v1883_v9 = vpack.c.bf16 %v4191_v30, %v4139_v53 }
 0x154   : > { %2677 = vmatmul.msk.bf16.gmra.mxu0 %vm290_vm0, %v1881_v1  ;;  %2859 = vrsqrt.f32 %v4158_v41  ;;  %v4171_v1 = vmul.f32 0.03125, %v398_v10  ;;  %v2186_v6 = vmax.f32 %v2034_v2, 0.0  ;;  %v4173_v14 = vadd.f32 1e-05, %v1017_v33  ;;  %v650_v32 = vpop.xlane.xlu2 %649 }
 0x155   : > { %v830_v63 = vmul.f32 0.03125, %v650_v32  ;;  %v401_v8 = vpop.xlane.xlu0 %400  ;;  %v4233_v31 = vadd.f32 1e-05, %v1014_v52  ;;  %v1442_v39 = vsel %vm4210_vm9, %v4057_v15, %v1438_v61  ;;  %v1452_v23 = vsel %vm4197_vm8, %v4051_v25, %v1448_v4 }
 0x156   : > { %v893_v13 = vmul.f32 %v4171_v1, %v4171_v1  ;;  %2861 = vrsqrt.f32 %v4173_v14  ;;  %v1465_v33 = vmul.f32 %v4176_v17, %v1464_v20  ;;  %v952_v10 = vsub.f32 %v826_v22, %v889_v19 }
 0x157   : > { %v4251_v15 = vmul.f32 0.03125, %v401_v8  ;;  %v444_v27 = vsel %vm290_vm0, %v278_v12, 0.0  ;;  %v4265_v29 = vmul.f32 %v1442_v39, %v1073_v48  ;;  %vm1499_vm10 = vweird.f32 %v4158_v41 }
 0x158   : > { %v956_v50 = vsub.f32 %v830_v63, %v893_v13  ;;  %445 = vadd.xlane.f32.xlu2 %v444_v27  ;;  %v4258_v63 = vmul.f32 %v1452_v23, %v1074_v37  ;;  %v1015_v46 = vmax.f32 %v952_v10, 0.0  ;;  %v279_v37 = vld [vmem:[%s3126_s9 + $0x1a0] sm:$0xff]  ;;  %vm1509_vm11 = vweird.f32 %v4173_v14 }
 0x159   : > { %v2035_v5 = vpop.f32.mrf.mxu0  ;;  %v894_v19 = vmul.f32 %v4251_v15, %v4251_v15  ;;  %v447_v39 = vsel %vm290_vm0, %v279_v37, 0.0  ;;  %vm1459_vm8 = vweird.f32 %v4137_v62  ;;  %vm1470_vm9 = vweird.f32 %v4176_v17 }
 0x15a   : > { %v2036_v59 = vadd.f32 %v3916_v43, %v2035_v5  ;;  %v4204_v44 = vpop.eup %2859  ;;  %v1019_v11 = vmax.f32 %v956_v50, 0.0  ;;  %v1018_v5 = vmax.f32 %v955_v26, 0.0  ;;  %v4262_v50 = vmul.f32 0.5, %v1465_v33 }
 0x15b   : > { %v1494_v2 = vmul.f32 %v4204_v44, %v4158_v41  ;;  %vm1500_vm12 = vweird.f32 %v4204_v44  ;;  %v1884_v30 = vpack.c.bf16 %v4258_v63, %v4265_v29 }
 0x15c   : > { %v2187_v21 = vmax.f32 %v2036_v59, 0.0  ;;  %v4229_v54 = vadd.f32 1e-05, %v1019_v11  ;;  %v4231_v40 = vpop.eup %2861  ;;  %v530_v59 = vmul.f32 %v277_v49, %v277_v49  ;;  %v4249_v32 = vadd.f32 1e-05, %v1018_v5  ;;  %v653_v24 = vpop.xlane.xlu2 %652  ;;  %v4286_v5 = vld [vmem:[%s3126_s9 + $0x100] sm:$0xff]  ;;  %vm4313_vm2 = vmor %vm1499_vm10, %vm1500_vm12 }
 0x15d   : > { %v1504_v36 = vmul.f32 %v4231_v40, %v4173_v14  ;;  %v1495_v47 = vmul.f32 %v4204_v44, %v1494_v2  ;;  %v531_v49 = vmul.f32 %v278_v12, %v278_v12  ;;  %v831_v2 = vmul.f32 0.03125, %v653_v24  ;;  %v656_v58 = vpop.xlane.xlu0 %655 }
 0x15e   : > { %v2264_v42 = vpack.c.bf16 %v2187_v21, %v2186_v6  ;;  %2863 = vrsqrt.f32 %v4229_v54  ;;  %v404_v6 = vpop.xlane.xlu1 %403  ;;  %v1455_v21 = vmul.f32 %v4186_v38, %v1454_v57  ;;  %v693_v0 = vsel %vm290_vm0, %v530_v59, 0.0 }
 0x15f   : > { %v1505_v25 = vmul.f32 %v4231_v40, %v1504_v36  ;;  %2865 = vrsqrt.f32 %v4249_v32  ;;  %694 = vadd.xlane.f32.xlu0 %v693_v0  ;;  %v696_v4 = vsel %vm290_vm0, %v531_v49, 0.0  ;;  %v1496_v52 = vmul.f32 0.5, %v1495_v47 }
 0x160   : > { %2363 = vmatmul.bf16.gmra.mxu1 %v2264_v42  ;;  %v4260_v42 = vmul.f32 0.03125, %v404_v6  ;;  %2867 = vrsqrt.f32 %v4233_v31  ;;  %697 = vadd.xlane.f32.xlu1 %v696_v4  ;;  %v4273_v20 = vmul.f32 0.5, %v1455_v21  ;;  %v1079_v8 = vsub.f32 %v4286_v5, %v4071_v60 }
 0x161   : > { %v2038_v45 = vpop.f32.mrf.mxu0  ;;  %v1506_v11 = vmul.f32 0.5, %v1505_v25  ;;  %v832_v12 = vmul.f32 0.03125, %v656_v58  ;;  %v1497_v59 = vsub.f32 1.5, %v1496_v52  ;;  %v957_v36 = vsub.f32 %v831_v2, %v894_v19  ;;  %448 = vadd.xlane.f32.xlu2 %v447_v39  ;;  %v2944_v39 = vld [vmem:[%s3126_s9 + $0x118] sm:$0xff] }
 0x162   : > { %v2039_v13 = vadd.f32 %v3916_v43, %v2038_v45  ;;  %v4276_v45 = vld [vmem:[%s3126_s9 + $0x108] sm:$0xff]  ;;  %v895_v26 = vmul.f32 %v4260_v42, %v4260_v42  ;;  %vm1510_vm13 = vweird.f32 %v4231_v40  ;;  %vm1529_vm14 = vweird.f32 %v4229_v54 }
 0x163   : > { %v1080_v22 = vsub.f32 %v4276_v45, %v4105_v34  ;;  %v1507_v21 = vsub.f32 1.5, %v1506_v11  ;;  %v1020_v49 = vmax.f32 %v957_v36, 0.0  ;;  %vm1519_vm15 = vweird.f32 %v4249_v32  ;;  %vm4329_vm4 = vmor %vm1509_vm11, %vm1510_vm13 }
 0x164   : > { %2678 = vmatmul.msk.bf16.gmra.mxu0 %vm290_vm0, %v1882_v3  ;;  %v4271_v56 = vpop.eup %2863  ;;  %v2188_v48 = vmax.f32 %v2039_v13, 0.0  ;;  %v958_v25 = vsub.f32 %v832_v12, %v895_v26  ;;  %v532_v58 = vmul.f32 %v279_v37, %v279_v37  ;;  %v410_v12 = vpop.xlane.xlu2 %409  ;;  %vm1460_vm10 = vweird.f32 %v4186_v38  ;;  %vm4430_vm13 = vmor %vm1469_vm7, %vm1470_vm9 }
 0x165   : > { %v1524_v3 = vmul.f32 %v4271_v56, %v4229_v54  ;;  %v4292_v23 = vpop.eup %2865  ;;  %vm1530_vm1 = vweird.f32 %v4271_v56  ;;  %v4307_v19 = vadd.f32 1e-05, %v1020_v49  ;;  %v1508_v26 = vmul.f32 %v4231_v40, %v1507_v21 }
 0x166   : > { %v4295_v6 = vpop.eup %2867  ;;  %v1514_v47 = vmul.f32 %v4292_v23, %v4249_v32  ;;  %v407_v0 = vpop.xlane.xlu1 %406  ;;  %v1021_v4 = vmax.f32 %v958_v25, 0.0  ;;  %vm1520_vm3 = vweird.f32 %v4292_v23  ;;  %vm4345_vm5 = vmor %vm1529_vm14, %vm1530_vm1  ;;  %v4360_v54 = vmul.f32 0.03125, %v410_v12 }
 0x167   : > { %v1525_v10 = vmul.f32 %v4271_v56, %v1524_v3  ;;  %v2943_v3 = vld [vmem:[%s3126_s9 + $0x110] sm:$0xff]  ;;  %2869 = vrsqrt.f32 %v4307_v19  ;;  %vm4355_vm6 = vmor %vm1519_vm15, %vm1520_vm3  ;;  %v1512_v36 = vsel %vm4329_vm4, %v4231_v40, %v1508_v26  ;;  %vm1539_vm11 = vweird.f32 %v4307_v19 }
 0x168   : > { %v1081_v2 = vsub.f32 %v2943_v3, %v4160_v55  ;;  %v1082_v55 = vsub.f32 %v2944_v39, %v4171_v1  ;;  %v897_v25 = vmul.f32 %v4360_v54, %v4360_v54  ;;  %v1457_v39 = vsub.f32 1.5, %v4273_v20 }
 0x169   : > { %v2040_v7 = vpop.f32.mrf.mxu0  ;;  %v1526_v27 = vmul.f32 0.5, %v1525_v10  ;;  %v1474_v29 = vmul.f32 %v4295_v6, %v4233_v31  ;;  %vm1479_vm4 = vweird.f32 %v4233_v31 }
 0x16a   : > { %v2041_v61 = vadd.f32 %v3916_v43, %v2040_v7  ;;  %v1515_v7 = vmul.f32 %v4292_v23, %v1514_v47 }
 0x16b   : > { %v1527_v52 = vsub.f32 1.5, %v1526_v27 }
 0x16c   : > { %v2189_v57 = vmax.f32 %v2041_v61, 0.0  ;;  %v1498_v61 = vmul.f32 %v4204_v44, %v1497_v59  ;;  %v1516_v24 = vmul.f32 0.5, %v1515_v7  ;;  %v1467_v7 = vsub.f32 1.5, %v4262_v50 }
 0x16d   : > { %v1528_v37 = vmul.f32 %v4271_v56, %v1527_v52 }
 0x16e   : > { %v2265_v33 = vpack.c.bf16 %v2189_v57, %v2188_v48  ;;  %v4319_v48 = vadd.f32 1e-05, %v1021_v4  ;;  %v4321_v57 = vadd.f32 1e-05, %v1015_v46  ;;  %v280_v46 = vld [vmem:[%s3126_s9 + $0x1a8] sm:$0xff]  ;;  %v1517_v59 = vsub.f32 1.5, %v1516_v24 }
 0x16f   : > { %v450_v53 = vsel %vm290_vm0, %v280_v46, 0.0  ;;  %v533_v1 = vmul.f32 %v280_v46, %v280_v46  ;;  %v1502_v32 = vsel %vm4313_vm2, %v4204_v44, %v1498_v61  ;;  %v1532_v27 = vsel %vm4345_vm5, %v4271_v56, %v1528_v37  ;;  %v4394_v56 = vpop.eup %2869  ;;  %v662_v61 = vpop.xlane.xlu1 %661  ;;  %v281_v24 = vld [vmem:[%s3126_s9 + $0x1b0] sm:$0xff]  ;;  %vm4456_vm2 = vmor %vm1459_vm8, %vm1460_vm10 }
 0x170   : > { %2368 = vmatmul.bf16.gmra.mxu1 %v2265_v33  ;;  %2871 = vrsqrt.f32 %v4319_v48  ;;  %451 = vadd.xlane.f32.xlu0 %v450_v53  ;;  %v4364_v33 = vmul.f32 0.03125, %v407_v0  ;;  %v1518_v10 = vmul.f32 %v4292_v23, %v1517_v59  ;;  %v1838_v40 = vmul.f32 %v1532_v27, %v1082_v55 }
 0x171   : > { %v2043_v13 = vpop.f32.mrf.mxu0  ;;  %v702_v47 = vsel %vm290_vm0, %v533_v1, 0.0  ;;  %v4387_v0 = vmul.f32 %v1502_v32, %v1079_v8  ;;  %2873 = vrsqrt.f32 %v4321_v57  ;;  %v1534_v60 = vmul.f32 %v4394_v56, %v4307_v19  ;;  %v2946_v19 = vld [vmem:[%s3126_s9 + $0x128] sm:$0xff] }
 0x172   : > { %v2044_v21 = vadd.f32 %v3916_v43, %v2043_v13  ;;  %703 = vadd.xlane.f32.xlu2 %v702_v47  ;;  %v1522_v44 = vsel %vm4355_vm6, %v4292_v23, %v1518_v10  ;;  %v4392_v13 = vmul.f32 %v1512_v36, %v1080_v22  ;;  %v896_v34 = vmul.f32 %v4364_v33, %v4364_v33  ;;  %v659_v22 = vpop.xlane.xlu0 %658  ;;  %v413_v36 = vpop.xlane.xlu2 %412 }
 0x173   : > { %v1837_v4 = vmul.f32 %v1522_v44, %v1081_v2  ;;  %v834_v45 = vmul.f32 0.03125, %v662_v61  ;;  %v1535_v3 = vmul.f32 %v4394_v56, %v1534_v60  ;;  %v833_v41 = vmul.f32 0.03125, %v659_v22 }
 0x174   : > { %2679 = vmatmul.msk.bf16.gmra.mxu0 %vm290_vm0, %v1883_v9  ;;  %v699_v9 = vsel %vm290_vm0, %v532_v58, 0.0  ;;  %v1887_v5 = vpack.c.bf16 %v4392_v13, %v4387_v0  ;;  %v2190_v50 = vmax.f32 %v2044_v21, 0.0  ;;  %v453_v46 = vsel %vm290_vm0, %v281_v24, 0.0 }
 0x175   : > { %700 = vadd.xlane.f32.xlu1 %v699_v9  ;;  %v1888_v26 = vpack.c.bf16 %v1838_v40, %v1837_v4  ;;  %v960_v2 = vsub.f32 %v834_v45, %v897_v25  ;;  %v1536_v55 = vmul.f32 0.5, %v1535_v3  ;;  %v959_v59 = vsub.f32 %v833_v41, %v896_v34  ;;  %v2945_v25 = vld [vmem:[%s3126_s9 + $0x120] sm:$0xff] }
 0x176   : > { %v4399_v52 = vpop.eup %2871  ;;  %vm1540_vm12 = vweird.f32 %v4394_v56  ;;  %v1468_v9 = vmul.f32 %v4176_v17, %v1467_v7  ;;  %vm1549_vm14 = vweird.f32 %v4319_v48  ;;  %v1458_v47 = vmul.f32 %v4186_v38, %v1457_v39  ;;  %v282_v7 = vld [vmem:[%s3126_s9 + $0x1b8] sm:$0xff] }
 0x177   : > { %v1544_v11 = vmul.f32 %v4399_v52, %v4319_v48  ;;  %2684 = vmatmul.msk.bf16.vlgmr.msra.gmra.mxu3 %vm290_vm0, %v1888_v26  ;;  %v1023_v14 = vmax.f32 %v960_v2, 0.0  ;;  %v4417_v53 = vpop.eup %2873  ;;  %v1537_v10 = vsub.f32 1.5, %v1536_v55  ;;  %v1022_v32 = vmax.f32 %v959_v59, 0.0  ;;  %vm4445_vm1 = vmor %vm1539_vm11, %vm1540_vm12  ;;  %v665_v59 = vpop.xlane.xlu1 %664 }
 0x178   : > { %454 = vadd.xlane.f32.xlu0 %v453_v46  ;;  %vm1550_vm15 = vweird.f32 %v4399_v52  ;;  %v1083_v27 = vsub.f32 %v2945_v25, %v4251_v15  ;;  %v1484_v15 = vmul.f32 %v4417_v53, %v4321_v57  ;;  %v1084_v40 = vsub.f32 %v2946_v19, %v4260_v42 }
 0x179   : > { %v2045_v49 = vpop.f32.mrf.mxu0  ;;  %v1545_v12 = vmul.f32 %v4399_v52, %v1544_v11  ;;  %v4424_v20 = vadd.f32 1e-05, %v1023_v14  ;;  %v1538_v4 = vmul.f32 %v4394_v56, %v1537_v10  ;;  %vm4471_vm3 = vmor %vm1549_vm14, %vm1550_vm15  ;;  %v4476_v61 = vmul.f32 0.03125, %v413_v36  ;;  %v2948_v11 = vld [vmem:[%s3126_s9 + $0xe8] sm:$0xff] }
 0x17a   : > { %v2046_v23 = vadd.f32 %v3916_v43, %v2045_v49  ;;  %v4450_v49 = vadd.f32 1e-05, %v1022_v32  ;;  %v456_v60 = vsel %vm290_vm0, %v282_v7, 0.0  ;;  %v535_v42 = vmul.f32 %v282_v7, %v282_v7  ;;  %v416_v39 = vpop.xlane.xlu0 %415  ;;  %v668_v10 = vpop.xlane.xlu2 %667 }
 0x17b   : > { %v1546_v1 = vmul.f32 0.5, %v1545_v12  ;;  %2875 = vrsqrt.f32 %v4424_v20  ;;  %v1475_v34 = vmul.f32 %v4295_v6, %v1474_v29  ;;  %v1542_v48 = vsel %vm4445_vm1, %v4394_v56, %v1538_v4 }
 0x17c   : > { %v2191_v8 = vmax.f32 %v2046_v23, 0.0  ;;  %v534_v23 = vmul.f32 %v281_v24, %v281_v24  ;;  %2877 = vrsqrt.f32 %v4450_v49  ;;  %v1076_v26 = vsub.f32 %v2948_v11, %v4006_v18 }
 0x17d   : > { %v1547_v21 = vsub.f32 1.5, %v1546_v1  ;;  %457 = vadd.xlane.f32.xlu1 %v456_v60  ;;  %v708_v24 = vsel %vm290_vm0, %v535_v42, 0.0  ;;  %v1839_v3 = vmul.f32 %v1542_v48, %v1083_v27  ;;  %v1462_v41 = vsel %vm4456_vm2, %v4186_v38, %v1458_v47 }
 0x17e   : > { %v2266_v58 = vpack.c.bf16 %v2191_v8, %v2190_v50  ;;  %v705_v45 = vsel %vm290_vm0, %v534_v23, 0.0  ;;  %v2947_v50 = vld [vmem:[%s3126_s9 + $0xe0] sm:$0xff]  ;;  %v1472_v56 = vsel %vm4430_vm13, %v4176_v17, %v1468_v9  ;;  %v1485_v46 = vmul.f32 %v4417_v53, %v1484_v15 }
 0x17f   : > { %v1548_v22 = vmul.f32 %v4399_v52, %v1547_v21  ;;  %v1075_v8 = vsub.f32 %v2947_v50, %v4029_v16  ;;  %706 = vadd.xlane.f32.xlu2 %v705_v45  ;;  %v898_v12 = vmul.f32 %v4476_v61, %v4476_v61  ;;  %v1476_v38 = vmul.f32 0.5, %v1475_v34  ;;  %v283_v21 = vld [vmem:[%s3126_s9 + $0x1c0] sm:$0xff] }
 0x180   : > { %2373 = vmatmul.bf16.gmra.mxu1 %v2266_v58  ;;  %709 = vadd.xlane.f32.xlu0 %v708_v24  ;;  %v1832_v9 = vmul.f32 %v1472_v56, %v1076_v26  ;;  %v835_v32 = vmul.f32 0.03125, %v665_v59  ;;  %vm1489_vm5 = vweird.f32 %v4321_v57  ;;  %v1486_v47 = vmul.f32 0.5, %v1485_v46 }
 0x181   : > { %v2048_v37 = vpop.f32.mrf.mxu0  ;;  %v1552_v16 = vsel %vm4471_vm3, %v4399_v52, %v1548_v22  ;;  %v4500_v18 = vpop.eup %2875  ;;  %v4509_v52 = vmul.f32 0.03125, %v416_v39  ;;  %v1831_v1 = vmul.f32 %v1462_v41, %v1075_v8  ;;  %v836_v27 = vmul.f32 0.03125, %v668_v10  ;;  %v2949_v8 = vld [vmem:[%s3126_s9 + $0x130] sm:$0xff]  ;;  %v2950_v41 = vld [vmem:[%s3126_s9 + $0x138] sm:$0xff] }
 0x182   : > { %v2049_v2 = vadd.f32 %v3916_v43, %v2048_v37  ;;  %v1840_v55 = vmul.f32 %v1552_v16, %v1084_v40  ;;  %v1564_v14 = vmul.f32 %v4500_v18, %v4424_v20  ;;  %v961_v35 = vsub.f32 %v835_v32, %v898_v12  ;;  %v419_v24 = vpop.xlane.xlu0 %418  ;;  %v284_v16 = vld [vmem:[%s3126_s9 + $0x1c8] sm:$0xff] }
 0x183   : > { %v899_v25 = vmul.f32 %v4509_v52, %v4509_v52  ;;  %v459_v40 = vsel %vm290_vm0, %v283_v21, 0.0  ;;  %v1477_v7 = vsub.f32 1.5, %v1476_v38  ;;  %vm1480_vm6 = vweird.f32 %v4295_v6 }
 0x184   : > { %2680 = vmatmul.msk.bf16.gmra.mxu0 %vm290_vm0, %v1884_v30  ;;  %v4511_v30 = vpop.eup %2877  ;;  %v1889_v37 = vpack.c.bf16 %v1840_v55, %v1839_v3  ;;  %v2192_v36 = vmax.f32 %v2049_v2, 0.0  ;;  %v1565_v29 = vmul.f32 %v4500_v18, %v1564_v14  ;;  %v1024_v4 = vmax.f32 %v961_v35, 0.0  ;;  %vm4559_vm14 = vmor %vm1479_vm4, %vm1480_vm6 }
 0x185   : > { %v962_v23 = vsub.f32 %v836_v27, %v899_v25  ;;  %460 = vadd.xlane.f32.xlu1 %v459_v40  ;;  %vm1559_vm7 = vweird.f32 %v4450_v49  ;;  %vm1560_vm8 = vweird.f32 %v4511_v30  ;;  %vm1569_vm9 = vweird.f32 %v4424_v20  ;;  %v671_v27 = vpop.xlane.xlu2 %670 }
 0x186   : > { %v1566_v15 = vmul.f32 0.5, %v1565_v29  ;;  %vm1570_vm10 = vweird.f32 %v4500_v18  ;;  %v4528_v45 = vadd.f32 1e-05, %v1024_v4  ;;  %v1487_v48 = vsub.f32 1.5, %v1486_v47  ;;  %vm4533_vm12 = vmor %vm1559_vm7, %vm1560_vm8 }
 0x187   : > { %2685 = vmatmul.msk.bf16.gmra.mxu3 %vm290_vm0, %v1889_v37  ;;  %v1025_v34 = vmax.f32 %v962_v23, 0.0  ;;  %vm1490_vm11 = vweird.f32 %v4417_v53  ;;  %v1885_v22 = vpack.c.bf16 %v1832_v9, %v1831_v1  ;;  %v1478_v2 = vmul.f32 %v4295_v6, %v1477_v7  ;;  %vm4549_vm13 = vmor %vm1569_vm9, %vm1570_vm10 }
 0x188   : > { %v1567_v62 = vsub.f32 1.5, %v1566_v15  ;;  %2879 = vrsqrt.f32 %v4528_v45  ;;  %v1086_v56 = vsub.f32 %v2950_v41, %v4360_v54  ;;  %v536_v46 = vmul.f32 %v283_v21, %v283_v21  ;;  %vm4578_vm15 = vmor %vm1489_vm5, %vm1490_vm11 }
 0x189   : > { %v2050_v58 = vpop.f32.mrf.mxu0  ;;  %v4537_v26 = vadd.f32 1e-05, %v1025_v34  ;;  %v4564_v54 = vmul.f32 0.03125, %v419_v24  ;;  %v462_v20 = vsel %vm290_vm0, %v284_v16, 0.0  ;;  %v537_v39 = vmul.f32 %v284_v16, %v284_v16  ;;  %v2954_v16 = vld [vmem:[%s3126_s9 + $0x140] sm:$0xff] }
 0x18a   : > { %v2051_v17 = vadd.f32 %v3916_v43, %v2050_v58  ;;  %v1554_v43 = vmul.f32 %v4511_v30, %v4450_v49  ;;  %v1085_v49 = vsub.f32 %v2949_v8, %v4364_v33  ;;  %v1568_v3 = vmul.f32 %v4500_v18, %v1567_v62  ;;  %463 = vadd.xlane.f32.xlu2 %v462_v20 }
 0x18b   : > { %2881 = vrsqrt.f32 %v4537_v26  ;;  %v1488_v55 = vmul.f32 %v4417_v53, %v1487_v48  ;;  %v711_v38 = vsel %vm290_vm0, %v536_v46, 0.0  ;;  %v714_v1 = vsel %vm290_vm0, %v537_v39, 0.0  ;;  %v2955_v39 = vld [vmem:[%s3126_s9 + $0x148] sm:$0xff] }
 0x18c   : > { %v2193_v63 = vmax.f32 %v2051_v17, 0.0  ;;  %v1555_v19 = vmul.f32 %v4511_v30, %v1554_v43  ;;  %v2951_v17 = vld [vmem:[%s3126_s9 + $0xf0] sm:$0xff]  ;;  %712 = vadd.xlane.f32.xlu0 %v711_v38  ;;  %v1572_v9 = vsel %vm4549_vm13, %v4500_v18, %v1568_v3  ;;  %v1482_v57 = vsel %vm4559_vm14, %v4295_v6, %v1478_v2  ;;  %v422_v43 = vpop.xlane.xlu1 %421 }
 0x18d   : > { %v1077_v14 = vsub.f32 %v2951_v17, %v4128_v51  ;;  %v4589_v51 = vld [vmem:[%s5195_s2] ss:$0 sm:$0xff]  ;;  %715 = vadd.xlane.f32.xlu1 %v714_v1  ;;  %v1842_v10 = vmul.f32 %v1572_v9, %v1086_v56  ;;  %v900_v29 = vmul.f32 %v4564_v54, %v4564_v54  ;;  %v1492_v47 = vsel %vm4578_vm15, %v4417_v53, %v1488_v55 }
 0x18e   : > { %v2267_v44 = vpack.c.bf16 %v2193_v63, %v2192_v36  ;;  %v1556_v60 = vmul.f32 0.5, %v1555_v19  ;;  %v4595_v32 = vpop.eup %2879  ;;  %v2953_v36 = vld [vmem:[%s3126_s9 + $0xf8] sm:$0xff]  ;;  %v4607_v25 = vmul.f32 0.03125, %v422_v43  ;;  %v837_v15 = vmul.f32 0.03125, %v671_v27  ;;  %v674_v19 = vpop.xlane.xlu0 %673 }
 0x18f   : > { %v1078_v63 = vsub.f32 %v2953_v36, %v4168_v28  ;;  %v1574_v6 = vmul.f32 %v4595_v32, %v4528_v45  ;;  %vm1579_vm1 = vweird.f32 %v4528_v45  ;;  %vm1580_vm2 = vweird.f32 %v4595_v32  ;;  %v286_v45 = vld [vmem:[%s3126_s9 + $0x1d8] sm:$0xff] }
 0x190   : > { %2378 = vmatmul.bf16.gmra.mxu1 %v2267_v44  ;;  %v1557_v50 = vsub.f32 1.5, %v1556_v60  ;;  %v1833_v44 = vmul.f32 %v1482_v57, %v1077_v14  ;;  %v901_v53 = vmul.f32 %v4607_v25, %v4607_v25  ;;  %v963_v60 = vsub.f32 %v837_v15, %v900_v29  ;;  %vm4627_vm5 = vmor %vm1579_vm1, %vm1580_vm2  ;;  %v428_v29 = vpop.xlane.xlu2 %427 }
 0x191   : > { %v2053_v42 = vpop.f32.mrf.mxu0  ;;  %v2882_v35 = vpop.eup %2881  ;;  %v1575_v4 = vmul.f32 %v4595_v32, %v1574_v6  ;;  %v1834_v62 = vmul.f32 %v1492_v47, %v1078_v63  ;;  %vm1589_vm3 = vweird.f32 %v4537_v26  ;;  %v1087_v46 = vsub.f32 %v2954_v16, %v4476_v61 }
 0x192   : > { %v1558_v58 = vmul.f32 %v4511_v30, %v1557_v50  ;;  %v1584_v23 = vmul.f32 %v2882_v35, %v4537_v26  ;;  %v285_v50 = vld [vmem:[%s3126_s9 + $0x1d0] sm:$0xff]  ;;  %v1026_v8 = vmax.f32 %v963_v60, 0.0  ;;  %vm1590_vm4 = vweird.f32 %v2882_v35 }
 0x193   : > { %v465_v11 = vsel %vm290_vm0, %v285_v50, 0.0  ;;  %v1088_v55 = vsub.f32 %v2955_v39, %v4509_v52  ;;  %vm4635_vm6 = vmor %vm1589_vm3, %vm1590_vm4  ;;  %v468_v52 = vsel %vm290_vm0, %v286_v45, 0.0  ;;  %v539_v14 = vmul.f32 %v286_v45, %v286_v45  ;;  %v288_v39 = vld [vmem:[%s3126_s9 + $0x1e8] sm:$0xff] }
 0x194   : > { %2681 = vmatmul.msk.bf16.gmra.mxu0 %vm290_vm0, %v1885_v22  ;;  %v1562_v31 = vsel %vm4533_vm12, %v4511_v30, %v1558_v58  ;;  %v2054_v30 = vadd.f32 %v4589_v51, %v2053_v42  ;;  %v838_v42 = vmul.f32 0.03125, %v674_v19  ;;  %v1585_v48 = vmul.f32 %v2882_v35, %v1584_v23  ;;  %466 = vadd.xlane.f32.xlu2 %v465_v11  ;;  %v425_v33 = vpop.xlane.xlu1 %424 }
 0x195   : > { %v1841_v37 = vmul.f32 %v1562_v31, %v1085_v49  ;;  %v1576_v22 = vmul.f32 0.5, %v1575_v4  ;;  %v4619_v41 = vadd.f32 1e-05, %v1026_v8  ;;  %v1886_v58 = vpack.c.bf16 %v1834_v62, %v1833_v44  ;;  %469 = vadd.xlane.f32.xlu0 %v468_v52 }
 0x196   : > { %v2194_v40 = vmax.f32 %v2054_v30, 0.0  ;;  %v964_v49 = vsub.f32 %v838_v42, %v901_v53  ;;  %v1586_v24 = vmul.f32 0.5, %v1585_v48  ;;  %v538_v26 = vmul.f32 %v285_v50, %v285_v50  ;;  %v677_v44 = vpop.xlane.xlu0 %676  ;;  %v287_v42 = vld [vmem:[%s3126_s9 + $0x1e0] sm:$0xff] }
 0x197   : > { %v1890_v28 = vpack.c.bf16 %v1842_v10, %v1841_v37  ;;  %v1577_v3 = vsub.f32 1.5, %v1576_v22  ;;  %2883 = vrsqrt.f32 %v4619_v41  ;;  %v4652_v9 = vmul.f32 0.03125, %v425_v33 }
 0x198   : > { %v1027_v56 = vmax.f32 %v964_v49, 0.0  ;;  %v1587_v12 = vsub.f32 1.5, %v1586_v24  ;;  %v720_v37 = vsel %vm290_vm0, %v539_v14, 0.0  ;;  %v717_v36 = vsel %vm290_vm0, %v538_v26, 0.0 }
 0x199   : > { %v2055_v18 = vpop.f32.mrf.mxu0  ;;  %2686 = vmatmul.msk.bf16.gmra.mxu3 %vm290_vm0, %v1890_v28  ;;  %v1578_v31 = vmul.f32 %v4595_v32, %v1577_v3  ;;  %718 = vadd.xlane.f32.xlu1 %v717_v36  ;;  %v902_v27 = vmul.f32 %v4652_v9, %v4652_v9  ;;  %v839_v4 = vmul.f32 0.03125, %v677_v44  ;;  %v471_v22 = vsel %vm290_vm0, %v287_v42, 0.0 }
 0x19a   : > { %v2056_v21 = vadd.f32 %v4589_v51, %v2055_v18  ;;  %v4640_v61 = vadd.f32 1e-05, %v1027_v56  ;;  %v1588_v17 = vmul.f32 %v2882_v35, %v1587_v12  ;;  %vm1599_vm7 = vweird.f32 %v4619_v41  ;;  %v2957_v12 = vld [vmem:[%s3126_s9 + $0x158] sm:$0xff] }
 0x19b   : > { %v1582_v59 = vsel %vm4627_vm5, %v4595_v32, %v1578_v31  ;;  %v965_v48 = vsub.f32 %v839_v4, %v902_v27  ;;  %v1090_v20 = vsub.f32 %v2957_v12, %v4607_v25  ;;  %v474_v38 = vsel %vm290_vm0, %v288_v39, 0.0 }
 0x19c   : > { %v2195_v7 = vmax.f32 %v2056_v21, 0.0  ;;  %2885 = vrsqrt.f32 %v4640_v61  ;;  %v1592_v1 = vsel %vm4635_vm6, %v2882_v35, %v1588_v17  ;;  %v1843_v30 = vmul.f32 %v1582_v59, %v1087_v46  ;;  %721 = vadd.xlane.f32.xlu2 %v720_v37  ;;  %v680_v35 = vpop.xlane.xlu1 %679  ;;  %v431_v46 = vpop.xlane.xlu2 %430 }
 0x19d   : > { %v1844_v57 = vmul.f32 %v1592_v1, %v1088_v55  ;;  %v2884_v63 = vpop.eup %2883  ;;  %v4659_v21 = vmul.f32 0.03125, %v428_v29  ;;  %v840_v23 = vmul.f32 0.03125, %v680_v35  ;;  %472 = vadd.xlane.f32.xlu0 %v471_v22  ;;  %vm1609_vm9 = vweird.f32 %v4640_v61  ;;  %v4713_v1 = vld [vmem:[%s5197_s4] ss:$0 sm:$0xff] }
 0x19e   : > { %v2268_v34 = vpack.c.bf16 %v2195_v7, %v2194_v40  ;;  %v1594_v43 = vmul.f32 %v2884_v63, %v4619_v41  ;;  %vm1600_vm8 = vweird.f32 %v2884_v63  ;;  %v1028_v24 = vmax.f32 %v965_v48, 0.0 }
 0x19f   : > { %v1891_v47 = vpack.c.bf16 %v1844_v57, %v1843_v30  ;;  %v903_v7 = vmul.f32 %v4659_v21, %v4659_v21  ;;  %vm4673_vm11 = vmor %vm1599_vm7, %vm1600_vm8  ;;  %v540_v0 = vmul.f32 %v287_v42, %v287_v42  ;;  %v541_v13 = vmul.f32 %v288_v39, %v288_v39 }
 0x1a0   : > { %2383 = vmatmul.bf16.gmra.mxu1 %v2268_v34  ;;  %v1595_v19 = vmul.f32 %v2884_v63, %v1594_v43  ;;  %v4679_v16 = vadd.f32 1e-05, %v1028_v24  ;;  %v4707_v26 = vmul.f32 0.03125, %v431_v46 }
 0x1a1   : > { %v2058_v2 = vpop.f32.mrf.mxu0  ;;  %v966_v34 = vsub.f32 %v840_v23, %v903_v7  ;;  %475 = vadd.xlane.f32.xlu1 %v474_v38  ;;  %v723_v45 = vsel %vm290_vm0, %v540_v0, 0.0  ;;  %v726_v17 = vsel %vm290_vm0, %v541_v13, 0.0 }
 0x1a2   : > { %v2059_v10 = vadd.f32 %v4589_v51, %v2058_v2  ;;  %v2886_v6 = vpop.eup %2885  ;;  %v1596_v53 = vmul.f32 0.5, %v1595_v19  ;;  %v2956_v2 = vld [vmem:[%s3126_s9 + $0x150] sm:$0xff]  ;;  %vm1619_vm15 = vweird.f32 %v4679_v16 }
 0x1a3   : > { %v1604_v40 = vmul.f32 %v2886_v6, %v4640_v61  ;;  %vm1610_vm10 = vweird.f32 %v2886_v6  ;;  %v1029_v11 = vmax.f32 %v966_v34, 0.0  ;;  %v1089_v56 = vsub.f32 %v2956_v2, %v4564_v54 }
 0x1a4   : > { %2682 = vmatmul.msk.bf16.gmra.mxu0 %vm290_vm0, %v1886_v58  ;;  %v2196_v28 = vmax.f32 %v2059_v10, 0.0  ;;  %v1597_v50 = vsub.f32 1.5, %v1596_v53  ;;  %vm4689_vm12 = vmor %vm1609_vm9, %vm1610_vm10  ;;  %724 = vadd.xlane.f32.xlu2 %v723_v45 }
 0x1a5   : > { %v1605_v60 = vmul.f32 %v2886_v6, %v1604_v40  ;;  %v4677_v41 = vadd.f32 1e-05, %v1029_v11  ;;  %727 = vadd.xlane.f32.xlu0 %v726_v17  ;;  %v2959_v11 = vld [vmem:[%s3126_s9 + $0x168] sm:$0xff] }
 0x1a6   : > { %v1598_v58 = vmul.f32 %v2884_v63, %v1597_v50  ;;  %v1092_v24 = vsub.f32 %v2959_v11, %v4659_v21 }
 0x1a7   : > { %v1606_v8 = vmul.f32 0.5, %v1605_v60  ;;  %2887 = vrsqrt.f32 %v4677_v41  ;;  %vm1629_vm13 = vweird.f32 %v4677_v41 }
 0x1a8   : > { %2889 = vrsqrt.f32 %v4679_v16 }
 0x1a9   : > { %v2060_v18 = vpop.f32.mrf.mxu0  ;;  %2687 = vmatmul.msk.bf16.gmra.mxu3 %vm290_vm0, %v1891_v47  ;;  %v1607_v3 = vsub.f32 1.5, %v1606_v8  ;;  %v904_v47 = vmul.f32 %v4707_v26, %v4707_v26  ;;  %v2958_v8 = vld [vmem:[%s3126_s9 + $0x160] sm:$0xff] }
 0x1aa   : > { %v2061_v32 = vadd.f32 %v4589_v51, %v2060_v18  ;;  %v434_v57 = vpop.xlane.xlu0 %433 }
 0x1ab   : > { %v1608_v55 = vmul.f32 %v2886_v6, %v1607_v3  ;;  %v4716_v29 = vmul.f32 0.03125, %v434_v57 }
 0x1ac   : > { %v2197_v15 = vmax.f32 %v2061_v32, 0.0 }
 0x1ad   : > { %v1612_v25 = vsel %vm4689_vm12, %v2886_v6, %v1608_v55  ;;  %v2888_v30 = vpop.eup %2887 }
 0x1ae   : > { %v2269_v62 = vpack.c.bf16 %v2197_v15, %v2196_v28  ;;  %v1846_v52 = vmul.f32 %v1612_v25, %v1090_v20  ;;  %v2890_v10 = vpop.eup %2889  ;;  %v1624_v18 = vmul.f32 %v2888_v30, %v4677_v41  ;;  %v905_v28 = vmul.f32 %v4716_v29, %v4716_v29 }
 0x1af   : > { %v1614_v43 = vmul.f32 %v2890_v10, %v4679_v16  ;;  %vm1630_vm14 = vweird.f32 %v2888_v30  ;;  %vm1620_vm1 = vweird.f32 %v2890_v10 }
 0x1b0   : > { %2388 = vmatmul.bf16.gmra.mxu1 %v2269_v62  ;;  %v686_v6 = vpop.xlane.xlu2 %685  ;;  %v1625_v44 = vmul.f32 %v2888_v30, %v1624_v18  ;;  %vm4730_vm2 = vmor %vm1629_vm13, %vm1630_vm14 }
 0x1b1   : > { %v2063_v49 = vpop.f32.mrf.mxu0  ;;  %v1615_v19 = vmul.f32 %v2890_v10, %v1614_v43  ;;  %v842_v40 = vmul.f32 0.03125, %v686_v6  ;;  %vm1621_vm3 = vmor %vm1619_vm15, %vm1620_vm1 }
 0x1b2   : > { %v2064_v31 = vadd.f32 %v4589_v51, %v2063_v49  ;;  %v1626_v23 = vmul.f32 0.5, %v1625_v44  ;;  %v1091_v49 = vsub.f32 %v2958_v8, %v4652_v9 }
 0x1b3   : > { %v1616_v62 = vmul.f32 0.5, %v1615_v19  ;;  %v968_v53 = vsub.f32 %v842_v40, %v905_v28 }
 0x1b4   : > { %2683 = vmatmul.msk.bf16.gmra.mxu0 %vm290_vm0, %v1887_v5  ;;  %v1602_v5 = vsel %vm4673_vm11, %v2884_v63, %v1598_v58  ;;  %v2198_v36 = vmax.f32 %v2064_v31, 0.0  ;;  %v683_v15 = vpop.xlane.xlu1 %682  ;;  %v1627_v42 = vsub.f32 1.5, %v1626_v23 }
 0x1b5   : > { %v1845_v61 = vmul.f32 %v1602_v5, %v1089_v56  ;;  %v841_v7 = vmul.f32 0.03125, %v683_v15  ;;  %v1617_v48 = vsub.f32 1.5, %v1616_v62  ;;  %v1031_v22 = vmax.f32 %v968_v53, 0.0  ;;  %v4763_v15 = vld [vmem:[%s3126_s9 + $0x1f0] sm:$0xff]  ;;  %v2960_v53 = vld [vmem:[%s3126_s9 + $0x178] sm:$0xff] }
 0x1b6   : > { %v437_v3 = vpop.xlane.xlu0 %436  ;;  %v1628_v2 = vmul.f32 %v2888_v30, %v1627_v42 }
 0x1b7   : > { %v1892_v37 = vpack.c.bf16 %v1846_v52, %v1845_v61  ;;  %v967_v60 = vsub.f32 %v841_v7, %v904_v47  ;;  %v1157_v33 = vadd.f32 1e-05, %v1031_v22  ;;  %v4740_v16 = vmul.f32 0.03125, %v437_v3  ;;  %v2961_v22 = vld [vmem:[%s3126_s9 + $0x170] sm:$0xff] }
 0x1b8   : > { %v1618_v46 = vmul.f32 %v2890_v10, %v1617_v48  ;;  %v1632_v12 = vsel %vm4730_vm2, %v2888_v30, %v1628_v2  ;;  %v542_v48 = vmul.f32 %v4763_v15, %v4763_v15 }
 0x1b9   : > { %v2065_v14 = vpop.f32.mrf.mxu0  ;;  %2688 = vmatmul.msk.bf16.gmra.mxu3 %vm290_vm0, %v1892_v37  ;;  %v1030_v50 = vmax.f32 %v967_v60, 0.0  ;;  %2891 = vrsqrt.f32 %v1157_v33  ;;  %v1848_v20 = vmul.f32 %v1632_v12, %v1092_v24  ;;  %v906_v39 = vmul.f32 %v4740_v16, %v4740_v16  ;;  %v689_v13 = vpop.xlane.xlu2 %688 }
 0x1ba   : > { %v2066_v59 = vadd.f32 %v4589_v51, %v2065_v14  ;;  %v1622_v21 = vsel %vm1621_vm3, %v2890_v10, %v1618_v46  ;;  %v843_v61 = vmul.f32 0.03125, %v689_v13  ;;  %vm1649_vm4 = vweird.f32 %v1157_v33 }
 0x1bb   : > { %v4738_v41 = vadd.f32 1e-05, %v1030_v50  ;;  %v1847_v55 = vmul.f32 %v1622_v21, %v1091_v49  ;;  %v1094_v60 = vsub.f32 %v2960_v53, %v4716_v29  ;;  %v1093_v50 = vsub.f32 %v2961_v22, %v4707_v26 }
 0x1bc   : > { %v2199_v63 = vmax.f32 %v2066_v59, 0.0  ;;  %v440_v0 = vpop.xlane.xlu1 %439  ;;  %v969_v37 = vsub.f32 %v843_v61, %v906_v39  ;;  %v729_v11 = vsel %vm290_vm0, %v542_v48, 0.0 }
 0x1bd   : > { %v2354_v32 = vpop.f32.mrf.mxu1  ;;  %2893 = vrsqrt.f32 %v4738_v41  ;;  %v4751_v5 = vmul.f32 0.03125, %v440_v0  ;;  %v1893_v25 = vpack.c.bf16 %v1848_v20, %v1847_v55  ;;  %vm1639_vm6 = vweird.f32 %v4738_v41  ;;  %730 = vadd.xlane.f32.xlu2 %v729_v11 }
 0x1be   : > { %v2355_v27 = vadd.f32 %v4713_v1, %v2354_v32  ;;  %v2270_v35 = vpack.c.bf16 %v2199_v63, %v2198_v36  ;;  %v692_v17 = vpop.xlane.xlu0 %691  ;;  %v1032_v32 = vmax.f32 %v969_v37, 0.0 }
 0x1bf   : > { %v2892_v52 = vpop.eup %2891  ;;  %v907_v59 = vmul.f32 %v4751_v5, %v4751_v5  ;;  %v844_v30 = vmul.f32 0.03125, %v692_v17 }
 0x1c0   : > { %2513 = vst [vmem:[%s4725_s7] sm:$0xff] %v2355_v27  ;;  %2393 = vmatmul.bf16.gmra.mxu1 %v2270_v35  ;;  %v1644_v63 = vmul.f32 %v2892_v52, %v1157_v33  ;;  %v4759_v35 = vadd.f32 1e-05, %v1032_v32  ;;  %vm1650_vm5 = vweird.f32 %v2892_v52 }
 0x1c1   : > { %v2068_v4 = vpop.f32.mrf.mxu0  ;;  %v970_v43 = vsub.f32 %v844_v30, %v907_v59  ;;  %vm4772_vm8 = vmor %vm1649_vm4, %vm1650_vm5 }
 0x1c2   : > { %v2069_v9 = vadd.f32 %v4589_v51, %v2068_v4  ;;  %v1645_v47 = vmul.f32 %v2892_v52, %v1644_v63  ;;  %2895 = vrsqrt.f32 %v4759_v35  ;;  %v477_v4 = vsel %vm290_vm0, %v4763_v15, 0.0 }
 0x1c3   : > { %v2894_v57 = vpop.eup %2893  ;;  %v1033_v44 = vmax.f32 %v970_v43, 0.0  ;;  %478 = vadd.xlane.f32.xlu1 %v477_v4  ;;  %vm1659_vm10 = vweird.f32 %v4759_v35  ;;  %v2962_v43 = vld [vmem:[%s3126_s9 + $0x180] sm:$0xff] }
 0x1c4   : > { %v2200_v31 = vmax.f32 %v2069_v9, 0.0  ;;  %v1634_v18 = vmul.f32 %v2894_v57, %v4738_v41  ;;  %v1646_v28 = vmul.f32 0.5, %v1645_v47  ;;  %vm1640_vm7 = vweird.f32 %v2894_v57  ;;  %v443_v7 = vpop.xlane.xlu1 %442 }
 0x1c5   : > { %v2356_v56 = vpop.f32.mrf.mxu1  ;;  %v4766_v40 = vadd.f32 1e-05, %v1033_v44  ;;  %vm1641_vm9 = vmor %vm1639_vm6, %vm1640_vm7  ;;  %v4785_v49 = vmul.f32 0.03125, %v443_v7  ;;  %v1095_v47 = vsub.f32 %v2962_v43, %v4740_v16  ;;  %v2963_v44 = vld [vmem:[%s3126_s9 + $0x188] sm:$0xff] }
 0x1c6   : > { %v2357_v58 = vadd.f32 %v4713_v1, %v2356_v56  ;;  %v1635_v27 = vmul.f32 %v2894_v57, %v1634_v18  ;;  %v1647_v23 = vsub.f32 1.5, %v1646_v28  ;;  %v1096_v28 = vsub.f32 %v2963_v44, %v4751_v5 }
 0x1c7   : > { %2897 = vrsqrt.f32 %v4766_v40  ;;  %v908_v21 = vmul.f32 %v4785_v49, %v4785_v49  ;;  %vm1669_vm12 = vweird.f32 %v4766_v40 }
 0x1c8   : > { %2514 = vst [vmem:[%s4725_s7 + $0x8] sm:$0xff] %v2357_v58  ;;  %v1636_v19 = vmul.f32 0.5, %v1635_v27  ;;  %v1648_v29 = vmul.f32 %v2892_v52, %v1647_v23  ;;  %v2896_v26 = vpop.eup %2895 }
 0x1c9   : > { %v2070_v54 = vpop.f32.mrf.mxu0  ;;  %2689 = vmatmul.msk.bf16.gmra.mxu3 %vm290_vm0, %v1893_v25  ;;  %v1654_v58 = vmul.f32 %v2896_v26, %v4759_v35  ;;  %vm1660_vm11 = vweird.f32 %v2896_v26 }
 0x1ca   : > { %v2071_v38 = vadd.f32 %v4589_v51, %v2070_v54  ;;  %v1637_v34 = vsub.f32 1.5, %v1636_v19  ;;  %v1652_v2 = vsel %vm4772_vm8, %v2892_v52, %v1648_v29  ;;  %vm4811_vm14 = vmor %vm1659_vm10, %vm1660_vm11 }
 0x1cb   : > { %v1850_v46 = vmul.f32 %v1652_v2, %v1094_v60  ;;  %v446_v20 = vpop.xlane.xlu2 %445 }
 0x1cc   : > { %v2201_v45 = vmax.f32 %v2071_v38, 0.0  ;;  %v1638_v24 = vmul.f32 %v2894_v57, %v1637_v34  ;;  %v1655_v38 = vmul.f32 %v2896_v26, %v1654_v58  ;;  %v4798_v25 = vmul.f32 0.03125, %v446_v20 }
 0x1cd   : > { %v2359_v14 = vpop.f32.mrf.mxu1  ;;  %v2898_v9 = vpop.eup %2897 }
 0x1ce   : > { %v2360_v10 = vadd.f32 %v4713_v1, %v2359_v14  ;;  %v2271_v36 = vpack.c.bf16 %v2201_v45, %v2200_v31  ;;  %v1642_v33 = vsel %vm1641_vm9, %v2894_v57, %v1638_v24  ;;  %v1664_v0 = vmul.f32 %v2898_v9, %v4766_v40 }
 0x1cf   : > { %v1849_v12 = vmul.f32 %v1642_v33, %v1093_v50  ;;  %v1656_v14 = vmul.f32 0.5, %v1655_v38  ;;  %v909_v37 = vmul.f32 %v4798_v25, %v4798_v25  ;;  %vm1670_vm13 = vweird.f32 %v2898_v9 }
 0x1d0   : > { %2515 = vst [vmem:[%s4725_s7 + $0x10] sm:$0xff] %v2360_v10  ;;  %2398 = vmatmul.bf16.gmra.mxu1 %v2271_v36  ;;  %v1665_v59 = vmul.f32 %v2898_v9, %v1664_v0  ;;  %vm1671_vm15 = vmor %vm1669_vm12, %vm1670_vm13 }
 0x1d1   : > { %v2073_v6 = vpop.f32.mrf.mxu0  ;;  %v1894_v61 = vpack.c.bf16 %v1850_v46, %v1849_v12  ;;  %v1657_v10 = vsub.f32 1.5, %v1656_v14 }
 0x1d2   : > { %v2074_v3 = vadd.f32 %v4589_v51, %v2073_v6  ;;  %v695_v54 = vpop.xlane.xlu0 %694  ;;  %v1666_v36 = vmul.f32 0.5, %v1665_v59 }
 0x1d3   : > { %v698_v31 = vpop.xlane.xlu1 %697  ;;  %v845_v45 = vmul.f32 0.03125, %v695_v54  ;;  %v1658_v23 = vmul.f32 %v2896_v26, %v1657_v10 }
 0x1d4   : > { %v2202_v39 = vmax.f32 %v2074_v3, 0.0  ;;  %v846_v30 = vmul.f32 0.03125, %v698_v31  ;;  %v1667_v27 = vsub.f32 1.5, %v1666_v36  ;;  %v449_v7 = vpop.xlane.xlu2 %448 }
 0x1d5   : > { %v2361_v62 = vpop.f32.mrf.mxu1  ;;  %v971_v57 = vsub.f32 %v845_v45, %v908_v21  ;;  %v4817_v53 = vmul.f32 0.03125, %v449_v7  ;;  %v1662_v35 = vsel %vm4811_vm14, %v2896_v26, %v1658_v23 }
 0x1d6   : > { %v2362_v8 = vadd.f32 %v4713_v1, %v2361_v62  ;;  %v972_v18 = vsub.f32 %v846_v30, %v909_v37  ;;  %v1668_v4 = vmul.f32 %v2898_v9, %v1667_v27  ;;  %v1851_v5 = vmul.f32 %v1662_v35, %v1095_v47 }
 0x1d7   : > { %v1034_v32 = vmax.f32 %v971_v57, 0.0  ;;  %v910_v50 = vmul.f32 %v4817_v53, %v4817_v53  ;;  %v2964_v57 = vld [vmem:[%s3126_s9 + $0x190] sm:$0xff] }
 0x1d8   : > { %2516 = vst [vmem:[%s4725_s7 + $0x18] sm:$0xff] %v2362_v8  ;;  %v1035_v19 = vmax.f32 %v972_v18, 0.0  ;;  %v1672_v42 = vsel %vm1671_vm15, %v2898_v9, %v1668_v4  ;;  %v1097_v10 = vsub.f32 %v2964_v57, %v4785_v49  ;;  %v2965_v18 = vld [vmem:[%s3126_s9 + $0x198] sm:$0xff] }
 0x1d9   : > { %v2075_v56 = vpop.f32.mrf.mxu0  ;;  %2690 = vmatmul.msk.bf16.gmra.mxu3 %vm290_vm0, %v1894_v61  ;;  %v1160_v40 = vadd.f32 1e-05, %v1034_v32  ;;  %v1852_v34 = vmul.f32 %v1672_v42, %v1096_v28  ;;  %v1098_v32 = vsub.f32 %v2965_v18, %v4798_v25 }
 0x1da   : > { %v2076_v41 = vadd.f32 %v4589_v51, %v2075_v56  ;;  %v1161_v16 = vadd.f32 1e-05, %v1035_v19 }
 0x1db   : > { %2899 = vrsqrt.f32 %v1160_v40  ;;  %v1895_v2 = vpack.c.bf16 %v1852_v34, %v1851_v5  ;;  %vm1679_vm1 = vweird.f32 %v1160_v40 }
 0x1dc   : > { %v2203_v55 = vmax.f32 %v2076_v41, 0.0  ;;  %2901 = vrsqrt.f32 %v1161_v16  ;;  %vm1689_vm3 = vweird.f32 %v1161_v16 }
 0x1dd   : > { %v2364_v13 = vpop.f32.mrf.mxu1 }
 0x1de   : > { %v2365_v17 = vadd.f32 %v4713_v1, %v2364_v13  ;;  %v2272_v52 = vpack.c.bf16 %v2203_v55, %v2202_v39 }
 0x1e0   : > { %2517 = vst [vmem:[%s4725_s7 + $0x20] sm:$0xff] %v2365_v17  ;;  %2403 = vmatmul.bf16.gmra.mxu1 %v2272_v52 }
 0x1e1   : > { %v2078_v63 = vpop.f32.mrf.mxu0  ;;  %v2900_v3 = vpop.eup %2899 }
 0x1e2   : > { %v2079_v48 = vadd.f32 %v4589_v51, %v2078_v63  ;;  %v1674_v46 = vmul.f32 %v2900_v3, %v1160_v40  ;;  %v2902_v12 = vpop.eup %2901  ;;  %vm1680_vm2 = vweird.f32 %v2900_v3 }
 0x1e3   : > { %v452_v8 = vpop.xlane.xlu0 %451  ;;  %v1684_v55 = vmul.f32 %v2902_v12, %v1161_v16  ;;  %vm1690_vm4 = vweird.f32 %v2902_v12  ;;  %vm1681_vm5 = vmor %vm1679_vm1, %vm1680_vm2 }
 0x1e4   : > { %v4827_v11 = vmul.f32 0.03125, %v452_v8  ;;  %v2204_v56 = vmax.f32 %v2079_v48, 0.0  ;;  %v1675_v38 = vmul.f32 %v2900_v3, %v1674_v46  ;;  %vm1691_vm6 = vmor %vm1689_vm3, %vm1690_vm4 }
 0x1e5   : > { %v2366_v62 = vpop.f32.mrf.mxu1  ;;  %v704_v58 = vpop.xlane.xlu2 %703  ;;  %v1685_v61 = vmul.f32 %v2902_v12, %v1684_v55 }
 0x1e6   : > { %v2367_v60 = vadd.f32 %v4713_v1, %v2366_v62  ;;  %v911_v41 = vmul.f32 %v4827_v11, %v4827_v11  ;;  %v848_v21 = vmul.f32 0.03125, %v704_v58  ;;  %v1676_v45 = vmul.f32 0.5, %v1675_v38 }
 0x1e7   : > { %v1686_v14 = vmul.f32 0.5, %v1685_v61  ;;  %v2966_v61 = vld [vmem:[%s3126_s9 + $0x1a0] sm:$0xff] }
 0x1e8   : > { %2518 = vst [vmem:[%s4725_s7 + $0x28] sm:$0xff] %v2367_v60  ;;  %v701_v24 = vpop.xlane.xlu1 %700  ;;  %v974_v0 = vsub.f32 %v848_v21, %v911_v41  ;;  %v1677_v59 = vsub.f32 1.5, %v1676_v45  ;;  %v2967_v45 = vld [vmem:[%s3126_s9 + $0x1a8] sm:$0xff] }
 0x1e9   : > { %v2080_v22 = vpop.f32.mrf.mxu0  ;;  %v847_v26 = vmul.f32 0.03125, %v701_v24  ;;  %2691 = vmatmul.msk.bf16.gmra.mxu3 %vm290_vm0, %v1895_v2  ;;  %v1687_v36 = vsub.f32 1.5, %v1686_v14 }
 0x1ea   : > { %v2081_v29 = vadd.f32 %v4589_v51, %v2080_v22  ;;  %v1037_v17 = vmax.f32 %v974_v0, 0.0  ;;  %v1678_v47 = vmul.f32 %v2900_v3, %v1677_v59 }
 0x1eb   : > { %v973_v20 = vsub.f32 %v847_v26, %v910_v50  ;;  %v455_v30 = vpop.xlane.xlu0 %454  ;;  %v1688_v27 = vmul.f32 %v2902_v12, %v1687_v36 }
 0x1ec   : > { %v2205_v33 = vmax.f32 %v2081_v29, 0.0  ;;  %v4836_v37 = vadd.f32 1e-05, %v1037_v17  ;;  %v4845_v43 = vmul.f32 0.03125, %v455_v30  ;;  %v1682_v44 = vsel %vm1681_vm5, %v2900_v3, %v1678_v47 }
 0x1ed   : > { %v2369_v9 = vpop.f32.mrf.mxu1  ;;  %v1036_v13 = vmax.f32 %v973_v20, 0.0  ;;  %v1692_v49 = vsel %vm1691_vm6, %v2902_v12, %v1688_v27  ;;  %v1853_v19 = vmul.f32 %v1682_v44, %v1097_v10  ;;  %v1100_v17 = vsub.f32 %v2967_v45, %v4827_v11 }
 0x1ee   : > { %v2370_v54 = vadd.f32 %v4713_v1, %v2369_v9  ;;  %v2273_v39 = vpack.c.bf16 %v2205_v33, %v2204_v56  ;;  %v912_v25 = vmul.f32 %v4845_v43, %v4845_v43  ;;  %v1854_v4 = vmul.f32 %v1692_v49, %v1098_v32 }
 0x1ef   : > { %v4834_v52 = vadd.f32 1e-05, %v1036_v13  ;;  %vm1709_vm9 = vweird.f32 %v4836_v37 }
 0x1f0   : > { %2519 = vst [vmem:[%s4725_s7 + $0x30] sm:$0xff] %v2370_v54  ;;  %2408 = vmatmul.bf16.gmra.mxu1 %v2273_v39  ;;  %v458_v23 = vpop.xlane.xlu1 %457  ;;  %v1896_v5 = vpack.c.bf16 %v1854_v4, %v1853_v19 }
 0x1f1   : > { %v2083_v31 = vpop.f32.mrf.mxu0  ;;  %2903 = vrsqrt.f32 %v4834_v52  ;;  %v4854_v35 = vmul.f32 0.03125, %v458_v23  ;;  %vm1699_vm7 = vweird.f32 %v4834_v52 }
 0x1f2   : > { %2905 = vrsqrt.f32 %v4836_v37  ;;  %v2084_v28 = vadd.f32 %v4589_v51, %v2083_v31  ;;  %v707_v60 = vpop.xlane.xlu2 %706  ;;  %v1099_v31 = vsub.f32 %v2966_v61, %v4817_v53 }
 0x1f3   : > { %v849_v34 = vmul.f32 0.03125, %v707_v60  ;;  %v710_v48 = vpop.xlane.xlu0 %709  ;;  %v913_v3 = vmul.f32 %v4854_v35, %v4854_v35 }
 0x1f4   : > { %v2206_v22 = vmax.f32 %v2084_v28, 0.0  ;;  %v850_v26 = vmul.f32 0.03125, %v710_v48 }
 0x1f5   : > { %v2371_v63 = vpop.f32.mrf.mxu1  ;;  %v975_v2 = vsub.f32 %v849_v34, %v912_v25 }
 0x1f6   : > { %v2372_v6 = vadd.f32 %v4713_v1, %v2371_v63  ;;  %v976_v12 = vsub.f32 %v850_v26, %v913_v3 }
 0x1f7   : > { %v2904_v40 = vpop.eup %2903  ;;  %v1038_v58 = vmax.f32 %v975_v2, 0.0 }
 0x1f8   : > { %2520 = vst [vmem:[%s4725_s7 + $0x38] sm:$0xff] %v2372_v6  ;;  %v1694_v16 = vmul.f32 %v2904_v40, %v4834_v52  ;;  %v2906_v42 = vpop.eup %2905  ;;  %vm1700_vm8 = vweird.f32 %v2904_v40  ;;  %v1039_v39 = vmax.f32 %v976_v12, 0.0  ;;  %v461_v13 = vpop.xlane.xlu1 %460 }
 0x1f9   : > { %v2085_v7 = vpop.f32.mrf.mxu0  ;;  %v1704_v8 = vmul.f32 %v2906_v42, %v4836_v37  ;;  %2692 = vmatmul.msk.bf16.gmra.mxu3 %vm290_vm0, %v1896_v5  ;;  %vm1710_vm10 = vweird.f32 %v2906_v42  ;;  %v4864_v54 = vadd.f32 1e-05, %v1038_v58  ;;  %vm4871_vm11 = vmor %vm1699_vm7, %vm1700_vm8  ;;  %v4885_v32 = vmul.f32 0.03125, %v461_v13  ;;  %v2970_v58 = vld [vmem:[%s3126_s9 + $0x1c0] sm:$0xff] }
 0x1fa   : > { %v2086_v62 = vadd.f32 %v4589_v51, %v2085_v7  ;;  %v1695_v29 = vmul.f32 %v2904_v40, %v1694_v16  ;;  %v4866_v55 = vpop.f32.mrf.mxu3  ;;  %vm1711_vm12 = vmor %vm1709_vm9, %vm1710_vm10  ;;  %v1165_v14 = vadd.f32 1e-05, %v1039_v39 }
 0x1fb   : > { %v1705_v46 = vmul.f32 %v2906_v42, %v1704_v8  ;;  %2907 = vrsqrt.f32 %v4864_v54  ;;  %v914_v60 = vmul.f32 %v4885_v32, %v4885_v32  ;;  %vm1719_vm13 = vweird.f32 %v4864_v54 }
 0x1fc   : > { %v2207_v50 = vmax.f32 %v2086_v62, 0.0  ;;  %v1696_v41 = vmul.f32 0.5, %v1695_v29  ;;  %2909 = vrsqrt.f32 %v1165_v14  ;;  %vm1729_vm15 = vweird.f32 %v1165_v14 }
 0x1fd   : > { %v2374_v24 = vpop.f32.mrf.mxu1  ;;  %v1706_v9 = vmul.f32 0.5, %v1705_v46  ;;  %v464_v44 = vpop.xlane.xlu2 %463  ;;  %v2968_v46 = vld [vmem:[%s3126_s9 + $0x1b0] sm:$0xff] }
 0x1fe   : > { %v2274_v56 = vpack.c.bf16 %v2207_v50, %v2206_v22  ;;  %v2375_v33 = vadd.f32 %v4713_v1, %v2374_v24  ;;  %v1697_v21 = vsub.f32 1.5, %v1696_v41  ;;  %v4891_v49 = vmul.f32 0.03125, %v464_v44 }
 0x1ff   : > { %v1707_v38 = vsub.f32 1.5, %v1706_v9  ;;  %v713_v62 = vpop.xlane.xlu0 %712  ;;  %v1101_v41 = vsub.f32 %v2968_v46, %v4845_v43  ;;  %v2969_v9 = vld [vmem:[%s3126_s9 + $0x1b8] sm:$0xff] }
 0x200   : > { %2521 = vst [vmem:[%s4725_s7 + $0x40] sm:$0xff] %v2375_v33  ;;  %2413 = vmatmul.bf16.gmra.mxu1 %v2274_v56  ;;  %v1698_v59 = vmul.f32 %v2904_v40, %v1697_v21  ;;  %v851_v29 = vmul.f32 0.03125, %v713_v62  ;;  %v1102_v21 = vsub.f32 %v2969_v9, %v4854_v35 }
 0x201   : > { %v2088_v20 = vpop.f32.mrf.mxu0  ;;  %v1708_v37 = vmul.f32 %v2906_v42, %v1707_v38  ;;  %v2908_v11 = vpop.eup %2907 }
 0x202   : > { %v1702_v57 = vsel %vm4871_vm11, %v2904_v40, %v1698_v59  ;;  %v2089_v63 = vadd.f32 %v4589_v51, %v2088_v20  ;;  %v4887_v47 = vpop.f32.mrf.mxu3  ;;  %v1714_v27 = vmul.f32 %v2908_v11, %v4864_v54  ;;  %v2910_v28 = vpop.eup %2909  ;;  %vm1720_vm14 = vweird.f32 %v2908_v11 }
 0x203   : > { %v1712_v10 = vsel %vm1711_vm12, %v2906_v42, %v1708_v37  ;;  %v1855_v36 = vmul.f32 %v1702_v57, %v1099_v31  ;;  %v716_v40 = vpop.xlane.xlu1 %715  ;;  %v1724_v4 = vmul.f32 %v2910_v28, %v1165_v14  ;;  %v915_v42 = vmul.f32 %v4891_v49, %v4891_v49  ;;  %vm4908_vm2 = vmor %vm1719_vm13, %vm1720_vm14 }
 0x204   : > { %v1856_v53 = vmul.f32 %v1712_v10, %v1100_v17  ;;  %v2208_v7 = vmax.f32 %v2089_v63, 0.0  ;;  %v1715_v23 = vmul.f32 %v2908_v11, %v1714_v27  ;;  %v852_v5 = vmul.f32 0.03125, %v716_v40 }
 0x205   : > { %v2376_v30 = vpop.f32.mrf.mxu1  ;;  %v1725_v50 = vmul.f32 %v2910_v28, %v1724_v4  ;;  %vm1730_vm1 = vweird.f32 %v2910_v28  ;;  %v977_v56 = vsub.f32 %v851_v29, %v914_v60 }
 0x206   : > { %v2377_v52 = vadd.f32 %v4713_v1, %v2376_v30  ;;  %v1897_v19 = vpack.c.bf16 %v1856_v53, %v1855_v36  ;;  %v1716_v22 = vmul.f32 0.5, %v1715_v23  ;;  %v978_v8 = vsub.f32 %v852_v5, %v915_v42  ;;  %vm1731_vm3 = vmor %vm1729_vm15, %vm1730_vm1 }
 0x207   : > { %v1726_v3 = vmul.f32 0.5, %v1725_v50  ;;  %v1040_v39 = vmax.f32 %v977_v56, 0.0  ;;  %v467_v38 = vpop.xlane.xlu2 %466 }
 0x208   : > { %2522 = vst [vmem:[%s4725_s7 + $0x48] sm:$0xff] %v2377_v52  ;;  %v1717_v24 = vsub.f32 1.5, %v1716_v22  ;;  %v1041_v26 = vmax.f32 %v978_v8, 0.0  ;;  %v4917_v17 = vmul.f32 0.03125, %v467_v38  ;;  %v470_v57 = vpop.xlane.xlu0 %469 }
 0x209   : > { %v2090_v18 = vpop.f32.mrf.mxu0  ;;  %2693 = vmatmul.msk.bf16.gmra.mxu3 %vm290_vm0, %v1897_v19  ;;  %v1727_v12 = vsub.f32 1.5, %v1726_v3  ;;  %v1166_v43 = vadd.f32 1e-05, %v1040_v39  ;;  %v4928_v53 = vmul.f32 0.03125, %v470_v57 }
 0x20a   : > { %v2091_v6 = vadd.f32 %v4589_v51, %v2090_v18  ;;  %v4901_v33 = vpop.f32.mrf.mxu3  ;;  %v1167_v20 = vadd.f32 1e-05, %v1041_v26  ;;  %v1718_v0 = vmul.f32 %v2908_v11, %v1717_v24  ;;  %v916_v36 = vmul.f32 %v4917_v17, %v4917_v17 }
 0x20b   : > { %v1728_v13 = vmul.f32 %v2910_v28, %v1727_v12  ;;  %vm1739_vm6 = vweird.f32 %v1166_v43  ;;  %v1103_v12 = vsub.f32 %v2970_v58, %v4885_v32 }
 0x20c   : > { %v2209_v25 = vmax.f32 %v2091_v6, 0.0  ;;  %2911 = vrsqrt.f32 %v1167_v20  ;;  %v1722_v54 = vsel %vm4908_vm2, %v2908_v11, %v1718_v0  ;;  %v719_v44 = vpop.xlane.xlu1 %718  ;;  %vm1749_vm4 = vweird.f32 %v1167_v20  ;;  %v4960_v0 = vld [vmem:[%s5195_s2] ss:$0 sm:$0xff] }
 0x20d   : > { %v2379_v16 = vpop.f32.mrf.mxu1  ;;  %v1732_v45 = vsel %vm1731_vm3, %v2910_v28, %v1728_v13  ;;  %2913 = vrsqrt.f32 %v1166_v43  ;;  %v1857_v35 = vmul.f32 %v1722_v54, %v1101_v41 }
 0x20e   : > { %v2275_v34 = vpack.c.bf16 %v2209_v25, %v2208_v7  ;;  %v2380_v48 = vadd.f32 %v4713_v1, %v2379_v16  ;;  %v1858_v14 = vmul.f32 %v1732_v45, %v1102_v21  ;;  %v853_v7 = vmul.f32 0.03125, %v719_v44  ;;  %v2971_v21 = vld [vmem:[%s3126_s9 + $0x1c8] sm:$0xff] }
 0x20f   : > { %v722_v11 = vpop.xlane.xlu2 %721 }
 0x210   : > { %2523 = vst [vmem:[%s4725_s7 + $0x50] sm:$0xff] %v2380_v48  ;;  %2418 = vmatmul.bf16.gmra.mxu1 %v2275_v34  ;;  %v1898_v63 = vpack.c.bf16 %v1858_v14, %v1857_v35  ;;  %v854_v40 = vmul.f32 0.03125, %v722_v11  ;;  %v979_v60 = vsub.f32 %v853_v7, %v916_v36 }
 0x211   : > { %v2093_v2 = vpop.f32.mrf.mxu0 }
 0x212   : > { %v2094_v59 = vadd.f32 %v4589_v51, %v2093_v2  ;;  %v4921_v30 = vpop.f32.mrf.mxu3  ;;  %v4924_v10 = vpop.eup %2911  ;;  %v1042_v22 = vmax.f32 %v979_v60, 0.0 }
 0x213   : > { %v1744_v27 = vmul.f32 %v4924_v10, %v1167_v20  ;;  %v2914_v28 = vpop.eup %2913  ;;  %vm1750_vm5 = vweird.f32 %v4924_v10  ;;  %v473_v2 = vpop.xlane.xlu0 %472  ;;  %v1104_v20 = vsub.f32 %v2971_v21, %v4891_v49 }
 0x214   : > { %v2210_v18 = vmax.f32 %v2094_v59, 0.0  ;;  %v1734_v62 = vmul.f32 %v2914_v28, %v1166_v43  ;;  %vm1740_vm7 = vweird.f32 %v2914_v28  ;;  %v4940_v3 = vadd.f32 1e-05, %v1042_v22  ;;  %vm4942_vm8 = vmor %vm1749_vm4, %vm1750_vm5 }
 0x215   : > { %v2381_v61 = vpop.f32.mrf.mxu1  ;;  %v1745_v4 = vmul.f32 %v4924_v10, %v1744_v27  ;;  %vm1741_vm9 = vmor %vm1739_vm6, %vm1740_vm7 }
 0x216   : > { %v2382_v31 = vadd.f32 %v4713_v1, %v2381_v61  ;;  %v1735_v5 = vmul.f32 %v2914_v28, %v1734_v62  ;;  %v4964_v61 = vmul.f32 0.03125, %v473_v2  ;;  %vm1759_vm12 = vweird.f32 %v4940_v3  ;;  %v2974_v2 = vld [vmem:[%s3126_s9 + $0x1d8] sm:$0xff] }
 0x217   : > { %v1746_v42 = vmul.f32 0.5, %v1745_v4  ;;  %v725_v36 = vpop.xlane.xlu2 %724  ;;  %v1106_v26 = vsub.f32 %v2974_v2, %v4928_v53  ;;  %v5020_v2 = vld [vmem:[%s5197_s4] ss:$0 sm:$0xff] }
 0x218   : > { %2524 = vst [vmem:[%s4725_s7 + $0x58] sm:$0xff] %v2382_v31  ;;  %v1736_v29 = vmul.f32 0.5, %v1735_v5  ;;  %v476_v31 = vpop.xlane.xlu1 %475  ;;  %v855_v7 = vmul.f32 0.03125, %v725_v36 }
 0x219   : > { %v2095_v37 = vpop.f32.mrf.mxu0  ;;  %2694 = vmatmul.msk.bf16.gmra.mxu3 %vm290_vm0, %v1898_v63  ;;  %v1747_v8 = vsub.f32 1.5, %v1746_v42  ;;  %v4969_v59 = vmul.f32 0.03125, %v476_v31 }
 0x21a   : > { %v2096_v52 = vadd.f32 %v4589_v51, %v2095_v37  ;;  %v917_v51 = vmul.f32 %v4928_v53, %v4928_v53  ;;  %v1737_v56 = vsub.f32 1.5, %v1736_v29  ;;  %v2973_v29 = vld [vmem:[%s3126_s9 + $0x1d0] sm:$0xff] }
 0x21b   : > { %v1748_v41 = vmul.f32 %v4924_v10, %v1747_v8  ;;  %v728_v63 = vpop.xlane.xlu0 %727  ;;  %v919_v27 = vmul.f32 %v4969_v59, %v4969_v59 }
 0x21c   : > { %v2211_v6 = vmax.f32 %v2096_v52, 0.0  ;;  %v980_v16 = vsub.f32 %v854_v40, %v917_v51  ;;  %v4938_v50 = vpop.f32.mrf.mxu3  ;;  %v1738_v39 = vmul.f32 %v2914_v28, %v1737_v56 }
 0x21d   : > { %v2384_v19 = vpop.f32.mrf.mxu1  ;;  %v1752_v38 = vsel %vm4942_vm8, %v4924_v10, %v1748_v41 }
 0x21e   : > { %v2276_v25 = vpack.c.bf16 %v2211_v6, %v2210_v18  ;;  %v2385_v23 = vadd.f32 %v4713_v1, %v2384_v19  ;;  %v1043_v48 = vmax.f32 %v980_v16, 0.0  ;;  %v1742_v43 = vsel %vm1741_vm9, %v2914_v28, %v1738_v39 }
 0x21f   : > { %v1859_v45 = vmul.f32 %v1742_v43, %v1103_v12  ;;  %v1860_v35 = vmul.f32 %v1752_v38, %v1104_v20  ;;  %v918_v6 = vmul.f32 %v4964_v61, %v4964_v61 }
 0x220   : > { %2525 = vst [vmem:[%s4725_s7 + $0x60] sm:$0xff] %v2385_v23  ;;  %2423 = vmatmul.bf16.gmra.mxu1 %v2276_v25  ;;  %v1169_v24 = vadd.f32 1e-05, %v1043_v48  ;;  %v856_v25 = vmul.f32 0.03125, %v728_v63 }
 0x221   : > { %v2098_v34 = vpop.f32.mrf.mxu0  ;;  %v1899_v51 = vpack.c.bf16 %v1860_v35, %v1859_v45  ;;  %v981_v16 = vsub.f32 %v855_v7, %v918_v6 }
 0x222   : > { %2915 = vrsqrt.f32 %v1169_v24  ;;  %v2099_v32 = vadd.f32 %v4960_v0, %v2098_v34  ;;  %vm1769_vm10 = vweird.f32 %v1169_v24  ;;  %v982_v60 = vsub.f32 %v856_v25, %v919_v27  ;;  %v2976_v25 = vld [vmem:[%s3126_s9 + $0x1e8] sm:$0xff] }
 0x223   : > { %2917 = vrsqrt.f32 %v4940_v3  ;;  %v1044_v22 = vmax.f32 %v981_v16, 0.0  ;;  %v2109_v27 = vadd.f32 %v4960_v0, %v4866_v55 }
 0x224   : > { %v4966_v49 = vpop.f32.mrf.mxu3  ;;  %v2212_v52 = vmax.f32 %v2099_v32, 0.0  ;;  %v1045_v8 = vmax.f32 %v982_v60, 0.0 }
 0x225   : > { %v2386_v46 = vpop.f32.mrf.mxu1  ;;  %v1170_v58 = vadd.f32 1e-05, %v1044_v22 }
 0x226   : > { %v2387_v9 = vadd.f32 %v4713_v1, %v2386_v46  ;;  %v1171_v12 = vadd.f32 1e-05, %v1045_v8 }
 0x227   : > { %2919 = vrsqrt.f32 %v1170_v58  ;;  %vm1779_vm1 = vweird.f32 %v1170_v58 }
 0x228   : > { %2526 = vst [vmem:[%s4725_s7 + $0x68] sm:$0xff] %v2387_v9  ;;  %v2916_v14 = vpop.eup %2915  ;;  %2921 = vrsqrt.f32 %v1171_v12  ;;  %vm1789_vm3 = vweird.f32 %v1171_v12 }
 0x229   : > { %v2100_v13 = vpop.f32.mrf.mxu0  ;;  %v2918_v37 = vpop.eup %2917  ;;  %v1764_v10 = vmul.f32 %v2916_v14, %v1169_v24  ;;  %vm1770_vm11 = vweird.f32 %v2916_v14  ;;  %2695 = vmatmul.msk.bf16.gmra.mxu3 %vm290_vm0, %v1899_v51  ;;  %v1105_v24 = vsub.f32 %v2973_v29, %v4917_v17 }
 0x22a   : > { %v2101_v54 = vadd.f32 %v4960_v0, %v2100_v13  ;;  %v1754_v18 = vmul.f32 %v2918_v37, %v4940_v3  ;;  %vm1760_vm13 = vweird.f32 %v2918_v37  ;;  %vm4982_vm14 = vmor %vm1769_vm10, %vm1770_vm11 }
 0x22b   : > { %v1765_v19 = vmul.f32 %v2916_v14, %v1764_v10  ;;  %vm1761_vm15 = vmor %vm1759_vm12, %vm1760_vm13 }
 0x22c   : > { %v2213_v57 = vmax.f32 %v2101_v54, 0.0  ;;  %v1755_v40 = vmul.f32 %v2918_v37, %v1754_v18  ;;  %v4980_v42 = vpop.f32.mrf.mxu3 }
 0x22d   : > { %v2389_v11 = vpop.f32.mrf.mxu1  ;;  %v1766_v23 = vmul.f32 0.5, %v1765_v19  ;;  %v2920_v31 = vpop.eup %2919 }
 0x22e   : > { %v2277_v44 = vpack.c.bf16 %v2213_v57, %v2212_v52  ;;  %v2390_v28 = vadd.f32 %v4713_v1, %v2389_v11  ;;  %v1756_v62 = vmul.f32 0.5, %v1755_v40  ;;  %v2922_v35 = vpop.eup %2921  ;;  %v1774_v52 = vmul.f32 %v2920_v31, %v1170_v58 }
 0x22f   : > { %v1767_v5 = vsub.f32 1.5, %v1766_v23  ;;  %v1784_v57 = vmul.f32 %v2922_v35, %v1171_v12  ;;  %vm1780_vm2 = vweird.f32 %v2920_v31  ;;  %vm1790_vm4 = vweird.f32 %v2922_v35 }
 0x230   : > { %2527 = vst [vmem:[%s4725_s7 + $0x70] sm:$0xff] %v2390_v28  ;;  %2428 = vmatmul.bf16.gmra.mxu1 %v2277_v44  ;;  %v1757_v48 = vsub.f32 1.5, %v1756_v62  ;;  %v1775_v10 = vmul.f32 %v2920_v31, %v1774_v52  ;;  %v2975_v44 = vld [vmem:[%s3126_s9 + $0x1e0] sm:$0xff]  ;;  %vm1781_vm5 = vmor %vm1779_vm1, %vm1780_vm2  ;;  %v2111_v40 = vadd.f32 %v4960_v0, %v4887_v47  ;;  %v1108_v23 = vsub.f32 %v2976_v25, %v4969_v59 }
 0x231   : > { %v2103_v4 = vpop.f32.mrf.mxu0  ;;  %v1768_v56 = vmul.f32 %v2916_v14, %v1767_v5  ;;  %v1785_v36 = vmul.f32 %v2922_v35, %v1784_v57  ;;  %v1107_v28 = vsub.f32 %v2975_v44, %v4964_v61  ;;  %vm1791_vm6 = vmor %vm1789_vm3, %vm1790_vm4 }
 0x232   : > { %v1758_v41 = vmul.f32 %v2918_v37, %v1757_v48  ;;  %v2104_v17 = vadd.f32 %v4960_v0, %v2103_v4  ;;  %v1776_v11 = vmul.f32 0.5, %v1775_v10  ;;  %v2216_v48 = vmax.f32 %v2109_v27, 0.0 }
 0x233   : > { %v1772_v21 = vsel %vm4982_vm14, %v2916_v14, %v1768_v56  ;;  %v1786_v18 = vmul.f32 0.5, %v1785_v36  ;;  %v2217_v22 = vmax.f32 %v2111_v40, 0.0  ;;  %v2119_v10 = vadd.f32 %v4960_v0, %v4938_v50 }
 0x234   : > { %v1762_v20 = vsel %vm1761_vm15, %v2918_v37, %v1758_v41  ;;  %v1862_v39 = vmul.f32 %v1772_v21, %v1106_v26  ;;  %v4997_v38 = vpop.f32.mrf.mxu3  ;;  %v2214_v13 = vmax.f32 %v2104_v17, 0.0  ;;  %v1777_v6 = vsub.f32 1.5, %v1776_v11 }
 0x235   : > { %v2391_v46 = vpop.f32.mrf.mxu1  ;;  %v1861_v53 = vmul.f32 %v1762_v20, %v1105_v24  ;;  %v1787_v51 = vsub.f32 1.5, %v1786_v18  ;;  %v2279_v56 = vpack.c.bf16 %v2217_v22, %v2216_v48  ;;  %v2114_v21 = vadd.f32 %v4960_v0, %v4901_v33 }
 0x236   : > { %v2392_v9 = vadd.f32 %v4713_v1, %v2391_v46  ;;  %v1778_v4 = vmul.f32 %v2920_v31, %v1777_v6  ;;  %v479_v16 = vpop.xlane.xlu1 %478  ;;  %v2116_v20 = vadd.f32 %v4960_v0, %v4921_v30  ;;  %v2121_v36 = vadd.f32 %v4960_v0, %v4966_v49 }
 0x237   : > { %v1900_v54 = vpack.c.bf16 %v1862_v39, %v1861_v53  ;;  %v1788_v62 = vmul.f32 %v2922_v35, %v1787_v51  ;;  %v794_v61 = vmul.f32 0.03125, %v479_v16  ;;  %v2124_v40 = vadd.f32 %v4960_v0, %v4980_v42 }
 0x238   : > { %2528 = vst [vmem:[%s4725_s7 + $0x78] sm:$0xff] %v2392_v9  ;;  %v1782_v55 = vsel %vm1781_vm5, %v2920_v31, %v1778_v4  ;;  %v2221_v27 = vmax.f32 %v2121_v36, 0.0 }
 0x239   : > { %v2105_v3 = vpop.f32.mrf.mxu0  ;;  %2696 = vmatmul.msk.bf16.gmra.mxu3 %vm290_vm0, %v1900_v54  ;;  %v1792_v5 = vsel %vm1791_vm6, %v2922_v35, %v1788_v62  ;;  %v1863_v34 = vmul.f32 %v1782_v55, %v1107_v28  ;;  %v920_v8 = vmul.f32 %v794_v61, %v794_v61  ;;  %v1109_v30 = vsub.f32 %v4763_v15, %v794_v61 }
 0x23a   : > { %v2106_v32 = vadd.f32 %v4960_v0, %v2105_v3  ;;  %v1864_v47 = vmul.f32 %v1792_v5, %v1108_v23  ;;  %v2218_v3 = vmax.f32 %v2114_v21, 0.0  ;;  %v2220_v15 = vmax.f32 %v2119_v10, 0.0 }
 0x23b   : > { %v2222_v23 = vmax.f32 %v2124_v40, 0.0 }
 0x23c   : > { %v2215_v43 = vmax.f32 %v2106_v32, 0.0  ;;  %v5003_v63 = vpop.f32.mrf.mxu3  ;;  %v1901_v24 = vpack.c.bf16 %v1864_v47, %v1863_v34  ;;  %v2219_v32 = vmax.f32 %v2116_v20, 0.0  ;;  %v2281_v51 = vpack.c.bf16 %v2221_v27, %v2220_v15 }
 0x23d   : > { %v2394_v45 = vpop.f32.mrf.mxu1  ;;  %v2129_v42 = vadd.f32 %v4960_v0, %v5003_v63 }
 0x23e   : > { %v2395_v14 = vadd.f32 %v4713_v1, %v2394_v45  ;;  %v2278_v37 = vpack.c.bf16 %v2215_v43, %v2214_v13  ;;  %v2280_v45 = vpack.c.bf16 %v2219_v32, %v2218_v3 }
 0x23f   : > { %v2224_v22 = vmax.f32 %v2129_v42, 0.0 }
 0x240   : > { %2529 = vst [vmem:[%s4725_s7 + $0x80] sm:$0xff] %v2395_v14  ;;  %2433 = vmatmul.bf16.vlgmr.msra.gmra.mxu2 %v2278_v37 }
 0x244   : > { %v5015_v60 = vpop.f32.mrf.mxu3 }
 0x245   : > { %v2396_v19 = vpop.f32.mrf.mxu1 }
 0x246   : > { %v2397_v7 = vadd.f32 %v4713_v1, %v2396_v19  ;;  %v731_v1 = vpop.xlane.xlu2 %730 }
 0x247   : > { %v857_v29 = vmul.f32 0.03125, %v731_v1 }
 0x248   : > { %2530 = vst [vmem:[%s4725_s7 + $0x88] sm:$0xff] %v2397_v7  ;;  %v2126_v7 = vadd.f32 %v4960_v0, %v4997_v38  ;;  %v2131_v38 = vadd.f32 %v4960_v0, %v5015_v60 }
 0x249   : > { %v983_v46 = vsub.f32 %v857_v29, %v920_v8  ;;  %2697 = vmatmul.msk.bf16.gmra.mxu3 %vm290_vm0, %v1901_v24 }
 0x24a   : > { %v2223_v4 = vmax.f32 %v2126_v7, 0.0  ;;  %v2225_v47 = vmax.f32 %v2131_v38, 0.0 }
 0x24b   : > { %v1046_v41 = vmax.f32 %v983_v46, 0.0 }
 0x24c   : > { %v5025_v58 = vpop.f32.mrf.mxu3  ;;  %v2282_v61 = vpack.c.bf16 %v2223_v4, %v2222_v23  ;;  %v2283_v24 = vpack.c.bf16 %v2225_v47, %v2224_v22 }
 0x24d   : > { %v2399_v59 = vpop.f32.mrf.mxu1  ;;  %v1172_v12 = vadd.f32 1e-05, %v1046_v41  ;;  %v2134_v63 = vadd.f32 %v4960_v0, %v5025_v58 }
 0x24e   : > { %v2400_v26 = vadd.f32 %v5020_v2, %v2399_v59 }
 0x24f   : > { %2923 = vrsqrt.f32 %v1172_v12  ;;  %vm1799_vm7 = vweird.f32 %v1172_v12  ;;  %v2226_v46 = vmax.f32 %v2134_v63, 0.0 }
 0x250   : > { %2531 = vst [vmem:[%s4725_s7 + $0x90] sm:$0xff] %v2400_v26  ;;  %2438 = vmatmul.bf16.gmra.mxu2 %v2279_v56 }
 0x254   : > { %v5033_v53 = vpop.f32.mrf.mxu3 }
 0x255   : > { %v2401_v9 = vpop.f32.mrf.mxu1  ;;  %v2924_v39 = vpop.eup %2923  ;;  %v2136_v60 = vadd.f32 %v4960_v0, %v5033_v53 }
 0x256   : > { %v2402_v17 = vadd.f32 %v5020_v2, %v2401_v9  ;;  %v1794_v13 = vmul.f32 %v2924_v39, %v1172_v12  ;;  %vm1800_vm8 = vweird.f32 %v2924_v39 }
 0x257   : > { %vm1801_vm9 = vmor %vm1799_vm7, %vm1800_vm8  ;;  %v2227_v41 = vmax.f32 %v2136_v60, 0.0 }
 0x258   : > { %2532 = vst [vmem:[%s4725_s7 + $0x98] sm:$0xff] %v2402_v17  ;;  %v1795_v54 = vmul.f32 %v2924_v39, %v1794_v13 }
 0x259   : > { %v2284_v20 = vpack.c.bf16 %v2227_v41, %v2226_v46 }
 0x25a   : > { %v1796_v35 = vmul.f32 0.5, %v1795_v54 }
 0x25c   : > { %v1797_v33 = vsub.f32 1.5, %v1796_v35  ;;  %v5038_v14 = vpop.f32.mrf.mxu3 }
 0x25d   : > { %v2404_v43 = vpop.f32.mrf.mxu1  ;;  %v2139_v58 = vadd.f32 %v4960_v0, %v5038_v14 }
 0x25e   : > { %v2405_v31 = vadd.f32 %v5020_v2, %v2404_v43  ;;  %v1798_v37 = vmul.f32 %v2924_v39, %v1797_v33 }
 0x25f   : > { %v2228_v32 = vmax.f32 %v2139_v58, 0.0 }
 0x260   : > { %2533 = vst [vmem:[%s4725_s7 + $0xa0] sm:$0xff] %v2405_v31  ;;  %2443 = vmatmul.bf16.gmra.mxu2 %v2280_v45  ;;  %v1802_v57 = vsel %vm1801_vm9, %v2924_v39, %v1798_v37 }
 0x261   : > { %v1865_v18 = vmul.f32 %v1802_v57, %v1109_v30 }
 0x263   : > { %v1902_v6 = vpack.c.bf16 %v1865_v18, %v1865_v18 }
 0x264   : > { %v2140_v44 = vpop.f32.mrf.mxu3 }
 0x265   : > { %v2406_v52 = vpop.f32.mrf.mxu1  ;;  %2698 = vmatmul.msk.bf16.gmra.mxu3 %vm290_vm0, %v1902_v6  ;;  %v2141_v53 = vadd.f32 %v4960_v0, %v2140_v44 }
 0x266   : > { %v2407_v11 = vadd.f32 %v5020_v2, %v2406_v52 }
 0x267   : > { %v2229_v13 = vmax.f32 %v2141_v53, 0.0 }
 0x268   : > { %2534 = vst [vmem:[%s4725_s7 + $0xa8] sm:$0xff] %v2407_v11 }
 0x269   : > { %v2285_v45 = vpack.c.bf16 %v2229_v13, %v2228_v32 }
 0x26c   : > { %v2143_v50 = vpop.f32.mrf.mxu3 }
 0x26d   : > { %v2409_v28 = vpop.f32.mrf.mxu1  ;;  %v2144_v30 = vadd.f32 %v4960_v0, %v2143_v50 }
 0x26e   : > { %v2410_v19 = vadd.f32 %v5020_v2, %v2409_v28 }
 0x26f   : > { %v2230_v52 = vmax.f32 %v2144_v30, 0.0 }
 0x270   : > { %2535 = vst [vmem:[%s4725_s7 + $0xb0] sm:$0xff] %v2410_v19  ;;  %2448 = vmatmul.bf16.gmra.mxu2 %v2281_v51 }
 0x274   : > { %v2145_v62 = vpop.f32.mrf.mxu3 }
 0x275   : > { %v2411_v49 = vpop.f32.mrf.mxu1  ;;  %v2146_v14 = vadd.f32 %v4960_v0, %v2145_v62 }
 0x276   : > { %v2412_v25 = vadd.f32 %v5020_v2, %v2411_v49 }
 0x277   : > { %v2231_v57 = vmax.f32 %v2146_v14, 0.0 }
 0x278   : > { %2536 = vst [vmem:[%s4725_s7 + $0xb8] sm:$0xff] %v2412_v25 }
 0x279   : > { %v2286_v36 = vpack.c.bf16 %v2231_v57, %v2230_v52 }
 0x27c   : > { %v2148_v5 = vpop.f32.mrf.mxu3 }
 0x27d   : > { %v2414_v16 = vpop.f32.mrf.mxu1  ;;  %v2149_v6 = vadd.f32 %v4960_v0, %v2148_v5 }
 0x27e   : > { %v2415_v55 = vadd.f32 %v5020_v2, %v2414_v16 }
 0x27f   : > { %v2232_v44 = vmax.f32 %v2149_v6, 0.0 }
 0x280   : > { %2537 = vst [vmem:[%s4725_s7 + $0xc0] sm:$0xff] %v2415_v55  ;;  %2453 = vmatmul.bf16.gmra.mxu2 %v2282_v61 }
 0x284   : > { %v2150_v8 = vpop.f32.mrf.mxu3 }
 0x285   : > { %v2416_v34 = vpop.f32.mrf.mxu1  ;;  %v2151_v15 = vadd.f32 %v4960_v0, %v2150_v8 }
 0x286   : > { %v2417_v48 = vadd.f32 %v5020_v2, %v2416_v34 }
 0x287   : > { %v2233_v28 = vmax.f32 %v2151_v15, 0.0 }
 0x288   : > { %2538 = vst [vmem:[%s4725_s7 + $0xc8] sm:$0xff] %v2417_v48 }
 0x289   : > { %v2287_v50 = vpack.c.bf16 %v2233_v28, %v2232_v44 }
 0x28c   : > { %v2153_v59 = vpop.f32.mrf.mxu3 }
 0x28d   : > { %v2419_v1 = vpop.f32.mrf.mxu1  ;;  %v2154_v25 = vadd.f32 %v4960_v0, %v2153_v59 }
 0x28e   : > { %v2420_v29 = vadd.f32 %v5020_v2, %v2419_v1 }
 0x28f   : > { %v2234_v4 = vmax.f32 %v2154_v25, 0.0 }
 0x290   : > { %2539 = vst [vmem:[%s4725_s7 + $0xd0] sm:$0xff] %v2420_v29  ;;  %2458 = vmatmul.bf16.gmra.mxu2 %v2283_v24 }
 0x294   : > { %v2155_v12 = vpop.f32.mrf.mxu3 }
 0x295   : > { %v2421_v26 = vpop.f32.mrf.mxu1  ;;  %v2156_v23 = vadd.f32 %v4960_v0, %v2155_v12 }
 0x296   : > { %v2422_v56 = vadd.f32 %v5020_v2, %v2421_v26 }
 0x297   : > { %v2235_v62 = vmax.f32 %v2156_v23, 0.0 }
 0x298   : > { %2540 = vst [vmem:[%s4725_s7 + $0xd8] sm:$0xff] %v2422_v56 }
 0x299   : > { %v2288_v5 = vpack.c.bf16 %v2235_v62, %v2234_v4 }
 0x29c   : > { %v2158_v17 = vpop.f32.mrf.mxu3 }
 0x29d   : > { %v2424_v9 = vpop.f32.mrf.mxu1  ;;  %v2159_v48 = vadd.f32 %v4960_v0, %v2158_v17 }
 0x29e   : > { %v2425_v21 = vadd.f32 %v5020_v2, %v2424_v9 }
 0x29f   : > { %v2236_v47 = vmax.f32 %v2159_v48, 0.0 }
 0x2a0   : > { %2541 = vst [vmem:[%s4725_s7 + $0xe0] sm:$0xff] %v2425_v21  ;;  %2463 = vmatmul.bf16.gmra.mxu2 %v2284_v20 }
 0x2a4   : > { %v2160_v43 = vpop.f32.mrf.mxu3 }
 0x2a5   : > { %v2426_v39 = vpop.f32.mrf.mxu1  ;;  %v2161_v22 = vadd.f32 %v4960_v0, %v2160_v43 }
 0x2a6   : > { %v2427_v3 = vadd.f32 %v5020_v2, %v2426_v39 }
 0x2a7   : > { %v2237_v8 = vmax.f32 %v2161_v22, 0.0 }
 0x2a8   : > { %2542 = vst [vmem:[%s4725_s7 + $0xe8] sm:$0xff] %v2427_v3 }
 0x2a9   : > { %v2289_v59 = vpack.c.bf16 %v2237_v8, %v2236_v47 }
 0x2ac   : > { %v2163_v35 = vpop.f32.mrf.mxu3 }
 0x2ad   : > { %v2429_v54 = vpop.f32.mrf.mxu1  ;;  %v2164_v56 = vadd.f32 %v4960_v0, %v2163_v35 }
 0x2ae   : > { %v2430_v31 = vadd.f32 %v5020_v2, %v2429_v54 }
 0x2af   : > { %v2238_v41 = vmax.f32 %v2164_v56, 0.0 }
 0x2b0   : > { %2543 = vst [vmem:[%s4725_s7 + $0xf0] sm:$0xff] %v2430_v31  ;;  %2468 = vmatmul.bf16.gmra.mxu2 %v2285_v45 }
 0x2b4   : > { %v2165_v10 = vpop.f32.mrf.mxu3 }
 0x2b5   : > { %v2431_v33 = vpop.f32.mrf.mxu1  ;;  %v2166_v46 = vadd.f32 %v4960_v0, %v2165_v10 }
 0x2b6   : > { %v2432_v37 = vadd.f32 %v5020_v2, %v2431_v33 }
 0x2b7   : > { %v2239_v12 = vmax.f32 %v2166_v46, 0.0 }
 0x2b8   : > { %2544 = vst [vmem:[%s4725_s7 + $0xf8] sm:$0xff] %v2432_v37 }
 0x2b9   : > { %v2290_v20 = vpack.c.bf16 %v2239_v12, %v2238_v41 }
 0x2bc   : > { %v2168_v27 = vpop.f32.mrf.mxu3 }
 0x2bd   : > { %v2169_v58 = vadd.f32 %v4960_v0, %v2168_v27 }
 0x2bf   : > { %v2240_v3 = vmax.f32 %v2169_v58, 0.0 }
 0x2c0   : > { %2473 = vmatmul.bf16.gmra.mxu2 %v2286_v36 }
 0x2c3   : > { %v2434_v11 = vpop.f32.mrf.mxu2 }
 0x2c4   : > { %v2435_v18 = vadd.f32 %v5020_v2, %v2434_v11  ;;  %v2170_v49 = vpop.f32.mrf.mxu3 }
 0x2c5   : > { %v2171_v53 = vadd.f32 %v4960_v0, %v2170_v49 }
 0x2c6   : > { %2545 = vst [vmem:[%s4725_s7 + $0x100] sm:$0xff] %v2435_v18 }
 0x2c7   : > { %v2241_v32 = vmax.f32 %v2171_v53, 0.0 }
 0x2c9   : > { %v2291_v54 = vpack.c.bf16 %v2241_v32, %v2240_v3 }
 0x2cb   : > { %v2436_v19 = vpop.f32.mrf.mxu2 }
 0x2cc   : > { %v2437_v51 = vadd.f32 %v5020_v2, %v2436_v19  ;;  %v2173_v55 = vpop.f32.mrf.mxu3 }
 0x2cd   : > { %v2174_v35 = vadd.f32 %v4960_v0, %v2173_v55 }
 0x2ce   : > { %2546 = vst [vmem:[%s4725_s7 + $0x108] sm:$0xff] %v2437_v51 }
 0x2cf   : > { %v2242_v30 = vmax.f32 %v2174_v35, 0.0 }
 0x2d0   : > { %2478 = vmatmul.bf16.gmra.mxu2 %v2287_v50 }
 0x2d3   : > { %v2439_v40 = vpop.f32.mrf.mxu2 }
 0x2d4   : > { %v2440_v7 = vadd.f32 %v5020_v2, %v2439_v40  ;;  %v2175_v38 = vpop.f32.mrf.mxu3 }
 0x2d5   : > { %v2176_v33 = vadd.f32 %v4960_v0, %v2175_v38 }
 0x2d6   : > { %2547 = vst [vmem:[%s4725_s7 + $0x110] sm:$0xff] %v2440_v7 }
 0x2d7   : > { %v2243_v14 = vmax.f32 %v2176_v33, 0.0 }
 0x2d9   : > { %v2292_v57 = vpack.c.bf16 %v2243_v14, %v2242_v30 }
 0x2db   : > { %v2441_v16 = vpop.f32.mrf.mxu2 }
 0x2dc   : > { %v2442_v61 = vadd.f32 %v5020_v2, %v2441_v16 }
 0x2de   : > { %2548 = vst [vmem:[%s4725_s7 + $0x118] sm:$0xff] %v2442_v61 }
 0x2e0   : > { %2483 = vmatmul.bf16.gmra.mxu2 %v2288_v5 }
 0x2e3   : > { %v2444_v34 = vpop.f32.mrf.mxu2 }
 0x2e4   : > { %v2445_v42 = vadd.f32 %v5020_v2, %v2444_v34 }
 0x2e6   : > { %2549 = vst [vmem:[%s4725_s7 + $0x120] sm:$0xff] %v2445_v42 }
 0x2e8   : > { %v2178_v24 = vpop.f32.mrf.mxu3 }
 0x2e9   : > { %v2179_v11 = vadd.f32 %v4960_v0, %v2178_v24 }
 0x2eb   : > { %v2446_v1 = vpop.f32.mrf.mxu2  ;;  %v2244_v18 = vmax.f32 %v2179_v11, 0.0 }
 0x2ec   : > { %v2447_v29 = vadd.f32 %v5020_v2, %v2446_v1 }
 0x2ed   : > { %v2293_v27 = vpack.c.bf16 %v2244_v18, %v2244_v18 }
 0x2ee   : > { %2550 = vst [vmem:[%s4725_s7 + $0x128] sm:$0xff] %v2447_v29 }
 0x2f0   : > { %2488 = vmatmul.bf16.gmra.mxu2 %v2289_v59  ;;  %v2180_v60 = vpop.f32.mrf.mxu3 }
 0x2f3   : > { %v2449_v26 = vpop.f32.mrf.mxu2 }
 0x2f4   : > { %v2450_v63 = vadd.f32 %v5020_v2, %v2449_v26 }
 0x2f6   : > { %2551 = vst [vmem:[%s4725_s7 + $0x130] sm:$0xff] %v2450_v63 }
 0x2fb   : > { %v2451_v9 = vpop.f32.mrf.mxu2 }
 0x2fc   : > { %v2452_v21 = vadd.f32 %v5020_v2, %v2451_v9 }
 0x2fe   : > { %2552 = vst [vmem:[%s4725_s7 + $0x138] sm:$0xff] %v2452_v21 }
 0x300   : > { %2493 = vmatmul.bf16.gmra.mxu2 %v2290_v20 }
 0x303   : > { %v2454_v17 = vpop.f32.mrf.mxu2 }
 0x304   : > { %v2455_v39 = vadd.f32 %v5020_v2, %v2454_v17 }
 0x306   : > { %2553 = vst [vmem:[%s4725_s7 + $0x140] sm:$0xff] %v2455_v39 }
 0x30b   : > { %v2456_v13 = vpop.f32.mrf.mxu2 }
 0x30c   : > { %v2457_v43 = vadd.f32 %v5020_v2, %v2456_v13 }
 0x30e   : > { %2554 = vst [vmem:[%s4725_s7 + $0x148] sm:$0xff] %v2457_v43 }
 0x310   : > { %2498 = vmatmul.bf16.gmra.mxu2 %v2291_v54 }
 0x313   : > { %v2459_v31 = vpop.f32.mrf.mxu2 }
 0x314   : > { %v2460_v45 = vadd.f32 %v5020_v2, %v2459_v31 }
 0x316   : > { %2555 = vst [vmem:[%s4725_s7 + $0x150] sm:$0xff] %v2460_v45 }
 0x31b   : > { %v2461_v37 = vpop.f32.mrf.mxu2 }
 0x31c   : > { %v2462_v52 = vadd.f32 %v5020_v2, %v2461_v37 }
 0x31e   : > { %2556 = vst [vmem:[%s4725_s7 + $0x158] sm:$0xff] %v2462_v52 }
 0x320   : > { %2503 = vmatmul.bf16.gmra.mxu2 %v2292_v57 }
 0x323   : > { %v2464_v10 = vpop.f32.mrf.mxu2 }
 0x324   : > { %v2465_v36 = vadd.f32 %v5020_v2, %v2464_v10 }
 0x326   : > { %2557 = vst [vmem:[%s4725_s7 + $0x160] sm:$0xff] %v2465_v36 }
 0x32b   : > { %v2466_v6 = vpop.f32.mrf.mxu2 }
 0x32c   : > { %v2467_v15 = vadd.f32 %v5020_v2, %v2466_v6 }
 0x32e   : > { %2558 = vst [vmem:[%s4725_s7 + $0x168] sm:$0xff] %v2467_v15 }
 0x330   : > { %2508 = vmatmul.bf16.gmra.mxu2 %v2293_v27 }
 0x333   : > { %v2469_v44 = vpop.f32.mrf.mxu2 }
 0x334   : > { %v2470_v28 = vadd.f32 %v5020_v2, %v2469_v44 }
 0x336   : > { %2559 = vst [vmem:[%s4725_s7 + $0x170] sm:$0xff] %v2470_v28 }
 0x33b   : > { %v2471_v19 = vpop.f32.mrf.mxu2 }
 0x33c   : > { %v2472_v51 = vadd.f32 %v5020_v2, %v2471_v19 }
 0x33e   : > { %2560 = vst [vmem:[%s4725_s7 + $0x178] sm:$0xff] %v2472_v51 }
 0x343   : > { %v2474_v0 = vpop.f32.mrf.mxu2 }
 0x344   : > { %v2475_v50 = vadd.f32 %v5020_v2, %v2474_v0 }
 0x346   : > { %2561 = vst [vmem:[%s4725_s7 + $0x180] sm:$0xff] %v2475_v50 }
 0x34b   : > { %v2476_v49 = vpop.f32.mrf.mxu2 }
 0x34c   : > { %v2477_v40 = vadd.f32 %v5020_v2, %v2476_v49 }
 0x34e   : > { %2562 = vst [vmem:[%s4725_s7 + $0x188] sm:$0xff] %v2477_v40 }
 0x353   : > { %v2479_v7 = vpop.f32.mrf.mxu2 }
 0x354   : > { %v2480_v25 = vadd.f32 %v5020_v2, %v2479_v7 }
 0x356   : > { %2563 = vst [vmem:[%s4725_s7 + $0x190] sm:$0xff] %v2480_v25 }
 0x35b   : > { %v2481_v23 = vpop.f32.mrf.mxu2 }
 0x35c   : > { %v2482_v4 = vadd.f32 %v5020_v2, %v2481_v23 }
 0x35e   : > { %2564 = vst [vmem:[%s4725_s7 + $0x198] sm:$0xff] %v2482_v4 }
 0x363   : > { %v2484_v62 = vpop.f32.mrf.mxu2 }
 0x364   : > { %v2485_v16 = vadd.f32 %v5020_v2, %v2484_v62 }
 0x366   : > { %2565 = vst [vmem:[%s4725_s7 + $0x1a0] sm:$0xff] %v2485_v16 }
 0x36b   : > { %v2486_v55 = vpop.f32.mrf.mxu2 }
 0x36c   : > { %v2487_v61 = vadd.f32 %v5020_v2, %v2486_v55 }
 0x36e   : > { %2566 = vst [vmem:[%s4725_s7 + $0x1a8] sm:$0xff] %v2487_v61 }
 0x373   : > { %v2489_v5 = vpop.f32.mrf.mxu2 }
 0x374   : > { %v2490_v34 = vadd.f32 %v5020_v2, %v2489_v5 }
 0x376   : > { %2567 = vst [vmem:[%s4725_s7 + $0x1b0] sm:$0xff] %v2490_v34 }
 0x37b   : > { %v2491_v42 = vpop.f32.mrf.mxu2 }
 0x37c   : > { %v2492_v38 = vadd.f32 %v5020_v2, %v2491_v42 }
 0x37e   : > { %2568 = vst [vmem:[%s4725_s7 + $0x1b8] sm:$0xff] %v2492_v38 }
 0x383   : > { %v2494_v48 = vpop.f32.mrf.mxu2 }
 0x384   : > { %v2495_v22 = vadd.f32 %v5020_v2, %v2494_v48 }
 0x386   : > { %2569 = vst [vmem:[%s4725_s7 + $0x1c0] sm:$0xff] %v2495_v22 }
 0x38b   : > { %v2496_v47 = vpop.f32.mrf.mxu2 }
 0x38c   : > { %v2497_v8 = vadd.f32 %v5020_v2, %v2496_v47 }
 0x38e   : > { %2570 = vst [vmem:[%s4725_s7 + $0x1c8] sm:$0xff] %v2497_v8 }
 0x393   : > { %v2499_v1 = vpop.f32.mrf.mxu2 }
 0x394   : > { %v2500_v29 = vadd.f32 %v5020_v2, %v2499_v1 }
 0x396   : > { %2571 = vst [vmem:[%s4725_s7 + $0x1d0] sm:$0xff] %v2500_v29 }
 0x39b   : > { %v2501_v24 = vpop.f32.mrf.mxu2 }
 0x39c   : > { %v2502_v59 = vadd.f32 %v5020_v2, %v2501_v24 }
 0x39e   : > { %2572 = vst [vmem:[%s4725_s7 + $0x1d8] sm:$0xff] %v2502_v59 }
 0x3a3   : > { %v2504_v26 = vpop.f32.mrf.mxu2 }
 0x3a4   : > { %v2505_v63 = vadd.f32 %v5020_v2, %v2504_v26 }
 0x3a6   : > { %2573 = vst [vmem:[%s4725_s7 + $0x1e0] sm:$0xff] %v2505_v63 }
 0x3ab   : > { %v2506_v60 = vpop.f32.mrf.mxu2 }
 0x3ac   : > { %v2507_v56 = vadd.f32 %v5020_v2, %v2506_v60 }
 0x3ae   : > { %2574 = vst [vmem:[%s4725_s7 + $0x1e8] sm:$0xff] %v2507_v56 }
 0x3b3   : > { %v2509_v46 = vpop.f32.mrf.mxu2 }
 0x3b4   : > { %v2510_v41 = vadd.f32 %v5020_v2, %v2509_v46 }
 0x3b6   : > { %2575 = vst [vmem:[%s4725_s7 + $0x1f0] sm:$0xff] %v2510_v41 }
 0x3b7   : > { %3005 = shalt.err (!%p3002_p3)
}
 0x3b8   : > { %s3042_s25 = smov 128   ;;  %s3043_s7 = smov 8  }
 0x3b9   : > { %2756 = dma.vmem_to_hbm [thread:$0]  (%p3112_p5), %s2590_s16, 8064, %s2592_s17, %s2577_s23, %s3042_s25, %s3042_s25, %s3043_s7  }
 0x3bb   : > { %v2511_v2 = vpop.f32.mrf.mxu2 }
 0x3bc PF: > { %p2762_p4 = scmp.ge.s32.totalorder %s3040_s21, 2  ;;  %s2606_s11 = sand.u32 1, %s3028_s18  }
 0x3bd   : > { %s2607_s12 = scalar_lea.sflag [#allocation3], %s2606_s11 }
 0x3be   : > { %p2759_p7 = pnand %p2762_p4, %p3116_p6 }
 0x3c0   : > { %p2760_p8 = pneg %p2759_p7 }
 0x3c2   : > { %3023 = dma.done.wait (%p2760_p8), %s2607_s12, 8064  }
 0x3c3   : > { %3025 = vsyncadd (%p2760_p8), %s2607_s12, 4294959232  ;;  %p15_p9 = scmp.ge.s32.totalorder %s3099_s24, 4   ;;  %s5301_s18 = smov %s3032_s19 }
 0x3c4   : > { %s5302_s19 = smov %s3036_s20  ;;  %s5303_s20 = smov %s3110_s27 }
 0x3c5   : > { %s5304_s21 = smov %s3099_s24  ;;  %17 = sbr.rel (!%p15_p9) target bundleno = 3 (0x3), region = 75 }
 0x3ca   :  { %2613 = vsyncpa [#allocation3], 1 }
 0x3cb   :  { %2615 = vsyncpa [#allocation3 + $0x1], 1 }

</bundles_post_ra>
